<compile_context>
chip_gen: v5e
topology: v5e:2x2
jax: 0.10.0
libtpu: 0.0.40
codegen_flags: <defaults>
</compile_context>

<pallas_src>
import functools

import numpy as np

import jax
import jax.numpy as jnp
from jax.experimental import pallas as pl
from jax.experimental.pallas import tpu as pltpu

BN_EPS = 1e-5
MAX_M_TILE = 1024      # rows per tile (fits easily in VMEM on v5e/v6e/v7x)
MAX_LANES = 512        # pass-2 lane-fold target width
STAT_ROWS = 8          # row 0 = per-tile sum, row 1 = per-tile centered SS


def _round_up(x, m):
    return (x + m - 1) // m * m


def _mosaic_params(dim_sem, est_bytes):
    # modest explicit scoped-VMEM limit, capped at 32 MiB so the same code is
    # safe on v7x (64 MiB physical VMEM per TensorCore).
    limit = int(min(max(3 * est_bytes, 8 * 2**20), 32 * 2**20))
    return pltpu.CompilerParams(dimension_semantics=dim_sem,
                                vmem_limit_bytes=limit)


def _pick_tile(n, max_tile=MAX_M_TILE):
    """Pick a row tile that is a multiple of 16 (bf16 sublane packing) or the
    full dim.  Prefers >=2 tiles so the 'parallel' grid axis can be split
    across the two TensorCores of a v7x chip.  Returns (tile, padded_n, num)."""
    if n <= max_tile:
        if n >= 32 and n % 32 == 0:
            return n // 2, n, 2
        return n, n, 1
    num = -(-n // max_tile)
    tile = _round_up(-(-n // num), 16)
    return tile, tile * num, num


def _pick_fold(m, c):
    """Largest g dividing m with g*c <= MAX_LANES, preferring g*c % 128 == 0,
    so pass-2 blocks are lane-dense (unmasked stores) without channel padding."""
    best128, best = 1, 1
    for g in range(1, max(1, MAX_LANES // c) + 1):
        if m % g == 0:
            best = g
            if (g * c) % 128 == 0:
                best128 = g
    return best128 if best128 > 1 else best


# ----------------------------------------------------------------------------
# Pass 1 kernel: per (phase p, row-tile i):
#   Y = patches @ W                     (bf16 x bf16, f32 MXU accumulation)
#   stats = [sum(Y); sum((Y - tile_mean)^2)] per channel  (f32, centered)
# Y is stored in bf16 (it is re-read exactly once by pass 2).
# grid = (P, num_m), both axes parallel (no reduction axis: K is untiled).
# ----------------------------------------------------------------------------
def _conv_stats_kernel(p_ref, w_ref, y_ref, stats_ref, *, m_total, m_tile, masked):
    acc = jnp.dot(p_ref[0], w_ref[0], preferred_element_type=jnp.float32)
    if masked:
        i = pl.program_id(1)
        valid = jnp.minimum(m_total - i * m_tile, m_tile)
        rows = jax.lax.broadcasted_iota(jnp.int32, acc.shape, 0)
        mask = (rows < valid).astype(jnp.float32)
        cnt = jnp.maximum(valid, 1).astype(jnp.float32)
        s = jnp.sum(acc * mask, axis=0, keepdims=True)
        d = (acc - s / cnt) * mask
    else:
        s = jnp.sum(acc, axis=0, keepdims=True)
        d = acc - s * (1.0 / m_tile)
    ssc = jnp.sum(d * d, axis=0, keepdims=True)
    r8 = jax.lax.broadcasted_iota(jnp.int32, (STAT_ROWS, acc.shape[1]), 0)
    stats = jnp.where(r8 == 0, s, jnp.where(r8 == 1, ssc, 0.0))
    stats_ref[...] = stats[None, None]
    y_ref[...] = acc[None].astype(y_ref.dtype)


def _pass1(patches, weights):
    """patches: (P, M, K); weights: (P, K, Cout).
    Returns Y (P, M, Cout) bf16 and a (sum, centered-SS, count) stats record."""
    P, M, K = patches.shape
    Cout = weights.shape[2]
    m_tile, m_pad, num_m = _pick_tile(M)
    patches = patches.astype(jnp.bfloat16)
    weights = weights.astype(jnp.bfloat16)
    if m_pad != M:
        patches = jnp.pad(patches, ((0, 0), (0, m_pad - M), (0, 0)))

    est = 2 * (m_tile * K * 2 + K * Cout * 2 + m_tile * Cout * 2
               + STAT_ROWS * Cout * 4)
    y, stats = pl.pallas_call(
        functools.partial(_conv_stats_kernel, m_total=M, m_tile=m_tile,
                          masked=(m_pad != M)),
        out_shape=(jax.ShapeDtypeStruct((P, m_pad, Cout), jnp.bfloat16),
                   jax.ShapeDtypeStruct((P, num_m, STAT_ROWS, Cout), jnp.float32)),
        grid_spec=pltpu.PrefetchScalarGridSpec(
            num_scalar_prefetch=0,
            grid=(P, num_m),
            in_specs=[
                pl.BlockSpec((1, m_tile, K), lambda p, i: (p, i, 0)),
                pl.BlockSpec((1, K, Cout), lambda p, i: (p, 0, 0)),
            ],
            out_specs=[
                pl.BlockSpec((1, m_tile, Cout), lambda p, i: (p, i, 0)),
                pl.BlockSpec((1, 1, STAT_ROWS, Cout), lambda p, i: (p, i, 0, 0)),
            ],
        ),
        compiler_params=_mosaic_params(("parallel", "parallel"), est),
    )(patches, weights)

    cnt = np.minimum(M - np.arange(num_m) * m_tile, m_tile).astype(np.float32)
    cnt = np.tile(cnt, P)
    sums = stats[:, :, 0, :].reshape(P * num_m, Cout)
    sscs = stats[:, :, 1, :].reshape(P * num_m, Cout)
    return y[:, :M, :], (sums, sscs, cnt)


def _bn_scale_bias(records, gamma, beta):
    """Chan-style merge of per-tile (sum, centered SS, count) into global
    train-mode BatchNorm scale / bias (f32, numerically stable)."""
    sums = jnp.concatenate([r[0] for r in records], axis=0)
    sscs = jnp.concatenate([r[1] for r in records], axis=0)
    cnts = np.concatenate([r[2] for r in records], axis=0)
    total = float(cnts.sum())
    cj = jnp.asarray(cnts)[:, None]
    mean = jnp.sum(sums, axis=0) / total
    mu_t = sums / cj
    var = (jnp.sum(sscs, axis=0)
           + jnp.sum(cj * (mu_t - mean) ** 2, axis=0)) / total
    var = jnp.maximum(var, 0.0)
    scale = gamma.astype(jnp.float32) * jax.lax.rsqrt(var + BN_EPS)
    bias = beta.astype(jnp.float32) - mean * scale
    return scale, bias


# ----------------------------------------------------------------------------
# Pass 2 kernel: out = [relu]( y * scale + bias [+ residual] ), lane-folded.
# ----------------------------------------------------------------------------
def _bn_apply_kernel(*refs, has_res, relu):
    if has_res:
        y_ref, s_ref, b_ref, r_ref, o_ref = refs
    else:
        y_ref, s_ref, b_ref, o_ref = refs
        r_ref = None
    y = y_ref[...].astype(jnp.float32) * s_ref[...] + b_ref[...]
    if r_ref is not None:
        y = y + r_ref[...].astype(jnp.float32)
    if relu:
        y = jnp.maximum(y, 0.0)
    o_ref[...] = y.astype(o_ref.dtype)


def _bn_apply(y, scale, bias, residual, relu):
    """y: (M, Cout) bf16 conv output -> bf16 normalized [+res] [+relu] output.
    The (M, Cout) plane is folded to (M/G, G*Cout) so lanes are dense."""
    M, C = y.shape
    G = _pick_fold(M, C)
    R, L = M // G, G * C
    r_tile, r_pad, num_r = _pick_tile(R)

    yv = y.reshape(R, L)
    sv = jnp.tile(scale.astype(jnp.float32), G).reshape(1, L)
    bv = jnp.tile(bias.astype(jnp.float32), G).reshape(1, L)
    if r_pad != R:
        yv = jnp.pad(yv, ((0, r_pad - R), (0, 0)))

    inputs = [yv, sv, bv]
    in_specs = [
        pl.BlockSpec((r_tile, L), lambda i: (i, 0)),
        pl.BlockSpec((1, L), lambda i: (0, 0)),
        pl.BlockSpec((1, L), lambda i: (0, 0)),
    ]
    has_res = residual is not None
    if has_res:
        rv = residual.astype(jnp.bfloat16).reshape(R, L)
        if r_pad != R:
            rv = jnp.pad(rv, ((0, r_pad - R), (0, 0)))
        inputs.append(rv)
        in_specs.append(pl.BlockSpec((r_tile, L), lambda i: (i, 0)))

    est = 2 * ((2 + int(has_res)) * r_tile * L * 2 + 2 * L * 4) + 2 * r_tile * L * 2
    out = pl.pallas_call(
        functools.partial(_bn_apply_kernel, has_res=has_res, relu=relu),
        out_shape=jax.ShapeDtypeStruct((r_pad, L), jnp.bfloat16),
        grid_spec=pltpu.PrefetchScalarGridSpec(
            num_scalar_prefetch=0,
            grid=(num_r,),
            in_specs=in_specs,
            out_specs=pl.BlockSpec((r_tile, L), lambda i: (i, 0)),
        ),
        compiler_params=_mosaic_params(("parallel",), est),
    )(*inputs)
    return out[:R].reshape(M, C)


# ----------------------------------------------------------------------------
# im2col (regular conv) and the two conv wrappers
# ----------------------------------------------------------------------------
def _im2col_3d(x, stride, pad):
    """x: (N, D, H, W, C) -> patches (N*Do*Ho*Wo, 27*C), output dims."""
    N, D, H, W, C = x.shape
    if pad:
        x = jnp.pad(x, ((0, 0), (pad, pad), (pad, pad), (pad, pad), (0, 0)))
    Do = (D + 2 * pad - 3) // stride + 1
    Ho = (H + 2 * pad - 3) // stride + 1
    Wo = (W + 2 * pad - 3) // stride + 1
    cols = []
    for kd in range(3):
        for kh in range(3):
            for kw in range(3):
                cols.append(x[:, kd:kd + (Do - 1) * stride + 1:stride,
                                 kh:kh + (Ho - 1) * stride + 1:stride,
                                 kw:kw + (Wo - 1) * stride + 1:stride, :])
    p = jnp.stack(cols, axis=-2)                     # (N, Do, Ho, Wo, 27, C)
    return p.reshape(N * Do * Ho * Wo, 27 * C), (N, Do, Ho, Wo)


def _conv3d_bn(x, w, gamma, beta, stride, relu, residual=None):
    """Conv3d(k=3, pad=1, bias=False) + train-mode BN [+residual] [+ReLU].
    x: (N, D, H, W, Cin) channels-last; w: (Cout, Cin, 3, 3, 3) PyTorch layout."""
    Cout, Cin = w.shape[0], w.shape[1]
    # TODO(synk): fuse the patch build into pass 1 (in-kernel halo windows).
    patches, (N, Do, Ho, Wo) = _im2col_3d(x.astype(jnp.bfloat16),
                                          stride=stride, pad=1)
    w_mat = jnp.transpose(w, (2, 3, 4, 1, 0)).reshape(27 * Cin, Cout)
    y, rec = _pass1(patches[None], w_mat[None])
    scale, bias = _bn_scale_bias([rec], gamma, beta)
    M = patches.shape[0]
    res = None if residual is None else residual.reshape(M, Cout)
    out = _bn_apply(y[0], scale, bias, res, relu)
    return out.reshape(N, Do, Ho, Wo, Cout)


# stride-2 transposed conv: per output parity q, per-dim taps (kernel idx, input offset)
_TC_TAPS = {0: ((1, 0),), 1: ((0, 1), (2, 0))}


def _convT3d_bn(x, w_t, gamma, beta, relu, residual=None):
    """ConvTranspose3d(k=3, s=2, p=1, out_pad=1, bias=False) + BN [+res] [+ReLU],
    decomposed into the 8 output-parity phases (no zero-stuffed dilated volume).
    x: (N, Di, Hi, Wi, Cin); w_t: (Cin, Cout, 3, 3, 3) PyTorch ConvTranspose layout."""
    Cin, Cout = w_t.shape[0], w_t.shape[1]
    N, Di, Hi, Wi, _ = x.shape
    xp = jnp.pad(x.astype(jnp.bfloat16),
                 ((0, 0), (0, 1), (0, 1), (0, 1), (0, 0)))
    M_phase = N * Di * Hi * Wi

    groups = {}   # tap_count -> list of (phase, patches, w_mat); phases batched per group
    for qd in (0, 1):
        for qh in (0, 1):
            for qw in (0, 1):
                taps = [(td, th, tw) for td in _TC_TAPS[qd]
                        for th in _TC_TAPS[qh] for tw in _TC_TAPS[qw]]
                cols = [xp[:, od:od + Di, oh:oh + Hi, ow:ow + Wi, :]
                        for (_, od), (_, oh), (_, ow) in taps]
                p = jnp.stack(cols, axis=-2).reshape(M_phase, len(taps) * Cin)
                wm = jnp.stack([w_t[:, :, kd, kh, kw]
                                for (kd, _), (kh, _), (kw, _) in taps], axis=0)
                wm = wm.reshape(len(taps) * Cin, Cout)
                groups.setdefault(len(taps), []).append(((qd, qh, qw), p, wm))

    y_phase, records = {}, []
    for t_count in sorted(groups):
        items = groups[t_count]
        pg = jnp.stack([p for _, p, _ in items], axis=0)
        wg = jnp.stack([w for _, _, w in items], axis=0)
        yg, rec = _pass1(pg, wg)
        records.append(rec)
        for idx, (q, _, _) in enumerate(items):
            y_phase[q] = yg[idx]

    scale, bias = _bn_scale_bias(records, gamma, beta)

    # interleave the 8 phases into the (N, 2Di, 2Hi, 2Wi, Cout) output volume
    stacked = jnp.stack([y_phase[(qd, qh, qw)].reshape(N, Di, Hi, Wi, Cout)
                         for qd in (0, 1) for qh in (0, 1) for qw in (0, 1)],
                        axis=0).reshape(2, 2, 2, N, Di, Hi, Wi, Cout)
    y_full = jnp.transpose(stacked, (3, 4, 0, 5, 1, 6, 2, 7)).reshape(
        N * 2 * Di * 2 * Hi * 2 * Wi, Cout)

    res = None if residual is None else residual.reshape(y_full.shape[0], Cout)
    out = _bn_apply(y_full, scale, bias, res, relu)
    return out.reshape(N, 2 * Di, 2 * Hi, 2 * Wi, Cout)


# ----------------------------------------------------------------------------
# hourglass forward (matches the PyTorch module; presqu/postsqu optional)
# ----------------------------------------------------------------------------
def hourglass_forward(params, x_ncdhw, presqu=None, postsqu=None):
    to_cl = lambda t: jnp.transpose(t, (0, 2, 3, 4, 1))
    x = to_cl(x_ncdhw).astype(jnp.bfloat16)
    postsqu_cl = None if postsqu is None else to_cl(postsqu).astype(jnp.bfloat16)
    presqu_cl = None if presqu is None else to_cl(presqu).astype(jnp.bfloat16)

    out = _conv3d_bn(x, params["w1"], params["g1"], params["b1"], stride=2, relu=True)
    pre = _conv3d_bn(out, params["w2"], params["g2"], params["b2"],
                     stride=1, relu=True, residual=postsqu_cl)
    out = _conv3d_bn(pre, params["w3"], params["g3"], params["b3"], stride=2, relu=True)
    out = _conv3d_bn(out, params["w4"], params["g4"], params["b4"], stride=1, relu=True)
    res5 = presqu_cl if presqu_cl is not None else pre
    post = _convT3d_bn(out, params["w5"], params["g5"], params["b5"],
                       relu=True, residual=res5)
    out = _convT3d_bn(post, params["w6"], params["g6"], params["b6"],
                      relu=False, residual=None)

    to_ncdhw = lambda t: jnp.transpose(t, (0, 4, 1, 2, 3)).astype(jnp.float32)
    return to_ncdhw(out), to_ncdhw(pre), to_ncdhw(post)


def init_params(key, inplanes):
    c2 = inplanes * 2
    ks = jax.random.split(key, 18)
    n = lambda k, s: 0.1 * jax.random.normal(k, s, jnp.float32)
    g = lambda k, s: 1.0 + 0.1 * jax.random.normal(k, s, jnp.float32)
    return {
        "w1": n(ks[0], (c2, inplanes, 3, 3, 3)), "g1": g(ks[1], (c2,)), "b1": n(ks[2], (c2,)),
        "w2": n(ks[3], (c2, c2, 3, 3, 3)),       "g2": g(ks[4], (c2,)), "b2": n(ks[5], (c2,)),
        "w3": n(ks[6], (c2, c2, 3, 3, 3)),       "g3": g(ks[7], (c2,)), "b3": n(ks[8], (c2,)),
        "w4": n(ks[9], (c2, c2, 3, 3, 3)),       "g4": g(ks[10], (c2,)), "b4": n(ks[11], (c2,)),
        # ConvTranspose3d weights are (Cin, Cout, kd, kh, kw)
        "w5": n(ks[12], (c2, c2, 3, 3, 3)),      "g5": g(ks[13], (c2,)), "b5": n(ks[14], (c2,)),
        "w6": n(ks[15], (c2, inplanes, 3, 3, 3)), "g6": g(ks[16], (inplanes,)), "b6": n(ks[17], (inplanes,)),
    }


# ----------------------------------------------------------------------------
# Pure-JAX reference (same bf16 input/weight quantization; f32 conv + BN) used
# only for a loose numerical self-check in __main__.
# ----------------------------------------------------------------------------
def _ref_bn(y, gamma, beta, relu, residual=None):
    mean = jnp.mean(y, axis=(0, 2, 3, 4), keepdims=True)
    var = jnp.mean(jnp.square(y - mean), axis=(0, 2, 3, 4), keepdims=True)
    out = (y - mean) * jax.lax.rsqrt(var + BN_EPS) \
        * gamma.reshape(1, -1, 1, 1, 1) + beta.reshape(1, -1, 1, 1, 1)
    if residual is not None:
        out = out + residual
    if relu:
        out = jnp.maximum(out, 0.0)
    return out


def _ref_conv(x, w, stride):
    xq = x.astype(jnp.bfloat16).astype(jnp.float32)
    wq = w.astype(jnp.bfloat16).astype(jnp.float32)
    return jax.lax.conv_general_dilated(
        xq, wq, (stride,) * 3, [(1, 1)] * 3,
        dimension_numbers=("NCDHW", "OIDHW", "NCDHW"))


def _ref_convT(x, w_t):
    xq = x.astype(jnp.bfloat16).astype(jnp.float32)
    wq = w_t.astype(jnp.bfloat16).astype(jnp.float32)
    N, C, D, H, W = xq.shape
    z = jnp.zeros((N, C, 2 * D - 1, 2 * H - 1, 2 * W - 1), xq.dtype)
    z = z.at[:, :, ::2, ::2, ::2].set(xq)
    z = jnp.pad(z, ((0, 0), (0, 0), (1, 2), (1, 2), (1, 2)))
    w_conv = jnp.transpose(jnp.flip(wq, axis=(2, 3, 4)), (1, 0, 2, 3, 4))
    return jax.lax.conv_general_dilated(
        z, w_conv, (1, 1, 1), [(0, 0)] * 3,
        dimension_numbers=("NCDHW", "OIDHW", "NCDHW"))


def hourglass_reference(params, x, presqu=None, postsqu=None):
    out = _ref_bn(_ref_conv(x, params["w1"], 2), params["g1"], params["b1"], True)
    pre = _ref_bn(_ref_conv(out, params["w2"], 1), params["g2"], params["b2"], True, postsqu)
    out = _ref_bn(_ref_conv(pre, params["w3"], 2), params["g3"], params["b3"], True)
    out = _ref_bn(_ref_conv(out, params["w4"], 1), params["g4"], params["b4"], True)
    res5 = presqu if presqu is not None else pre
    post = _ref_bn(_ref_convT(out, params["w5"]), params["g5"], params["b5"], True, res5)
    out = _ref_bn(_ref_convT(post, params["w6"]), params["g6"], params["b6"], False)
    return out, pre, post


if __name__ == "__main__":
    inplanes = 4
    N, D, H, W = 1, 8, 16, 16          # x: (N, C, D, H, W) cost-volume style input

    key = jax.random.PRNGKey(0)
    kx, kp, ka, kb = jax.random.split(key, 4)
    x = jax.random.normal(kx, (N, inplanes, D, H, W), jnp.float32)
    params = init_params(kp, inplanes)

    fwd = jax.jit(hourglass_forward)

    # path 1: no presqu / postsqu (conv5 residual = pre)
    out, pre, post = fwd(params, x, None, None)
    jax.block_until_ready((out, pre, post))
    assert out.shape == (N, inplanes, D, H, W)
    assert pre.shape == (N, 2 * inplanes, D // 2, H // 2, W // 2)
    assert post.shape == (N, 2 * inplanes, D // 2, H // 2, W // 2)
    assert bool(jnp.all(jnp.isfinite(out)))

    r_out, r_pre, r_post = hourglass_reference(params, x, None, None)
    for a, b in ((out, r_out), (pre, r_pre), (post, r_post)):
        err = float(jnp.max(jnp.abs(a - b)))
        assert err < 0.15, f"mismatch vs reference: {err}"

    # path 2: with presqu / postsqu residual inputs (exercises residual kernels)
    sq_shape = (N, 2 * inplanes, D // 2, H // 2, W // 2)
    presqu = jax.random.normal(ka, sq_shape, jnp.float32)
    postsqu = jax.random.normal(kb, sq_shape, jnp.float32)
    out2, pre2, post2 = fwd(params, x, presqu, postsqu)
    jax.block_until_ready((out2, pre2, post2))
    assert out2.shape == (N, inplanes, D, H, W)
    assert bool(jnp.all(jnp.isfinite(out2)))
    r2 = hourglass_reference(params, x, presqu, postsqu)
    for a, b in zip((out2, pre2, post2), r2):
        err = float(jnp.max(jnp.abs(a - b)))
        assert err < 0.15, f"mismatch vs reference: {err}"

    print("KERNEL_OK")
</pallas_src>

<mosaic_0001>
module attributes {stable_mosaic.version = 11 : i64} {
  func.func @_conv_stats_kernel(%arg0: i32, %arg1: i32, %arg2: memref<1x128x108xbf16, #tpu.memory_space<vmem>>, %arg3: memref<1x108x8xbf16, #tpu.memory_space<vmem>>, %arg4: memref<1x128x8xbf16, #tpu.memory_space<vmem>>, %arg5: memref<1x1x8x8xf32, #tpu.memory_space<vmem>>) attributes {dimension_semantics = [#tpu.dimension_semantics<parallel>, #tpu.dimension_semantics<parallel>], iteration_bounds = array<i64: 1, 2>, scalar_prefetch = 0 : i64, scratch_operands = 0 : i64, tpu.core_type = #tpu.core_type<tc>, window_params = [{transform_indices = @transform_0, window_bounds = array<i64: 1, 128, 108>}, {transform_indices = @transform_1, window_bounds = array<i64: 1, 108, 8>}, {transform_indices = @transform_2, window_bounds = array<i64: 1, 128, 8>}, {transform_indices = @transform_3, window_bounds = array<i64: 1, 1, 8, 8>}]} {
    %c0 = arith.constant 0 : index
    %c0_0 = arith.constant 0 : index
    %c0_1 = arith.constant 0 : index
    %0 = vector.load %arg2[%c0, %c0_0, %c0_1] : memref<1x128x108xbf16, #tpu.memory_space<vmem>>, vector<1x128x108xbf16>
    %1 = vector.shape_cast %0 : vector<1x128x108xbf16> to vector<128x108xbf16>
    %c0_2 = arith.constant 0 : index
    %c0_3 = arith.constant 0 : index
    %c0_4 = arith.constant 0 : index
    %2 = vector.load %arg3[%c0_2, %c0_3, %c0_4] : memref<1x108x8xbf16, #tpu.memory_space<vmem>>, vector<1x108x8xbf16>
    %3 = vector.shape_cast %2 : vector<1x108x8xbf16> to vector<108x8xbf16>
    %cst = arith.constant dense<0.000000e+00> : vector<128x8xf32>
    %4 = tpu.matmul %1, %3, %cst {dimension_numbers = #tpu.dot_dimension_numbers<[1], [0], [0], [1], [0, 0, 1, 1], [], []>} : vector<128x108xbf16>, vector<108x8xbf16>, vector<128x8xf32> -> vector<128x8xf32>
    %cst_5 = arith.constant dense<0.000000e+00> : vector<8xf32>
    %5 = vector.multi_reduction <add>, %4, %cst_5 [0] : vector<128x8xf32> to vector<8xf32>
    %6 = vector.shape_cast %5 : vector<8xf32> to vector<1x8xf32>
    %cst_6 = arith.constant 7.812500e-03 : f32
    %7 = vector.broadcast %cst_6 : f32 to vector<1x8xf32>
    %8 = arith.mulf %6, %7 : vector<1x8xf32>
    %9 = vector.broadcast %8 : vector<1x8xf32> to vector<128x8xf32>
    %10 = arith.subf %4, %9 : vector<128x8xf32>
    %11 = arith.mulf %10, %10 : vector<128x8xf32>
    %cst_7 = arith.constant dense<0.000000e+00> : vector<8xf32>
    %12 = vector.multi_reduction <add>, %11, %cst_7 [0] : vector<128x8xf32> to vector<8xf32>
    %13 = vector.shape_cast %12 : vector<8xf32> to vector<1x8xf32>
    %14 = tpu.iota {dimensions = array<i32: 0>} : vector<8x8xi32>
    %c0_i32 = arith.constant 0 : i32
    %15 = vector.broadcast %c0_i32 : i32 to vector<8x8xi32>
    %16 = arith.cmpi eq, %14, %15 : vector<8x8xi32>
    %c1_i32 = arith.constant 1 : i32
    %17 = vector.broadcast %c1_i32 : i32 to vector<8x8xi32>
    %18 = arith.cmpi eq, %14, %17 : vector<8x8xi32>
    %cst_8 = arith.constant 0.000000e+00 : f32
    %19 = vector.shape_cast %13 : vector<1x8xf32> to vector<1x8xf32>
    %20 = vector.broadcast %19 : vector<1x8xf32> to vector<8x8xf32>
    %21 = vector.broadcast %cst_8 : f32 to vector<8x8xf32>
    %22 = arith.select %18, %20, %21 : vector<8x8xi1>, vector<8x8xf32>
    %23 = vector.shape_cast %6 : vector<1x8xf32> to vector<1x8xf32>
    %24 = vector.broadcast %23 : vector<1x8xf32> to vector<8x8xf32>
    %25 = arith.select %16, %24, %22 : vector<8x8xi1>, vector<8x8xf32>
    %26 = vector.shape_cast %25 : vector<8x8xf32> to vector<1x1x8x8xf32>
    %c0_9 = arith.constant 0 : index
    %c0_10 = arith.constant 0 : index
    %c0_11 = arith.constant 0 : index
    %c0_12 = arith.constant 0 : index
    %27 = vector.load %arg5[%c0_9, %c0_10, %c0_11, %c0_12] : memref<1x1x8x8xf32, #tpu.memory_space<vmem>>, vector<1x1x8x8xf32>
    tpu.vector_store %arg5[%c0_9, %c0_10, %c0_11, %c0_12], %26 {strides = array<i32>} : memref<1x1x8x8xf32, #tpu.memory_space<vmem>>, vector<1x1x8x8xf32>,
    %28 = vector.shape_cast %4 : vector<128x8xf32> to vector<1x128x8xf32>
    %29 = arith.truncf %28 : vector<1x128x8xf32> to vector<1x128x8xbf16>
    %c0_13 = arith.constant 0 : index
    %c0_14 = arith.constant 0 : index
    %c0_15 = arith.constant 0 : index
    %30 = vector.load %arg4[%c0_13, %c0_14, %c0_15] : memref<1x128x8xbf16, #tpu.memory_space<vmem>>, vector<1x128x8xbf16>
    tpu.vector_store %arg4[%c0_13, %c0_14, %c0_15], %29 {strides = array<i32>} : memref<1x128x8xbf16, #tpu.memory_space<vmem>>, vector<1x128x8xbf16>,
    return
  }
  func.func @transform_0(%arg0: i32, %arg1: i32) -> (i32, i32, i32) {
    %c0_i32 = arith.constant 0 : i32
    %c0_i32_0 = arith.constant 0 : i32
    return %arg0, %arg1, %c0_i32 : i32, i32, i32
  }
  func.func @transform_1(%arg0: i32, %arg1: i32) -> (i32, i32, i32) {
    %c0_i32 = arith.constant 0 : i32
    %c0_i32_0 = arith.constant 0 : i32
    %c0_i32_1 = arith.constant 0 : i32
    return %arg0, %c0_i32, %c0_i32_0 : i32, i32, i32
  }
  func.func @transform_2(%arg0: i32, %arg1: i32) -> (i32, i32, i32) {
    %c0_i32 = arith.constant 0 : i32
    %c0_i32_0 = arith.constant 0 : i32
    return %arg0, %arg1, %c0_i32 : i32, i32, i32
  }
  func.func @transform_3(%arg0: i32, %arg1: i32) -> (i32, i32, i32, i32) {
    %c0_i32 = arith.constant 0 : i32
    %c0_i32_0 = arith.constant 0 : i32
    %c0_i32_1 = arith.constant 0 : i32
    return %arg0, %arg1, %c0_i32, %c0_i32_0 : i32, i32, i32, i32
  }
}

module attributes {stable_mosaic.version = 11 : i64} {
  func.func @_bn_apply_kernel(%arg0: i32, %arg1: memref<4x512xbf16, #tpu.memory_space<vmem>>, %arg2: memref<1x512xf32, #tpu.memory_space<vmem>>, %arg3: memref<1x512xf32, #tpu.memory_space<vmem>>, %arg4: memref<4x512xbf16, #tpu.memory_space<vmem>>) attributes {dimension_semantics = [#tpu.dimension_semantics<parallel>], iteration_bounds = array<i64: 1>, scalar_prefetch = 0 : i64, scratch_operands = 0 : i64, tpu.core_type = #tpu.core_type<tc>, window_params = [{transform_indices = @transform_0, window_bounds = array<i64: 4, 512>}, {pipeline_mode = #tpu.pipeline_mode<synchronous>, transform_indices = @transform_1, window_bounds = array<i64: 1, 512>}, {pipeline_mode = #tpu.pipeline_mode<synchronous>, transform_indices = @transform_2, window_bounds = array<i64: 1, 512>}, {transform_indices = @transform_3, window_bounds = array<i64: 4, 512>}]} {
    %c0 = arith.constant 0 : index
    %c0_0 = arith.constant 0 : index
    %0 = vector.load %arg1[%c0, %c0_0] : memref<4x512xbf16, #tpu.memory_space<vmem>>, vector<4x512xbf16>
    %1 = arith.extf %0 : vector<4x512xbf16> to vector<4x512xf32>
    %c0_1 = arith.constant 0 : index
    %c0_2 = arith.constant 0 : index
    %2 = vector.load %arg2[%c0_1, %c0_2] : memref<1x512xf32, #tpu.memory_space<vmem>>, vector<1x512xf32>
    %3 = vector.broadcast %2 : vector<1x512xf32> to vector<4x512xf32>
    %4 = arith.mulf %1, %3 : vector<4x512xf32>
    %c0_3 = arith.constant 0 : index
    %c0_4 = arith.constant 0 : index
    %5 = vector.load %arg3[%c0_3, %c0_4] : memref<1x512xf32, #tpu.memory_space<vmem>>, vector<1x512xf32>
    %6 = vector.broadcast %5 : vector<1x512xf32> to vector<4x512xf32>
    %7 = arith.addf %4, %6 : vector<4x512xf32>
    %cst = arith.constant 0.000000e+00 : f32
    %8 = vector.broadcast %cst : f32 to vector<4x512xf32>
    %9 = arith.maximumf %7, %8 : vector<4x512xf32>
    %10 = arith.truncf %9 : vector<4x512xf32> to vector<4x512xbf16>
    %c0_5 = arith.constant 0 : index
    %c0_6 = arith.constant 0 : index
    %11 = vector.load %arg4[%c0_5, %c0_6] : memref<4x512xbf16, #tpu.memory_space<vmem>>, vector<4x512xbf16>
    tpu.vector_store %arg4[%c0_5, %c0_6], %10 {strides = array<i32>} : memref<4x512xbf16, #tpu.memory_space<vmem>>, vector<4x512xbf16>,
    return
  }
  func.func @transform_0(%arg0: i32) -> (i32, i32) {
    %c0_i32 = arith.constant 0 : i32
    %c0_i32_0 = arith.constant 0 : i32
    return %arg0, %c0_i32 : i32, i32
  }
  func.func @transform_1(%arg0: i32) -> (i32, i32) {
    %c0_i32 = arith.constant 0 : i32
    %c0_i32_0 = arith.constant 0 : i32
    %c0_i32_1 = arith.constant 0 : i32
    return %c0_i32, %c0_i32_0 : i32, i32
  }
  func.func @transform_2(%arg0: i32) -> (i32, i32) {
    %c0_i32 = arith.constant 0 : i32
    %c0_i32_0 = arith.constant 0 : i32
    %c0_i32_1 = arith.constant 0 : i32
    return %c0_i32, %c0_i32_0 : i32, i32
  }
  func.func @transform_3(%arg0: i32) -> (i32, i32) {
    %c0_i32 = arith.constant 0 : i32
    %c0_i32_0 = arith.constant 0 : i32
    return %arg0, %c0_i32 : i32, i32
  }
}

module attributes {stable_mosaic.version = 11 : i64} {
  func.func @_conv_stats_kernel(%arg0: i32, %arg1: i32, %arg2: memref<1x128x216xbf16, #tpu.memory_space<vmem>>, %arg3: memref<1x216x8xbf16, #tpu.memory_space<vmem>>, %arg4: memref<1x128x8xbf16, #tpu.memory_space<vmem>>, %arg5: memref<1x1x8x8xf32, #tpu.memory_space<vmem>>) attributes {dimension_semantics = [#tpu.dimension_semantics<parallel>, #tpu.dimension_semantics<parallel>], iteration_bounds = array<i64: 1, 2>, scalar_prefetch = 0 : i64, scratch_operands = 0 : i64, tpu.core_type = #tpu.core_type<tc>, window_params = [{transform_indices = @transform_0, window_bounds = array<i64: 1, 128, 216>}, {transform_indices = @transform_1, window_bounds = array<i64: 1, 216, 8>}, {transform_indices = @transform_2, window_bounds = array<i64: 1, 128, 8>}, {transform_indices = @transform_3, window_bounds = array<i64: 1, 1, 8, 8>}]} {
    %c0 = arith.constant 0 : index
    %c0_0 = arith.constant 0 : index
    %c0_1 = arith.constant 0 : index
    %0 = vector.load %arg2[%c0, %c0_0, %c0_1] : memref<1x128x216xbf16, #tpu.memory_space<vmem>>, vector<1x128x216xbf16>
    %1 = vector.shape_cast %0 : vector<1x128x216xbf16> to vector<128x216xbf16>
    %c0_2 = arith.constant 0 : index
    %c0_3 = arith.constant 0 : index
    %c0_4 = arith.constant 0 : index
    %2 = vector.load %arg3[%c0_2, %c0_3, %c0_4] : memref<1x216x8xbf16, #tpu.memory_space<vmem>>, vector<1x216x8xbf16>
    %3 = vector.shape_cast %2 : vector<1x216x8xbf16> to vector<216x8xbf16>
    %cst = arith.constant dense<0.000000e+00> : vector<128x8xf32>
    %4 = tpu.matmul %1, %3, %cst {dimension_numbers = #tpu.dot_dimension_numbers<[1], [0], [0], [1], [0, 0, 1, 1], [], []>} : vector<128x216xbf16>, vector<216x8xbf16>, vector<128x8xf32> -> vector<128x8xf32>
    %cst_5 = arith.constant dense<0.000000e+00> : vector<8xf32>
    %5 = vector.multi_reduction <add>, %4, %cst_5 [0] : vector<128x8xf32> to vector<8xf32>
    %6 = vector.shape_cast %5 : vector<8xf32> to vector<1x8xf32>
    %cst_6 = arith.constant 7.812500e-03 : f32
    %7 = vector.broadcast %cst_6 : f32 to vector<1x8xf32>
    %8 = arith.mulf %6, %7 : vector<1x8xf32>
    %9 = vector.broadcast %8 : vector<1x8xf32> to vector<128x8xf32>
    %10 = arith.subf %4, %9 : vector<128x8xf32>
    %11 = arith.mulf %10, %10 : vector<128x8xf32>
    %cst_7 = arith.constant dense<0.000000e+00> : vector<8xf32>
    %12 = vector.multi_reduction <add>, %11, %cst_7 [0] : vector<128x8xf32> to vector<8xf32>
    %13 = vector.shape_cast %12 : vector<8xf32> to vector<1x8xf32>
    %14 = tpu.iota {dimensions = array<i32: 0>} : vector<8x8xi32>
    %c0_i32 = arith.constant 0 : i32
    %15 = vector.broadcast %c0_i32 : i32 to vector<8x8xi32>
    %16 = arith.cmpi eq, %14, %15 : vector<8x8xi32>
    %c1_i32 = arith.constant 1 : i32
    %17 = vector.broadcast %c1_i32 : i32 to vector<8x8xi32>
    %18 = arith.cmpi eq, %14, %17 : vector<8x8xi32>
    %cst_8 = arith.constant 0.000000e+00 : f32
    %19 = vector.shape_cast %13 : vector<1x8xf32> to vector<1x8xf32>
    %20 = vector.broadcast %19 : vector<1x8xf32> to vector<8x8xf32>
    %21 = vector.broadcast %cst_8 : f32 to vector<8x8xf32>
    %22 = arith.select %18, %20, %21 : vector<8x8xi1>, vector<8x8xf32>
    %23 = vector.shape_cast %6 : vector<1x8xf32> to vector<1x8xf32>
    %24 = vector.broadcast %23 : vector<1x8xf32> to vector<8x8xf32>
    %25 = arith.select %16, %24, %22 : vector<8x8xi1>, vector<8x8xf32>
    %26 = vector.shape_cast %25 : vector<8x8xf32> to vector<1x1x8x8xf32>
    %c0_9 = arith.constant 0 : index
    %c0_10 = arith.constant 0 : index
    %c0_11 = arith.constant 0 : index
    %c0_12 = arith.constant 0 : index
    %27 = vector.load %arg5[%c0_9, %c0_10, %c0_11, %c0_12] : memref<1x1x8x8xf32, #tpu.memory_space<vmem>>, vector<1x1x8x8xf32>
    tpu.vector_store %arg5[%c0_9, %c0_10, %c0_11, %c0_12], %26 {strides = array<i32>} : memref<1x1x8x8xf32, #tpu.memory_space<vmem>>, vector<1x1x8x8xf32>,
    %28 = vector.shape_cast %4 : vector<128x8xf32> to vector<1x128x8xf32>
    %29 = arith.truncf %28 : vector<1x128x8xf32> to vector<1x128x8xbf16>
    %c0_13 = arith.constant 0 : index
    %c0_14 = arith.constant 0 : index
    %c0_15 = arith.constant 0 : index
    %30 = vector.load %arg4[%c0_13, %c0_14, %c0_15] : memref<1x128x8xbf16, #tpu.memory_space<vmem>>, vector<1x128x8xbf16>
    tpu.vector_store %arg4[%c0_13, %c0_14, %c0_15], %29 {strides = array<i32>} : memref<1x128x8xbf16, #tpu.memory_space<vmem>>, vector<1x128x8xbf16>,
    return
  }
  func.func @transform_0(%arg0: i32, %arg1: i32) -> (i32, i32, i32) {
    %c0_i32 = arith.constant 0 : i32
    %c0_i32_0 = arith.constant 0 : i32
    return %arg0, %arg1, %c0_i32 : i32, i32, i32
  }
  func.func @transform_1(%arg0: i32, %arg1: i32) -> (i32, i32, i32) {
    %c0_i32 = arith.constant 0 : i32
    %c0_i32_0 = arith.constant 0 : i32
    %c0_i32_1 = arith.constant 0 : i32
    return %arg0, %c0_i32, %c0_i32_0 : i32, i32, i32
  }
  func.func @transform_2(%arg0: i32, %arg1: i32) -> (i32, i32, i32) {
    %c0_i32 = arith.constant 0 : i32
    %c0_i32_0 = arith.constant 0 : i32
    return %arg0, %arg1, %c0_i32 : i32, i32, i32
  }
  func.func @transform_3(%arg0: i32, %arg1: i32) -> (i32, i32, i32, i32) {
    %c0_i32 = arith.constant 0 : i32
    %c0_i32_0 = arith.constant 0 : i32
    %c0_i32_1 = arith.constant 0 : i32
    return %arg0, %arg1, %c0_i32, %c0_i32_0 : i32, i32, i32, i32
  }
}

module attributes {stable_mosaic.version = 11 : i64} {
  func.func @_conv_stats_kernel(%arg0: i32, %arg1: i32, %arg2: memref<1x16x216xbf16, #tpu.memory_space<vmem>>, %arg3: memref<1x216x8xbf16, #tpu.memory_space<vmem>>, %arg4: memref<1x16x8xbf16, #tpu.memory_space<vmem>>, %arg5: memref<1x1x8x8xf32, #tpu.memory_space<vmem>>) attributes {dimension_semantics = [#tpu.dimension_semantics<parallel>, #tpu.dimension_semantics<parallel>], iteration_bounds = array<i64: 1, 2>, scalar_prefetch = 0 : i64, scratch_operands = 0 : i64, tpu.core_type = #tpu.core_type<tc>, window_params = [{transform_indices = @transform_0, window_bounds = array<i64: 1, 16, 216>}, {transform_indices = @transform_1, window_bounds = array<i64: 1, 216, 8>}, {transform_indices = @transform_2, window_bounds = array<i64: 1, 16, 8>}, {transform_indices = @transform_3, window_bounds = array<i64: 1, 1, 8, 8>}]} {
    %c0 = arith.constant 0 : index
    %c0_0 = arith.constant 0 : index
    %c0_1 = arith.constant 0 : index
    %0 = vector.load %arg2[%c0, %c0_0, %c0_1] : memref<1x16x216xbf16, #tpu.memory_space<vmem>>, vector<1x16x216xbf16>
    %1 = vector.shape_cast %0 : vector<1x16x216xbf16> to vector<16x216xbf16>
    %c0_2 = arith.constant 0 : index
    %c0_3 = arith.constant 0 : index
    %c0_4 = arith.constant 0 : index
    %2 = vector.load %arg3[%c0_2, %c0_3, %c0_4] : memref<1x216x8xbf16, #tpu.memory_space<vmem>>, vector<1x216x8xbf16>
    %3 = vector.shape_cast %2 : vector<1x216x8xbf16> to vector<216x8xbf16>
    %cst = arith.constant dense<0.000000e+00> : vector<16x8xf32>
    %4 = tpu.matmul %1, %3, %cst {dimension_numbers = #tpu.dot_dimension_numbers<[1], [0], [0], [1], [0, 0, 1, 1], [], []>} : vector<16x216xbf16>, vector<216x8xbf16>, vector<16x8xf32> -> vector<16x8xf32>
    %cst_5 = arith.constant dense<0.000000e+00> : vector<8xf32>
    %5 = vector.multi_reduction <add>, %4, %cst_5 [0] : vector<16x8xf32> to vector<8xf32>
    %6 = vector.shape_cast %5 : vector<8xf32> to vector<1x8xf32>
    %cst_6 = arith.constant 6.250000e-02 : f32
    %7 = vector.broadcast %cst_6 : f32 to vector<1x8xf32>
    %8 = arith.mulf %6, %7 : vector<1x8xf32>
    %9 = vector.broadcast %8 : vector<1x8xf32> to vector<16x8xf32>
    %10 = arith.subf %4, %9 : vector<16x8xf32>
    %11 = arith.mulf %10, %10 : vector<16x8xf32>
    %cst_7 = arith.constant dense<0.000000e+00> : vector<8xf32>
    %12 = vector.multi_reduction <add>, %11, %cst_7 [0] : vector<16x8xf32> to vector<8xf32>
    %13 = vector.shape_cast %12 : vector<8xf32> to vector<1x8xf32>
    %14 = tpu.iota {dimensions = array<i32: 0>} : vector<8x8xi32>
    %c0_i32 = arith.constant 0 : i32
    %15 = vector.broadcast %c0_i32 : i32 to vector<8x8xi32>
    %16 = arith.cmpi eq, %14, %15 : vector<8x8xi32>
    %c1_i32 = arith.constant 1 : i32
    %17 = vector.broadcast %c1_i32 : i32 to vector<8x8xi32>
    %18 = arith.cmpi eq, %14, %17 : vector<8x8xi32>
    %cst_8 = arith.constant 0.000000e+00 : f32
    %19 = vector.shape_cast %13 : vector<1x8xf32> to vector<1x8xf32>
    %20 = vector.broadcast %19 : vector<1x8xf32> to vector<8x8xf32>
    %21 = vector.broadcast %cst_8 : f32 to vector<8x8xf32>
    %22 = arith.select %18, %20, %21 : vector<8x8xi1>, vector<8x8xf32>
    %23 = vector.shape_cast %6 : vector<1x8xf32> to vector<1x8xf32>
    %24 = vector.broadcast %23 : vector<1x8xf32> to vector<8x8xf32>
    %25 = arith.select %16, %24, %22 : vector<8x8xi1>, vector<8x8xf32>
    %26 = vector.shape_cast %25 : vector<8x8xf32> to vector<1x1x8x8xf32>
    %c0_9 = arith.constant 0 : index
    %c0_10 = arith.constant 0 : index
    %c0_11 = arith.constant 0 : index
    %c0_12 = arith.constant 0 : index
    %27 = vector.load %arg5[%c0_9, %c0_10, %c0_11, %c0_12] : memref<1x1x8x8xf32, #tpu.memory_space<vmem>>, vector<1x1x8x8xf32>
    tpu.vector_store %arg5[%c0_9, %c0_10, %c0_11, %c0_12], %26 {strides = array<i32>} : memref<1x1x8x8xf32, #tpu.memory_space<vmem>>, vector<1x1x8x8xf32>,
    %28 = vector.shape_cast %4 : vector<16x8xf32> to vector<1x16x8xf32>
    %29 = arith.truncf %28 : vector<1x16x8xf32> to vector<1x16x8xbf16>
    %c0_13 = arith.constant 0 : index
    %c0_14 = arith.constant 0 : index
    %c0_15 = arith.constant 0 : index
    %30 = vector.load %arg4[%c0_13, %c0_14, %c0_15] : memref<1x16x8xbf16, #tpu.memory_space<vmem>>, vector<1x16x8xbf16>
    tpu.vector_store %arg4[%c0_13, %c0_14, %c0_15], %29 {strides = array<i32>} : memref<1x16x8xbf16, #tpu.memory_space<vmem>>, vector<1x16x8xbf16>,
    return
  }
  func.func @transform_0(%arg0: i32, %arg1: i32) -> (i32, i32, i32) {
    %c0_i32 = arith.constant 0 : i32
    %c0_i32_0 = arith.constant 0 : i32
    return %arg0, %arg1, %c0_i32 : i32, i32, i32
  }
  func.func @transform_1(%arg0: i32, %arg1: i32) -> (i32, i32, i32) {
    %c0_i32 = arith.constant 0 : i32
    %c0_i32_0 = arith.constant 0 : i32
    %c0_i32_1 = arith.constant 0 : i32
    return %arg0, %c0_i32, %c0_i32_0 : i32, i32, i32
  }
  func.func @transform_2(%arg0: i32, %arg1: i32) -> (i32, i32, i32) {
    %c0_i32 = arith.constant 0 : i32
    %c0_i32_0 = arith.constant 0 : i32
    return %arg0, %arg1, %c0_i32 : i32, i32, i32
  }
  func.func @transform_3(%arg0: i32, %arg1: i32) -> (i32, i32, i32, i32) {
    %c0_i32 = arith.constant 0 : i32
    %c0_i32_0 = arith.constant 0 : i32
    %c0_i32_1 = arith.constant 0 : i32
    return %arg0, %arg1, %c0_i32, %c0_i32_0 : i32, i32, i32, i32
  }
}

module attributes {stable_mosaic.version = 11 : i64} {
  func.func @_bn_apply_kernel(%arg0: i32, %arg1: memref<1x256xbf16, #tpu.memory_space<vmem>>, %arg2: memref<1x256xf32, #tpu.memory_space<vmem>>, %arg3: memref<1x256xf32, #tpu.memory_space<vmem>>, %arg4: memref<1x256xbf16, #tpu.memory_space<vmem>>) attributes {dimension_semantics = [#tpu.dimension_semantics<parallel>], iteration_bounds = array<i64: 1>, scalar_prefetch = 0 : i64, scratch_operands = 0 : i64, tpu.core_type = #tpu.core_type<tc>, window_params = [{transform_indices = @transform_0, window_bounds = array<i64: 1, 256>}, {pipeline_mode = #tpu.pipeline_mode<synchronous>, transform_indices = @transform_1, window_bounds = array<i64: 1, 256>}, {pipeline_mode = #tpu.pipeline_mode<synchronous>, transform_indices = @transform_2, window_bounds = array<i64: 1, 256>}, {transform_indices = @transform_3, window_bounds = array<i64: 1, 256>}]} {
    %c0 = arith.constant 0 : index
    %c0_0 = arith.constant 0 : index
    %0 = vector.load %arg1[%c0, %c0_0] : memref<1x256xbf16, #tpu.memory_space<vmem>>, vector<1x256xbf16>
    %1 = arith.extf %0 : vector<1x256xbf16> to vector<1x256xf32>
    %c0_1 = arith.constant 0 : index
    %c0_2 = arith.constant 0 : index
    %2 = vector.load %arg2[%c0_1, %c0_2] : memref<1x256xf32, #tpu.memory_space<vmem>>, vector<1x256xf32>
    %3 = arith.mulf %1, %2 : vector<1x256xf32>
    %c0_3 = arith.constant 0 : index
    %c0_4 = arith.constant 0 : index
    %4 = vector.load %arg3[%c0_3, %c0_4] : memref<1x256xf32, #tpu.memory_space<vmem>>, vector<1x256xf32>
    %5 = arith.addf %3, %4 : vector<1x256xf32>
    %cst = arith.constant 0.000000e+00 : f32
    %6 = vector.broadcast %cst : f32 to vector<1x256xf32>
    %7 = arith.maximumf %5, %6 : vector<1x256xf32>
    %8 = arith.truncf %7 : vector<1x256xf32> to vector<1x256xbf16>
    %c0_5 = arith.constant 0 : index
    %c0_6 = arith.constant 0 : index
    %9 = vector.load %arg4[%c0_5, %c0_6] : memref<1x256xbf16, #tpu.memory_space<vmem>>, vector<1x256xbf16>
    tpu.vector_store %arg4[%c0_5, %c0_6], %8 {strides = array<i32>} : memref<1x256xbf16, #tpu.memory_space<vmem>>, vector<1x256xbf16>,
    return
  }
  func.func @transform_0(%arg0: i32) -> (i32, i32) {
    %c0_i32 = arith.constant 0 : i32
    %c0_i32_0 = arith.constant 0 : i32
    return %arg0, %c0_i32 : i32, i32
  }
  func.func @transform_1(%arg0: i32) -> (i32, i32) {
    %c0_i32 = arith.constant 0 : i32
    %c0_i32_0 = arith.constant 0 : i32
    %c0_i32_1 = arith.constant 0 : i32
    return %c0_i32, %c0_i32_0 : i32, i32
  }
  func.func @transform_2(%arg0: i32) -> (i32, i32) {
    %c0_i32 = arith.constant 0 : i32
    %c0_i32_0 = arith.constant 0 : i32
    %c0_i32_1 = arith.constant 0 : i32
    return %c0_i32, %c0_i32_0 : i32, i32
  }
  func.func @transform_3(%arg0: i32) -> (i32, i32) {
    %c0_i32 = arith.constant 0 : i32
    %c0_i32_0 = arith.constant 0 : i32
    return %arg0, %c0_i32 : i32, i32
  }
}

module attributes {stable_mosaic.version = 11 : i64} {
  func.func @_conv_stats_kernel(%arg0: i32, %arg1: i32, %arg2: memref<1x16x64xbf16, #tpu.memory_space<vmem>>, %arg3: memref<1x64x8xbf16, #tpu.memory_space<vmem>>, %arg4: memref<1x16x8xbf16, #tpu.memory_space<vmem>>, %arg5: memref<1x1x8x8xf32, #tpu.memory_space<vmem>>) attributes {dimension_semantics = [#tpu.dimension_semantics<parallel>, #tpu.dimension_semantics<parallel>], iteration_bounds = array<i64: 1, 2>, scalar_prefetch = 0 : i64, scratch_operands = 0 : i64, tpu.core_type = #tpu.core_type<tc>, window_params = [{transform_indices = @transform_0, window_bounds = array<i64: 1, 16, 64>}, {transform_indices = @transform_1, window_bounds = array<i64: 1, 64, 8>}, {transform_indices = @transform_2, window_bounds = array<i64: 1, 16, 8>}, {transform_indices = @transform_3, window_bounds = array<i64: 1, 1, 8, 8>}]} {
    %c0 = arith.constant 0 : index
    %c0_0 = arith.constant 0 : index
    %c0_1 = arith.constant 0 : index
    %0 = vector.load %arg2[%c0, %c0_0, %c0_1] : memref<1x16x64xbf16, #tpu.memory_space<vmem>>, vector<1x16x64xbf16>
    %1 = vector.shape_cast %0 : vector<1x16x64xbf16> to vector<16x64xbf16>
    %c0_2 = arith.constant 0 : index
    %c0_3 = arith.constant 0 : index
    %c0_4 = arith.constant 0 : index
    %2 = vector.load %arg3[%c0_2, %c0_3, %c0_4] : memref<1x64x8xbf16, #tpu.memory_space<vmem>>, vector<1x64x8xbf16>
    %3 = vector.shape_cast %2 : vector<1x64x8xbf16> to vector<64x8xbf16>
    %cst = arith.constant dense<0.000000e+00> : vector<16x8xf32>
    %4 = tpu.matmul %1, %3, %cst {dimension_numbers = #tpu.dot_dimension_numbers<[1], [0], [0], [1], [0, 0, 1, 1], [], []>} : vector<16x64xbf16>, vector<64x8xbf16>, vector<16x8xf32> -> vector<16x8xf32>
    %cst_5 = arith.constant dense<0.000000e+00> : vector<8xf32>
    %5 = vector.multi_reduction <add>, %4, %cst_5 [0] : vector<16x8xf32> to vector<8xf32>
    %6 = vector.shape_cast %5 : vector<8xf32> to vector<1x8xf32>
    %cst_6 = arith.constant 6.250000e-02 : f32
    %7 = vector.broadcast %cst_6 : f32 to vector<1x8xf32>
    %8 = arith.mulf %6, %7 : vector<1x8xf32>
    %9 = vector.broadcast %8 : vector<1x8xf32> to vector<16x8xf32>
    %10 = arith.subf %4, %9 : vector<16x8xf32>
    %11 = arith.mulf %10, %10 : vector<16x8xf32>
    %cst_7 = arith.constant dense<0.000000e+00> : vector<8xf32>
    %12 = vector.multi_reduction <add>, %11, %cst_7 [0] : vector<16x8xf32> to vector<8xf32>
    %13 = vector.shape_cast %12 : vector<8xf32> to vector<1x8xf32>
    %14 = tpu.iota {dimensions = array<i32: 0>} : vector<8x8xi32>
    %c0_i32 = arith.constant 0 : i32
    %15 = vector.broadcast %c0_i32 : i32 to vector<8x8xi32>
    %16 = arith.cmpi eq, %14, %15 : vector<8x8xi32>
    %c1_i32 = arith.constant 1 : i32
    %17 = vector.broadcast %c1_i32 : i32 to vector<8x8xi32>
    %18 = arith.cmpi eq, %14, %17 : vector<8x8xi32>
    %cst_8 = arith.constant 0.000000e+00 : f32
    %19 = vector.shape_cast %13 : vector<1x8xf32> to vector<1x8xf32>
    %20 = vector.broadcast %19 : vector<1x8xf32> to vector<8x8xf32>
    %21 = vector.broadcast %cst_8 : f32 to vector<8x8xf32>
    %22 = arith.select %18, %20, %21 : vector<8x8xi1>, vector<8x8xf32>
    %23 = vector.shape_cast %6 : vector<1x8xf32> to vector<1x8xf32>
    %24 = vector.broadcast %23 : vector<1x8xf32> to vector<8x8xf32>
    %25 = arith.select %16, %24, %22 : vector<8x8xi1>, vector<8x8xf32>
    %26 = vector.shape_cast %25 : vector<8x8xf32> to vector<1x1x8x8xf32>
    %c0_9 = arith.constant 0 : index
    %c0_10 = arith.constant 0 : index
    %c0_11 = arith.constant 0 : index
    %c0_12 = arith.constant 0 : index
    %27 = vector.load %arg5[%c0_9, %c0_10, %c0_11, %c0_12] : memref<1x1x8x8xf32, #tpu.memory_space<vmem>>, vector<1x1x8x8xf32>
    tpu.vector_store %arg5[%c0_9, %c0_10, %c0_11, %c0_12], %26 {strides = array<i32>} : memref<1x1x8x8xf32, #tpu.memory_space<vmem>>, vector<1x1x8x8xf32>,
    %28 = vector.shape_cast %4 : vector<16x8xf32> to vector<1x16x8xf32>
    %29 = arith.truncf %28 : vector<1x16x8xf32> to vector<1x16x8xbf16>
    %c0_13 = arith.constant 0 : index
    %c0_14 = arith.constant 0 : index
    %c0_15 = arith.constant 0 : index
    %30 = vector.load %arg4[%c0_13, %c0_14, %c0_15] : memref<1x16x8xbf16, #tpu.memory_space<vmem>>, vector<1x16x8xbf16>
    tpu.vector_store %arg4[%c0_13, %c0_14, %c0_15], %29 {strides = array<i32>} : memref<1x16x8xbf16, #tpu.memory_space<vmem>>, vector<1x16x8xbf16>,
    return
  }
  func.func @transform_0(%arg0: i32, %arg1: i32) -> (i32, i32, i32) {
    %c0_i32 = arith.constant 0 : i32
    %c0_i32_0 = arith.constant 0 : i32
    return %arg0, %arg1, %c0_i32 : i32, i32, i32
  }
  func.func @transform_1(%arg0: i32, %arg1: i32) -> (i32, i32, i32) {
    %c0_i32 = arith.constant 0 : i32
    %c0_i32_0 = arith.constant 0 : i32
    %c0_i32_1 = arith.constant 0 : i32
    return %arg0, %c0_i32, %c0_i32_0 : i32, i32, i32
  }
  func.func @transform_2(%arg0: i32, %arg1: i32) -> (i32, i32, i32) {
    %c0_i32 = arith.constant 0 : i32
    %c0_i32_0 = arith.constant 0 : i32
    return %arg0, %arg1, %c0_i32 : i32, i32, i32
  }
  func.func @transform_3(%arg0: i32, %arg1: i32) -> (i32, i32, i32, i32) {
    %c0_i32 = arith.constant 0 : i32
    %c0_i32_0 = arith.constant 0 : i32
    %c0_i32_1 = arith.constant 0 : i32
    return %arg0, %arg1, %c0_i32, %c0_i32_0 : i32, i32, i32, i32
  }
}

module attributes {stable_mosaic.version = 11 : i64} {
  func.func @_conv_stats_kernel(%arg0: i32, %arg1: i32, %arg2: memref<1x16x32xbf16, #tpu.memory_space<vmem>>, %arg3: memref<1x32x8xbf16, #tpu.memory_space<vmem>>, %arg4: memref<1x16x8xbf16, #tpu.memory_space<vmem>>, %arg5: memref<1x1x8x8xf32, #tpu.memory_space<vmem>>) attributes {dimension_semantics = [#tpu.dimension_semantics<parallel>, #tpu.dimension_semantics<parallel>], iteration_bounds = array<i64: 3, 2>, scalar_prefetch = 0 : i64, scratch_operands = 0 : i64, tpu.core_type = #tpu.core_type<tc>, window_params = [{transform_indices = @transform_0, window_bounds = array<i64: 1, 16, 32>}, {transform_indices = @transform_1, window_bounds = array<i64: 1, 32, 8>}, {transform_indices = @transform_2, window_bounds = array<i64: 1, 16, 8>}, {transform_indices = @transform_3, window_bounds = array<i64: 1, 1, 8, 8>}]} {
    %c0 = arith.constant 0 : index
    %c0_0 = arith.constant 0 : index
    %c0_1 = arith.constant 0 : index
    %0 = vector.load %arg2[%c0, %c0_0, %c0_1] : memref<1x16x32xbf16, #tpu.memory_space<vmem>>, vector<1x16x32xbf16>
    %1 = vector.shape_cast %0 : vector<1x16x32xbf16> to vector<16x32xbf16>
    %c0_2 = arith.constant 0 : index
    %c0_3 = arith.constant 0 : index
    %c0_4 = arith.constant 0 : index
    %2 = vector.load %arg3[%c0_2, %c0_3, %c0_4] : memref<1x32x8xbf16, #tpu.memory_space<vmem>>, vector<1x32x8xbf16>
    %3 = vector.shape_cast %2 : vector<1x32x8xbf16> to vector<32x8xbf16>
    %cst = arith.constant dense<0.000000e+00> : vector<16x8xf32>
    %4 = tpu.matmul %1, %3, %cst {dimension_numbers = #tpu.dot_dimension_numbers<[1], [0], [0], [1], [0, 0, 1, 1], [], []>} : vector<16x32xbf16>, vector<32x8xbf16>, vector<16x8xf32> -> vector<16x8xf32>
    %cst_5 = arith.constant dense<0.000000e+00> : vector<8xf32>
    %5 = vector.multi_reduction <add>, %4, %cst_5 [0] : vector<16x8xf32> to vector<8xf32>
    %6 = vector.shape_cast %5 : vector<8xf32> to vector<1x8xf32>
    %cst_6 = arith.constant 6.250000e-02 : f32
    %7 = vector.broadcast %cst_6 : f32 to vector<1x8xf32>
    %8 = arith.mulf %6, %7 : vector<1x8xf32>
    %9 = vector.broadcast %8 : vector<1x8xf32> to vector<16x8xf32>
    %10 = arith.subf %4, %9 : vector<16x8xf32>
    %11 = arith.mulf %10, %10 : vector<16x8xf32>
    %cst_7 = arith.constant dense<0.000000e+00> : vector<8xf32>
    %12 = vector.multi_reduction <add>, %11, %cst_7 [0] : vector<16x8xf32> to vector<8xf32>
    %13 = vector.shape_cast %12 : vector<8xf32> to vector<1x8xf32>
    %14 = tpu.iota {dimensions = array<i32: 0>} : vector<8x8xi32>
    %c0_i32 = arith.constant 0 : i32
    %15 = vector.broadcast %c0_i32 : i32 to vector<8x8xi32>
    %16 = arith.cmpi eq, %14, %15 : vector<8x8xi32>
    %c1_i32 = arith.constant 1 : i32
    %17 = vector.broadcast %c1_i32 : i32 to vector<8x8xi32>
    %18 = arith.cmpi eq, %14, %17 : vector<8x8xi32>
    %cst_8 = arith.constant 0.000000e+00 : f32
    %19 = vector.shape_cast %13 : vector<1x8xf32> to vector<1x8xf32>
    %20 = vector.broadcast %19 : vector<1x8xf32> to vector<8x8xf32>
    %21 = vector.broadcast %cst_8 : f32 to vector<8x8xf32>
    %22 = arith.select %18, %20, %21 : vector<8x8xi1>, vector<8x8xf32>
    %23 = vector.shape_cast %6 : vector<1x8xf32> to vector<1x8xf32>
    %24 = vector.broadcast %23 : vector<1x8xf32> to vector<8x8xf32>
    %25 = arith.select %16, %24, %22 : vector<8x8xi1>, vector<8x8xf32>
    %26 = vector.shape_cast %25 : vector<8x8xf32> to vector<1x1x8x8xf32>
    %c0_9 = arith.constant 0 : index
    %c0_10 = arith.constant 0 : index
    %c0_11 = arith.constant 0 : index
    %c0_12 = arith.constant 0 : index
    %27 = vector.load %arg5[%c0_9, %c0_10, %c0_11, %c0_12] : memref<1x1x8x8xf32, #tpu.memory_space<vmem>>, vector<1x1x8x8xf32>
    tpu.vector_store %arg5[%c0_9, %c0_10, %c0_11, %c0_12], %26 {strides = array<i32>} : memref<1x1x8x8xf32, #tpu.memory_space<vmem>>, vector<1x1x8x8xf32>,
    %28 = vector.shape_cast %4 : vector<16x8xf32> to vector<1x16x8xf32>
    %29 = arith.truncf %28 : vector<1x16x8xf32> to vector<1x16x8xbf16>
    %c0_13 = arith.constant 0 : index
    %c0_14 = arith.constant 0 : index
    %c0_15 = arith.constant 0 : index
    %30 = vector.load %arg4[%c0_13, %c0_14, %c0_15] : memref<1x16x8xbf16, #tpu.memory_space<vmem>>, vector<1x16x8xbf16>
    tpu.vector_store %arg4[%c0_13, %c0_14, %c0_15], %29 {strides = array<i32>} : memref<1x16x8xbf16, #tpu.memory_space<vmem>>, vector<1x16x8xbf16>,
    return
  }
  func.func @transform_0(%arg0: i32, %arg1: i32) -> (i32, i32, i32) {
    %c0_i32 = arith.constant 0 : i32
    %c0_i32_0 = arith.constant 0 : i32
    return %arg0, %arg1, %c0_i32 : i32, i32, i32
  }
  func.func @transform_1(%arg0: i32, %arg1: i32) -> (i32, i32, i32) {
    %c0_i32 = arith.constant 0 : i32
    %c0_i32_0 = arith.constant 0 : i32
    %c0_i32_1 = arith.constant 0 : i32
    return %arg0, %c0_i32, %c0_i32_0 : i32, i32, i32
  }
  func.func @transform_2(%arg0: i32, %arg1: i32) -> (i32, i32, i32) {
    %c0_i32 = arith.constant 0 : i32
    %c0_i32_0 = arith.constant 0 : i32
    return %arg0, %arg1, %c0_i32 : i32, i32, i32
  }
  func.func @transform_3(%arg0: i32, %arg1: i32) -> (i32, i32, i32, i32) {
    %c0_i32 = arith.constant 0 : i32
    %c0_i32_0 = arith.constant 0 : i32
    %c0_i32_1 = arith.constant 0 : i32
    return %arg0, %arg1, %c0_i32, %c0_i32_0 : i32, i32, i32, i32
  }
}

module attributes {stable_mosaic.version = 11 : i64} {
  func.func @_conv_stats_kernel(%arg0: i32, %arg1: i32, %arg2: memref<1x16x16xbf16, #tpu.memory_space<vmem>>, %arg3: memref<1x16x8xbf16, #tpu.memory_space<vmem>>, %arg4: memref<1x16x8xbf16, #tpu.memory_space<vmem>>, %arg5: memref<1x1x8x8xf32, #tpu.memory_space<vmem>>) attributes {dimension_semantics = [#tpu.dimension_semantics<parallel>, #tpu.dimension_semantics<parallel>], iteration_bounds = array<i64: 3, 2>, scalar_prefetch = 0 : i64, scratch_operands = 0 : i64, tpu.core_type = #tpu.core_type<tc>, window_params = [{transform_indices = @transform_0, window_bounds = array<i64: 1, 16, 16>}, {transform_indices = @transform_1, window_bounds = array<i64: 1, 16, 8>}, {transform_indices = @transform_2, window_bounds = array<i64: 1, 16, 8>}, {transform_indices = @transform_3, window_bounds = array<i64: 1, 1, 8, 8>}]} {
    %c0 = arith.constant 0 : index
    %c0_0 = arith.constant 0 : index
    %c0_1 = arith.constant 0 : index
    %0 = vector.load %arg2[%c0, %c0_0, %c0_1] : memref<1x16x16xbf16, #tpu.memory_space<vmem>>, vector<1x16x16xbf16>
    %1 = vector.shape_cast %0 : vector<1x16x16xbf16> to vector<16x16xbf16>
    %c0_2 = arith.constant 0 : index
    %c0_3 = arith.constant 0 : index
    %c0_4 = arith.constant 0 : index
    %2 = vector.load %arg3[%c0_2, %c0_3, %c0_4] : memref<1x16x8xbf16, #tpu.memory_space<vmem>>, vector<1x16x8xbf16>
    %3 = vector.shape_cast %2 : vector<1x16x8xbf16> to vector<16x8xbf16>
    %cst = arith.constant dense<0.000000e+00> : vector<16x8xf32>
    %4 = tpu.matmul %1, %3, %cst {dimension_numbers = #tpu.dot_dimension_numbers<[1], [0], [0], [1], [0, 0, 1, 1], [], []>} : vector<16x16xbf16>, vector<16x8xbf16>, vector<16x8xf32> -> vector<16x8xf32>
    %cst_5 = arith.constant dense<0.000000e+00> : vector<8xf32>
    %5 = vector.multi_reduction <add>, %4, %cst_5 [0] : vector<16x8xf32> to vector<8xf32>
    %6 = vector.shape_cast %5 : vector<8xf32> to vector<1x8xf32>
    %cst_6 = arith.constant 6.250000e-02 : f32
    %7 = vector.broadcast %cst_6 : f32 to vector<1x8xf32>
    %8 = arith.mulf %6, %7 : vector<1x8xf32>
    %9 = vector.broadcast %8 : vector<1x8xf32> to vector<16x8xf32>
    %10 = arith.subf %4, %9 : vector<16x8xf32>
    %11 = arith.mulf %10, %10 : vector<16x8xf32>
    %cst_7 = arith.constant dense<0.000000e+00> : vector<8xf32>
    %12 = vector.multi_reduction <add>, %11, %cst_7 [0] : vector<16x8xf32> to vector<8xf32>
    %13 = vector.shape_cast %12 : vector<8xf32> to vector<1x8xf32>
    %14 = tpu.iota {dimensions = array<i32: 0>} : vector<8x8xi32>
    %c0_i32 = arith.constant 0 : i32
    %15 = vector.broadcast %c0_i32 : i32 to vector<8x8xi32>
    %16 = arith.cmpi eq, %14, %15 : vector<8x8xi32>
    %c1_i32 = arith.constant 1 : i32
    %17 = vector.broadcast %c1_i32 : i32 to vector<8x8xi32>
    %18 = arith.cmpi eq, %14, %17 : vector<8x8xi32>
    %cst_8 = arith.constant 0.000000e+00 : f32
    %19 = vector.shape_cast %13 : vector<1x8xf32> to vector<1x8xf32>
    %20 = vector.broadcast %19 : vector<1x8xf32> to vector<8x8xf32>
    %21 = vector.broadcast %cst_8 : f32 to vector<8x8xf32>
    %22 = arith.select %18, %20, %21 : vector<8x8xi1>, vector<8x8xf32>
    %23 = vector.shape_cast %6 : vector<1x8xf32> to vector<1x8xf32>
    %24 = vector.broadcast %23 : vector<1x8xf32> to vector<8x8xf32>
    %25 = arith.select %16, %24, %22 : vector<8x8xi1>, vector<8x8xf32>
    %26 = vector.shape_cast %25 : vector<8x8xf32> to vector<1x1x8x8xf32>
    %c0_9 = arith.constant 0 : index
    %c0_10 = arith.constant 0 : index
    %c0_11 = arith.constant 0 : index
    %c0_12 = arith.constant 0 : index
    %27 = vector.load %arg5[%c0_9, %c0_10, %c0_11, %c0_12] : memref<1x1x8x8xf32, #tpu.memory_space<vmem>>, vector<1x1x8x8xf32>
    tpu.vector_store %arg5[%c0_9, %c0_10, %c0_11, %c0_12], %26 {strides = array<i32>} : memref<1x1x8x8xf32, #tpu.memory_space<vmem>>, vector<1x1x8x8xf32>,
    %28 = vector.shape_cast %4 : vector<16x8xf32> to vector<1x16x8xf32>
    %29 = arith.truncf %28 : vector<1x16x8xf32> to vector<1x16x8xbf16>
    %c0_13 = arith.constant 0 : index
    %c0_14 = arith.constant 0 : index
    %c0_15 = arith.constant 0 : index
    %30 = vector.load %arg4[%c0_13, %c0_14, %c0_15] : memref<1x16x8xbf16, #tpu.memory_space<vmem>>, vector<1x16x8xbf16>
    tpu.vector_store %arg4[%c0_13, %c0_14, %c0_15], %29 {strides = array<i32>} : memref<1x16x8xbf16, #tpu.memory_space<vmem>>, vector<1x16x8xbf16>,
    return
  }
  func.func @transform_0(%arg0: i32, %arg1: i32) -> (i32, i32, i32) {
    %c0_i32 = arith.constant 0 : i32
    %c0_i32_0 = arith.constant 0 : i32
    return %arg0, %arg1, %c0_i32 : i32, i32, i32
  }
  func.func @transform_1(%arg0: i32, %arg1: i32) -> (i32, i32, i32) {
    %c0_i32 = arith.constant 0 : i32
    %c0_i32_0 = arith.constant 0 : i32
    %c0_i32_1 = arith.constant 0 : i32
    return %arg0, %c0_i32, %c0_i32_0 : i32, i32, i32
  }
  func.func @transform_2(%arg0: i32, %arg1: i32) -> (i32, i32, i32) {
    %c0_i32 = arith.constant 0 : i32
    %c0_i32_0 = arith.constant 0 : i32
    return %arg0, %arg1, %c0_i32 : i32, i32, i32
  }
  func.func @transform_3(%arg0: i32, %arg1: i32) -> (i32, i32, i32, i32) {
    %c0_i32 = arith.constant 0 : i32
    %c0_i32_0 = arith.constant 0 : i32
    %c0_i32_1 = arith.constant 0 : i32
    return %arg0, %arg1, %c0_i32, %c0_i32_0 : i32, i32, i32, i32
  }
}

module attributes {stable_mosaic.version = 11 : i64} {
  func.func @_conv_stats_kernel(%arg0: i32, %arg1: i32, %arg2: memref<1x16x8xbf16, #tpu.memory_space<vmem>>, %arg3: memref<1x8x8xbf16, #tpu.memory_space<vmem>>, %arg4: memref<1x16x8xbf16, #tpu.memory_space<vmem>>, %arg5: memref<1x1x8x8xf32, #tpu.memory_space<vmem>>) attributes {dimension_semantics = [#tpu.dimension_semantics<parallel>, #tpu.dimension_semantics<parallel>], iteration_bounds = array<i64: 1, 2>, scalar_prefetch = 0 : i64, scratch_operands = 0 : i64, tpu.core_type = #tpu.core_type<tc>, window_params = [{transform_indices = @transform_0, window_bounds = array<i64: 1, 16, 8>}, {transform_indices = @transform_1, window_bounds = array<i64: 1, 8, 8>}, {transform_indices = @transform_2, window_bounds = array<i64: 1, 16, 8>}, {transform_indices = @transform_3, window_bounds = array<i64: 1, 1, 8, 8>}]} {
    %c0 = arith.constant 0 : index
    %c0_0 = arith.constant 0 : index
    %c0_1 = arith.constant 0 : index
    %0 = vector.load %arg2[%c0, %c0_0, %c0_1] : memref<1x16x8xbf16, #tpu.memory_space<vmem>>, vector<1x16x8xbf16>
    %1 = vector.shape_cast %0 : vector<1x16x8xbf16> to vector<16x8xbf16>
    %c0_2 = arith.constant 0 : index
    %c0_3 = arith.constant 0 : index
    %c0_4 = arith.constant 0 : index
    %2 = vector.load %arg3[%c0_2, %c0_3, %c0_4] : memref<1x8x8xbf16, #tpu.memory_space<vmem>>, vector<1x8x8xbf16>
    %3 = vector.shape_cast %2 : vector<1x8x8xbf16> to vector<8x8xbf16>
    %cst = arith.constant dense<0.000000e+00> : vector<16x8xf32>
    %4 = tpu.matmul %1, %3, %cst {dimension_numbers = #tpu.dot_dimension_numbers<[1], [0], [0], [1], [0, 0, 1, 1], [], []>} : vector<16x8xbf16>, vector<8x8xbf16>, vector<16x8xf32> -> vector<16x8xf32>
    %cst_5 = arith.constant dense<0.000000e+00> : vector<8xf32>
    %5 = vector.multi_reduction <add>, %4, %cst_5 [0] : vector<16x8xf32> to vector<8xf32>
    %6 = vector.shape_cast %5 : vector<8xf32> to vector<1x8xf32>
    %cst_6 = arith.constant 6.250000e-02 : f32
    %7 = vector.broadcast %cst_6 : f32 to vector<1x8xf32>
    %8 = arith.mulf %6, %7 : vector<1x8xf32>
    %9 = vector.broadcast %8 : vector<1x8xf32> to vector<16x8xf32>
    %10 = arith.subf %4, %9 : vector<16x8xf32>
    %11 = arith.mulf %10, %10 : vector<16x8xf32>
    %cst_7 = arith.constant dense<0.000000e+00> : vector<8xf32>
    %12 = vector.multi_reduction <add>, %11, %cst_7 [0] : vector<16x8xf32> to vector<8xf32>
    %13 = vector.shape_cast %12 : vector<8xf32> to vector<1x8xf32>
    %14 = tpu.iota {dimensions = array<i32: 0>} : vector<8x8xi32>
    %c0_i32 = arith.constant 0 : i32
    %15 = vector.broadcast %c0_i32 : i32 to vector<8x8xi32>
    %16 = arith.cmpi eq, %14, %15 : vector<8x8xi32>
    %c1_i32 = arith.constant 1 : i32
    %17 = vector.broadcast %c1_i32 : i32 to vector<8x8xi32>
    %18 = arith.cmpi eq, %14, %17 : vector<8x8xi32>
    %cst_8 = arith.constant 0.000000e+00 : f32
    %19 = vector.shape_cast %13 : vector<1x8xf32> to vector<1x8xf32>
    %20 = vector.broadcast %19 : vector<1x8xf32> to vector<8x8xf32>
    %21 = vector.broadcast %cst_8 : f32 to vector<8x8xf32>
    %22 = arith.select %18, %20, %21 : vector<8x8xi1>, vector<8x8xf32>
    %23 = vector.shape_cast %6 : vector<1x8xf32> to vector<1x8xf32>
    %24 = vector.broadcast %23 : vector<1x8xf32> to vector<8x8xf32>
    %25 = arith.select %16, %24, %22 : vector<8x8xi1>, vector<8x8xf32>
    %26 = vector.shape_cast %25 : vector<8x8xf32> to vector<1x1x8x8xf32>
    %c0_9 = arith.constant 0 : index
    %c0_10 = arith.constant 0 : index
    %c0_11 = arith.constant 0 : index
    %c0_12 = arith.constant 0 : index
    %27 = vector.load %arg5[%c0_9, %c0_10, %c0_11, %c0_12] : memref<1x1x8x8xf32, #tpu.memory_space<vmem>>, vector<1x1x8x8xf32>
    tpu.vector_store %arg5[%c0_9, %c0_10, %c0_11, %c0_12], %26 {strides = array<i32>} : memref<1x1x8x8xf32, #tpu.memory_space<vmem>>, vector<1x1x8x8xf32>,
    %28 = vector.shape_cast %4 : vector<16x8xf32> to vector<1x16x8xf32>
    %29 = arith.truncf %28 : vector<1x16x8xf32> to vector<1x16x8xbf16>
    %c0_13 = arith.constant 0 : index
    %c0_14 = arith.constant 0 : index
    %c0_15 = arith.constant 0 : index
    %30 = vector.load %arg4[%c0_13, %c0_14, %c0_15] : memref<1x16x8xbf16, #tpu.memory_space<vmem>>, vector<1x16x8xbf16>
    tpu.vector_store %arg4[%c0_13, %c0_14, %c0_15], %29 {strides = array<i32>} : memref<1x16x8xbf16, #tpu.memory_space<vmem>>, vector<1x16x8xbf16>,
    return
  }
  func.func @transform_0(%arg0: i32, %arg1: i32) -> (i32, i32, i32) {
    %c0_i32 = arith.constant 0 : i32
    %c0_i32_0 = arith.constant 0 : i32
    return %arg0, %arg1, %c0_i32 : i32, i32, i32
  }
  func.func @transform_1(%arg0: i32, %arg1: i32) -> (i32, i32, i32) {
    %c0_i32 = arith.constant 0 : i32
    %c0_i32_0 = arith.constant 0 : i32
    %c0_i32_1 = arith.constant 0 : i32
    return %arg0, %c0_i32, %c0_i32_0 : i32, i32, i32
  }
  func.func @transform_2(%arg0: i32, %arg1: i32) -> (i32, i32, i32) {
    %c0_i32 = arith.constant 0 : i32
    %c0_i32_0 = arith.constant 0 : i32
    return %arg0, %arg1, %c0_i32 : i32, i32, i32
  }
  func.func @transform_3(%arg0: i32, %arg1: i32) -> (i32, i32, i32, i32) {
    %c0_i32 = arith.constant 0 : i32
    %c0_i32_0 = arith.constant 0 : i32
    %c0_i32_1 = arith.constant 0 : i32
    return %arg0, %arg1, %c0_i32, %c0_i32_0 : i32, i32, i32, i32
  }
}

module attributes {stable_mosaic.version = 11 : i64} {
  func.func @_bn_apply_kernel(%arg0: i32, %arg1: memref<4x512xbf16, #tpu.memory_space<vmem>>, %arg2: memref<1x512xf32, #tpu.memory_space<vmem>>, %arg3: memref<1x512xf32, #tpu.memory_space<vmem>>, %arg4: memref<4x512xbf16, #tpu.memory_space<vmem>>, %arg5: memref<4x512xbf16, #tpu.memory_space<vmem>>) attributes {dimension_semantics = [#tpu.dimension_semantics<parallel>], iteration_bounds = array<i64: 1>, scalar_prefetch = 0 : i64, scratch_operands = 0 : i64, tpu.core_type = #tpu.core_type<tc>, window_params = [{transform_indices = @transform_0, window_bounds = array<i64: 4, 512>}, {pipeline_mode = #tpu.pipeline_mode<synchronous>, transform_indices = @transform_1, window_bounds = array<i64: 1, 512>}, {pipeline_mode = #tpu.pipeline_mode<synchronous>, transform_indices = @transform_2, window_bounds = array<i64: 1, 512>}, {transform_indices = @transform_3, window_bounds = array<i64: 4, 512>}, {transform_indices = @transform_4, window_bounds = array<i64: 4, 512>}]} {
    %c0 = arith.constant 0 : index
    %c0_0 = arith.constant 0 : index
    %0 = vector.load %arg1[%c0, %c0_0] : memref<4x512xbf16, #tpu.memory_space<vmem>>, vector<4x512xbf16>
    %1 = arith.extf %0 : vector<4x512xbf16> to vector<4x512xf32>
    %c0_1 = arith.constant 0 : index
    %c0_2 = arith.constant 0 : index
    %2 = vector.load %arg2[%c0_1, %c0_2] : memref<1x512xf32, #tpu.memory_space<vmem>>, vector<1x512xf32>
    %3 = vector.broadcast %2 : vector<1x512xf32> to vector<4x512xf32>
    %4 = arith.mulf %1, %3 : vector<4x512xf32>
    %c0_3 = arith.constant 0 : index
    %c0_4 = arith.constant 0 : index
    %5 = vector.load %arg3[%c0_3, %c0_4] : memref<1x512xf32, #tpu.memory_space<vmem>>, vector<1x512xf32>
    %6 = vector.broadcast %5 : vector<1x512xf32> to vector<4x512xf32>
    %7 = arith.addf %4, %6 : vector<4x512xf32>
    %c0_5 = arith.constant 0 : index
    %c0_6 = arith.constant 0 : index
    %8 = vector.load %arg4[%c0_5, %c0_6] : memref<4x512xbf16, #tpu.memory_space<vmem>>, vector<4x512xbf16>
    %9 = arith.extf %8 : vector<4x512xbf16> to vector<4x512xf32>
    %10 = arith.addf %7, %9 : vector<4x512xf32>
    %cst = arith.constant 0.000000e+00 : f32
    %11 = vector.broadcast %cst : f32 to vector<4x512xf32>
    %12 = arith.maximumf %10, %11 : vector<4x512xf32>
    %13 = arith.truncf %12 : vector<4x512xf32> to vector<4x512xbf16>
    %c0_7 = arith.constant 0 : index
    %c0_8 = arith.constant 0 : index
    %14 = vector.load %arg5[%c0_7, %c0_8] : memref<4x512xbf16, #tpu.memory_space<vmem>>, vector<4x512xbf16>
    tpu.vector_store %arg5[%c0_7, %c0_8], %13 {strides = array<i32>} : memref<4x512xbf16, #tpu.memory_space<vmem>>, vector<4x512xbf16>,
    return
  }
  func.func @transform_0(%arg0: i32) -> (i32, i32) {
    %c0_i32 = arith.constant 0 : i32
    %c0_i32_0 = arith.constant 0 : i32
    return %arg0, %c0_i32 : i32, i32
  }
  func.func @transform_1(%arg0: i32) -> (i32, i32) {
    %c0_i32 = arith.constant 0 : i32
    %c0_i32_0 = arith.constant 0 : i32
    %c0_i32_1 = arith.constant 0 : i32
    return %c0_i32, %c0_i32_0 : i32, i32
  }
  func.func @transform_2(%arg0: i32) -> (i32, i32) {
    %c0_i32 = arith.constant 0 : i32
    %c0_i32_0 = arith.constant 0 : i32
    %c0_i32_1 = arith.constant 0 : i32
    return %c0_i32, %c0_i32_0 : i32, i32
  }
  func.func @transform_3(%arg0: i32) -> (i32, i32) {
    %c0_i32 = arith.constant 0 : i32
    %c0_i32_0 = arith.constant 0 : i32
    return %arg0, %c0_i32 : i32, i32
  }
  func.func @transform_4(%arg0: i32) -> (i32, i32) {
    %c0_i32 = arith.constant 0 : i32
    %c0_i32_0 = arith.constant 0 : i32
    return %arg0, %c0_i32 : i32, i32
  }
}

module attributes {stable_mosaic.version = 11 : i64} {
  func.func @_conv_stats_kernel(%arg0: i32, %arg1: i32, %arg2: memref<1x128x64xbf16, #tpu.memory_space<vmem>>, %arg3: memref<1x64x4xbf16, #tpu.memory_space<vmem>>, %arg4: memref<1x128x4xbf16, #tpu.memory_space<vmem>>, %arg5: memref<1x1x8x4xf32, #tpu.memory_space<vmem>>) attributes {dimension_semantics = [#tpu.dimension_semantics<parallel>, #tpu.dimension_semantics<parallel>], iteration_bounds = array<i64: 1, 2>, scalar_prefetch = 0 : i64, scratch_operands = 0 : i64, tpu.core_type = #tpu.core_type<tc>, window_params = [{transform_indices = @transform_0, window_bounds = array<i64: 1, 128, 64>}, {transform_indices = @transform_1, window_bounds = array<i64: 1, 64, 4>}, {transform_indices = @transform_2, window_bounds = array<i64: 1, 128, 4>}, {transform_indices = @transform_3, window_bounds = array<i64: 1, 1, 8, 4>}]} {
    %c0 = arith.constant 0 : index
    %c0_0 = arith.constant 0 : index
    %c0_1 = arith.constant 0 : index
    %0 = vector.load %arg2[%c0, %c0_0, %c0_1] : memref<1x128x64xbf16, #tpu.memory_space<vmem>>, vector<1x128x64xbf16>
    %1 = vector.shape_cast %0 : vector<1x128x64xbf16> to vector<128x64xbf16>
    %c0_2 = arith.constant 0 : index
    %c0_3 = arith.constant 0 : index
    %c0_4 = arith.constant 0 : index
    %2 = vector.load %arg3[%c0_2, %c0_3, %c0_4] : memref<1x64x4xbf16, #tpu.memory_space<vmem>>, vector<1x64x4xbf16>
    %3 = vector.shape_cast %2 : vector<1x64x4xbf16> to vector<64x4xbf16>
    %cst = arith.constant dense<0.000000e+00> : vector<128x4xf32>
    %4 = tpu.matmul %1, %3, %cst {dimension_numbers = #tpu.dot_dimension_numbers<[1], [0], [0], [1], [0, 0, 1, 1], [], []>} : vector<128x64xbf16>, vector<64x4xbf16>, vector<128x4xf32> -> vector<128x4xf32>
    %cst_5 = arith.constant dense<0.000000e+00> : vector<4xf32>
    %5 = vector.multi_reduction <add>, %4, %cst_5 [0] : vector<128x4xf32> to vector<4xf32>
    %6 = vector.shape_cast %5 : vector<4xf32> to vector<1x4xf32>
    %cst_6 = arith.constant 7.812500e-03 : f32
    %7 = vector.broadcast %cst_6 : f32 to vector<1x4xf32>
    %8 = arith.mulf %6, %7 : vector<1x4xf32>
    %9 = vector.broadcast %8 : vector<1x4xf32> to vector<128x4xf32>
    %10 = arith.subf %4, %9 : vector<128x4xf32>
    %11 = arith.mulf %10, %10 : vector<128x4xf32>
    %cst_7 = arith.constant dense<0.000000e+00> : vector<4xf32>
    %12 = vector.multi_reduction <add>, %11, %cst_7 [0] : vector<128x4xf32> to vector<4xf32>
    %13 = vector.shape_cast %12 : vector<4xf32> to vector<1x4xf32>
    %14 = tpu.iota {dimensions = array<i32: 0>} : vector<8x4xi32>
    %c0_i32 = arith.constant 0 : i32
    %15 = vector.broadcast %c0_i32 : i32 to vector<8x4xi32>
    %16 = arith.cmpi eq, %14, %15 : vector<8x4xi32>
    %c1_i32 = arith.constant 1 : i32
    %17 = vector.broadcast %c1_i32 : i32 to vector<8x4xi32>
    %18 = arith.cmpi eq, %14, %17 : vector<8x4xi32>
    %cst_8 = arith.constant 0.000000e+00 : f32
    %19 = vector.shape_cast %13 : vector<1x4xf32> to vector<1x4xf32>
    %20 = vector.broadcast %19 : vector<1x4xf32> to vector<8x4xf32>
    %21 = vector.broadcast %cst_8 : f32 to vector<8x4xf32>
    %22 = arith.select %18, %20, %21 : vector<8x4xi1>, vector<8x4xf32>
    %23 = vector.shape_cast %6 : vector<1x4xf32> to vector<1x4xf32>
    %24 = vector.broadcast %23 : vector<1x4xf32> to vector<8x4xf32>
    %25 = arith.select %16, %24, %22 : vector<8x4xi1>, vector<8x4xf32>
    %26 = vector.shape_cast %25 : vector<8x4xf32> to vector<1x1x8x4xf32>
    %c0_9 = arith.constant 0 : index
    %c0_10 = arith.constant 0 : index
    %c0_11 = arith.constant 0 : index
    %c0_12 = arith.constant 0 : index
    %27 = vector.load %arg5[%c0_9, %c0_10, %c0_11, %c0_12] : memref<1x1x8x4xf32, #tpu.memory_space<vmem>>, vector<1x1x8x4xf32>
    tpu.vector_store %arg5[%c0_9, %c0_10, %c0_11, %c0_12], %26 {strides = array<i32>} : memref<1x1x8x4xf32, #tpu.memory_space<vmem>>, vector<1x1x8x4xf32>,
    %28 = vector.shape_cast %4 : vector<128x4xf32> to vector<1x128x4xf32>
    %29 = arith.truncf %28 : vector<1x128x4xf32> to vector<1x128x4xbf16>
    %c0_13 = arith.constant 0 : index
    %c0_14 = arith.constant 0 : index
    %c0_15 = arith.constant 0 : index
    %30 = vector.load %arg4[%c0_13, %c0_14, %c0_15] : memref<1x128x4xbf16, #tpu.memory_space<vmem>>, vector<1x128x4xbf16>
    tpu.vector_store %arg4[%c0_13, %c0_14, %c0_15], %29 {strides = array<i32>} : memref<1x128x4xbf16, #tpu.memory_space<vmem>>, vector<1x128x4xbf16>,
    return
  }
  func.func @transform_0(%arg0: i32, %arg1: i32) -> (i32, i32, i32) {
    %c0_i32 = arith.constant 0 : i32
    %c0_i32_0 = arith.constant 0 : i32
    return %arg0, %arg1, %c0_i32 : i32, i32, i32
  }
  func.func @transform_1(%arg0: i32, %arg1: i32) -> (i32, i32, i32) {
    %c0_i32 = arith.constant 0 : i32
    %c0_i32_0 = arith.constant 0 : i32
    %c0_i32_1 = arith.constant 0 : i32
    return %arg0, %c0_i32, %c0_i32_0 : i32, i32, i32
  }
  func.func @transform_2(%arg0: i32, %arg1: i32) -> (i32, i32, i32) {
    %c0_i32 = arith.constant 0 : i32
    %c0_i32_0 = arith.constant 0 : i32
    return %arg0, %arg1, %c0_i32 : i32, i32, i32
  }
  func.func @transform_3(%arg0: i32, %arg1: i32) -> (i32, i32, i32, i32) {
    %c0_i32 = arith.constant 0 : i32
    %c0_i32_0 = arith.constant 0 : i32
    %c0_i32_1 = arith.constant 0 : i32
    return %arg0, %arg1, %c0_i32, %c0_i32_0 : i32, i32, i32, i32
  }
}

module attributes {stable_mosaic.version = 11 : i64} {
  func.func @_conv_stats_kernel(%arg0: i32, %arg1: i32, %arg2: memref<1x128x32xbf16, #tpu.memory_space<vmem>>, %arg3: memref<1x32x4xbf16, #tpu.memory_space<vmem>>, %arg4: memref<1x128x4xbf16, #tpu.memory_space<vmem>>, %arg5: memref<1x1x8x4xf32, #tpu.memory_space<vmem>>) attributes {dimension_semantics = [#tpu.dimension_semantics<parallel>, #tpu.dimension_semantics<parallel>], iteration_bounds = array<i64: 3, 2>, scalar_prefetch = 0 : i64, scratch_operands = 0 : i64, tpu.core_type = #tpu.core_type<tc>, window_params = [{transform_indices = @transform_0, window_bounds = array<i64: 1, 128, 32>}, {transform_indices = @transform_1, window_bounds = array<i64: 1, 32, 4>}, {transform_indices = @transform_2, window_bounds = array<i64: 1, 128, 4>}, {transform_indices = @transform_3, window_bounds = array<i64: 1, 1, 8, 4>}]} {
    %c0 = arith.constant 0 : index
    %c0_0 = arith.constant 0 : index
    %c0_1 = arith.constant 0 : index
    %0 = vector.load %arg2[%c0, %c0_0, %c0_1] : memref<1x128x32xbf16, #tpu.memory_space<vmem>>, vector<1x128x32xbf16>
    %1 = vector.shape_cast %0 : vector<1x128x32xbf16> to vector<128x32xbf16>
    %c0_2 = arith.constant 0 : index
    %c0_3 = arith.constant 0 : index
    %c0_4 = arith.constant 0 : index
    %2 = vector.load %arg3[%c0_2, %c0_3, %c0_4] : memref<1x32x4xbf16, #tpu.memory_space<vmem>>, vector<1x32x4xbf16>
    %3 = vector.shape_cast %2 : vector<1x32x4xbf16> to vector<32x4xbf16>
    %cst = arith.constant dense<0.000000e+00> : vector<128x4xf32>
    %4 = tpu.matmul %1, %3, %cst {dimension_numbers = #tpu.dot_dimension_numbers<[1], [0], [0], [1], [0, 0, 1, 1], [], []>} : vector<128x32xbf16>, vector<32x4xbf16>, vector<128x4xf32> -> vector<128x4xf32>
    %cst_5 = arith.constant dense<0.000000e+00> : vector<4xf32>
    %5 = vector.multi_reduction <add>, %4, %cst_5 [0] : vector<128x4xf32> to vector<4xf32>
    %6 = vector.shape_cast %5 : vector<4xf32> to vector<1x4xf32>
    %cst_6 = arith.constant 7.812500e-03 : f32
    %7 = vector.broadcast %cst_6 : f32 to vector<1x4xf32>
    %8 = arith.mulf %6, %7 : vector<1x4xf32>
    %9 = vector.broadcast %8 : vector<1x4xf32> to vector<128x4xf32>
    %10 = arith.subf %4, %9 : vector<128x4xf32>
    %11 = arith.mulf %10, %10 : vector<128x4xf32>
    %cst_7 = arith.constant dense<0.000000e+00> : vector<4xf32>
    %12 = vector.multi_reduction <add>, %11, %cst_7 [0] : vector<128x4xf32> to vector<4xf32>
    %13 = vector.shape_cast %12 : vector<4xf32> to vector<1x4xf32>
    %14 = tpu.iota {dimensions = array<i32: 0>} : vector<8x4xi32>
    %c0_i32 = arith.constant 0 : i32
    %15 = vector.broadcast %c0_i32 : i32 to vector<8x4xi32>
    %16 = arith.cmpi eq, %14, %15 : vector<8x4xi32>
    %c1_i32 = arith.constant 1 : i32
    %17 = vector.broadcast %c1_i32 : i32 to vector<8x4xi32>
    %18 = arith.cmpi eq, %14, %17 : vector<8x4xi32>
    %cst_8 = arith.constant 0.000000e+00 : f32
    %19 = vector.shape_cast %13 : vector<1x4xf32> to vector<1x4xf32>
    %20 = vector.broadcast %19 : vector<1x4xf32> to vector<8x4xf32>
    %21 = vector.broadcast %cst_8 : f32 to vector<8x4xf32>
    %22 = arith.select %18, %20, %21 : vector<8x4xi1>, vector<8x4xf32>
    %23 = vector.shape_cast %6 : vector<1x4xf32> to vector<1x4xf32>
    %24 = vector.broadcast %23 : vector<1x4xf32> to vector<8x4xf32>
    %25 = arith.select %16, %24, %22 : vector<8x4xi1>, vector<8x4xf32>
    %26 = vector.shape_cast %25 : vector<8x4xf32> to vector<1x1x8x4xf32>
    %c0_9 = arith.constant 0 : index
    %c0_10 = arith.constant 0 : index
    %c0_11 = arith.constant 0 : index
    %c0_12 = arith.constant 0 : index
    %27 = vector.load %arg5[%c0_9, %c0_10, %c0_11, %c0_12] : memref<1x1x8x4xf32, #tpu.memory_space<vmem>>, vector<1x1x8x4xf32>
    tpu.vector_store %arg5[%c0_9, %c0_10, %c0_11, %c0_12], %26 {strides = array<i32>} : memref<1x1x8x4xf32, #tpu.memory_space<vmem>>, vector<1x1x8x4xf32>,
    %28 = vector.shape_cast %4 : vector<128x4xf32> to vector<1x128x4xf32>
    %29 = arith.truncf %28 : vector<1x128x4xf32> to vector<1x128x4xbf16>
    %c0_13 = arith.constant 0 : index
    %c0_14 = arith.constant 0 : index
    %c0_15 = arith.constant 0 : index
    %30 = vector.load %arg4[%c0_13, %c0_14, %c0_15] : memref<1x128x4xbf16, #tpu.memory_space<vmem>>, vector<1x128x4xbf16>
    tpu.vector_store %arg4[%c0_13, %c0_14, %c0_15], %29 {strides = array<i32>} : memref<1x128x4xbf16, #tpu.memory_space<vmem>>, vector<1x128x4xbf16>,
    return
  }
  func.func @transform_0(%arg0: i32, %arg1: i32) -> (i32, i32, i32) {
    %c0_i32 = arith.constant 0 : i32
    %c0_i32_0 = arith.constant 0 : i32
    return %arg0, %arg1, %c0_i32 : i32, i32, i32
  }
  func.func @transform_1(%arg0: i32, %arg1: i32) -> (i32, i32, i32) {
    %c0_i32 = arith.constant 0 : i32
    %c0_i32_0 = arith.constant 0 : i32
    %c0_i32_1 = arith.constant 0 : i32
    return %arg0, %c0_i32, %c0_i32_0 : i32, i32, i32
  }
  func.func @transform_2(%arg0: i32, %arg1: i32) -> (i32, i32, i32) {
    %c0_i32 = arith.constant 0 : i32
    %c0_i32_0 = arith.constant 0 : i32
    return %arg0, %arg1, %c0_i32 : i32, i32, i32
  }
  func.func @transform_3(%arg0: i32, %arg1: i32) -> (i32, i32, i32, i32) {
    %c0_i32 = arith.constant 0 : i32
    %c0_i32_0 = arith.constant 0 : i32
    %c0_i32_1 = arith.constant 0 : i32
    return %arg0, %arg1, %c0_i32, %c0_i32_0 : i32, i32, i32, i32
  }
}

module attributes {stable_mosaic.version = 11 : i64} {
  func.func @_conv_stats_kernel(%arg0: i32, %arg1: i32, %arg2: memref<1x128x16xbf16, #tpu.memory_space<vmem>>, %arg3: memref<1x16x4xbf16, #tpu.memory_space<vmem>>, %arg4: memref<1x128x4xbf16, #tpu.memory_space<vmem>>, %arg5: memref<1x1x8x4xf32, #tpu.memory_space<vmem>>) attributes {dimension_semantics = [#tpu.dimension_semantics<parallel>, #tpu.dimension_semantics<parallel>], iteration_bounds = array<i64: 3, 2>, scalar_prefetch = 0 : i64, scratch_operands = 0 : i64, tpu.core_type = #tpu.core_type<tc>, window_params = [{transform_indices = @transform_0, window_bounds = array<i64: 1, 128, 16>}, {transform_indices = @transform_1, window_bounds = array<i64: 1, 16, 4>}, {transform_indices = @transform_2, window_bounds = array<i64: 1, 128, 4>}, {transform_indices = @transform_3, window_bounds = array<i64: 1, 1, 8, 4>}]} {
    %c0 = arith.constant 0 : index
    %c0_0 = arith.constant 0 : index
    %c0_1 = arith.constant 0 : index
    %0 = vector.load %arg2[%c0, %c0_0, %c0_1] : memref<1x128x16xbf16, #tpu.memory_space<vmem>>, vector<1x128x16xbf16>
    %1 = vector.shape_cast %0 : vector<1x128x16xbf16> to vector<128x16xbf16>
    %c0_2 = arith.constant 0 : index
    %c0_3 = arith.constant 0 : index
    %c0_4 = arith.constant 0 : index
    %2 = vector.load %arg3[%c0_2, %c0_3, %c0_4] : memref<1x16x4xbf16, #tpu.memory_space<vmem>>, vector<1x16x4xbf16>
    %3 = vector.shape_cast %2 : vector<1x16x4xbf16> to vector<16x4xbf16>
    %cst = arith.constant dense<0.000000e+00> : vector<128x4xf32>
    %4 = tpu.matmul %1, %3, %cst {dimension_numbers = #tpu.dot_dimension_numbers<[1], [0], [0], [1], [0, 0, 1, 1], [], []>} : vector<128x16xbf16>, vector<16x4xbf16>, vector<128x4xf32> -> vector<128x4xf32>
    %cst_5 = arith.constant dense<0.000000e+00> : vector<4xf32>
    %5 = vector.multi_reduction <add>, %4, %cst_5 [0] : vector<128x4xf32> to vector<4xf32>
    %6 = vector.shape_cast %5 : vector<4xf32> to vector<1x4xf32>
    %cst_6 = arith.constant 7.812500e-03 : f32
    %7 = vector.broadcast %cst_6 : f32 to vector<1x4xf32>
    %8 = arith.mulf %6, %7 : vector<1x4xf32>
    %9 = vector.broadcast %8 : vector<1x4xf32> to vector<128x4xf32>
    %10 = arith.subf %4, %9 : vector<128x4xf32>
    %11 = arith.mulf %10, %10 : vector<128x4xf32>
    %cst_7 = arith.constant dense<0.000000e+00> : vector<4xf32>
    %12 = vector.multi_reduction <add>, %11, %cst_7 [0] : vector<128x4xf32> to vector<4xf32>
    %13 = vector.shape_cast %12 : vector<4xf32> to vector<1x4xf32>
    %14 = tpu.iota {dimensions = array<i32: 0>} : vector<8x4xi32>
    %c0_i32 = arith.constant 0 : i32
    %15 = vector.broadcast %c0_i32 : i32 to vector<8x4xi32>
    %16 = arith.cmpi eq, %14, %15 : vector<8x4xi32>
    %c1_i32 = arith.constant 1 : i32
    %17 = vector.broadcast %c1_i32 : i32 to vector<8x4xi32>
    %18 = arith.cmpi eq, %14, %17 : vector<8x4xi32>
    %cst_8 = arith.constant 0.000000e+00 : f32
    %19 = vector.shape_cast %13 : vector<1x4xf32> to vector<1x4xf32>
    %20 = vector.broadcast %19 : vector<1x4xf32> to vector<8x4xf32>
    %21 = vector.broadcast %cst_8 : f32 to vector<8x4xf32>
    %22 = arith.select %18, %20, %21 : vector<8x4xi1>, vector<8x4xf32>
    %23 = vector.shape_cast %6 : vector<1x4xf32> to vector<1x4xf32>
    %24 = vector.broadcast %23 : vector<1x4xf32> to vector<8x4xf32>
    %25 = arith.select %16, %24, %22 : vector<8x4xi1>, vector<8x4xf32>
    %26 = vector.shape_cast %25 : vector<8x4xf32> to vector<1x1x8x4xf32>
    %c0_9 = arith.constant 0 : index
    %c0_10 = arith.constant 0 : index
    %c0_11 = arith.constant 0 : index
    %c0_12 = arith.constant 0 : index
    %27 = vector.load %arg5[%c0_9, %c0_10, %c0_11, %c0_12] : memref<1x1x8x4xf32, #tpu.memory_space<vmem>>, vector<1x1x8x4xf32>
    tpu.vector_store %arg5[%c0_9, %c0_10, %c0_11, %c0_12], %26 {strides = array<i32>} : memref<1x1x8x4xf32, #tpu.memory_space<vmem>>, vector<1x1x8x4xf32>,
    %28 = vector.shape_cast %4 : vector<128x4xf32> to vector<1x128x4xf32>
    %29 = arith.truncf %28 : vector<1x128x4xf32> to vector<1x128x4xbf16>
    %c0_13 = arith.constant 0 : index
    %c0_14 = arith.constant 0 : index
    %c0_15 = arith.constant 0 : index
    %30 = vector.load %arg4[%c0_13, %c0_14, %c0_15] : memref<1x128x4xbf16, #tpu.memory_space<vmem>>, vector<1x128x4xbf16>
    tpu.vector_store %arg4[%c0_13, %c0_14, %c0_15], %29 {strides = array<i32>} : memref<1x128x4xbf16, #tpu.memory_space<vmem>>, vector<1x128x4xbf16>,
    return
  }
  func.func @transform_0(%arg0: i32, %arg1: i32) -> (i32, i32, i32) {
    %c0_i32 = arith.constant 0 : i32
    %c0_i32_0 = arith.constant 0 : i32
    return %arg0, %arg1, %c0_i32 : i32, i32, i32
  }
  func.func @transform_1(%arg0: i32, %arg1: i32) -> (i32, i32, i32) {
    %c0_i32 = arith.constant 0 : i32
    %c0_i32_0 = arith.constant 0 : i32
    %c0_i32_1 = arith.constant 0 : i32
    return %arg0, %c0_i32, %c0_i32_0 : i32, i32, i32
  }
  func.func @transform_2(%arg0: i32, %arg1: i32) -> (i32, i32, i32) {
    %c0_i32 = arith.constant 0 : i32
    %c0_i32_0 = arith.constant 0 : i32
    return %arg0, %arg1, %c0_i32 : i32, i32, i32
  }
  func.func @transform_3(%arg0: i32, %arg1: i32) -> (i32, i32, i32, i32) {
    %c0_i32 = arith.constant 0 : i32
    %c0_i32_0 = arith.constant 0 : i32
    %c0_i32_1 = arith.constant 0 : i32
    return %arg0, %arg1, %c0_i32, %c0_i32_0 : i32, i32, i32, i32
  }
}

module attributes {stable_mosaic.version = 11 : i64} {
  func.func @_conv_stats_kernel(%arg0: i32, %arg1: i32, %arg2: memref<1x128x8xbf16, #tpu.memory_space<vmem>>, %arg3: memref<1x8x4xbf16, #tpu.memory_space<vmem>>, %arg4: memref<1x128x4xbf16, #tpu.memory_space<vmem>>, %arg5: memref<1x1x8x4xf32, #tpu.memory_space<vmem>>) attributes {dimension_semantics = [#tpu.dimension_semantics<parallel>, #tpu.dimension_semantics<parallel>], iteration_bounds = array<i64: 1, 2>, scalar_prefetch = 0 : i64, scratch_operands = 0 : i64, tpu.core_type = #tpu.core_type<tc>, window_params = [{transform_indices = @transform_0, window_bounds = array<i64: 1, 128, 8>}, {transform_indices = @transform_1, window_bounds = array<i64: 1, 8, 4>}, {transform_indices = @transform_2, window_bounds = array<i64: 1, 128, 4>}, {transform_indices = @transform_3, window_bounds = array<i64: 1, 1, 8, 4>}]} {
    %c0 = arith.constant 0 : index
    %c0_0 = arith.constant 0 : index
    %c0_1 = arith.constant 0 : index
    %0 = vector.load %arg2[%c0, %c0_0, %c0_1] : memref<1x128x8xbf16, #tpu.memory_space<vmem>>, vector<1x128x8xbf16>
    %1 = vector.shape_cast %0 : vector<1x128x8xbf16> to vector<128x8xbf16>
    %c0_2 = arith.constant 0 : index
    %c0_3 = arith.constant 0 : index
    %c0_4 = arith.constant 0 : index
    %2 = vector.load %arg3[%c0_2, %c0_3, %c0_4] : memref<1x8x4xbf16, #tpu.memory_space<vmem>>, vector<1x8x4xbf16>
    %3 = vector.shape_cast %2 : vector<1x8x4xbf16> to vector<8x4xbf16>
    %cst = arith.constant dense<0.000000e+00> : vector<128x4xf32>
    %4 = tpu.matmul %1, %3, %cst {dimension_numbers = #tpu.dot_dimension_numbers<[1], [0], [0], [1], [0, 0, 1, 1], [], []>} : vector<128x8xbf16>, vector<8x4xbf16>, vector<128x4xf32> -> vector<128x4xf32>
    %cst_5 = arith.constant dense<0.000000e+00> : vector<4xf32>
    %5 = vector.multi_reduction <add>, %4, %cst_5 [0] : vector<128x4xf32> to vector<4xf32>
    %6 = vector.shape_cast %5 : vector<4xf32> to vector<1x4xf32>
    %cst_6 = arith.constant 7.812500e-03 : f32
    %7 = vector.broadcast %cst_6 : f32 to vector<1x4xf32>
    %8 = arith.mulf %6, %7 : vector<1x4xf32>
    %9 = vector.broadcast %8 : vector<1x4xf32> to vector<128x4xf32>
    %10 = arith.subf %4, %9 : vector<128x4xf32>
    %11 = arith.mulf %10, %10 : vector<128x4xf32>
    %cst_7 = arith.constant dense<0.000000e+00> : vector<4xf32>
    %12 = vector.multi_reduction <add>, %11, %cst_7 [0] : vector<128x4xf32> to vector<4xf32>
    %13 = vector.shape_cast %12 : vector<4xf32> to vector<1x4xf32>
    %14 = tpu.iota {dimensions = array<i32: 0>} : vector<8x4xi32>
    %c0_i32 = arith.constant 0 : i32
    %15 = vector.broadcast %c0_i32 : i32 to vector<8x4xi32>
    %16 = arith.cmpi eq, %14, %15 : vector<8x4xi32>
    %c1_i32 = arith.constant 1 : i32
    %17 = vector.broadcast %c1_i32 : i32 to vector<8x4xi32>
    %18 = arith.cmpi eq, %14, %17 : vector<8x4xi32>
    %cst_8 = arith.constant 0.000000e+00 : f32
    %19 = vector.shape_cast %13 : vector<1x4xf32> to vector<1x4xf32>
    %20 = vector.broadcast %19 : vector<1x4xf32> to vector<8x4xf32>
    %21 = vector.broadcast %cst_8 : f32 to vector<8x4xf32>
    %22 = arith.select %18, %20, %21 : vector<8x4xi1>, vector<8x4xf32>
    %23 = vector.shape_cast %6 : vector<1x4xf32> to vector<1x4xf32>
    %24 = vector.broadcast %23 : vector<1x4xf32> to vector<8x4xf32>
    %25 = arith.select %16, %24, %22 : vector<8x4xi1>, vector<8x4xf32>
    %26 = vector.shape_cast %25 : vector<8x4xf32> to vector<1x1x8x4xf32>
    %c0_9 = arith.constant 0 : index
    %c0_10 = arith.constant 0 : index
    %c0_11 = arith.constant 0 : index
    %c0_12 = arith.constant 0 : index
    %27 = vector.load %arg5[%c0_9, %c0_10, %c0_11, %c0_12] : memref<1x1x8x4xf32, #tpu.memory_space<vmem>>, vector<1x1x8x4xf32>
    tpu.vector_store %arg5[%c0_9, %c0_10, %c0_11, %c0_12], %26 {strides = array<i32>} : memref<1x1x8x4xf32, #tpu.memory_space<vmem>>, vector<1x1x8x4xf32>,
    %28 = vector.shape_cast %4 : vector<128x4xf32> to vector<1x128x4xf32>
    %29 = arith.truncf %28 : vector<1x128x4xf32> to vector<1x128x4xbf16>
    %c0_13 = arith.constant 0 : index
    %c0_14 = arith.constant 0 : index
    %c0_15 = arith.constant 0 : index
    %30 = vector.load %arg4[%c0_13, %c0_14, %c0_15] : memref<1x128x4xbf16, #tpu.memory_space<vmem>>, vector<1x128x4xbf16>
    tpu.vector_store %arg4[%c0_13, %c0_14, %c0_15], %29 {strides = array<i32>} : memref<1x128x4xbf16, #tpu.memory_space<vmem>>, vector<1x128x4xbf16>,
    return
  }
  func.func @transform_0(%arg0: i32, %arg1: i32) -> (i32, i32, i32) {
    %c0_i32 = arith.constant 0 : i32
    %c0_i32_0 = arith.constant 0 : i32
    return %arg0, %arg1, %c0_i32 : i32, i32, i32
  }
  func.func @transform_1(%arg0: i32, %arg1: i32) -> (i32, i32, i32) {
    %c0_i32 = arith.constant 0 : i32
    %c0_i32_0 = arith.constant 0 : i32
    %c0_i32_1 = arith.constant 0 : i32
    return %arg0, %c0_i32, %c0_i32_0 : i32, i32, i32
  }
  func.func @transform_2(%arg0: i32, %arg1: i32) -> (i32, i32, i32) {
    %c0_i32 = arith.constant 0 : i32
    %c0_i32_0 = arith.constant 0 : i32
    return %arg0, %arg1, %c0_i32 : i32, i32, i32
  }
  func.func @transform_3(%arg0: i32, %arg1: i32) -> (i32, i32, i32, i32) {
    %c0_i32 = arith.constant 0 : i32
    %c0_i32_0 = arith.constant 0 : i32
    %c0_i32_1 = arith.constant 0 : i32
    return %arg0, %arg1, %c0_i32, %c0_i32_0 : i32, i32, i32, i32
  }
}

module attributes {stable_mosaic.version = 11 : i64} {
  func.func @_bn_apply_kernel(%arg0: i32, %arg1: memref<16x512xbf16, #tpu.memory_space<vmem>>, %arg2: memref<1x512xf32, #tpu.memory_space<vmem>>, %arg3: memref<1x512xf32, #tpu.memory_space<vmem>>, %arg4: memref<16x512xbf16, #tpu.memory_space<vmem>>) attributes {dimension_semantics = [#tpu.dimension_semantics<parallel>], iteration_bounds = array<i64: 1>, scalar_prefetch = 0 : i64, scratch_operands = 0 : i64, tpu.core_type = #tpu.core_type<tc>, window_params = [{transform_indices = @transform_0, window_bounds = array<i64: 16, 512>}, {pipeline_mode = #tpu.pipeline_mode<synchronous>, transform_indices = @transform_1, window_bounds = array<i64: 1, 512>}, {pipeline_mode = #tpu.pipeline_mode<synchronous>, transform_indices = @transform_2, window_bounds = array<i64: 1, 512>}, {transform_indices = @transform_3, window_bounds = array<i64: 16, 512>}]} {
    %c0 = arith.constant 0 : index
    %c0_0 = arith.constant 0 : index
    %0 = vector.load %arg1[%c0, %c0_0] : memref<16x512xbf16, #tpu.memory_space<vmem>>, vector<16x512xbf16>
    %1 = arith.extf %0 : vector<16x512xbf16> to vector<16x512xf32>
    %c0_1 = arith.constant 0 : index
    %c0_2 = arith.constant 0 : index
    %2 = vector.load %arg2[%c0_1, %c0_2] : memref<1x512xf32, #tpu.memory_space<vmem>>, vector<1x512xf32>
    %3 = vector.broadcast %2 : vector<1x512xf32> to vector<16x512xf32>
    %4 = arith.mulf %1, %3 : vector<16x512xf32>
    %c0_3 = arith.constant 0 : index
    %c0_4 = arith.constant 0 : index
    %5 = vector.load %arg3[%c0_3, %c0_4] : memref<1x512xf32, #tpu.memory_space<vmem>>, vector<1x512xf32>
    %6 = vector.broadcast %5 : vector<1x512xf32> to vector<16x512xf32>
    %7 = arith.addf %4, %6 : vector<16x512xf32>
    %8 = arith.truncf %7 : vector<16x512xf32> to vector<16x512xbf16>
    %c0_5 = arith.constant 0 : index
    %c0_6 = arith.constant 0 : index
    %9 = vector.load %arg4[%c0_5, %c0_6] : memref<16x512xbf16, #tpu.memory_space<vmem>>, vector<16x512xbf16>
    tpu.vector_store %arg4[%c0_5, %c0_6], %8 {strides = array<i32>} : memref<16x512xbf16, #tpu.memory_space<vmem>>, vector<16x512xbf16>,
    return
  }
  func.func @transform_0(%arg0: i32) -> (i32, i32) {
    %c0_i32 = arith.constant 0 : i32
    %c0_i32_0 = arith.constant 0 : i32
    return %arg0, %c0_i32 : i32, i32
  }
  func.func @transform_1(%arg0: i32) -> (i32, i32) {
    %c0_i32 = arith.constant 0 : i32
    %c0_i32_0 = arith.constant 0 : i32
    %c0_i32_1 = arith.constant 0 : i32
    return %c0_i32, %c0_i32_0 : i32, i32
  }
  func.func @transform_2(%arg0: i32) -> (i32, i32) {
    %c0_i32 = arith.constant 0 : i32
    %c0_i32_0 = arith.constant 0 : i32
    %c0_i32_1 = arith.constant 0 : i32
    return %c0_i32, %c0_i32_0 : i32, i32
  }
  func.func @transform_3(%arg0: i32) -> (i32, i32) {
    %c0_i32 = arith.constant 0 : i32
    %c0_i32_0 = arith.constant 0 : i32
    return %arg0, %c0_i32 : i32, i32
  }
}

</mosaic_0001>

<bundles_post_ra>
// kernel: tile.63
= control target key start
LH: loop header
LB: loop body
LE: loop exit
PB: predicated region body
PF: predicated region fallthrough
CT: control target
= control target key end

     0   :  { %s64_s0 = inlined_call_operand.vmem [shape: f32[8], index: 0, kind: input, shape index: {}]   ;;  %s65_s1 = inlined_call_operand.vmem [shape: f32[64,8], index: 1, kind: output, shape index: {}]  }
   0x1   :  { %v4_v0 = vld [vmem:[%s64_s0] ss:$0 sm:$0xff] }
   0x2   :  { %5 = vst [vmem:[%s65_s1] sm:$0xff] %v4_v0 }
   0x3   :  { %20 = vst [vmem:[%s65_s1 + $0x8] sm:$0xff] %v4_v0 }
   0x4   :  { %21 = vst [vmem:[%s65_s1 + $0x10] sm:$0xff] %v4_v0 }
   0x5   :  { %22 = vst [vmem:[%s65_s1 + $0x18] sm:$0xff] %v4_v0 }
   0x6   :  { %23 = vst [vmem:[%s65_s1 + $0x20] sm:$0xff] %v4_v0 }
   0x7   :  { %24 = vst [vmem:[%s65_s1 + $0x28] sm:$0xff] %v4_v0 }
   0x8   :  { %25 = vst [vmem:[%s65_s1 + $0x30] sm:$0xff] %v4_v0 }
   0x9   :  { %26 = vst [vmem:[%s65_s1 + $0x38] sm:$0xff] %v4_v0 }

// kernel: tile.64
= control target key start
LH: loop header
LB: loop body
LE: loop exit
PB: predicated region body
PF: predicated region fallthrough
CT: control target
= control target key end

     0   :  { %vm6_vm0 = vcmask 1043458   ;;  %s11_s6 = smov 3  ;;  %s14_s7 = smov 12  ;;  %vm8_vm1 = vcmask 64512   ;;  %vm20_vm2 = vcmask 1048512   ;;  %vm32_vm3 = vcmask 982912   ;;  %s411_s0 = inlined_call_operand.vmem [shape: f32[64,8], index: 0, kind: input, shape index: {}]   ;;  %s412_s1 = inlined_call_operand.vmem [shape: f32[1,512], index: 1, kind: output, shape index: {}]  }
   0x1   :  { %v214_v0 = vld [vmem:[%s411_s0 + $0xf] ss:$16 sm:%s11_s6]   ;;  %s35_s12 = smov 3  ;;  %s38_s15 = smov 12  ;;  %vm44_vm4 = vcmask 917312   ;;  %vm56_vm5 = vcmask 851712  }
   0x2   :  { %v215_v1 = vld [vmem:[%s411_s0 + $0xf] ss:$16 sm:%s14_s7]   ;;  %v218_v3 = vld [vmem:[%s411_s0 + $0xd] ss:$16 sm:%s35_s12]   ;;  %s262_s16 = smov 120   ;;  %s23_s19 = smov 3 }
   0x3   :  { %v17_v2 = vsel %vm6_vm0, %v215_v1, %v214_v0  ;;  %v219_v4 = vld [vmem:[%s411_s0 + $0xd] ss:$16 sm:%s38_s15]   ;;  %s26_s20 = smov 12  ;;  %v216_v6 = vld [vmem:[%s411_s0 + $0xe] ss:$16 sm:%s23_s19]   ;;  %s47_s23 = smov 3 }
   0x4   :  { %18 = vrot.lane.b32.xlu0 %v17_v2, %s262_s16  ;;  %v41_v5 = vsel %vm6_vm0, %v219_v4, %v218_v3  ;;  %s263_s24 = smov 104   ;;  %v217_v7 = vld [vmem:[%s411_s0 + $0xe] ss:$16 sm:%s26_s20]   ;;  %s50_s27 = smov 12  ;;  %vm68_vm6 = vcmask 786112   ;;  %vm80_vm7 = vcmask 720512  }
   0x5   :  { %42 = vrot.lane.b32.xlu1 %v41_v5, %s263_s24  ;;  %v220_v8 = vld [vmem:[%s411_s0 + $0xc] ss:$16 sm:%s47_s23]   ;;  %v29_v10 = vsel %vm6_vm0, %v217_v7, %v216_v6  ;;  %s83_s3 = smov 3  ;;  %s86_s4 = smov 12  ;;  %vm92_vm8 = vcmask 654912   ;;  %vm104_vm9 = vcmask 589312  }
   0x6   :  { %v221_v9 = vld [vmem:[%s411_s0 + $0xc] ss:$16 sm:%s50_s27]   ;;  %s264_s5 = smov 112   ;;  %s95_s6 = smov 3  ;;  %v226_v12 = vld [vmem:[%s411_s0 + $0x9] ss:$16 sm:%s83_s3]  }
   0x7   :  { %v53_v11 = vsel %vm6_vm0, %v221_v9, %v220_v8  ;;  %s98_s7 = smov 12  ;;  %v227_v13 = vld [vmem:[%s411_s0 + $0x9] ss:$16 sm:%s86_s4]   ;;  %s59_s12 = smov 3  ;;  %v228_v16 = vld [vmem:[%s411_s0 + $0x8] ss:$16 sm:%s95_s6]  }
   0x8   :  { %s62_s13 = smov 12  ;;  %s265_s14 = smov 96   ;;  %v222_v14 = vld [vmem:[%s411_s0 + $0xb] ss:$16 sm:%s59_s12]   ;;  %v229_v17 = vld [vmem:[%s411_s0 + $0x8] ss:$16 sm:%s98_s7]   ;;  %v89_v19 = vsel %vm6_vm0, %v227_v13, %v226_v12 }
   0x9   :  { %v223_v15 = vld [vmem:[%s411_s0 + $0xb] ss:$16 sm:%s62_s13]   ;;  %s266_s23 = smov 88   ;;  %s71_s24 = smov 3  ;;  %v101_v20 = vsel %vm6_vm0, %v229_v17, %v228_v16  ;;  %vm116_vm10 = vcmask 523712   ;;  %vm128_vm11 = vcmask 458112  }
   0xa   :  { %v65_v18 = vsel %vm6_vm0, %v223_v15, %v222_v14  ;;  %s119_s25 = smov 3  ;;  %s74_s26 = smov 12  ;;  %v224_v21 = vld [vmem:[%s411_s0 + $0xa] ss:$16 sm:%s71_s24]   ;;  %vm140_vm12 = vcmask 392512   ;;  %vm152_vm13 = vcmask 326912  }
   0xb   :  { %66 = vrot.lane.b32.xlu2 %v65_v18, %s266_s23  ;;  %s122_s27 = smov 12  ;;  %v225_v22 = vld [vmem:[%s411_s0 + $0xa] ss:$16 sm:%s74_s26]   ;;  %s267_s3 = smov 72   ;;  %vm164_vm14 = vcmask 261312   ;;  %vm176_vm15 = vcmask 195712  }
   0xc   :  { %30 = vrot.lane.b32.xlu0 %v29_v10, %s264_s5  ;;  %v232_v23 = vld [vmem:[%s411_s0 + $0x6] ss:$16 sm:%s119_s25]   ;;  %s131_s6 = smov 3  ;;  %s134_s7 = smov 12  ;;  %v77_v25 = vsel %vm6_vm0, %v225_v22, %v224_v21 }
   0xd   :  { %54 = vrot.lane.b32.xlu1 %v53_v11, %s265_s14  ;;  %s268_s8 = smov 64   ;;  %v233_v24 = vld [vmem:[%s411_s0 + $0x6] ss:$16 sm:%s122_s27]   ;;  %s107_s15 = smov 3 }
   0xe   :  { %v234_v26 = vld [vmem:[%s411_s0 + $0x5] ss:$16 sm:%s131_s6]   ;;  %s110_s16 = smov 12  ;;  %v125_v28 = vsel %vm6_vm0, %v233_v24, %v232_v23  ;;  %s269_s17 = smov 80   ;;  %v230_v30 = vld [vmem:[%s411_s0 + $0x7] ss:$16 sm:%s107_s15]  }
   0xf   :  { %v235_v27 = vld [vmem:[%s411_s0 + $0x5] ss:$16 sm:%s134_s7]   ;;  %s155_s18 = smov 3  ;;  %s158_s19 = smov 12  ;;  %v231_v31 = vld [vmem:[%s411_s0 + $0x7] ss:$16 sm:%s110_s16]  }
  0x10   :  { %v137_v29 = vsel %vm6_vm0, %v235_v27, %v234_v26  ;;  %s270_s24 = smov 48   ;;  %v238_v32 = vld [vmem:[%s411_s0 + $0x3] ss:$16 sm:%s155_s18]   ;;  %s167_s27 = smov 3  ;;  %v113_v34 = vsel %vm6_vm0, %v231_v31, %v230_v30 }
  0x11   :  { %s170_s28 = smov 12  ;;  %s271_s29 = smov 40   ;;  %v239_v33 = vld [vmem:[%s411_s0 + $0x3] ss:$16 sm:%s158_s19]   ;;  %v240_v35 = vld [vmem:[%s411_s0 + $0x2] ss:$16 sm:%s167_s27]  }
  0x12   :  { %v241_v36 = vld [vmem:[%s411_s0 + $0x2] ss:$16 sm:%s170_s28]   ;;  %s143_s7 = smov 3  ;;  %v161_v37 = vsel %vm6_vm0, %v239_v33, %v238_v32  ;;  %s272_s9 = smov 56  }
  0x13   :  { %78 = vrot.lane.b32.xlu2 %v77_v25, %s269_s17  ;;  %v173_v38 = vsel %vm6_vm0, %v241_v36, %v240_v35  ;;  %v236_v39 = vld [vmem:[%s411_s0 + $0x4] ss:$16 sm:%s143_s7]   ;;  %s273_s14 = smov 24   ;;  %s274_s15 = smov 16  }
  0x14   :  { %90 = vrot.lane.b32.xlu0 %v89_v19, %s267_s3  ;;  %s179_s16 = smov 3  ;;  %s182_s17 = smov 12 }
  0x15   :  { %102 = vrot.lane.b32.xlu1 %v101_v20, %s268_s8  ;;  %s146_s8 = smov 12  ;;  %s275_s18 = smov 32   ;;  %v242_v42 = vld [vmem:[%s411_s0 + $0x1] ss:$16 sm:%s179_s16]  }
  0x16   :  { %v237_v40 = vld [vmem:[%s411_s0 + $0x4] ss:$16 sm:%s146_s8]   ;;  %v243_v43 = vld [vmem:[%s411_s0 + $0x1] ss:$16 sm:%s182_s17]   ;;  %s276_s23 = smov 8   ;;  %s4_s25 = smov 12 }
  0x17   :  { %v149_v41 = vsel %vm6_vm0, %v237_v40, %v236_v39  ;;  %v185_v44 = vsel %vm6_vm0, %v243_v43, %v242_v42  ;;  %v5_v46 = vld [vmem:[%s411_s0] ss:$16 sm:%s4_s25]  }
  0x1b   :  { %114 = vrot.lane.b32.xlu2 %v113_v34, %s272_s9 }
  0x1c   :  { %126 = vrot.lane.b32.xlu0 %v125_v28, %s270_s24  ;;  %s2_s24 = smov 3 }
  0x1d   :  { %138 = vrot.lane.b32.xlu1 %v137_v29, %s271_s29  ;;  %v3_v45 = vld [vmem:[%s411_s0] ss:$16 sm:%s2_s24]  }
  0x1e   :  { %v7_v47 = vsel %vm6_vm0, %v5_v46, %v3_v45  ;;  %vm188_vm0 = vcmask 130112  }
  0x1f   :  { %9 = vst.msk [vmem:[#allocation0] ss:$8 sm:$0xf] %vm8_vm1, %v7_v47  }
  0x23   :  { %150 = vrot.lane.b32.xlu2 %v149_v41, %s275_s18 }
  0x24   :  { %162 = vrot.lane.b32.xlu0 %v161_v37, %s273_s14 }
  0x25   :  { %174 = vrot.lane.b32.xlu1 %v173_v38, %s274_s15 }
  0x2b   :  { %186 = vrot.lane.b32.xlu2 %v185_v44, %s276_s23 }
  0x65   :  { %v67_v48 = vpop.permute.xlu2 %66  }
  0x6d   :  { %v79_v49 = vpop.permute.xlu2 %78  }
  0x75   :  { %v115_v52 = vpop.permute.xlu2 %114  }
  0x76   :  { %v19_v50 = vpop.permute.xlu0 %18  }
  0x77   :  { %21 = vst.msk [vmem:[#allocation0] ss:$8 sm:$0xf] %vm20_vm2, %v19_v50   ;;  %v43_v51 = vpop.permute.xlu1 %42  }
  0x7d   :  { %v151_v55 = vpop.permute.xlu2 %150  }
  0x7e   :  { %v31_v53 = vpop.permute.xlu0 %30  }
  0x7f   :  { %33 = vst.msk [vmem:[#allocation0] ss:$8 sm:$0xf] %vm32_vm3, %v31_v53   ;;  %v55_v54 = vpop.permute.xlu1 %54  }
  0x80   :  { %45 = vst.msk [vmem:[#allocation0] ss:$8 sm:$0xf] %vm44_vm4, %v43_v51  }
  0x81   :  { %57 = vst.msk [vmem:[#allocation0] ss:$8 sm:$0xf] %vm56_vm5, %v55_v54  }
  0x82   :  { %69 = vst.msk [vmem:[#allocation0] ss:$8 sm:$0xf] %vm68_vm6, %v67_v48  }
  0x83   :  { %81 = vst.msk [vmem:[#allocation0] ss:$8 sm:$0xf] %vm80_vm7, %v79_v49  }
  0x85   :  { %v187_v58 = vpop.permute.xlu2 %186  }
  0x86   :  { %v91_v56 = vpop.permute.xlu0 %90  }
  0x87   :  { %93 = vst.msk [vmem:[#allocation0] ss:$8 sm:$0xf] %vm92_vm8, %v91_v56   ;;  %v103_v57 = vpop.permute.xlu1 %102  }
  0x88   :  { %105 = vst.msk [vmem:[#allocation0] ss:$8 sm:$0xf] %vm104_vm9, %v103_v57  }
  0x89   :  { %117 = vst.msk [vmem:[#allocation0] ss:$8 sm:$0xf] %vm116_vm10, %v115_v52  }
  0x8e   :  { %v127_v59 = vpop.permute.xlu0 %126  }
  0x8f   :  { %129 = vst.msk [vmem:[#allocation0] ss:$8 sm:$0xf] %vm128_vm11, %v127_v59   ;;  %v139_v60 = vpop.permute.xlu1 %138  }
  0x90   :  { %141 = vst.msk [vmem:[#allocation0] ss:$8 sm:$0xf] %vm140_vm12, %v139_v60  }
  0x91   :  { %153 = vst.msk [vmem:[#allocation0] ss:$8 sm:$0xf] %vm152_vm13, %v151_v55  }
  0x96   :  { %v163_v61 = vpop.permute.xlu0 %162  }
  0x97   :  { %165 = vst.msk [vmem:[#allocation0] ss:$8 sm:$0xf] %vm164_vm14, %v163_v61   ;;  %v175_v62 = vpop.permute.xlu1 %174  }
  0x98   :  { %177 = vst.msk [vmem:[#allocation0] ss:$8 sm:$0xf] %vm176_vm15, %v175_v62  }
  0x99   :  { %189 = vst.msk [vmem:[#allocation0] ss:$8 sm:$0xf] %vm188_vm0, %v187_v58  }
  0xa0   :  { %v192_v63 = vld [vmem:[#allocation0] sm:$0x1]  ;;  %v197_v0 = vld [vmem:[#allocation0 + $0x8] sm:$0x1]  ;;  %v203_v1 = vld [vmem:[#allocation0 + $0x10] sm:$0x1] }
  0xa1   :  { %195 = vst [vmem:[%s412_s1] sm:$0x1] %v192_v63  ;;  %v209_v2 = vld [vmem:[#allocation0 + $0x18] sm:$0x1] }
  0xa2   :  { %244 = vst [vmem:[%s412_s1 + $0x1] sm:$0x1] %v197_v0 }
  0xa3   :  { %245 = vst [vmem:[%s412_s1 + $0x2] sm:$0x1] %v203_v1 }
  0xa4   :  { %246 = vst [vmem:[%s412_s1 + $0x3] sm:$0x1] %v209_v2 }

// kernel: squeeze.100
= control target key start
LH: loop header
LB: loop body
LE: loop exit
PB: predicated region body
PF: predicated region fallthrough
CT: control target
= control target key end

     0   :  { %s534_s7 = smov 24  ;;  %vm527_vm0 = vcmask 1041409   ;;  %vm531_vm1 = vcmask 1042434   ;;  %vm536_vm2 = vcmask 1044483   ;;  %vm540_vm3 = vcmask 1045509   ;;  %s1804_s10 = smov 24  ;;  %s2101_s0 = inlined_call_operand.vmem [shape: bf16[1,256,8], index: 0, kind: input, shape index: {}]   ;;  %s2102_s1 = inlined_call_operand.vmem [shape: bf16[4,512], index: 1, kind: output, shape index: {}]  }
   0x1   :  { %v1712_v0 = vld [vmem:[%s2101_s0 + $0x68] sm:$0xff]   ;;  %v1717_v1 = vld [vmem:[%s2101_s0 + $0x60] sm:$0xff]   ;;  %v1758_v14 = vld [vmem:[%s2101_s0 + $0x78] sm:$0xff]   ;;  %vm544_vm4 = vcmask 1046534   ;;  %vm548_vm5 = vcmask 1047559   ;;  %s1807_s11 = smov 24 }
   0x2   :  { %v1722_v2 = vld [vmem:[%s2101_s0 + $0x48] sm:$0xff]   ;;  %v1601_v3 = vunpack.c.h.bf16 %v1712_v0  ;;  %v1605_v4 = vunpack.c.h.bf16 %v1717_v1  ;;  %v1730_v6 = vld [vmem:[%s2101_s0 + $0x40] sm:$0xff]   ;;  %v1764_v16 = vld [vmem:[%s2101_s0 + $0x70] sm:$0xff]   ;;  %v1593_v19 = vunpack.c.h.bf16 %v1758_v14  ;;  %s1809_s12 = smov 24  ;;  %s1811_s13 = smov 24  ;;  %v1600_v0 = vunpack.c.l.bf16 %v1712_v0 }
   0x3   :  { %v1617_v5 = vunpack.c.h.bf16 %v1722_v2  ;;  %v1735_v7 = vld [vmem:[%s2101_s0 + $0x28] sm:$0xff]   ;;  %v1740_v8 = vld [vmem:[%s2101_s0 + $0x20] sm:$0xff]   ;;  %v1621_v9 = vunpack.c.h.bf16 %v1730_v6  ;;  %v1770_v18 = vld [vmem:[%s2101_s0 + $0x58] sm:$0xff]   ;;  %v1597_v21 = vunpack.c.h.bf16 %v1764_v16  ;;  %s1819_s14 = smov 24  ;;  %s1821_s15 = smov 24  ;;  %v1604_v1 = vunpack.c.l.bf16 %v1717_v1 }
   0x4   :  { %v1746_v10 = vld [vmem:[%s2101_s0 + $0x8] sm:$0xff]   ;;  %78 = vst [vmem:[#allocation1 + $0xd8] sm:$0xff] %v1601_v3  ;;  %v1633_v11 = vunpack.c.h.bf16 %v1735_v7  ;;  %v1752_v12 = vld [vmem:[%s2101_s0] sm:$0xff]   ;;  %v1637_v13 = vunpack.c.h.bf16 %v1740_v8  ;;  %v1776_v20 = vld [vmem:[%s2101_s0 + $0x50] sm:$0xff]   ;;  %v1609_v23 = vunpack.c.h.bf16 %v1770_v18  ;;  %s1825_s16 = smov 24  ;;  %s1684_s17 = smov 120   ;;  %v1616_v2 = vunpack.c.l.bf16 %v1722_v2 }
   0x5   :  { %108 = vst [vmem:[#allocation1 + $0xc8] sm:$0xff] %v1605_v4  ;;  %v1649_v15 = vunpack.c.h.bf16 %v1746_v10  ;;  %v1653_v17 = vunpack.c.h.bf16 %v1752_v12  ;;  %v1782_v22 = vld [vmem:[%s2101_s0 + $0x38] sm:$0xff]   ;;  %v1788_v24 = vld [vmem:[%s2101_s0 + $0x30] sm:$0xff]   ;;  %v1613_v25 = vunpack.c.h.bf16 %v1776_v20  ;;  %s1685_s18 = smov 112   ;;  %s1851_s19 = smov 24  ;;  %v1620_v6 = vunpack.c.l.bf16 %v1730_v6 }
   0x6   :  { %198 = vst [vmem:[#allocation1 + $0x98] sm:$0xff] %v1617_v5  ;;  %v1794_v26 = vld [vmem:[%s2101_s0 + $0x18] sm:$0xff]   ;;  %v1625_v27 = vunpack.c.h.bf16 %v1782_v22  ;;  %v1800_v28 = vld [vmem:[%s2101_s0 + $0x10] sm:$0xff]   ;;  %s601_s0 = smov 24  ;;  %v1629_v29 = vunpack.c.h.bf16 %v1788_v24  ;;  %s1874_s20 = smov 24  ;;  %v1632_v7 = vunpack.c.l.bf16 %v1735_v7  ;;  %v1636_v8 = vunpack.c.l.bf16 %v1740_v8 }
   0x7   :  { %228 = vst [vmem:[#allocation1 + $0x88] sm:$0xff] %v1621_v9  ;;  %v1641_v30 = vunpack.c.h.bf16 %v1794_v26  ;;  %v1645_v33 = vunpack.c.h.bf16 %v1800_v28  ;;  %s1876_s21 = smov 24  ;;  %s1686_s22 = smov 104   ;;  %v1648_v10 = vunpack.c.l.bf16 %v1746_v10  ;;  %v1652_v12 = vunpack.c.l.bf16 %v1752_v12 }
   0x8   :  { %318 = vst [vmem:[#allocation1 + $0x58] sm:$0xff] %v1633_v11  ;;  %s1687_s23 = smov 96   ;;  %s802_s24 = smov 24  ;;  %v1592_v14 = vunpack.c.l.bf16 %v1758_v14  ;;  %v1596_v16 = vunpack.c.l.bf16 %v1764_v16  ;;  %v1608_v18 = vunpack.c.l.bf16 %v1770_v18  ;;  %v1612_v20 = vunpack.c.l.bf16 %v1776_v20 }
   0x9   :  { %348 = vst [vmem:[#allocation1 + $0x48] sm:$0xff] %v1637_v13  ;;  %s1893_s25 = smov 24  ;;  %s1036_s26 = smov 24  ;;  %v1624_v22 = vunpack.c.l.bf16 %v1782_v22  ;;  %v1628_v24 = vunpack.c.l.bf16 %v1788_v24  ;;  %v1640_v26 = vunpack.c.l.bf16 %v1794_v26  ;;  %v1644_v28 = vunpack.c.l.bf16 %v1800_v28 }
   0xa   :  { %438 = vst [vmem:[#allocation1 + $0x18] sm:$0xff] %v1649_v15  ;;  %s1688_s27 = smov 88   ;;  %s1689_s28 = smov 80   ;;  %vm486_vm6 = vcmask 1043458   ;;  %vm490_vm7 = vcmask 1045508   ;;  %vm494_vm8 = vcmask 1047558  }
   0xb   :  { %468 = vst [vmem:[#allocation1 + $0x8] sm:$0xff] %v1653_v17  ;;  %v547_v51 = vld [vmem:[#allocation1 + $0xd8] sm:$0x80]   ;;  %v614_v53 = vld [vmem:[#allocation1 + $0xd7] sm:$0x80]   ;;  %s1003_s29 = smov 24 }
   0xc   :  { %18 = vst [vmem:[#allocation1 + $0xf8] sm:$0xff] %v1593_v19  ;;  %s1070_s30 = smov 24  ;;  %s1690_s2 = smov 72   ;;  %vm496_vm9 = vcmask 64512   ;;  %vm552_vm10 = vcmask 1048512   ;;  %vm619_vm11 = vcmask 982912  }
   0xd   :  { %48 = vst [vmem:[#allocation1 + $0xe8] sm:$0xff] %v1597_v21  ;;  %v543_v39 = vld [vmem:[#allocation1 + $0x99] sm:$0x40]   ;;  %v610_v47 = vld [vmem:[#allocation1 + $0x98] sm:$0x40]   ;;  %s1137_s3 = smov 24 }
   0xe   :  { %138 = vst [vmem:[#allocation1 + $0xb8] sm:$0xff] %v1609_v23  ;;  %v530_v31 = vld [vmem:[#allocation1 + $0x8d] sm:$0x4]   ;;  %v597_v32 = vld [vmem:[#allocation1 + $0x8c] sm:$0x4]   ;;  %s1953_s4 = smov 24 }
   0xf   :  { %168 = vst [vmem:[#allocation1 + $0xa8] sm:$0xff] %v1613_v25  ;;  %v539_v42 = vld [vmem:[#allocation1 + $0x5a] sm:$0x20]   ;;  %v606_v44 = vld [vmem:[#allocation1 + $0x59] sm:$0x20]   ;;  %s1957_s5 = smov 24 }
  0x10   :  { %v526_v34 = vld [vmem:[#allocation1 + $0x4e] sm:$0x2]   ;;  %v593_v35 = vld [vmem:[#allocation1 + $0x4d] sm:$0x2]   ;;  %258 = vst [vmem:[#allocation1 + $0x78] sm:$0xff] %v1625_v27  ;;  %s1963_s6 = smov 24 }
  0x11   :  { %v535_v36 = vld [vmem:[#allocation1 + $0x2df] ss:$-176 sm:%s534_s7]   ;;  %v602_v37 = vld [vmem:[#allocation1 + $0x2de] ss:$-176 sm:%s601_s0]   ;;  %288 = vst [vmem:[#allocation1 + $0x68] sm:$0xff] %v1629_v29  ;;  %s1970_s7 = smov 24 }
  0x12   :  { %v524_v38 = vld [vmem:[#allocation1 + $0xf] sm:$0x1]   ;;  %v591_v40 = vld [vmem:[#allocation1 + $0xe] sm:$0x1]   ;;  %378 = vst [vmem:[#allocation1 + $0x38] sm:$0xff] %v1641_v30  ;;  %s1691_s8 = smov 64  }
  0x13   :  { %v528_v41 = vsel %vm527_vm0, %v526_v34, %v524_v38  ;;  %v595_v43 = vsel %vm527_vm0, %v593_v35, %v591_v40  ;;  %408 = vst [vmem:[#allocation1 + $0x28] sm:$0xff] %v1645_v33  ;;  %v725_v48 = vld [vmem:[#allocation1 + $0xc] sm:$0x1]   ;;  %v580_v30 = vld [vmem:[#allocation1 + $0xf8] sm:$0x80]   ;;  %s1976_s9 = smov 24 }
  0x14   :  { %v532_v45 = vsel %vm531_vm1, %v530_v31, %v528_v41  ;;  %v599_v46 = vsel %vm531_vm1, %v597_v32, %v595_v43  ;;  %v727_v49 = vld [vmem:[#allocation1 + $0x4b] sm:$0x2]   ;;  %v647_v43 = vld [vmem:[#allocation1 + $0xf7] sm:$0x80]   ;;  %93 = vst [vmem:[#allocation1 + $0xd0] sm:$0xff] %v1600_v0  ;;  %s1978_s0 = smov 24 }
  0x15   :  { %v537_v50 = vsel %vm536_vm2, %v535_v36, %v532_v45  ;;  %v604_v52 = vsel %vm536_vm2, %v602_v37, %v599_v46  ;;  %v729_v60 = vsel %vm527_vm0, %v727_v49, %v725_v48  ;;  %v731_v61 = vld [vmem:[#allocation1 + $0x8a] sm:$0x4]   ;;  %v576_v19 = vld [vmem:[#allocation1 + $0xb9] sm:$0x40]   ;;  %v643_v37 = vld [vmem:[#allocation1 + $0xb8] sm:$0x40]  }
  0x16   :  { %v541_v54 = vsel %vm540_vm3, %v539_v42, %v537_v50  ;;  %v608_v55 = vsel %vm540_vm3, %v606_v44, %v604_v52  ;;  %v563_v58 = vld [vmem:[#allocation1 + $0xad] sm:$0x4]   ;;  %v630_v59 = vld [vmem:[#allocation1 + $0xac] sm:$0x4]   ;;  %v736_v5 = vld [vmem:[#allocation1 + $0x2dc] ss:$-176 sm:%s1809_s12]   ;;  %v733_v23 = vsel %vm531_vm1, %v731_v61, %v729_v60 }
  0x17   :  { %v545_v56 = vsel %vm544_vm4, %v543_v39, %v541_v54  ;;  %v612_v57 = vsel %vm544_vm4, %v610_v47, %v608_v55  ;;  %v764_v15 = vld [vmem:[#allocation1 + $0xaa] sm:$0x4]   ;;  %v572_v29 = vld [vmem:[#allocation1 + $0x7a] sm:$0x20]   ;;  %v639_v32 = vld [vmem:[#allocation1 + $0x79] sm:$0x20]   ;;  %v738_v44 = vsel %vm536_vm2, %v736_v5, %v733_v23 }
  0x18   :  { %v549_v62 = vsel %vm548_vm5, %v547_v51, %v545_v56  ;;  %v616_v63 = vsel %vm548_vm5, %v614_v53, %v612_v57  ;;  %v559_v3 = vld [vmem:[#allocation1 + $0x6e] sm:$0x2]   ;;  %v626_v4 = vld [vmem:[#allocation1 + $0x6d] sm:$0x2]   ;;  %v760_v9 = vld [vmem:[#allocation1 + $0x6b] sm:$0x2]  }
  0x19   :  { %550 = vrot.lane.b32.xlu0 %v549_v62, %s1684_s17  ;;  %617 = vrot.lane.b32.xlu1 %v616_v63, %s1685_s18  ;;  %v568_v11 = vld [vmem:[#allocation1 + $0x2ff] ss:$-176 sm:%s1804_s10]   ;;  %v635_v13 = vld [vmem:[#allocation1 + $0x2fe] ss:$-176 sm:%s1807_s11]   ;;  %v827_v40 = vld [vmem:[#allocation1 + $0x6a] sm:$0x2]  }
  0x1a   :  { %v557_v17 = vld [vmem:[#allocation1 + $0x2f] sm:$0x1]   ;;  %v624_v21 = vld [vmem:[#allocation1 + $0x2e] sm:$0x1]   ;;  %v758_v25 = vld [vmem:[#allocation1 + $0x2c] sm:$0x1]  }
  0x1b   :  { %v561_v27 = vsel %vm527_vm0, %v559_v3, %v557_v17  ;;  %v628_v31 = vsel %vm527_vm0, %v626_v4, %v624_v21  ;;  %v762_v33 = vsel %vm527_vm0, %v760_v9, %v758_v25  ;;  %v769_v34 = vld [vmem:[#allocation1 + $0x2fc] ss:$-176 sm:%s1811_s13]   ;;  %v825_v39 = vld [vmem:[#allocation1 + $0x2b] sm:$0x1]   ;;  %v658_v51 = vld [vmem:[#allocation1 + $0xd] sm:$0x1]  }
  0x1c   :  { %v565_v35 = vsel %vm531_vm1, %v563_v58, %v561_v27  ;;  %v632_v36 = vsel %vm531_vm1, %v630_v59, %v628_v31  ;;  %v766_v38 = vsel %vm531_vm1, %v764_v15, %v762_v33  ;;  %v740_v45 = vld [vmem:[#allocation1 + $0x57] sm:$0x20]   ;;  %v829_v54 = vsel %vm527_vm0, %v827_v40, %v825_v39  ;;  %v831_v55 = vld [vmem:[#allocation1 + $0xa9] sm:$0x4]   ;;  %v660_v56 = vld [vmem:[#allocation1 + $0x4c] sm:$0x2]  }
  0x1d   :  { %v570_v41 = vsel %vm536_vm2, %v568_v11, %v565_v35  ;;  %v637_v42 = vsel %vm536_vm2, %v635_v13, %v632_v36  ;;  %v771_v46 = vsel %vm536_vm2, %v769_v34, %v766_v38  ;;  %v773_v47 = vld [vmem:[#allocation1 + $0x77] sm:$0x20]   ;;  %v664_v57 = vld [vmem:[#allocation1 + $0x8b] sm:$0x4]   ;;  %v742_v60 = vsel %vm540_vm3, %v740_v45, %v738_v44  ;;  %v673_v3 = vld [vmem:[#allocation1 + $0x58] sm:$0x20]  }
  0x1e   :  { %v574_v48 = vsel %vm540_vm3, %v572_v29, %v570_v41  ;;  %v641_v49 = vsel %vm540_vm3, %v639_v32, %v637_v42  ;;  %v744_v50 = vld [vmem:[#allocation1 + $0x96] sm:$0x40]   ;;  %v775_v61 = vsel %vm540_vm3, %v773_v47, %v771_v46  ;;  %v669_v63 = vld [vmem:[#allocation1 + $0x2dd] ss:$-176 sm:%s1821_s15]   ;;  %v662_v4 = vsel %vm527_vm0, %v660_v56, %v658_v51  ;;  %v859_v5 = vld [vmem:[#allocation1 + $0xa] sm:$0x1]  }
  0x1f   :  { %v578_v52 = vsel %vm544_vm4, %v576_v19, %v574_v48  ;;  %v645_v53 = vsel %vm544_vm4, %v643_v37, %v641_v49  ;;  %v777_v62 = vld [vmem:[#allocation1 + $0xb6] sm:$0x40]   ;;  %v861_v9 = vld [vmem:[#allocation1 + $0x49] sm:$0x2]   ;;  %v833_v13 = vsel %vm531_vm1, %v831_v55, %v829_v54  ;;  %v836_v15 = vld [vmem:[#allocation1 + $0x2fb] ss:$-176 sm:%s1819_s14]   ;;  %v666_v17 = vsel %vm531_vm1, %v664_v57, %v662_v4 }
  0x20   :  { %v582_v58 = vsel %vm548_vm5, %v580_v30, %v578_v52  ;;  %v649_v59 = vsel %vm548_vm5, %v647_v43, %v645_v53  ;;  %v865_v11 = vld [vmem:[#allocation1 + $0x88] sm:$0x4]   ;;  %v677_v19 = vld [vmem:[#allocation1 + $0x97] sm:$0x40]   ;;  %v863_v21 = vsel %vm527_vm0, %v861_v9, %v859_v5  ;;  %v746_v25 = vsel %vm544_vm4, %v744_v50, %v742_v60  ;;  %v748_v27 = vld [vmem:[#allocation1 + $0xd5] sm:$0x80]  }
  0x21   :  { %583 = vrot.lane.b32.xlu0 %v582_v58, %s1684_s17  ;;  %650 = vrot.lane.b32.xlu1 %v649_v59, %s1685_s18  ;;  %v870_v23 = vld [vmem:[#allocation1 + $0x2da] ss:$-176 sm:%s1825_s16]   ;;  %v779_v29 = vsel %vm544_vm4, %v777_v62, %v775_v61  ;;  %v781_v30 = vld [vmem:[#allocation1 + $0xf5] sm:$0x80]   ;;  %v671_v31 = vsel %vm536_vm2, %v669_v63, %v666_v17  ;;  %v681_v32 = vld [vmem:[#allocation1 + $0xd6] sm:$0x80]   ;;  %v867_v33 = vsel %vm531_vm1, %v865_v11, %v863_v21 }
  0x22   :  { %v675_v34 = vsel %vm540_vm3, %v673_v3, %v671_v31  ;;  %v926_v35 = vld [vmem:[#allocation1 + $0x9] sm:$0x1]   ;;  %v838_v37 = vsel %vm536_vm2, %v836_v15, %v833_v13  ;;  %v840_v38 = vld [vmem:[#allocation1 + $0x76] sm:$0x20]   ;;  %v872_v40 = vsel %vm536_vm2, %v870_v23, %v867_v33  ;;  %v874_v41 = vld [vmem:[#allocation1 + $0x55] sm:$0x20]   ;;  %v750_v43 = vsel %vm548_vm5, %v748_v27, %v746_v25 }
  0x23   :  { %v928_v36 = vld [vmem:[#allocation1 + $0x48] sm:$0x2]   ;;  %v679_v39 = vsel %vm544_vm4, %v677_v19, %v675_v34  ;;  %v691_v42 = vld [vmem:[#allocation1 + $0x2d] sm:$0x1]   ;;  %v783_v44 = vsel %vm548_vm5, %v781_v30, %v779_v29  ;;  %v844_v45 = vld [vmem:[#allocation1 + $0xb5] sm:$0x40]   ;;  %v842_v56 = vsel %vm540_vm3, %v840_v38, %v838_v37  ;;  %v876_v57 = vsel %vm540_vm3, %v874_v41, %v872_v40 }
  0x24   :  { %v683_v46 = vsel %vm548_vm5, %v681_v32, %v679_v39  ;;  %v878_v47 = vld [vmem:[#allocation1 + $0x94] sm:$0x40]   ;;  %v693_v48 = vld [vmem:[#allocation1 + $0x6c] sm:$0x2]   ;;  %v930_v51 = vsel %vm527_vm0, %v928_v36, %v926_v35  ;;  %v932_v52 = vld [vmem:[#allocation1 + $0x87] sm:$0x4]   ;;  %v846_v17 = vsel %vm544_vm4, %v844_v45, %v842_v56 }
  0x25   :  { %v697_v49 = vld [vmem:[#allocation1 + $0xab] sm:$0x4]   ;;  %684 = vrot.lane.b32.xlu2 %v683_v46, %s1686_s22  ;;  %v695_v53 = vsel %vm527_vm0, %v693_v48, %v691_v42  ;;  %v706_v54 = vld [vmem:[#allocation1 + $0x78] sm:$0x20]   ;;  %v959_v59 = vld [vmem:[#allocation1 + $0x29] sm:$0x1]   ;;  %v934_v5 = vsel %vm531_vm1, %v932_v52, %v930_v51  ;;  %v880_v19 = vsel %vm544_vm4, %v878_v47, %v876_v57 }
  0x26   :  { %v702_v50 = vld [vmem:[#allocation1 + $0x2fd] ss:$-176 sm:%s1851_s19]   ;;  %v699_v58 = vsel %vm531_vm1, %v697_v49, %v695_v53  ;;  %v961_v60 = vld [vmem:[#allocation1 + $0x68] sm:$0x2]   ;;  %v848_v4 = vld [vmem:[#allocation1 + $0xf4] sm:$0x80]  }
  0x27   :  { %v710_v55 = vld [vmem:[#allocation1 + $0xb7] sm:$0x40]   ;;  %v965_v61 = vld [vmem:[#allocation1 + $0xa7] sm:$0x4]   ;;  %v704_v62 = vsel %vm536_vm2, %v702_v50, %v699_v58  ;;  %v963_v3 = vsel %vm527_vm0, %v961_v60, %v959_v59  ;;  %v882_v21 = vld [vmem:[#allocation1 + $0xd3] sm:$0x80]   ;;  %v850_v38 = vsel %vm548_vm5, %v848_v4, %v846_v17 }
  0x28   :  { %v714_v63 = vld [vmem:[#allocation1 + $0xf6] sm:$0x80]   ;;  %v937_v9 = vld [vmem:[#allocation1 + $0x2d9] ss:$-176 sm:%s1874_s20]   ;;  %v708_v11 = vsel %vm540_vm3, %v706_v54, %v704_v62  ;;  %v967_v13 = vsel %vm531_vm1, %v965_v61, %v963_v3  ;;  %v1026_v30 = vld [vmem:[#allocation1 + $0x28] sm:$0x1]   ;;  %v884_v39 = vsel %vm548_vm5, %v882_v21, %v880_v19 }
  0x29   :  { %751 = vrot.lane.b32.xlu0 %v750_v43, %s1687_s23  ;;  %784 = vrot.lane.b32.xlu1 %v783_v44, %s1687_s23  ;;  %v970_v15 = vld [vmem:[#allocation1 + $0x2f9] ss:$-176 sm:%s1876_s21]   ;;  %v712_v25 = vsel %vm544_vm4, %v710_v55, %v708_v11  ;;  %v1028_v31 = vld [vmem:[#allocation1 + $0x67] sm:$0x2]   ;;  %v792_v32 = vld [vmem:[#allocation1 + $0xb] sm:$0x1]   ;;  %v939_v33 = vsel %vm536_vm2, %v937_v9, %v934_v5 }
  0x2a   :  { %v941_v23 = vld [vmem:[#allocation1 + $0x54] sm:$0x20]   ;;  %v716_v29 = vsel %vm548_vm5, %v714_v63, %v712_v25  ;;  %v972_v34 = vsel %vm536_vm2, %v970_v15, %v967_v13  ;;  %v794_v35 = vld [vmem:[#allocation1 + $0x4a] sm:$0x2]   ;;  %v1032_v42 = vld [vmem:[#allocation1 + $0xa6] sm:$0x4]   ;;  %v1030_v46 = vsel %vm527_vm0, %v1028_v31, %v1026_v30 }
  0x2b   :  { %v974_v27 = vld [vmem:[#allocation1 + $0x74] sm:$0x20]   ;;  %v798_v36 = vld [vmem:[#allocation1 + $0x89] sm:$0x4]   ;;  %v796_v43 = vsel %vm527_vm0, %v794_v35, %v792_v32  ;;  %v807_v44 = vld [vmem:[#allocation1 + $0x56] sm:$0x20]   ;;  %v943_v50 = vsel %vm540_vm3, %v941_v23, %v939_v33  ;;  %v1034_v61 = vsel %vm531_vm1, %v1032_v42, %v1030_v46 }
  0x2c   :  { %v803_v37 = vld [vmem:[#allocation1 + $0x2db] ss:$-176 sm:%s802_s24]   ;;  %v945_v40 = vld [vmem:[#allocation1 + $0x93] sm:$0x40]   ;;  %v800_v47 = vsel %vm531_vm1, %v798_v36, %v796_v43  ;;  %v892_v48 = vld [vmem:[#allocation1 + $0x2a] sm:$0x1]   ;;  %v976_v51 = vsel %vm540_vm3, %v974_v27, %v972_v34 }
  0x2d   :  { %v978_v41 = vld [vmem:[#allocation1 + $0xb3] sm:$0x40]   ;;  %v811_v45 = vld [vmem:[#allocation1 + $0x95] sm:$0x40]   ;;  %717 = vrot.lane.b32.xlu2 %v716_v29, %s1686_s22  ;;  %v894_v49 = vld [vmem:[#allocation1 + $0x69] sm:$0x2]   ;;  %v805_v52 = vsel %vm536_vm2, %v803_v37, %v800_v47  ;;  %v947_v4 = vsel %vm544_vm4, %v945_v40, %v943_v50 }
  0x2e   :  { %123 = vst [vmem:[#allocation1 + $0xc0] sm:$0xff] %v1604_v1  ;;  %v896_v53 = vsel %vm527_vm0, %v894_v49, %v892_v48  ;;  %v898_v54 = vld [vmem:[#allocation1 + $0xa8] sm:$0x4]   ;;  %v949_v56 = vld [vmem:[#allocation1 + $0xd2] sm:$0x80]   ;;  %v809_v58 = vsel %vm540_vm3, %v807_v44, %v805_v52  ;;  %v980_v5 = vsel %vm544_vm4, %v978_v41, %v976_v51  ;;  %s1982_s10 = smov 24 }
  0x2f   :  { %v903_v55 = vld [vmem:[#allocation1 + $0x2fa] ss:$-176 sm:%s1893_s25]   ;;  %v982_v57 = vld [vmem:[#allocation1 + $0xf2] sm:$0x80]   ;;  %v815_v59 = vld [vmem:[#allocation1 + $0xd4] sm:$0x80]   ;;  %v900_v60 = vsel %vm531_vm1, %v898_v54, %v896_v53  ;;  %v813_v63 = vsel %vm544_vm4, %v811_v45, %v809_v58  ;;  %v951_v25 = vsel %vm548_vm5, %v949_v56, %v947_v4 }
  0x30   :  { %213 = vst [vmem:[#allocation1 + $0x90] sm:$0xff] %v1616_v2  ;;  %v1037_v62 = vld [vmem:[#allocation1 + $0x2f8] ss:$-176 sm:%s1036_s26]   ;;  %v905_v9 = vsel %vm536_vm2, %v903_v55, %v900_v60  ;;  %v907_v11 = vld [vmem:[#allocation1 + $0x75] sm:$0x20]   ;;  %v817_v15 = vsel %vm548_vm5, %v815_v59, %v813_v63  ;;  %v984_v27 = vsel %vm548_vm5, %v982_v57, %v980_v5  ;;  %s1984_s11 = smov 24 }
  0x31   :  { %851 = vrot.lane.b32.xlu0 %v850_v38, %s1688_s27  ;;  %885 = vrot.lane.b32.xlu1 %v884_v39, %s1689_s28  ;;  %243 = vst [vmem:[#allocation1 + $0x80] sm:$0xff] %v1620_v6  ;;  %v993_v3 = vld [vmem:[#allocation1 + $0x8] sm:$0x1]   ;;  %v1039_v17 = vsel %vm536_vm2, %v1037_v62, %v1034_v61  ;;  %v1041_v19 = vld [vmem:[#allocation1 + $0x73] sm:$0x20]   ;;  %v909_v0 = vsel %vm540_vm3, %v907_v11, %v905_v9  ;;  %s1692_s12 = smov 56  }
  0x32   :  { %333 = vst [vmem:[#allocation1 + $0x50] sm:$0xff] %v1632_v7  ;;  %v995_v13 = vld [vmem:[#allocation1 + $0x47] sm:$0x2]   ;;  %v911_v29 = vld [vmem:[#allocation1 + $0xb4] sm:$0x40]   ;;  %v1043_v30 = vsel %vm540_vm3, %v1041_v19, %v1039_v17  ;;  %s1693_s13 = smov 48  }
  0x33   :  { %363 = vst [vmem:[#allocation1 + $0x40] sm:$0xff] %v1636_v8  ;;  %v997_v21 = vsel %vm527_vm0, %v995_v13, %v993_v3  ;;  %v999_v23 = vld [vmem:[#allocation1 + $0x86] sm:$0x4]   ;;  %v1045_v31 = vld [vmem:[#allocation1 + $0xb2] sm:$0x40]   ;;  %v913_v34 = vsel %vm544_vm4, %v911_v29, %v909_v0  ;;  %s1204_s14 = smov 24 }
  0x34   :  { %453 = vst [vmem:[#allocation1 + $0x10] sm:$0xff] %v1648_v10  ;;  %v1001_v32 = vsel %vm531_vm1, %v999_v23, %v997_v21  ;;  %v1004_v1 = vld [vmem:[#allocation1 + $0x2d8] ss:$-176 sm:%s1003_s29]   ;;  %v915_v35 = vld [vmem:[#allocation1 + $0xf3] sm:$0x80]   ;;  %v1047_v38 = vsel %vm544_vm4, %v1045_v31, %v1043_v30  ;;  %s2023_s15 = smov 24 }
  0x35   :  { %481 = vst [vmem:[#allocation1] sm:$0xff] %v1652_v12  ;;  %818 = vrot.lane.b32.xlu2 %v817_v15, %s1688_s27  ;;  %v1049_v33 = vld [vmem:[#allocation1 + $0xf1] sm:$0x80]   ;;  %v1006_v41 = vsel %vm536_vm2, %v1004_v1, %v1001_v32  ;;  %v917_v44 = vsel %vm548_vm5, %v915_v35, %v913_v34  ;;  %v1083_v57 = vld [vmem:[#allocation1 + $0xd0] sm:$0x80]   ;;  %s1694_s16 = smov 40  }
  0x36   :  { %33 = vst [vmem:[#allocation1 + $0xf0] sm:$0xff] %v1592_v14  ;;  %v1008_v36 = vld [vmem:[#allocation1 + $0x53] sm:$0x20]   ;;  %v1051_v47 = vsel %vm548_vm5, %v1049_v33, %v1047_v38  ;;  %v1150_v61 = vld [vmem:[#allocation1 + $0xcf] sm:$0x80]   ;;  %s1695_s17 = smov 32  }
  0x37   :  { %63 = vst [vmem:[#allocation1 + $0xe0] sm:$0xff] %v1596_v16  ;;  %v1012_v45 = vld [vmem:[#allocation1 + $0x92] sm:$0x40]   ;;  %v1010_v50 = vsel %vm540_vm3, %v1008_v36, %v1006_v41  ;;  %v1079_v52 = vld [vmem:[#allocation1 + $0x91] sm:$0x40]   ;;  %s1405_s18 = smov 24 }
  0x38   :  { %153 = vst [vmem:[#allocation1 + $0xb0] sm:$0xff] %v1608_v18  ;;  %v1066_v37 = vld [vmem:[#allocation1 + $0x85] sm:$0x4]   ;;  %v1133_v2 = vld [vmem:[#allocation1 + $0x84] sm:$0x4]   ;;  %v1014_v62 = vsel %vm544_vm4, %v1012_v45, %v1010_v50  ;;  %s1696_s19 = smov 24  }
  0x39   :  { %952 = vrot.lane.b32.xlu0 %v951_v25, %s1690_s2  ;;  %985 = vrot.lane.b32.xlu1 %v984_v27, %s1690_s2  ;;  %183 = vst [vmem:[#allocation1 + $0xa0] sm:$0xff] %v1612_v20  ;;  %v1075_v8 = vld [vmem:[#allocation1 + $0x52] sm:$0x20]   ;;  %v1142_v49 = vld [vmem:[#allocation1 + $0x51] sm:$0x20]   ;;  %s1505_s20 = smov 24 }
  0x3a   :  { %v1062_v39 = vld [vmem:[#allocation1 + $0x46] sm:$0x2]   ;;  %v1129_v40 = vld [vmem:[#allocation1 + $0x45] sm:$0x2]   ;;  %273 = vst [vmem:[#allocation1 + $0x70] sm:$0xff] %v1624_v22  ;;  %s1697_s21 = smov 16  }
  0x3b   :  { %v1071_v42 = vld [vmem:[#allocation1 + $0x2d7] ss:$-176 sm:%s1070_s30]   ;;  %v1138_v43 = vld [vmem:[#allocation1 + $0x2d6] ss:$-176 sm:%s1137_s3]   ;;  %303 = vst [vmem:[#allocation1 + $0x60] sm:$0xff] %v1628_v24  ;;  %s1698_s22 = smov 8  }
  0x3c   :  { %v1060_v6 = vld [vmem:[#allocation1 + $0x7] sm:$0x1]   ;;  %v1127_v46 = vld [vmem:[#allocation1 + $0x6] sm:$0x1]   ;;  %393 = vst [vmem:[#allocation1 + $0x30] sm:$0xff] %v1640_v26  ;;  %s482_s23 = smov 3 }
  0x3d   :  { %v1064_v7 = vsel %vm527_vm0, %v1062_v39, %v1060_v6  ;;  %v1131_v48 = vsel %vm527_vm0, %v1129_v40, %v1127_v46  ;;  %423 = vst [vmem:[#allocation1 + $0x20] sm:$0xff] %v1644_v28  ;;  %918 = vrot.lane.b32.xlu2 %v917_v44, %s1689_s28  ;;  %v1261_v54 = vld [vmem:[#allocation1 + $0x4] sm:$0x1]   ;;  %v1146_v59 = vld [vmem:[#allocation1 + $0x90] sm:$0x40]   ;;  %s484_s24 = smov 12 }
  0x3e   :  { %v1068_v51 = vsel %vm531_vm1, %v1066_v37, %v1064_v7  ;;  %v1135_v53 = vsel %vm531_vm1, %v1133_v2, %v1131_v48  ;;  %v1263_v55 = vld [vmem:[#allocation1 + $0x43] sm:$0x2]   ;;  %v1016_v63 = vld [vmem:[#allocation1 + $0xd1] sm:$0x80]   ;;  %v1328_v18 = vld [vmem:[#allocation1 + $0x3] sm:$0x1]  }
  0x3f   :  { %v1073_v56 = vsel %vm536_vm2, %v1071_v42, %v1068_v51  ;;  %v1140_v58 = vsel %vm536_vm2, %v1138_v43, %v1135_v53  ;;  %v1265_v4 = vsel %vm527_vm0, %v1263_v55, %v1261_v54  ;;  %v1267_v5 = vld [vmem:[#allocation1 + $0x82] sm:$0x4]   ;;  %v1018_v19 = vsel %vm548_vm5, %v1016_v63, %v1014_v62  ;;  %v1330_v21 = vld [vmem:[#allocation1 + $0x42] sm:$0x2]   ;;  %v1179_v30 = vld [vmem:[#allocation1 + $0xb0] sm:$0x40]  }
  0x40   :  { %v1077_v10 = vsel %vm540_vm3, %v1075_v8, %v1073_v56  ;;  %v1144_v60 = vsel %vm540_vm3, %v1142_v49, %v1140_v58  ;;  %v1166_v3 = vld [vmem:[#allocation1 + $0xa4] sm:$0x4]   ;;  %v1233_v15 = vld [vmem:[#allocation1 + $0xa3] sm:$0x4]   ;;  %v1272_v16 = vld [vmem:[#allocation1 + $0x2d4] ss:$-176 sm:%s1963_s6]   ;;  %v1269_v0 = vsel %vm531_vm1, %v1267_v5, %v1265_v4  ;;  %v1332_v33 = vsel %vm527_vm0, %v1330_v21, %v1328_v18 }
  0x41   :  { %1052 = vrot.lane.b32.xlu0 %v1051_v47, %s1691_s8  ;;  %v1081_v12 = vsel %vm544_vm4, %v1079_v52, %v1077_v10  ;;  %v1148_v11 = vsel %vm544_vm4, %v1146_v59, %v1144_v60  ;;  %v1175_v22 = vld [vmem:[#allocation1 + $0x71] sm:$0x20]   ;;  %v1242_v24 = vld [vmem:[#allocation1 + $0x70] sm:$0x20]   ;;  %v1334_v34 = vld [vmem:[#allocation1 + $0x81] sm:$0x4]   ;;  %v1274_v38 = vsel %vm536_vm2, %v1272_v16, %v1269_v0 }
  0x42   :  { %v1085_v9 = vsel %vm548_vm5, %v1083_v57, %v1081_v12  ;;  %v1162_v14 = vld [vmem:[#allocation1 + $0x65] sm:$0x2]   ;;  %v1229_v13 = vld [vmem:[#allocation1 + $0x64] sm:$0x2]   ;;  %v1152_v29 = vsel %vm548_vm5, %v1150_v61, %v1148_v11  ;;  %v1363_v26 = vld [vmem:[#allocation1 + $0x62] sm:$0x2]   ;;  %v1336_v6 = vsel %vm531_vm1, %v1334_v34, %v1332_v33 }
  0x43   :  { %1086 = vrot.lane.b32.xlu1 %v1085_v9, %s1692_s12  ;;  %v1171_v17 = vld [vmem:[#allocation1 + $0x2f6] ss:$-176 sm:%s1953_s4]   ;;  %v1238_v27 = vld [vmem:[#allocation1 + $0x2f5] ss:$-176 sm:%s1957_s5]   ;;  %v1276_v39 = vld [vmem:[#allocation1 + $0x4f] sm:$0x20]  }
  0x44   :  { %v1160_v23 = vld [vmem:[#allocation1 + $0x26] sm:$0x1]   ;;  %v1227_v25 = vld [vmem:[#allocation1 + $0x25] sm:$0x1]   ;;  %v1361_v35 = vld [vmem:[#allocation1 + $0x23] sm:$0x1]   ;;  %v1278_v51 = vsel %vm540_vm3, %v1276_v39, %v1274_v38 }
  0x45   :  { %v1164_v20 = vsel %vm527_vm0, %v1162_v14, %v1160_v23  ;;  %v1231_v31 = vsel %vm527_vm0, %v1229_v13, %v1227_v25  ;;  %1019 = vrot.lane.b32.xlu2 %v1018_v19, %s1691_s8  ;;  %v1183_v37 = vld [vmem:[#allocation1 + $0xef] sm:$0x80]   ;;  %v1246_v28 = vld [vmem:[#allocation1 + $0xaf] sm:$0x40]   ;;  %v1339_v42 = vld [vmem:[#allocation1 + $0x2d3] ss:$-176 sm:%s1970_s7]   ;;  %v1365_v46 = vsel %vm527_vm0, %v1363_v26, %v1361_v35 }
  0x46   :  { %v1168_v32 = vsel %vm531_vm1, %v1166_v3, %v1164_v20  ;;  %v1235_v1 = vsel %vm531_vm1, %v1233_v15, %v1231_v31  ;;  %v1093_v43 = vld [vmem:[#allocation1 + $0x27] sm:$0x1]   ;;  %v1367_v47 = vld [vmem:[#allocation1 + $0xa1] sm:$0x4]   ;;  %v1250_v50 = vld [vmem:[#allocation1 + $0xee] sm:$0x80]   ;;  %v1341_v10 = vsel %vm536_vm2, %v1339_v42, %v1336_v6 }
  0x47   :  { %v1173_v36 = vsel %vm536_vm2, %v1171_v17, %v1168_v32  ;;  %v1240_v2 = vsel %vm536_vm2, %v1238_v27, %v1235_v1  ;;  %v1095_v44 = vld [vmem:[#allocation1 + $0x66] sm:$0x2]   ;;  %v1280_v52 = vld [vmem:[#allocation1 + $0x8e] sm:$0x40]   ;;  %v1108_v54 = vld [vmem:[#allocation1 + $0x72] sm:$0x20]   ;;  %v1369_v61 = vsel %vm531_vm1, %v1367_v47, %v1365_v46 }
  0x48   :  { %v1177_v40 = vsel %vm540_vm3, %v1175_v22, %v1173_v36  ;;  %v1244_v41 = vsel %vm540_vm3, %v1242_v24, %v1240_v2  ;;  %v1099_v7 = vld [vmem:[#allocation1 + $0xa5] sm:$0x4]   ;;  %v1097_v53 = vsel %vm527_vm0, %v1095_v44, %v1093_v43  ;;  %v1284_v55 = vld [vmem:[#allocation1 + $0xcd] sm:$0x80]   ;;  %v1112_v57 = vld [vmem:[#allocation1 + $0xb1] sm:$0x40]   ;;  %v1282_v4 = vsel %vm544_vm4, %v1280_v52, %v1278_v51 }
  0x49   :  { %1153 = vrot.lane.b32.xlu0 %v1152_v29, %s1693_s13  ;;  %v1181_v45 = vsel %vm544_vm4, %v1179_v30, %v1177_v40  ;;  %v1104_v8 = vld [vmem:[#allocation1 + $0x2f7] ss:$-176 sm:%s1978_s0]   ;;  %v1248_v49 = vsel %vm544_vm4, %v1246_v28, %v1244_v41  ;;  %v1101_v56 = vsel %vm531_vm1, %v1099_v7, %v1097_v53  ;;  %v1428_v58 = vld [vmem:[#allocation1 + $0x22] sm:$0x1]   ;;  %v1343_v60 = vld [vmem:[#allocation1 + $0x4e] sm:$0x20]   ;;  %v1286_v29 = vsel %vm548_vm5, %v1284_v55, %v1282_v4 }
  0x4a   :  { %v1185_v48 = vsel %vm548_vm5, %v1183_v37, %v1181_v45  ;;  %v1430_v59 = vld [vmem:[#allocation1 + $0x61] sm:$0x2]   ;;  %v1372_v62 = vld [vmem:[#allocation1 + $0x2f3] ss:$-176 sm:%s1976_s9]   ;;  %v1106_v63 = vsel %vm536_vm2, %v1104_v8, %v1101_v56  ;;  %v1116_v12 = vld [vmem:[#allocation1 + $0xf0] sm:$0x80]   ;;  %v1252_v3 = vsel %vm548_vm5, %v1250_v50, %v1248_v49  ;;  %v1345_v19 = vsel %vm540_vm3, %v1343_v60, %v1341_v10 }
  0x4b   :  { %1186 = vrot.lane.b32.xlu1 %v1185_v48, %s1693_s13  ;;  %v1347_v5 = vld [vmem:[#allocation1 + $0x8d] sm:$0x40]   ;;  %v1110_v11 = vsel %vm540_vm3, %v1108_v54, %v1106_v63  ;;  %v1432_v13 = vsel %vm527_vm0, %v1430_v59, %v1428_v58  ;;  %v1434_v15 = vld [vmem:[#allocation1 + $0xa0] sm:$0x4]   ;;  %v1462_v16 = vld [vmem:[#allocation1 + $0x1] sm:$0x1]   ;;  %v1374_v18 = vsel %vm536_vm2, %v1372_v62, %v1369_v61 }
  0x4c   :  { %v1376_v9 = vld [vmem:[#allocation1 + $0x6e] sm:$0x20]   ;;  %v1114_v14 = vsel %vm544_vm4, %v1112_v57, %v1110_v11  ;;  %v1464_v17 = vld [vmem:[#allocation1 + $0x40] sm:$0x2]   ;;  %v1439_v23 = vld [vmem:[#allocation1 + $0x2f2] ss:$-176 sm:%s1982_s10]   ;;  %v1436_v1 = vsel %vm531_vm1, %v1434_v15, %v1432_v13  ;;  %v1349_v37 = vsel %vm544_vm4, %v1347_v5, %v1345_v19 }
  0x4d   :  { %v1118_v21 = vsel %vm548_vm5, %v1116_v12, %v1114_v14  ;;  %v1468_v25 = vld [vmem:[#allocation1 + $0x7f] sm:$0x4]   ;;  %v1194_v27 = vld [vmem:[#allocation1 + $0x5] sm:$0x1]   ;;  %v1351_v20 = vld [vmem:[#allocation1 + $0xcc] sm:$0x80]   ;;  %v1466_v33 = vsel %vm527_vm0, %v1464_v17, %v1462_v16  ;;  %v1378_v2 = vsel %vm540_vm3, %v1376_v9, %v1374_v18  ;;  %v1441_v45 = vsel %vm536_vm2, %v1439_v23, %v1436_v1 }
  0x4e   :  { %v1196_v0 = vld [vmem:[#allocation1 + $0x44] sm:$0x2]   ;;  %v1380_v22 = vld [vmem:[#allocation1 + $0xad] sm:$0x40]   ;;  %1119 = vrot.lane.b32.xlu2 %v1118_v21, %s1692_s12  ;;  %v1209_v32 = vld [vmem:[#allocation1 + $0x50] sm:$0x20]   ;;  %v1470_v6 = vsel %vm531_vm1, %v1468_v25, %v1466_v33  ;;  %v1353_v49 = vsel %vm548_vm5, %v1351_v20, %v1349_v37 }
  0x4f   :  { %v1198_v30 = vsel %vm527_vm0, %v1196_v0, %v1194_v27  ;;  %v1200_v31 = vld [vmem:[#allocation1 + $0x83] sm:$0x4]   ;;  %v1213_v35 = vld [vmem:[#allocation1 + $0x8f] sm:$0x40]   ;;  %v1294_v36 = vld [vmem:[#allocation1 + $0x24] sm:$0x1]   ;;  %v1382_v50 = vsel %vm544_vm4, %v1380_v22, %v1378_v2 }
  0x50   :  { %v1205_v24 = vld [vmem:[#allocation1 + $0x2d5] ss:$-176 sm:%s1204_s14]   ;;  %v1202_v34 = vsel %vm531_vm1, %v1200_v31, %v1198_v30  ;;  %v1296_v38 = vld [vmem:[#allocation1 + $0x63] sm:$0x2]   ;;  %v1443_v41 = vld [vmem:[#allocation1 + $0x6d] sm:$0x20]  }
  0x51   :  { %1253 = vrot.lane.b32.xlu0 %v1252_v3, %s1694_s16  ;;  %v1217_v26 = vld [vmem:[#allocation1 + $0xce] sm:$0x80]   ;;  %v1207_v28 = vsel %vm536_vm2, %v1205_v24, %v1202_v34  ;;  %v1300_v39 = vld [vmem:[#allocation1 + $0xa2] sm:$0x4]   ;;  %v1473_v42 = vld [vmem:[#allocation1 + $0x2d1] ss:$-176 sm:%s1984_s11]   ;;  %v1298_v44 = vsel %vm527_vm0, %v1296_v38, %v1294_v36  ;;  %v1445_v56 = vsel %vm540_vm3, %v1443_v41, %v1441_v45 }
  0x52   :  { %v1305_v40 = vld [vmem:[#allocation1 + $0x2f4] ss:$-176 sm:%s2023_s15]   ;;  %v1211_v43 = vsel %vm540_vm3, %v1209_v32, %v1207_v28  ;;  %v1302_v47 = vsel %vm531_vm1, %v1300_v39, %v1298_v44  ;;  %v1395_v8 = vld [vmem:[#allocation1 + $0x2] sm:$0x1]   ;;  %v1384_v51 = vld [vmem:[#allocation1 + $0xec] sm:$0x80]   ;;  %v1475_v58 = vsel %vm536_vm2, %v1473_v42, %v1470_v6 }
  0x53   :  { %1287 = vrot.lane.b32.xlu1 %v1286_v29, %s1695_s17  ;;  %v1215_v46 = vsel %vm544_vm4, %v1213_v35, %v1211_v43  ;;  %v1309_v7 = vld [vmem:[#allocation1 + $0x6f] sm:$0x20]   ;;  %v1397_v48 = vld [vmem:[#allocation1 + $0x41] sm:$0x2]   ;;  %v1307_v53 = vsel %vm536_vm2, %v1305_v40, %v1302_v47  ;;  %v1447_v57 = vld [vmem:[#allocation1 + $0xac] sm:$0x40]   ;;  %v1386_v61 = vsel %vm548_vm5, %v1384_v51, %v1382_v50 }
  0x54   :  { %v1219_v52 = vsel %vm548_vm5, %v1217_v26, %v1215_v46  ;;  %v1399_v54 = vsel %vm527_vm0, %v1397_v48, %v1395_v8  ;;  %v1401_v55 = vld [vmem:[#allocation1 + $0x80] sm:$0x4]   ;;  %v1477_v59 = vld [vmem:[#allocation1 + $0x4c] sm:$0x20]   ;;  %v1311_v10 = vsel %vm540_vm3, %v1309_v7, %v1307_v53  ;;  %v1313_v60 = vld [vmem:[#allocation1 + $0xae] sm:$0x40]   ;;  %v1449_v12 = vsel %vm544_vm4, %v1447_v57, %v1445_v56 }
  0x55   :  { %v1403_v62 = vsel %vm531_vm1, %v1401_v55, %v1399_v54  ;;  %v1406_v63 = vld [vmem:[#allocation1 + $0x2d2] ss:$-176 sm:%s1405_s18]   ;;  %v1479_v4 = vsel %vm540_vm3, %v1477_v59, %v1475_v58  ;;  %v1481_v5 = vld [vmem:[#allocation1 + $0x8b] sm:$0x40]   ;;  %v1315_v9 = vsel %vm544_vm4, %v1313_v60, %v1311_v10  ;;  %v1317_v11 = vld [vmem:[#allocation1 + $0xed] sm:$0x80]  }
  0x56   :  { %1220 = vrot.lane.b32.xlu2 %v1219_v52, %s1694_s16  ;;  %v1451_v3 = vld [vmem:[#allocation1 + $0xeb] sm:$0x80]   ;;  %v1495_v14 = vld [vmem:[#allocation1 + $0x21] sm:$0x1]   ;;  %v1408_v15 = vsel %vm536_vm2, %v1406_v63, %v1403_v62  ;;  %v1483_v19 = vsel %vm544_vm4, %v1481_v5, %v1479_v4  ;;  %v1485_v18 = vld [vmem:[#allocation1 + $0xca] sm:$0x80]   ;;  %v1319_v21 = vsel %vm548_vm5, %v1317_v11, %v1315_v9 }
  0x57   :  { %v1497_v13 = vld [vmem:[#allocation1 + $0x60] sm:$0x2]   ;;  %v1410_v16 = vld [vmem:[#allocation1 + $0x4d] sm:$0x20]   ;;  %v1453_v17 = vsel %vm548_vm5, %v1451_v3, %v1449_v12  ;;  %v1487_v29 = vsel %vm548_vm5, %v1485_v18, %v1483_v19  ;;  %v1510_v32 = vld [vmem:[#allocation1 + $0x6c] sm:$0x20]  }
  0x58   :  { %v1499_v23 = vsel %vm527_vm0, %v1497_v13, %v1495_v14  ;;  %v1501_v25 = vld [vmem:[#allocation1 + $0x9f] sm:$0x4]   ;;  %v1412_v27 = vsel %vm540_vm3, %v1410_v16, %v1408_v15  ;;  %v1414_v0 = vld [vmem:[#allocation1 + $0x8c] sm:$0x40]   ;;  %s488_s25 = smov 48  ;;  %s501_s26 = smov 3 }
  0x59   :  { %1354 = vrot.lane.b32.xlu0 %v1353_v49, %s1696_s19  ;;  %v1503_v20 = vsel %vm531_vm1, %v1501_v25, %v1499_v23  ;;  %v1506_v22 = vld [vmem:[#allocation1 + $0x2f1] ss:$-176 sm:%s1505_s20]   ;;  %v1416_v30 = vsel %vm544_vm4, %v1414_v0, %v1412_v27  ;;  %v1418_v31 = vld [vmem:[#allocation1 + $0xcb] sm:$0x80]   ;;  %s492_s27 = smov 192  ;;  %s504_s28 = smov 12 }
  0x5a   :  { %v1508_v24 = vsel %vm536_vm2, %v1506_v22, %v1503_v20  ;;  %v1420_v1 = vsel %vm548_vm5, %v1418_v31, %v1416_v30  ;;  %v1514_v34 = vld [vmem:[#allocation1 + $0xab] sm:$0x40]   ;;  %v483_v35 = vld [vmem:[#allocation1] ss:$16 sm:%s482_s23]   ;;  %s509_s29 = smov 48  ;;  %s514_s30 = smov 192 }
  0x5b   :  { %1387 = vrot.lane.b32.xlu1 %v1386_v61, %s1696_s19  ;;  %v1512_v33 = vsel %vm540_vm3, %v1510_v32, %v1508_v24  ;;  %v485_v26 = vld [vmem:[#allocation1] ss:$16 sm:%s484_s24]   ;;  %v1518_v38 = vld [vmem:[#allocation1 + $0xea] sm:$0x80]   ;;  %vm686_vm12 = vcmask 917312   ;;  %vm753_vm13 = vcmask 851712  }
  0x5c   :  { %v487_v36 = vsel %vm486_vm6, %v485_v26, %v483_v35  ;;  %v489_v37 = vld [vmem:[#allocation1] ss:$16 sm:%s488_s25]   ;;  %v1516_v28 = vsel %vm544_vm4, %v1514_v34, %v1512_v33  ;;  %vm820_vm14 = vcmask 786112   ;;  %vm887_vm15 = vcmask 720512  }
  0x5d   :  { %v502_v2 = vld [vmem:[#allocation1 + $0x80] ss:$16 sm:%s501_s26]   ;;  %v491_v39 = vsel %vm490_vm7, %v489_v37, %v487_v36  ;;  %v1520_v6 = vsel %vm548_vm5, %v1518_v38, %v1516_v28  ;;  %vm954_vm0 = vcmask 654912   ;;  %vm1021_vm1 = vcmask 589312  }
  0x5e   :  { %1320 = vrot.lane.b32.xlu2 %v1319_v21, %s1695_s17  ;;  %v493_v40 = vld [vmem:[#allocation1] ss:$16 sm:%s492_s27]   ;;  %vm1088_vm2 = vcmask 523712   ;;  %vm1155_vm3 = vcmask 458112   ;;  %vm1222_vm4 = vcmask 392512   ;;  %vm1289_vm5 = vcmask 326912  }
  0x5f   :  { %v495_v41 = vsel %vm494_vm8, %v493_v40, %v491_v39  ;;  %v505_v42 = vld [vmem:[#allocation1 + $0x80] ss:$16 sm:%s504_s28]  }
  0x60   :  { %v510_v43 = vld [vmem:[#allocation1 + $0x80] ss:$16 sm:%s509_s29]   ;;  %497 = vst.msk [vmem:[#allocation0] ss:$8 sm:$0xf] %vm496_vm9, %v495_v41   ;;  %v507_v44 = vsel %vm486_vm6, %v505_v42, %v502_v2  ;;  %vm1356_vm6 = vcmask 261312  }
  0x61   :  { %1454 = vrot.lane.b32.xlu0 %v1453_v17, %s1697_s21  ;;  %v515_v45 = vld [vmem:[#allocation1 + $0x80] ss:$16 sm:%s514_s30]   ;;  %499 = vst.msk [vmem:[#allocation0 - $0x1f] ss:$8 sm:$0xf0] %vm496_vm9, %v495_v41   ;;  %v512_v46 = vsel %vm490_vm7, %v510_v43, %v507_v44  ;;  %vm1423_vm7 = vcmask 195712  }
  0x62   :  { %v517_v47 = vsel %vm494_vm8, %v515_v45, %v512_v46  ;;  %vm1490_vm8 = vcmask 130112  }
  0x63   :  { %1488 = vrot.lane.b32.xlu1 %v1487_v29, %s1698_s22  ;;  %520 = vst.msk [vmem:[#allocation0 + $0x2] ss:$8 sm:$0xf] %vm496_vm9, %v517_v47  }
  0x64   :  { %522 = vst.msk [vmem:[#allocation0 - $0x1d] ss:$8 sm:$0xf0] %vm496_vm9, %v517_v47  }
  0x66   :  { %1421 = vrot.lane.b32.xlu2 %v1420_v1, %s1697_s21 }
  0x6e   :  { %1521 = vrot.lane.b32.xlu2 %v1520_v6, %s1698_s22 }
  0x7f   :  { %v685_v7 = vpop.permute.xlu2 %684  }
  0x87   :  { %v718_v8 = vpop.permute.xlu2 %717  }
  0x8b   :  { %v551_v48 = vpop.permute.xlu0 %550   ;;  %v618_v49 = vpop.permute.xlu1 %617  }
  0x8c   :  { %553 = vst.msk [vmem:[#allocation0] sm:$0xf] %vm552_vm10, %v551_v48  }
  0x8d   :  { %555 = vst.msk [vmem:[#allocation0 + $0x4] sm:$0xf0] %vm552_vm10, %v551_v48  }
  0x8e   :  { %620 = vst.msk [vmem:[#allocation0] sm:$0xf] %vm619_vm11, %v618_v49  }
  0x8f   :  { %622 = vst.msk [vmem:[#allocation0 + $0x4] sm:$0xf0] %vm619_vm11, %v618_v49   ;;  %v819_v50 = vpop.permute.xlu2 %818  }
  0x90   :  { %687 = vst.msk [vmem:[#allocation0] sm:$0xf] %vm686_vm12, %v685_v7  }
  0x91   :  { %689 = vst.msk [vmem:[#allocation0 + $0x4] sm:$0xf0] %vm686_vm12, %v685_v7  }
  0x93   :  { %v584_v51 = vpop.permute.xlu0 %583   ;;  %v651_v52 = vpop.permute.xlu1 %650  }
  0x94   :  { %587 = vst.msk [vmem:[#allocation0 + $0x10] sm:$0xf] %vm552_vm10, %v584_v51  }
  0x95   :  { %589 = vst.msk [vmem:[#allocation0 + $0x14] sm:$0xf0] %vm552_vm10, %v584_v51  }
  0x96   :  { %654 = vst.msk [vmem:[#allocation0 + $0x10] sm:$0xf] %vm619_vm11, %v651_v52  }
  0x97   :  { %656 = vst.msk [vmem:[#allocation0 + $0x14] sm:$0xf0] %vm619_vm11, %v651_v52   ;;  %v919_v53 = vpop.permute.xlu2 %918  }
  0x98   :  { %721 = vst.msk [vmem:[#allocation0 + $0x10] sm:$0xf] %vm686_vm12, %v718_v8  }
  0x99   :  { %723 = vst.msk [vmem:[#allocation0 + $0x14] sm:$0xf0] %vm686_vm12, %v718_v8  }
  0x9b   :  { %v752_v54 = vpop.permute.xlu0 %751   ;;  %v785_v55 = vpop.permute.xlu1 %784  }
  0x9c   :  { %754 = vst.msk [vmem:[#allocation0] sm:$0xf] %vm753_vm13, %v752_v54  }
  0x9d   :  { %756 = vst.msk [vmem:[#allocation0 + $0x4] sm:$0xf0] %vm753_vm13, %v752_v54  }
  0x9e   :  { %821 = vst.msk [vmem:[#allocation0] sm:$0xf] %vm820_vm14, %v819_v50  }
  0x9f   :  { %823 = vst.msk [vmem:[#allocation0 + $0x4] sm:$0xf0] %vm820_vm14, %v819_v50   ;;  %v1020_v56 = vpop.permute.xlu2 %1019  }
  0xa0   :  { %788 = vst.msk [vmem:[#allocation0 + $0x10] sm:$0xf] %vm753_vm13, %v785_v55  }
  0xa1   :  { %790 = vst.msk [vmem:[#allocation0 + $0x14] sm:$0xf0] %vm753_vm13, %v785_v55  }
  0xa3   :  { %v852_v57 = vpop.permute.xlu0 %851   ;;  %v886_v58 = vpop.permute.xlu1 %885  }
  0xa4   :  { %855 = vst.msk [vmem:[#allocation0 + $0x10] sm:$0xf] %vm820_vm14, %v852_v57  }
  0xa5   :  { %857 = vst.msk [vmem:[#allocation0 + $0x14] sm:$0xf0] %vm820_vm14, %v852_v57  }
  0xa6   :  { %922 = vst.msk [vmem:[#allocation0 + $0x10] sm:$0xf] %vm887_vm15, %v919_v53  }
  0xa7   :  { %924 = vst.msk [vmem:[#allocation0 + $0x14] sm:$0xf0] %vm887_vm15, %v919_v53  }
  0xa8   :  { %888 = vst.msk [vmem:[#allocation0] sm:$0xf] %vm887_vm15, %v886_v58   ;;  %v1120_v60 = vpop.permute.xlu2 %1119  }
  0xa9   :  { %890 = vst.msk [vmem:[#allocation0 + $0x4] sm:$0xf0] %vm887_vm15, %v886_v58  }
  0xab   :  { %v953_v59 = vpop.permute.xlu0 %952   ;;  %v986_v10 = vpop.permute.xlu1 %985  }
  0xac   :  { %955 = vst.msk [vmem:[#allocation0] sm:$0xf] %vm954_vm0, %v953_v59  }
  0xad   :  { %957 = vst.msk [vmem:[#allocation0 + $0x4] sm:$0xf0] %vm954_vm0, %v953_v59  }
  0xae   :  { %1022 = vst.msk [vmem:[#allocation0] sm:$0xf] %vm1021_vm1, %v1020_v56  }
  0xaf   :  { %1024 = vst.msk [vmem:[#allocation0 + $0x4] sm:$0xf0] %vm1021_vm1, %v1020_v56  }
  0xb0   :  { %989 = vst.msk [vmem:[#allocation0 + $0x10] sm:$0xf] %vm954_vm0, %v986_v10   ;;  %v1221_v62 = vpop.permute.xlu2 %1220  }
  0xb1   :  { %991 = vst.msk [vmem:[#allocation0 + $0x14] sm:$0xf0] %vm954_vm0, %v986_v10  }
  0xb3   :  { %v1053_v61 = vpop.permute.xlu0 %1052  }
  0xb4   :  { %1056 = vst.msk [vmem:[#allocation0 + $0x10] sm:$0xf] %vm1021_vm1, %v1053_v61  }
  0xb5   :  { %1058 = vst.msk [vmem:[#allocation0 + $0x14] sm:$0xf0] %vm1021_vm1, %v1053_v61   ;;  %v1087_v63 = vpop.permute.xlu1 %1086  }
  0xb6   :  { %1123 = vst.msk [vmem:[#allocation0 + $0x10] sm:$0xf] %vm1088_vm2, %v1120_v60  }
  0xb7   :  { %1089 = vst.msk [vmem:[#allocation0] sm:$0xf] %vm1088_vm2, %v1087_v63  }
  0xb8   :  { %1091 = vst.msk [vmem:[#allocation0 + $0x4] sm:$0xf0] %vm1088_vm2, %v1087_v63   ;;  %v1321_v3 = vpop.permute.xlu2 %1320  }
  0xb9   :  { %1125 = vst.msk [vmem:[#allocation0 + $0x14] sm:$0xf0] %vm1088_vm2, %v1120_v60  }
  0xbb   :  { %v1154_v12 = vpop.permute.xlu0 %1153  }
  0xbc   :  { %1156 = vst.msk [vmem:[#allocation0] sm:$0xf] %vm1155_vm3, %v1154_v12  }
  0xbd   :  { %1158 = vst.msk [vmem:[#allocation0 + $0x4] sm:$0xf0] %vm1155_vm3, %v1154_v12   ;;  %v1187_v4 = vpop.permute.xlu1 %1186  }
  0xbe   :  { %1223 = vst.msk [vmem:[#allocation0] sm:$0xf] %vm1222_vm4, %v1221_v62  }
  0xbf   :  { %1190 = vst.msk [vmem:[#allocation0 + $0x10] sm:$0xf] %vm1155_vm3, %v1187_v4  }
  0xc0   :  { %1192 = vst.msk [vmem:[#allocation0 + $0x14] sm:$0xf0] %vm1155_vm3, %v1187_v4   ;;  %v1422_v9 = vpop.permute.xlu2 %1421  }
  0xc1   :  { %1225 = vst.msk [vmem:[#allocation0 + $0x4] sm:$0xf0] %vm1222_vm4, %v1221_v62  }
  0xc3   :  { %v1254_v5 = vpop.permute.xlu0 %1253  }
  0xc4   :  { %1257 = vst.msk [vmem:[#allocation0 + $0x10] sm:$0xf] %vm1222_vm4, %v1254_v5  }
  0xc5   :  { %1259 = vst.msk [vmem:[#allocation0 + $0x14] sm:$0xf0] %vm1222_vm4, %v1254_v5   ;;  %v1288_v11 = vpop.permute.xlu1 %1287  }
  0xc6   :  { %1324 = vst.msk [vmem:[#allocation0 + $0x10] sm:$0xf] %vm1289_vm5, %v1321_v3  }
  0xc7   :  { %1290 = vst.msk [vmem:[#allocation0] sm:$0xf] %vm1289_vm5, %v1288_v11  }
  0xc8   :  { %1292 = vst.msk [vmem:[#allocation0 + $0x4] sm:$0xf0] %vm1289_vm5, %v1288_v11   ;;  %v1522_v13 = vpop.permute.xlu2 %1521  }
  0xc9   :  { %1326 = vst.msk [vmem:[#allocation0 + $0x14] sm:$0xf0] %vm1289_vm5, %v1321_v3  }
  0xcb   :  { %v1355_v14 = vpop.permute.xlu0 %1354  }
  0xcc   :  { %1357 = vst.msk [vmem:[#allocation0] sm:$0xf] %vm1356_vm6, %v1355_v14  }
  0xcd   :  { %1359 = vst.msk [vmem:[#allocation0 + $0x4] sm:$0xf0] %vm1356_vm6, %v1355_v14   ;;  %v1388_v15 = vpop.permute.xlu1 %1387  }
  0xce   :  { %1424 = vst.msk [vmem:[#allocation0] sm:$0xf] %vm1423_vm7, %v1422_v9  }
  0xcf   :  { %1391 = vst.msk [vmem:[#allocation0 + $0x10] sm:$0xf] %vm1356_vm6, %v1388_v15  }
  0xd0   :  { %1393 = vst.msk [vmem:[#allocation0 + $0x14] sm:$0xf0] %vm1356_vm6, %v1388_v15  }
  0xd1   :  { %1426 = vst.msk [vmem:[#allocation0 + $0x4] sm:$0xf0] %vm1423_vm7, %v1422_v9  }
  0xd3   :  { %v1455_v16 = vpop.permute.xlu0 %1454  }
  0xd4   :  { %1458 = vst.msk [vmem:[#allocation0 + $0x10] sm:$0xf] %vm1423_vm7, %v1455_v16  }
  0xd5   :  { %1460 = vst.msk [vmem:[#allocation0 + $0x14] sm:$0xf0] %vm1423_vm7, %v1455_v16   ;;  %v1489_v17 = vpop.permute.xlu1 %1488  }
  0xd6   :  { %1525 = vst.msk [vmem:[#allocation0 + $0x10] sm:$0xf] %vm1490_vm8, %v1522_v13  }
  0xd7   :  { %1491 = vst.msk [vmem:[#allocation0] sm:$0xf] %vm1490_vm8, %v1489_v17  }
  0xd8   :  { %1493 = vst.msk [vmem:[#allocation0 + $0x4] sm:$0xf0] %vm1490_vm8, %v1489_v17  }
  0xd9   :  { %1527 = vst.msk [vmem:[#allocation0 + $0x14] sm:$0xf0] %vm1490_vm8, %v1522_v13  }
  0xdd   :  { %v1543_v19 = vld [vmem:[#allocation0 + $0x10] sm:$0xf] }
  0xde   :  { %v1530_v18 = vld [vmem:[#allocation0] sm:$0xf]  ;;  %v1544_v21 = vpack.c.bf16 0.0, %v1543_v19 }
  0xdf   :  { %v1531_v23 = vpack.c.bf16 0.0, %v1530_v18  ;;  %v1536_v25 = vld [vmem:[#allocation0 + $0x8] sm:$0xf] }
  0xe0   :  { %v1537_v27 = vpack.c.bf16 0.0, %v1536_v25  ;;  %1588 = vst [vmem:[%s2102_s1 + $0x4] sm:$0x3] %v1544_v21  ;;  %v1550_v0 = vld [vmem:[#allocation0 + $0x18] sm:$0xf] }
  0xe1   :  { %1534 = vst [vmem:[%s2102_s1] sm:$0x3] %v1531_v23  ;;  %v1551_v29 = vpack.c.bf16 0.0, %v1550_v0 }
  0xe2   :  { %1587 = vst [vmem:[%s2102_s1 + $0x2] sm:$0x3] %v1537_v27 }
  0xe3   :  { %1589 = vst [vmem:[%s2102_s1 + $0x6] sm:$0x3] %v1551_v29 }

// kernel: hourglass_forward.19
= control target key start
LH: loop header
LB: loop body
LE: loop exit
PB: predicated region body
PF: predicated region fallthrough
CT: control target
= control target key end

     0   :  { %vm25_vm0 = vcmask 1043456   ;;  %vm68_vm1 = vcmask 1041408   ;;  %vm72_vm2 = vcmask 1045508   ;;  %s120_s0 = inlined_call_operand.vmem [shape: bf16[4,512], index: 0, kind: input, shape index: {}]   ;;  %s121_s1 = inlined_call_operand.vmem [shape: f32[1,512], index: 1, kind: input, shape index: {}]   ;;  %s122_s2 = inlined_call_operand.vmem [shape: f32[1,512], index: 2, kind: input, shape index: {}]   ;;  %s123_s3 = inlined_call_operand.vmem [shape: bf16[4,512], index: 3, kind: output, shape index: {}]  }
   0x1   :  { %v14_v0 = vld [vmem:[%s120_s0] sm:$0xff] }
   0x2   :  { %v17_v1 = vld [vmem:[%s121_s1] sm:$0xf]  ;;  %v15_v3 = vunpack.c.l.bf16 %v14_v0  ;;  %v16_v11 = vunpack.c.h.bf16 %v14_v0 }
   0x3   :  { %v32_v2 = vld [vmem:[%s122_s2] sm:$0xf]  ;;  %v19_v4 = vperm.slane %v17_v1, 0  ;;  %v20_v5 = vperm.slane %v17_v1, 1  ;;  %v21_v8 = vperm.slane %v17_v1, 2  ;;  %v22_v9 = vperm.slane %v17_v1, 3 }
   0x4   :  { %v34_v6 = vperm.slane %v32_v2, 0  ;;  %v35_v7 = vperm.slane %v32_v2, 1  ;;  %v36_v12 = vperm.slane %v32_v2, 2  ;;  %v37_v13 = vperm.slane %v32_v2, 3 }
   0x5   :  { %v23_v10 = vrot.slane %v20_v5, 4  ;;  %v24_v15 = vrot.slane %v22_v9, 4 }
   0x6   :  { %v38_v14 = vrot.slane %v35_v7, 4  ;;  %v39_v17 = vrot.slane %v37_v13, 4 }
   0x7   :  { %v26_v16 = vsel %vm25_vm0, %v19_v4, %v23_v10  ;;  %v27_v20 = vsel %vm25_vm0, %v21_v8, %v24_v15 }
   0x8   :  { %v30_v18 = vmul.f32 %v26_v16, %v15_v3  ;;  %v40_v19 = vsel %vm25_vm0, %v34_v6, %v38_v14  ;;  %v31_v21 = vmul.f32 %v27_v20, %v16_v11  ;;  %v41_v22 = vsel %vm25_vm0, %v36_v12, %v39_v17 }
   0xa   :  { %v44_v23 = vadd.f32 %v40_v19, %v30_v18  ;;  %v45_v24 = vadd.f32 %v41_v22, %v31_v21 }
   0xc   :  { %v46_v25 = vmax.f32 %v44_v23, 0.0  ;;  %v47_v26 = vmax.f32 %v45_v24, 0.0 }
   0xe   :  { %50 = vst [vmem:[#allocation1] ss:$2 sm:$0xff] %v46_v25 }
   0xf   :  { %52 = vst [vmem:[#allocation1 + $0x10] ss:$2 sm:$0xff] %v47_v26 }
  0x15   :  { %v53_v27 = vld.sshfl [vmem:[#allocation1] sm:$0xff pattern:$0x75316420]  ;;  %v54_v28 = vld.sshfl [vmem:[#allocation1 + $0x8] sm:$0xff pattern:$0x75316420] }
  0x16   :  { %v55_v29 = vld.sshfl [vmem:[#allocation1 + $0x10] sm:$0xff pattern:$0x75316420]  ;;  %v56_v30 = vld.sshfl [vmem:[#allocation1 + $0x18] sm:$0xff pattern:$0x75316420]  ;;  %v61_v31 = vpack.c.bf16 %v54_v28, %v53_v27 }
  0x17   :  { %v62_v32 = vpack.c.bf16 %v56_v30, %v55_v29 }
  0x18   :  { %v65_v33 = vrot.slane %v61_v31, 2 }
  0x19   :  { %v66_v34 = vrot.slane %v62_v32, 4  ;;  %v67_v35 = vrot.slane %v62_v32, 6 }
  0x1a   :  { %v71_v36 = vsel %vm68_vm1, %v61_v31, %v65_v33 }
  0x1b   :  { %v75_v37 = vsel %vm72_vm2, %v66_v34, %v67_v35 }
  0x1c   :  { %v76_v38 = vsel %vm25_vm0, %v71_v36, %v75_v37 }
  0x1d   :  { %78 = vst [vmem:[%s123_s3] sm:$0xff] %v76_v38 }

// kernel: hourglass_forward.18
= control target key start
LH: loop header
LB: loop body
LE: loop exit
PB: predicated region body
PF: predicated region fallthrough
CT: control target
= control target key end

     0   :  { %s923_s12 = smov 0   ;;  %s925_s13 = smov 0   ;;  %s1160_s0 = inlined_call_operand.vmem [shape: bf16[1,256,108], index: 0, kind: input, shape index: {}]   ;;  %s1161_s1 = inlined_call_operand.vmem [shape: bf16[1,108,8], index: 1, kind: input, shape index: {}]   ;;  %s1162_s2 = inlined_call_operand.vmem [shape: bf16[1,256,8], index: 2, kind: output, shape index: {0}]   ;;  %s1163_s3 = inlined_call_operand.vmem [shape: f32[1,2,8,8], index: 3, kind: output, shape index: {1}]  }
   0x1   :  { %s927_s14 = smov 0  }
   0x2 LB: > { %s23_s15 = sadd.s32 1, %s897_s13  ;;  %p743_p0 = scmp.ge.s32.totalorder %s901_s14, 1  ;;  %s901_s14 = sphi %s927_s14, %s14_s14   ;;  %s897_s13 = sphi %s925_s13, %s1165_s13   ;;  %s893_s12 = sphi %s923_s12, %s1164_s12  }
   0x3   : > { %p24_p1 = scmp.ge.s32.totalorder %s23_s15, 2  ;;  %p173_p2 = scmp.lt.s32.totalorder %s901_s14, 3 }
   0x5   : > { %s1167_s15 = smov (%p24_p1, %s23_s15), 0  ;;  %p174_p3 = pnand %p743_p0, %p173_p2 }
   0x6   : > { %s744_s24 = sshll.u32 (!%p174_p3), %s893_s12, 4  ;;  %p245_p5 = scmp.lt.s32.totalorder (!%p174_p3), %s893_s12, 1 }
   0x7   : > { %177 = sbr.rel (%p174_p3) target bundleno = 284 (0x11c), region = 28  ;;  %p221_p4 = scmp.lt.s32.totalorder (!%p174_p3), %s744_s24, 31 }
   0xc   : > { %v807_v0 = vld [vmem:[%s1161_s1 + $0x30] sm:$0xf]  ;;  %v833_v1 = vld [vmem:[%s1161_s1 + $0x30] sm:$0x30]  ;;  %vm388_vm0 = vcmask 1045504   ;;  %v832_v4 = vld [vmem:[%s1161_s1 + $0x28] sm:$0xff] }
   0xd   : > { %v808_v2 = vor.u32 %v833_v1, %v807_v0  ;;  %v831_v5 = vld [vmem:[%s1161_s1 + $0x20] sm:$0xff]  ;;  %v830_v6 = vld [vmem:[%s1161_s1 + $0x18] sm:$0xff]  ;;  %v829_v7 = vld [vmem:[%s1161_s1 + $0x10] sm:$0xff]  ;;  %s1169_s24 = smov (!%p221_p4, %s744_s24), 31  ;;  %vm363_vm1 = vcmask 883712   ;;  %vm572_vm2 = vcmask 60416  }
   0xe   : > { %v828_v8 = vld [vmem:[%s1161_s1 + $0x8] sm:$0xff]  ;;  %s745_s4 = sshll.u32 %s1169_s24, 2  ;;  %v827_v9 = vld [vmem:[%s1161_s1] sm:$0xff]  ;;  %vm441_vm3 = vcmask 64512   ;;  %s1171_s12 = smov (!%p245_p5, %s893_s12), 1 }
   0xf   : > { %v390_v3 = vsel %vm388_vm0, %v808_v2, 0  ;;  %s226_s9 = scalar_lea.vmem %s1160_s0, %s745_s4  ;;  %s985_s16 = scalar_lea.vmem %s1162_s2, %s745_s4 }
  0x10   : > { %393 = vmatpush.bf16.msra.mxu0 %v390_v3  ;;  %834 = vmatpush.bf16.msra.mxu1 %v390_v3  ;;  %v819_v10 = vld [vmem:[%s226_s9] sm:$0xff]  ;;  %v821_v11 = vld [vmem:[%s226_s9 + $0x10] sm:$0xff]  ;;  %v820_v14 = vld [vmem:[%s226_s9 + $0x8] sm:$0xff]  ;;  %s748_s17 = sshll.u32 %s1171_s12, 3 }
  0x11   : > { %835 = vmatpush.bf16.msra.mxu2 %v390_v3  ;;  %836 = vmatpush.bf16.msra.mxu3 %v390_v3  ;;  %v823_v12 = vld [vmem:[%s226_s9 + $0x20] sm:$0xff]  ;;  %v825_v13 = vld [vmem:[%s226_s9 + $0x30] sm:$0xff]  ;;  %v822_v15 = vld [vmem:[%s226_s9 + $0x18] sm:$0xff]  ;;  %s250_s20 = scalar_lea.vmem %s1163_s3, %s748_s17 }
  0x12   : > { %v824_v16 = vld [vmem:[%s226_s9 + $0x28] sm:$0xff]  ;;  %v826_v17 = vld [vmem:[%s226_s9 + $0x38] sm:$0xff] }
  0x14   : > { %394 = vmatpush.bf16.msra.mxu0 %v832_v4  ;;  %837 = vmatpush.bf16.msra.mxu1 %v832_v4 }
  0x15   : > { %838 = vmatpush.bf16.msra.mxu2 %v832_v4  ;;  %839 = vmatpush.bf16.msra.mxu3 %v832_v4 }
  0x18   : > { %395 = vmatpush.bf16.msra.mxu0 %v831_v5  ;;  %840 = vmatpush.bf16.msra.mxu1 %v831_v5 }
  0x19   : > { %841 = vmatpush.bf16.msra.mxu2 %v831_v5  ;;  %842 = vmatpush.bf16.msra.mxu3 %v831_v5 }
  0x1c   : > { %396 = vmatpush.bf16.msra.mxu0 %v830_v6  ;;  %843 = vmatpush.bf16.msra.mxu1 %v830_v6 }
  0x1d   : > { %844 = vmatpush.bf16.msra.mxu2 %v830_v6  ;;  %845 = vmatpush.bf16.msra.mxu3 %v830_v6 }
  0x20   : > { %397 = vmatpush.bf16.msra.mxu0 %v829_v7  ;;  %846 = vmatpush.bf16.msra.mxu1 %v829_v7 }
  0x21   : > { %847 = vmatpush.bf16.msra.mxu2 %v829_v7  ;;  %848 = vmatpush.bf16.msra.mxu3 %v829_v7 }
  0x24   : > { %398 = vmatpush.bf16.msra.mxu0 %v828_v8  ;;  %849 = vmatpush.bf16.msra.mxu1 %v828_v8 }
  0x25   : > { %850 = vmatpush.bf16.msra.mxu2 %v828_v8  ;;  %851 = vmatpush.bf16.msra.mxu3 %v828_v8 }
  0x28   : > { %399 = vmatpush.bf16.msra.mxu0 %v827_v9  ;;  %852 = vmatpush.bf16.msra.mxu1 %v827_v9 }
  0x29   : > { %853 = vmatpush.bf16.msra.mxu2 %v827_v9  ;;  %854 = vmatpush.bf16.msra.mxu3 %v827_v9 }
  0x2b   : > { %809 = vmatmul.msk.bf16.vlgmr.msra.gmra.mxu0 %vm363_vm1, %v819_v10  ;;  %811 = vmatmul.msk.bf16.vlgmr.msra.gmra.mxu1 %vm363_vm1, %v821_v11 }
  0x2c   : > { %813 = vmatmul.msk.bf16.vlgmr.msra.gmra.mxu2 %vm363_vm1, %v823_v12  ;;  %815 = vmatmul.msk.bf16.vlgmr.msra.gmra.mxu3 %vm363_vm1, %v825_v13 }
  0x3b   : > { %810 = vmatmul.msk.bf16.gmra.mxu0 %vm363_vm1, %v820_v14  ;;  %812 = vmatmul.msk.bf16.gmra.mxu1 %vm363_vm1, %v822_v15 }
  0x3c   : > { %814 = vmatmul.msk.bf16.gmra.mxu2 %vm363_vm1, %v824_v16  ;;  %816 = vmatmul.msk.bf16.gmra.mxu3 %vm363_vm1, %v826_v17 }
  0xa8   : > { %v987_v18 = vpop.f32.mrf.mxu0  ;;  %v989_v19 = vpop.f32.mrf.mxu1 }
  0xa9   : > { %v556_v20 = vpack.c.bf16 %v987_v18, %v987_v18  ;;  %v560_v21 = vpack.c.bf16 %v989_v19, %v989_v19  ;;  %v442_v39 = vsel %vm441_vm3, %v987_v18, 0.0  ;;  %v449_v53 = vsel %vm441_vm3, %v989_v19, 0.0 }
  0xab   : > { %573 = vst.msk [vmem:[%s985_s16] sm:$0xf] %vm572_vm2, %v556_v20 }
  0xac   : > { %577 = vst.msk [vmem:[%s985_s16 + $0x10] sm:$0xf] %vm572_vm2, %v560_v21 }
  0xaf   : > { %v999_v22 = vpop.f32.mrf.mxu2  ;;  %v1001_v23 = vpop.f32.mrf.mxu3 }
  0xb0   : > { %v1003_v24 = vpop.f32.mrf.mxu0  ;;  %v1005_v25 = vpop.f32.mrf.mxu1  ;;  %v564_v26 = vpack.c.bf16 %v999_v22, %v999_v22  ;;  %v568_v29 = vpack.c.bf16 %v1001_v23, %v1001_v23  ;;  %v457_v1 = vsel %vm441_vm3, %v999_v22, 0.0  ;;  %v465_v9 = vsel %vm441_vm3, %v1001_v23, 0.0 }
  0xb1   : > { %v557_v27 = vpack.c.bf16 %v1003_v24, %v1003_v24  ;;  %v561_v28 = vpack.c.bf16 %v1005_v25, %v1005_v25  ;;  %v443_v38 = vsel %vm441_vm3, %v1003_v24, 0.0  ;;  %v451_v55 = vsel %vm441_vm3, %v1005_v25, 0.0 }
  0xb2   : > { %581 = vst.msk [vmem:[%s985_s16 + $0x20] sm:$0xf] %vm572_vm2, %v564_v26  ;;  %v444_v41 = vadd.f32 %v443_v38, %v442_v39 }
  0xb3   : > { %574 = vst.msk [vmem:[%s985_s16 + $0x4] sm:$0xf] %vm572_vm2, %v557_v27 }
  0xb4   : > { %578 = vst.msk [vmem:[%s985_s16 + $0x14] sm:$0xf] %vm572_vm2, %v561_v28 }
  0xb5   : > { %585 = vst.msk [vmem:[%s985_s16 + $0x30] sm:$0xf] %vm572_vm2, %v568_v29 }
  0xb7   : > { %v1023_v30 = vpop.f32.mrf.mxu2  ;;  %v1025_v31 = vpop.f32.mrf.mxu3 }
  0xb8   : > { %v1027_v32 = vpop.f32.mrf.mxu0  ;;  %v1029_v33 = vpop.f32.mrf.mxu1  ;;  %v565_v34 = vpack.c.bf16 %v1023_v30, %v1023_v30  ;;  %v569_v37 = vpack.c.bf16 %v1025_v31, %v1025_v31  ;;  %v459_v3 = vsel %vm441_vm3, %v1023_v30, 0.0  ;;  %v467_v11 = vsel %vm441_vm3, %v1025_v31, 0.0 }
  0xb9   : > { %v558_v35 = vpack.c.bf16 %v1027_v32, %v1027_v32  ;;  %v562_v36 = vpack.c.bf16 %v1029_v33, %v1029_v33  ;;  %v445_v40 = vsel %vm441_vm3, %v1027_v32, 0.0  ;;  %v453_v57 = vsel %vm441_vm3, %v1029_v33, 0.0 }
  0xba   : > { %582 = vst.msk [vmem:[%s985_s16 + $0x24] sm:$0xf] %vm572_vm2, %v565_v34  ;;  %v446_v44 = vadd.f32 %v445_v40, %v444_v41 }
  0xbb   : > { %575 = vst.msk [vmem:[%s985_s16 + $0x8] sm:$0xf] %vm572_vm2, %v558_v35 }
  0xbc   : > { %579 = vst.msk [vmem:[%s985_s16 + $0x18] sm:$0xf] %vm572_vm2, %v562_v36 }
  0xbd   : > { %586 = vst.msk [vmem:[%s985_s16 + $0x34] sm:$0xf] %vm572_vm2, %v569_v37 }
  0xbf   : > { %v1053_v42 = vpop.f32.mrf.mxu2  ;;  %v1055_v43 = vpop.f32.mrf.mxu3 }
  0xc0   : > { %v408_v45 = vpop.f32.mrf.mxu0  ;;  %v1057_v46 = vpop.f32.mrf.mxu1  ;;  %v566_v47 = vpack.c.bf16 %v1053_v42, %v1053_v42  ;;  %v570_v51 = vpack.c.bf16 %v1055_v43, %v1055_v43  ;;  %v461_v5 = vsel %vm441_vm3, %v1053_v42, 0.0  ;;  %v469_v13 = vsel %vm441_vm3, %v1055_v43, 0.0 }
  0xc1   : > { %v447_v48 = vsel %vm441_vm3, %v408_v45, 0.0  ;;  %v559_v49 = vpack.c.bf16 %v408_v45, %v408_v45  ;;  %v563_v50 = vpack.c.bf16 %v1057_v46, %v1057_v46  ;;  %v455_v62 = vsel %vm441_vm3, %v1057_v46, 0.0 }
  0xc2   : > { %v448_v52 = vadd.f32 %v447_v48, %v446_v44  ;;  %583 = vst.msk [vmem:[%s985_s16 + $0x28] sm:$0xf] %vm572_vm2, %v566_v47 }
  0xc3   : > { %576 = vst.msk [vmem:[%s985_s16 + $0xc] sm:$0xf] %vm572_vm2, %v559_v49 }
  0xc4   : > { %v450_v54 = vadd.f32 %v449_v53, %v448_v52  ;;  %580 = vst.msk [vmem:[%s985_s16 + $0x1c] sm:$0xf] %vm572_vm2, %v563_v50 }
  0xc5   : > { %587 = vst.msk [vmem:[%s985_s16 + $0x38] sm:$0xf] %vm572_vm2, %v570_v51 }
  0xc6   : > { %v452_v56 = vadd.f32 %v451_v55, %v450_v54 }
  0xc7   : > { %v1080_v58 = vpop.f32.mrf.mxu2  ;;  %v1082_v59 = vpop.f32.mrf.mxu3 }
  0xc8   : > { %v454_v60 = vadd.f32 %v453_v57, %v452_v56  ;;  %v567_v61 = vpack.c.bf16 %v1080_v58, %v1080_v58  ;;  %v571_v63 = vpack.c.bf16 %v1082_v59, %v1082_v59  ;;  %v463_v7 = vsel %vm441_vm3, %v1080_v58, 0.0 }
  0xc9   : > { %v471_v15 = vsel %vm441_vm3, %v1082_v59, 0.0 }
  0xca   : > { %v456_v0 = vadd.f32 %v455_v62, %v454_v60  ;;  %584 = vst.msk [vmem:[%s985_s16 + $0x2c] sm:$0xf] %vm572_vm2, %v567_v61 }
  0xcb   : > { %588 = vst.msk [vmem:[%s985_s16 + $0x3c] sm:$0xf] %vm572_vm2, %v571_v63 }
  0xcc   : > { %v458_v2 = vadd.f32 %v457_v1, %v456_v0 }
  0xce   : > { %v460_v4 = vadd.f32 %v459_v3, %v458_v2 }
  0xd0   : > { %v462_v6 = vadd.f32 %v461_v5, %v460_v4 }
  0xd2   : > { %v464_v8 = vadd.f32 %v463_v7, %v462_v6 }
  0xd4   : > { %v466_v10 = vadd.f32 %v465_v9, %v464_v8 }
  0xd6   : > { %v468_v12 = vadd.f32 %v467_v11, %v466_v10 }
  0xd8   : > { %v470_v14 = vadd.f32 %v469_v13, %v468_v12 }
  0xda   : > { %v472_v16 = vadd.f32 %v471_v15, %v470_v14 }
  0xdc   : > { %v473_v17 = vrot.slane %v472_v16, 4 }
  0xde   : > { %v474_v20 = vadd.f32 %v473_v17, %v472_v16 }
  0xe0   : > { %v475_v21 = vrot.slane %v474_v20, 2 }
  0xe2   : > { %v476_v26 = vadd.f32 %v475_v21, %v474_v20 }
  0xe4   : > { %v477_v27 = vrot.slane %v476_v26, 1 }
  0xe6   : > { %v1110_v28 = vadd.f32 %v477_v27, %v476_v26 }
  0xe8   : > { %v479_v29 = vmul.f32 0.0078125, %v1110_v28 }
  0xea   : > { %v480_v34 = vsub.f32 %v987_v18, %v479_v29  ;;  %v481_v35 = vsub.f32 %v1003_v24, %v479_v29  ;;  %v482_v36 = vsub.f32 %v1027_v32, %v479_v29  ;;  %v483_v37 = vsub.f32 %v408_v45, %v479_v29 }
  0xeb   : > { %v484_v40 = vsub.f32 %v989_v19, %v479_v29  ;;  %v485_v44 = vsub.f32 %v1005_v25, %v479_v29  ;;  %v486_v18 = vsub.f32 %v1029_v33, %v479_v29  ;;  %v487_v45 = vsub.f32 %v1057_v46, %v479_v29 }
  0xec   : > { %v496_v38 = vmul.f32 %v480_v34, %v480_v34  ;;  %v497_v39 = vmul.f32 %v481_v35, %v481_v35  ;;  %v498_v41 = vmul.f32 %v482_v36, %v482_v36  ;;  %v499_v47 = vmul.f32 %v483_v37, %v483_v37 }
  0xed   : > { %v500_v51 = vmul.f32 %v484_v40, %v484_v40  ;;  %v501_v52 = vmul.f32 %v485_v44, %v485_v44  ;;  %v488_v25 = vsub.f32 %v999_v22, %v479_v29  ;;  %v502_v54 = vmul.f32 %v486_v18, %v486_v18 }
  0xee   : > { %v512_v48 = vsel %vm441_vm3, %v496_v38, 0.0  ;;  %v513_v49 = vsel %vm441_vm3, %v497_v39, 0.0  ;;  %v515_v24 = vsel %vm441_vm3, %v498_v41, 0.0  ;;  %v517_v19 = vsel %vm441_vm3, %v499_v47, 0.0 }
  0xef   : > { %v514_v50 = vadd.f32 %v513_v49, %v512_v48  ;;  %v519_v55 = vsel %vm441_vm3, %v500_v51, 0.0  ;;  %v489_v57 = vsub.f32 %v1023_v30, %v479_v29  ;;  %v503_v60 = vmul.f32 %v487_v45, %v487_v45 }
  0xf0   : > { %v521_v33 = vsel %vm441_vm3, %v501_v52, 0.0  ;;  %v490_v62 = vsub.f32 %v1053_v42, %v479_v29  ;;  %v504_v63 = vmul.f32 %v488_v25, %v488_v25  ;;  %v523_v46 = vsel %vm441_vm3, %v502_v54, 0.0 }
  0xf1   : > { %v516_v32 = vadd.f32 %v515_v24, %v514_v50  ;;  %v491_v1 = vsub.f32 %v1080_v58, %v479_v29  ;;  %v505_v2 = vmul.f32 %v489_v57, %v489_v57  ;;  %v525_v22 = vsel %vm441_vm3, %v503_v60, 0.0 }
  0xf2   : > { %v492_v4 = vsub.f32 %v1001_v23, %v479_v29  ;;  %v506_v5 = vmul.f32 %v490_v62, %v490_v62  ;;  %v527_v30 = vsel %vm441_vm3, %v504_v63, 0.0  ;;  %v493_v7 = vsub.f32 %v1025_v31, %v479_v29 }
  0xf3   : > { %v518_v53 = vadd.f32 %v517_v19, %v516_v32  ;;  %v507_v8 = vmul.f32 %v491_v1, %v491_v1  ;;  %v529_v42 = vsel %vm441_vm3, %v505_v2, 0.0  ;;  %v494_v10 = vsub.f32 %v1055_v43, %v479_v29 }
  0xf4   : > { %v508_v11 = vmul.f32 %v492_v4, %v492_v4  ;;  %v531_v58 = vsel %vm441_vm3, %v506_v5, 0.0  ;;  %v495_v13 = vsub.f32 %v1082_v59, %v479_v29  ;;  %v509_v23 = vmul.f32 %v493_v7, %v493_v7 }
  0xf5   : > { %v520_v56 = vadd.f32 %v519_v55, %v518_v53  ;;  %v533_v14 = vsel %vm441_vm3, %v507_v8, 0.0  ;;  %v510_v16 = vmul.f32 %v494_v10, %v494_v10  ;;  %v549_v29 = vlaneseq }
  0xf6   : > { %v535_v31 = vsel %vm441_vm3, %v508_v11, 0.0  ;;  %v511_v20 = vmul.f32 %v495_v13, %v495_v13  ;;  %v537_v21 = vsel %vm441_vm3, %v509_v23, 0.0 }
  0xf7   : > { %v522_v61 = vadd.f32 %v521_v33, %v520_v56  ;;  %v539_v26 = vsel %vm441_vm3, %v510_v16, 0.0  ;;  %v550_v38 = vshrl.u32 %v549_v29, 7 }
  0xf8   : > { %v541_v34 = vsel %vm441_vm3, %v511_v20, 0.0 }
  0xf9   : > { %v524_v0 = vadd.f32 %v523_v46, %v522_v61  ;;  %vm552_vm4 = vcmp.eq.s32.totalorder %v550_v38, 1  ;;  %vm551_vm5 = vcmp.eq.s32.totalorder %v550_v38, 0 }
  0xfb   : > { %v526_v3 = vadd.f32 %v525_v22, %v524_v0 }
  0xfd   : > { %v528_v6 = vadd.f32 %v527_v30, %v526_v3 }
  0xff   : > { %v530_v9 = vadd.f32 %v529_v42, %v528_v6 }
 0x101   : > { %v532_v12 = vadd.f32 %v531_v58, %v530_v9 }
 0x103   : > { %v534_v15 = vadd.f32 %v533_v14, %v532_v12 }
 0x105   : > { %v536_v17 = vadd.f32 %v535_v31, %v534_v15 }
 0x107   : > { %v538_v43 = vadd.f32 %v537_v21, %v536_v17 }
 0x109   : > { %v540_v27 = vadd.f32 %v539_v26, %v538_v43 }
 0x10b   : > { %v542_v35 = vadd.f32 %v541_v34, %v540_v27 }
 0x10d   : > { %v543_v59 = vrot.slane %v542_v35, 4 }
 0x10f   : > { %v544_v36 = vadd.f32 %v543_v59, %v542_v35 }
 0x111   : > { %v545_v37 = vrot.slane %v544_v36, 2 }
 0x113   : > { %v546_v39 = vadd.f32 %v545_v37, %v544_v36 }
 0x115   : > { %v547_v40 = vrot.slane %v546_v39, 1 }
 0x117   : > { %v548_v41 = vadd.f32 %v547_v40, %v546_v39 }
 0x119   : > { %v553_v44 = vsel %vm552_vm4, %v548_v41, 0.0 }
 0x11a   : > { %v554_v47 = vsel %vm551_vm5, %v1110_v28, %v553_v44 }
 0x11b   : > { %555 = vst.msk [vmem:[%s250_s20] sm:$0xff] %vm441_vm3, %v554_v47 }
 0x11c PF: > { %s14_s14 = sadd.s32 1, %s901_s14   ;;  %s1164_s12 = smov %s897_s13 }
 0x11d   : > { %p11_p6 = scmp.ge.s32.totalorder %s14_s14, 4   ;;  %s1165_s13 = smov %s1167_s15 }
 0x11f   :  { %13 = sbr.rel (!%p11_p6) target bundleno = 2 (0x2), region = 73 }

// kernel: hourglass_forward.20
= control target key start
LH: loop header
LB: loop body
LE: loop exit
PB: predicated region body
PF: predicated region fallthrough
CT: control target
= control target key end

     0   :  { %s1128_s12 = smov 0   ;;  %s1130_s13 = smov 0   ;;  %s1418_s0 = inlined_call_operand.vmem [shape: bf16[1,256,216], index: 0, kind: input, shape index: {}]   ;;  %s1419_s1 = inlined_call_operand.vmem [shape: bf16[1,216,8], index: 1, kind: input, shape index: {}]   ;;  %s1420_s2 = inlined_call_operand.vmem [shape: bf16[1,256,8], index: 2, kind: output, shape index: {0}]   ;;  %s1421_s3 = inlined_call_operand.vmem [shape: f32[1,2,8,8], index: 3, kind: output, shape index: {1}]  }
   0x1   :  { %s1132_s14 = smov 0  }
   0x2 LB: > { %s23_s15 = sadd.s32 1, %s1102_s13  ;;  %p883_p0 = scmp.ge.s32.totalorder %s1106_s14, 1  ;;  %s1106_s14 = sphi %s1132_s14, %s14_s14   ;;  %s1102_s13 = sphi %s1130_s13, %s1423_s13   ;;  %s1098_s12 = sphi %s1128_s12, %s1422_s12  }
   0x3   : > { %p24_p1 = scmp.ge.s32.totalorder %s23_s15, 2  ;;  %p174_p2 = scmp.lt.s32.totalorder %s1106_s14, 3 }
   0x5   : > { %s1425_s15 = smov (%p24_p1, %s23_s15), 0  ;;  %p175_p3 = pnand %p883_p0, %p174_p2 }
   0x6   : > { %s884_s22 = sshll.u32 (!%p175_p3), %s1098_s12, 4  ;;  %p248_p5 = scmp.lt.s32.totalorder (!%p175_p3), %s1098_s12, 1 }
   0x7   : > { %178 = sbr.rel (%p175_p3) target bundleno = 320 (0x140), region = 28  ;;  %p223_p4 = scmp.lt.s32.totalorder (!%p175_p3), %s884_s22, 31 }
   0xc   : > { %v1040_v0 = vld [vmem:[%s1419_s1 + $0x38] sm:$0xff]  ;;  %v297_v1 = vld [vmem:[%s1419_s1 + $0x68] sm:$0xf]  ;;  %vm476_vm0 = vcmask 1043456   ;;  %v1039_v3 = vld [vmem:[%s1419_s1 + $0x30] sm:$0xff]  ;;  %s1427_s22 = smov (!%p223_p4, %s884_s22), 31 }
   0xd   : > { %v423_v2 = vunpack.c.l.b16 %v297_v1  ;;  %480 = vmatpush.bf16.msra.mxu0 %v1040_v0  ;;  %1046 = vmatpush.bf16.msra.mxu2 %v1040_v0  ;;  %v1045_v6 = vld [vmem:[%s1419_s1 + $0x60] sm:$0xff]  ;;  %v1038_v7 = vld [vmem:[%s1419_s1 + $0x28] sm:$0xff]  ;;  %v1044_v8 = vld [vmem:[%s1419_s1 + $0x58] sm:$0xff]  ;;  %s1016_s8 = sshll.u32 %s1427_s22, 3  ;;  %vm451_vm1 = vcmask 719872   ;;  %s888_s27 = sshll.u32 %s1427_s22, 2 }
   0xe   : > { %v1037_v9 = vld [vmem:[%s1419_s1 + $0x20] sm:$0xff]  ;;  %v1043_v10 = vld [vmem:[%s1419_s1 + $0x50] sm:$0xff]  ;;  %v1036_v11 = vld [vmem:[%s1419_s1 + $0x18] sm:$0xff]  ;;  %s1188_s19 = scalar_lea.vmem %s1418_s0, %s1016_s8  ;;  %s1245_s30 = scalar_lea.vmem %s1420_s2, %s888_s27  ;;  %vm709_vm2 = vcmask 60416   ;;  %vm578_vm3 = vcmask 64512  }
   0xf   : > { %v437_v4 = vpack.c.b16 %v423_v2, %v423_v2  ;;  %v1042_v12 = vld [vmem:[%s1419_s1 + $0x48] sm:$0xff]  ;;  %v1035_v13 = vld [vmem:[%s1419_s1 + $0x10] sm:$0xff]  ;;  %v1041_v14 = vld [vmem:[%s1419_s1 + $0x40] sm:$0xff]  ;;  %s1429_s12 = smov (!%p248_p5, %s1098_s12), 1 }
  0x10   : > { %v1034_v15 = vld [vmem:[%s1419_s1 + $0x8] sm:$0xff]  ;;  %v1017_v16 = vld [vmem:[%s1188_s19 + $0x4] sm:$0xf]  ;;  %v1027_v18 = vld [vmem:[%s1188_s19 + $0x54] sm:$0xf]  ;;  %s889_s22 = sshll.u32 %s1429_s12, 3 }
  0x11   : > { %v478_v5 = vsel %vm476_vm0, %v437_v4, 0  ;;  %481 = vmatpush.bf16.msra.mxu0 %v1039_v3  ;;  %1047 = vmatpush.bf16.msra.mxu2 %v1039_v3  ;;  %v894_v17 = vld [vmem:[%s1188_s19 + $0x8] sm:$0xf0]  ;;  %v934_v19 = vld [vmem:[%s1188_s19 + $0x58] sm:$0xf0]  ;;  %v1033_v21 = vld [vmem:[%s1419_s1] sm:$0xff]  ;;  %s253_s6 = scalar_lea.vmem %s1421_s3, %s889_s22 }
  0x12   : > { %531 = vmatpush.bf16.msra.mxu1 %v478_v5  ;;  %1054 = vmatpush.bf16.msra.mxu3 %v478_v5  ;;  %v897_v20 = vor.u32 %v1017_v16, %v894_v17  ;;  %v892_v22 = vld [vmem:[%s1188_s19] sm:$0xf]  ;;  %v1018_v23 = vld [vmem:[%s1188_s19 + $0x4] sm:$0xf0]  ;;  %v937_v24 = vor.u32 %v1027_v18, %v934_v19  ;;  %v1019_v29 = vld [vmem:[%s1188_s19 + $0x14] sm:$0xf] }
  0x13   : > { %v924_v25 = vld [vmem:[%s1188_s19 + $0x40] sm:$0xf]  ;;  %v1026_v26 = vld [vmem:[%s1188_s19 + $0x44] sm:$0xf0]  ;;  %v893_v27 = vor.u32 %v1018_v23, %v892_v22  ;;  %v902_v30 = vld [vmem:[%s1188_s19 + $0x18] sm:$0xf0] }
  0x14   : > { %v925_v28 = vor.u32 %v1026_v26, %v924_v25  ;;  %v1029_v31 = vld [vmem:[%s1188_s19 + $0x64] sm:$0xf]  ;;  %v942_v32 = vld [vmem:[%s1188_s19 + $0x68] sm:$0xf0]  ;;  %v905_v33 = vor.u32 %v1019_v29, %v902_v30  ;;  %v900_v34 = vld [vmem:[%s1188_s19 + $0x10] sm:$0xf] }
  0x15   : > { %482 = vmatpush.bf16.msra.mxu0 %v1038_v7  ;;  %1048 = vmatpush.bf16.msra.mxu2 %v1038_v7  ;;  %v1020_v35 = vld [vmem:[%s1188_s19 + $0x14] sm:$0xf0]  ;;  %v945_v36 = vor.u32 %v1029_v31, %v942_v32  ;;  %v932_v37 = vld [vmem:[%s1188_s19 + $0x50] sm:$0xf]  ;;  %v1021_v41 = vld [vmem:[%s1188_s19 + $0x24] sm:$0xf] }
  0x16   : > { %532 = vmatpush.bf16.msra.mxu1 %v1045_v6  ;;  %1055 = vmatpush.bf16.msra.mxu3 %v1045_v6  ;;  %v1028_v38 = vld [vmem:[%s1188_s19 + $0x54] sm:$0xf0]  ;;  %v901_v39 = vor.u32 %v1020_v35, %v900_v34  ;;  %v910_v42 = vld [vmem:[%s1188_s19 + $0x28] sm:$0xf0]  ;;  %v1031_v43 = vld [vmem:[%s1188_s19 + $0x74] sm:$0xf] }
  0x17   : > { %v933_v40 = vor.u32 %v1028_v38, %v932_v37  ;;  %v950_v44 = vld [vmem:[%s1188_s19 + $0x78] sm:$0xf0]  ;;  %v913_v45 = vor.u32 %v1021_v41, %v910_v42  ;;  %v908_v46 = vld [vmem:[%s1188_s19 + $0x20] sm:$0xf]  ;;  %v1022_v47 = vld [vmem:[%s1188_s19 + $0x24] sm:$0xf0] }
  0x18   : > { %v953_v48 = vor.u32 %v1031_v43, %v950_v44  ;;  %v940_v49 = vld [vmem:[%s1188_s19 + $0x60] sm:$0xf]  ;;  %v1030_v50 = vld [vmem:[%s1188_s19 + $0x64] sm:$0xf0]  ;;  %v909_v51 = vor.u32 %v1022_v47, %v908_v46  ;;  %v1023_v53 = vld [vmem:[%s1188_s19 + $0x34] sm:$0xf] }
  0x19   : > { %483 = vmatpush.bf16.msra.mxu0 %v1037_v9  ;;  %1049 = vmatpush.bf16.msra.mxu2 %v1037_v9  ;;  %v941_v52 = vor.u32 %v1030_v50, %v940_v49  ;;  %v918_v54 = vld [vmem:[%s1188_s19 + $0x38] sm:$0xf0]  ;;  %v916_v56 = vld [vmem:[%s1188_s19 + $0x30] sm:$0xf]  ;;  %v1024_v57 = vld [vmem:[%s1188_s19 + $0x34] sm:$0xf0] }
  0x1a   : > { %533 = vmatpush.bf16.msra.mxu1 %v1044_v8  ;;  %1056 = vmatpush.bf16.msra.mxu3 %v1044_v8  ;;  %v921_v55 = vor.u32 %v1023_v53, %v918_v54  ;;  %v948_v58 = vld [vmem:[%s1188_s19 + $0x70] sm:$0xf]  ;;  %v1032_v59 = vld [vmem:[%s1188_s19 + $0x74] sm:$0xf0]  ;;  %v917_v60 = vor.u32 %v1024_v57, %v916_v56  ;;  %v1025_v62 = vld [vmem:[%s1188_s19 + $0x44] sm:$0xf] }
  0x1b   : > { %v949_v61 = vor.u32 %v1032_v59, %v948_v58  ;;  %v926_v63 = vld [vmem:[%s1188_s19 + $0x48] sm:$0xf0] }
  0x1c   : > { %v929_v0 = vor.u32 %v1025_v62, %v926_v63 }
  0x1d   : > { %484 = vmatpush.bf16.msra.mxu0 %v1036_v11  ;;  %1050 = vmatpush.bf16.msra.mxu2 %v1036_v11 }
  0x1e   : > { %534 = vmatpush.bf16.msra.mxu1 %v1043_v10  ;;  %1057 = vmatpush.bf16.msra.mxu3 %v1043_v10 }
  0x21   : > { %485 = vmatpush.bf16.msra.mxu0 %v1035_v13  ;;  %1051 = vmatpush.bf16.msra.mxu2 %v1035_v13 }
  0x22   : > { %535 = vmatpush.bf16.msra.mxu1 %v1042_v12  ;;  %1058 = vmatpush.bf16.msra.mxu3 %v1042_v12 }
  0x25   : > { %486 = vmatpush.bf16.msra.mxu0 %v1034_v15  ;;  %1052 = vmatpush.bf16.msra.mxu2 %v1034_v15 }
  0x26   : > { %536 = vmatpush.bf16.msra.mxu1 %v1041_v14  ;;  %1059 = vmatpush.bf16.msra.mxu3 %v1041_v14 }
  0x29   : > { %1006 = vmatmul.msk.bf16.vlgmr.msra.gmra.mxu1 %vm451_vm1, %v897_v20  ;;  %487 = vmatpush.bf16.msra.mxu0 %v1033_v21 }
  0x2a   : > { %1011 = vmatmul.msk.bf16.vlgmr.msra.gmra.mxu3 %vm451_vm1, %v937_v24  ;;  %1053 = vmatpush.bf16.msra.mxu2 %v1033_v21 }
  0x2c   : > { %488 = vmatmul.bf16.vlgmr.msra.gmra.mxu0 %v893_v27 }
  0x2d   : > { %508 = vmatmul.bf16.vlgmr.msra.gmra.mxu2 %v925_v28 }
  0x39   : > { %1007 = vmatmul.msk.bf16.gmra.mxu1 %vm451_vm1, %v905_v33 }
  0x3a   : > { %1012 = vmatmul.msk.bf16.gmra.mxu3 %vm451_vm1, %v945_v36 }
  0x3c   : > { %493 = vmatmul.bf16.gmra.mxu0 %v901_v39 }
  0x3d   : > { %513 = vmatmul.bf16.gmra.mxu2 %v933_v40 }
  0x49   : > { %1008 = vmatmul.msk.bf16.gmra.mxu1 %vm451_vm1, %v913_v45 }
  0x4a   : > { %1013 = vmatmul.msk.bf16.gmra.mxu3 %vm451_vm1, %v953_v48 }
  0x4c   : > { %498 = vmatmul.bf16.gmra.mxu0 %v909_v51 }
  0x4d   : > { %518 = vmatmul.bf16.gmra.mxu2 %v941_v52 }
  0x59   : > { %1009 = vmatmul.msk.bf16.gmra.mxu1 %vm451_vm1, %v921_v55 }
  0x5c   : > { %503 = vmatmul.bf16.gmra.mxu0 %v917_v60 }
  0x5d   : > { %523 = vmatmul.bf16.gmra.mxu2 %v949_v61 }
  0x69   : > { %1010 = vmatmul.msk.bf16.gmra.mxu1 %vm451_vm1, %v929_v0 }
  0xa6   : > { %v538_v1 = vpop.f32.mrf.mxu1 }
  0xa9   : > { %v489_v2 = vpop.f32.mrf.mxu0 }
  0xaa   : > { %v1240_v3 = vadd.f32 %v538_v1, %v489_v2 }
  0xac   : > { %v693_v4 = vpack.c.bf16 %v1240_v3, %v1240_v3  ;;  %v579_v50 = vsel %vm578_vm3, %v1240_v3, 0.0 }
  0xad   : > { %v563_v10 = vpop.f32.mrf.mxu3 }
  0xae   : > { %v540_v5 = vpop.f32.mrf.mxu1  ;;  %710 = vst.msk [vmem:[%s1245_s30] sm:$0xf] %vm709_vm2, %v693_v4 }
  0xb0   : > { %v1251_v6 = vpop.f32.mrf.mxu2 }
  0xb1   : > { %v491_v7 = vpop.f32.mrf.mxu0 }
  0xb2   : > { %v1253_v8 = vadd.f32 %v540_v5, %v491_v7 }
  0xb4   : > { %v694_v9 = vpack.c.bf16 %v1253_v8, %v1253_v8  ;;  %v580_v49 = vsel %vm578_vm3, %v1253_v8, 0.0 }
  0xb5   : > { %v565_v17 = vpop.f32.mrf.mxu3  ;;  %v581_v53 = vadd.f32 %v580_v49, %v579_v50 }
  0xb6   : > { %v543_v11 = vpop.f32.mrf.mxu1  ;;  %711 = vst.msk [vmem:[%s1245_s30 + $0x4] sm:$0xf] %vm709_vm2, %v694_v9 }
  0xb8   : > { %v1259_v12 = vpop.f32.mrf.mxu2 }
  0xb9   : > { %v494_v13 = vpop.f32.mrf.mxu0 }
  0xba   : > { %v1261_v14 = vadd.f32 %v543_v11, %v494_v13 }
  0xbc   : > { %v695_v15 = vpack.c.bf16 %v1261_v14, %v1261_v14  ;;  %v582_v51 = vsel %vm578_vm3, %v1261_v14, 0.0 }
  0xbd   : > { %v568_v26 = vpop.f32.mrf.mxu3  ;;  %v583_v58 = vadd.f32 %v582_v51, %v581_v53 }
  0xbe   : > { %v545_v16 = vpop.f32.mrf.mxu1  ;;  %712 = vst.msk [vmem:[%s1245_s30 + $0x8] sm:$0xf] %vm709_vm2, %v695_v15 }
  0xc0   : > { %v514_v18 = vpop.f32.mrf.mxu2 }
  0xc1   : > { %v496_v19 = vpop.f32.mrf.mxu0  ;;  %v1267_v20 = vadd.f32 %v563_v10, %v514_v18 }
  0xc2   : > { %v1269_v21 = vadd.f32 %v545_v16, %v496_v19 }
  0xc3   : > { %v703_v22 = vpack.c.bf16 %v1267_v20, %v1267_v20 }
  0xc4   : > { %v696_v23 = vpack.c.bf16 %v1269_v21, %v1269_v21  ;;  %v584_v56 = vsel %vm578_vm3, %v1269_v21, 0.0 }
  0xc5   : > { %720 = vst.msk [vmem:[%s1245_s30 + $0x28] sm:$0xf] %vm709_vm2, %v703_v22  ;;  %v570_v37 = vpop.f32.mrf.mxu3  ;;  %v585_v62 = vadd.f32 %v584_v56, %v583_v58 }
  0xc6   : > { %v548_v24 = vpop.f32.mrf.mxu1  ;;  %713 = vst.msk [vmem:[%s1245_s30 + $0xc] sm:$0xf] %vm709_vm2, %v696_v23 }
  0xc8   : > { %v516_v25 = vpop.f32.mrf.mxu2 }
  0xc9   : > { %v499_v27 = vpop.f32.mrf.mxu0  ;;  %v1279_v28 = vadd.f32 %v565_v17, %v516_v25 }
  0xca   : > { %v1281_v29 = vadd.f32 %v548_v24, %v499_v27 }
  0xcb   : > { %v704_v30 = vpack.c.bf16 %v1279_v28, %v1279_v28 }
  0xcc   : > { %v697_v31 = vpack.c.bf16 %v1281_v29, %v1281_v29  ;;  %v586_v60 = vsel %vm578_vm3, %v1281_v29, 0.0 }
  0xcd   : > { %721 = vst.msk [vmem:[%s1245_s30 + $0x2c] sm:$0xf] %vm709_vm2, %v704_v30  ;;  %v573_v47 = vpop.f32.mrf.mxu3  ;;  %v587_v4 = vadd.f32 %v586_v60, %v585_v62  ;;  %v600_v30 = vsel %vm578_vm3, %v1279_v28, 0.0 }
  0xce   : > { %v550_v32 = vpop.f32.mrf.mxu1  ;;  %714 = vst.msk [vmem:[%s1245_s30 + $0x10] sm:$0xf] %vm709_vm2, %v697_v31 }
  0xd0   : > { %v519_v33 = vpop.f32.mrf.mxu2 }
  0xd1   : > { %v501_v34 = vpop.f32.mrf.mxu0  ;;  %v1291_v35 = vadd.f32 %v568_v26, %v519_v33  ;;  %v598_v26 = vsel %vm578_vm3, %v1267_v20, 0.0 }
  0xd2   : > { %v1293_v36 = vadd.f32 %v550_v32, %v501_v34 }
  0xd3   : > { %v705_v38 = vpack.c.bf16 %v1291_v35, %v1291_v35  ;;  %v602_v32 = vsel %vm578_vm3, %v1291_v35, 0.0 }
  0xd4   : > { %v698_v39 = vpack.c.bf16 %v1293_v36, %v1293_v36  ;;  %v588_v0 = vsel %vm578_vm3, %v1293_v36, 0.0 }
  0xd5   : > { %722 = vst.msk [vmem:[%s1245_s30 + $0x30] sm:$0xf] %vm709_vm2, %v705_v38  ;;  %v575_v2 = vpop.f32.mrf.mxu3  ;;  %v589_v10 = vadd.f32 %v588_v0, %v587_v4 }
  0xd6   : > { %v553_v40 = vpop.f32.mrf.mxu1  ;;  %715 = vst.msk [vmem:[%s1245_s30 + $0x14] sm:$0xf] %vm709_vm2, %v698_v39 }
  0xd8   : > { %v521_v41 = vpop.f32.mrf.mxu2 }
  0xd9   : > { %v504_v42 = vpop.f32.mrf.mxu0  ;;  %v1303_v43 = vadd.f32 %v570_v37, %v521_v41 }
  0xda   : > { %v1305_v44 = vadd.f32 %v553_v40, %v504_v42 }
  0xdb   : > { %v706_v45 = vpack.c.bf16 %v1303_v43, %v1303_v43 }
  0xdc   : > { %v699_v46 = vpack.c.bf16 %v1305_v44, %v1305_v44  ;;  %v590_v5 = vsel %vm578_vm3, %v1305_v44, 0.0 }
  0xdd   : > { %723 = vst.msk [vmem:[%s1245_s30 + $0x34] sm:$0xf] %vm709_vm2, %v706_v45  ;;  %v591_v15 = vadd.f32 %v590_v5, %v589_v10 }
  0xde   : > { %v555_v48 = vpop.f32.mrf.mxu1  ;;  %716 = vst.msk [vmem:[%s1245_s30 + $0x18] sm:$0xf] %vm709_vm2, %v699_v46 }
  0xe0   : > { %v524_v52 = vpop.f32.mrf.mxu2 }
  0xe1   : > { %v506_v54 = vpop.f32.mrf.mxu0  ;;  %v1321_v55 = vadd.f32 %v573_v47, %v524_v52 }
  0xe2   : > { %v1325_v57 = vadd.f32 %v555_v48, %v506_v54 }
  0xe3   : > { %v707_v59 = vpack.c.bf16 %v1321_v55, %v1321_v55  ;;  %v606_v37 = vsel %vm578_vm3, %v1321_v55, 0.0 }
  0xe4   : > { %v700_v61 = vpack.c.bf16 %v1325_v57, %v1325_v57  ;;  %v592_v13 = vsel %vm578_vm3, %v1325_v57, 0.0 }
  0xe5   : > { %724 = vst.msk [vmem:[%s1245_s30 + $0x38] sm:$0xf] %vm709_vm2, %v707_v59  ;;  %v593_v17 = vadd.f32 %v592_v13, %v591_v15 }
  0xe6   : > { %v558_v63 = vpop.f32.mrf.mxu1  ;;  %717 = vst.msk [vmem:[%s1245_s30 + $0x1c] sm:$0xf] %vm709_vm2, %v700_v61 }
  0xe7   : > { %v559_v1 = vadd.f32 %v558_v63, %v1251_v6 }
  0xe8   : > { %v526_v9 = vpop.f32.mrf.mxu2 }
  0xe9   : > { %v701_v7 = vpack.c.bf16 %v559_v1, %v559_v1  ;;  %v1342_v11 = vadd.f32 %v575_v2, %v526_v9  ;;  %v594_v16 = vsel %vm578_vm3, %v559_v1, 0.0 }
  0xea   : > { %v595_v22 = vadd.f32 %v594_v16, %v593_v17 }
  0xeb   : > { %718 = vst.msk [vmem:[%s1245_s30 + $0x20] sm:$0xf] %vm709_vm2, %v701_v7  ;;  %v708_v6 = vpack.c.bf16 %v1342_v11, %v1342_v11  ;;  %v608_v39 = vsel %vm578_vm3, %v1342_v11, 0.0 }
  0xed   : > { %725 = vst.msk [vmem:[%s1245_s30 + $0x3c] sm:$0xf] %vm709_vm2, %v708_v6 }
  0xee   : > { %v560_v18 = vpop.f32.mrf.mxu1 }
  0xef   : > { %v561_v19 = vadd.f32 %v560_v18, %v1259_v12  ;;  %v604_v12 = vsel %vm578_vm3, %v1303_v43, 0.0 }
  0xf1   : > { %v596_v23 = vsel %vm578_vm3, %v561_v19, 0.0  ;;  %v702_v24 = vpack.c.bf16 %v561_v19, %v561_v19 }
  0xf2   : > { %v597_v25 = vadd.f32 %v596_v23, %v595_v22 }
  0xf3   : > { %719 = vst.msk [vmem:[%s1245_s30 + $0x24] sm:$0xf] %vm709_vm2, %v702_v24 }
  0xf4   : > { %v599_v27 = vadd.f32 %v598_v26, %v597_v25 }
  0xf6   : > { %v601_v31 = vadd.f32 %v600_v30, %v599_v27 }
  0xf8   : > { %v603_v33 = vadd.f32 %v602_v32, %v601_v31 }
  0xfa   : > { %v605_v34 = vadd.f32 %v604_v12, %v603_v33 }
  0xfc   : > { %v607_v38 = vadd.f32 %v606_v37, %v605_v34 }
  0xfe   : > { %v609_v40 = vadd.f32 %v608_v39, %v607_v38 }
 0x100   : > { %v610_v41 = vrot.slane %v609_v40, 4 }
 0x102   : > { %v611_v42 = vadd.f32 %v610_v41, %v609_v40 }
 0x104   : > { %v612_v45 = vrot.slane %v611_v42, 2 }
 0x106   : > { %v613_v46 = vadd.f32 %v612_v45, %v611_v42 }
 0x108   : > { %v614_v47 = vrot.slane %v613_v46, 1 }
 0x10a   : > { %v1369_v48 = vadd.f32 %v614_v47, %v613_v46 }
 0x10c   : > { %v616_v49 = vmul.f32 0.0078125, %v1369_v48 }
 0x10e   : > { %v617_v50 = vsub.f32 %v1240_v3, %v616_v49  ;;  %v618_v51 = vsub.f32 %v1253_v8, %v616_v49  ;;  %v619_v52 = vsub.f32 %v1261_v14, %v616_v49  ;;  %v620_v53 = vsub.f32 %v1269_v21, %v616_v49 }
 0x10f   : > { %v621_v58 = vsub.f32 %v1281_v29, %v616_v49  ;;  %v622_v60 = vsub.f32 %v1293_v36, %v616_v49  ;;  %v623_v3 = vsub.f32 %v1305_v44, %v616_v49  ;;  %v624_v21 = vsub.f32 %v1325_v57, %v616_v49 }
 0x110   : > { %v633_v54 = vmul.f32 %v617_v50, %v617_v50  ;;  %v634_v56 = vmul.f32 %v618_v51, %v618_v51  ;;  %v635_v59 = vmul.f32 %v619_v52, %v619_v52  ;;  %v636_v61 = vmul.f32 %v620_v53, %v620_v53 }
 0x111   : > { %v637_v8 = vmul.f32 %v621_v58, %v621_v58  ;;  %v638_v4 = vmul.f32 %v622_v60, %v622_v60  ;;  %v625_v7 = vsub.f32 %v559_v1, %v616_v49  ;;  %v639_v36 = vmul.f32 %v623_v3, %v623_v3 }
 0x112   : > { %v649_v62 = vsel %vm578_vm3, %v633_v54, 0.0  ;;  %v650_v63 = vsel %vm578_vm3, %v634_v56, 0.0  ;;  %v652_v14 = vsel %vm578_vm3, %v635_v59, 0.0  ;;  %v654_v29 = vsel %vm578_vm3, %v636_v61, 0.0 }
 0x113   : > { %v651_v0 = vadd.f32 %v650_v63, %v649_v62  ;;  %v656_v9 = vsel %vm578_vm3, %v637_v8, 0.0  ;;  %v626_v13 = vsub.f32 %v561_v19, %v616_v49  ;;  %v640_v15 = vmul.f32 %v624_v21, %v624_v21 }
 0x114   : > { %v658_v6 = vsel %vm578_vm3, %v638_v4, 0.0  ;;  %v627_v16 = vsub.f32 %v1267_v20, %v616_v49  ;;  %v641_v17 = vmul.f32 %v625_v7, %v625_v7  ;;  %v660_v18 = vsel %vm578_vm3, %v639_v36, 0.0 }
 0x115   : > { %v653_v2 = vadd.f32 %v652_v14, %v651_v0  ;;  %v628_v22 = vsub.f32 %v1279_v28, %v616_v49  ;;  %v642_v23 = vmul.f32 %v626_v13, %v626_v13  ;;  %v662_v1 = vsel %vm578_vm3, %v640_v15, 0.0 }
 0x116   : > { %v629_v25 = vsub.f32 %v1291_v35, %v616_v49  ;;  %v643_v26 = vmul.f32 %v627_v16, %v627_v16  ;;  %v664_v19 = vsel %vm578_vm3, %v641_v17, 0.0  ;;  %v630_v30 = vsub.f32 %v1303_v43, %v616_v49 }
 0x117   : > { %v655_v5 = vadd.f32 %v654_v29, %v653_v2  ;;  %v644_v31 = vmul.f32 %v628_v22, %v628_v22  ;;  %v666_v20 = vsel %vm578_vm3, %v642_v23, 0.0  ;;  %v631_v33 = vsub.f32 %v1321_v55, %v616_v49 }
 0x118   : > { %v645_v12 = vmul.f32 %v629_v25, %v629_v25  ;;  %v668_v28 = vsel %vm578_vm3, %v643_v26, 0.0  ;;  %v632_v37 = vsub.f32 %v1342_v11, %v616_v49  ;;  %v646_v35 = vmul.f32 %v630_v30, %v630_v30 }
 0x119   : > { %v657_v10 = vadd.f32 %v656_v9, %v655_v5  ;;  %v670_v38 = vsel %vm578_vm3, %v644_v31, 0.0  ;;  %v647_v40 = vmul.f32 %v631_v33, %v631_v33  ;;  %v686_v49 = vlaneseq }
 0x11a   : > { %v672_v43 = vsel %vm578_vm3, %v645_v12, 0.0  ;;  %v648_v42 = vmul.f32 %v632_v37, %v632_v37  ;;  %v674_v45 = vsel %vm578_vm3, %v646_v35, 0.0 }
 0x11b   : > { %v659_v44 = vadd.f32 %v658_v6, %v657_v10  ;;  %v676_v46 = vsel %vm578_vm3, %v647_v40, 0.0  ;;  %v687_v54 = vshrl.u32 %v686_v49, 7 }
 0x11c   : > { %v678_v50 = vsel %vm578_vm3, %v648_v42, 0.0 }
 0x11d   : > { %v661_v57 = vadd.f32 %v660_v18, %v659_v44  ;;  %vm689_vm4 = vcmp.eq.s32.totalorder %v687_v54, 1  ;;  %vm688_vm5 = vcmp.eq.s32.totalorder %v687_v54, 0 }
 0x11f   : > { %v663_v24 = vadd.f32 %v662_v1, %v661_v57 }
 0x121   : > { %v665_v27 = vadd.f32 %v664_v19, %v663_v24 }
 0x123   : > { %v667_v32 = vadd.f32 %v666_v20, %v665_v27 }
 0x125   : > { %v669_v34 = vadd.f32 %v668_v28, %v667_v32 }
 0x127   : > { %v671_v39 = vadd.f32 %v670_v38, %v669_v34 }
 0x129   : > { %v673_v41 = vadd.f32 %v672_v43, %v671_v39 }
 0x12b   : > { %v675_v55 = vadd.f32 %v674_v45, %v673_v41 }
 0x12d   : > { %v677_v47 = vadd.f32 %v676_v46, %v675_v55 }
 0x12f   : > { %v679_v51 = vadd.f32 %v678_v50, %v677_v47 }
 0x131   : > { %v680_v11 = vrot.slane %v679_v51, 4 }
 0x133   : > { %v681_v52 = vadd.f32 %v680_v11, %v679_v51 }
 0x135   : > { %v682_v53 = vrot.slane %v681_v52, 2 }
 0x137   : > { %v683_v56 = vadd.f32 %v682_v53, %v681_v52 }
 0x139   : > { %v684_v58 = vrot.slane %v683_v56, 1 }
 0x13b   : > { %v685_v59 = vadd.f32 %v684_v58, %v683_v56 }
 0x13d   : > { %v690_v60 = vsel %vm689_vm4, %v685_v59, 0.0 }
 0x13e   : > { %v691_v61 = vsel %vm688_vm5, %v1369_v48, %v690_v60 }
 0x13f   : > { %692 = vst.msk [vmem:[%s253_s6] sm:$0xff] %vm578_vm3, %v691_v61 }
 0x140 PF: > { %s14_s14 = sadd.s32 1, %s1106_s14   ;;  %s1422_s12 = smov %s1102_s13 }
 0x141   : > { %p11_p6 = scmp.ge.s32.totalorder %s14_s14, 4   ;;  %s1423_s13 = smov %s1425_s15 }
 0x143   :  { %13 = sbr.rel (!%p11_p6) target bundleno = 2 (0x2), region = 73 }

// kernel: hourglass_forward.22
= control target key start
LH: loop header
LB: loop body
LE: loop exit
PB: predicated region body
PF: predicated region fallthrough
CT: control target
= control target key end

     0   :  { %s757_s12 = smov 0   ;;  %s759_s13 = smov 0   ;;  %s849_s0 = inlined_call_operand.vmem [shape: bf16[1,32,216], index: 0, kind: input, shape index: {}]   ;;  %s850_s1 = inlined_call_operand.vmem [shape: bf16[1,216,8], index: 1, kind: input, shape index: {}]   ;;  %s851_s2 = inlined_call_operand.vmem [shape: bf16[1,32,8], index: 2, kind: output, shape index: {0}]   ;;  %s852_s3 = inlined_call_operand.vmem [shape: f32[1,2,8,8], index: 3, kind: output, shape index: {1}]  }
   0x1   :  { %s761_s14 = smov 0  }
   0x2 LB: > { %s23_s15 = sadd.s32 1, %s731_s13  ;;  %p603_p0 = scmp.ge.s32.totalorder %s735_s14, 1  ;;  %s735_s14 = sphi %s761_s14, %s14_s14   ;;  %s731_s13 = sphi %s759_s13, %s854_s13   ;;  %s727_s12 = sphi %s757_s12, %s853_s12  }
   0x3   : > { %p24_p1 = scmp.ge.s32.totalorder %s23_s15, 2  ;;  %p174_p2 = scmp.lt.s32.totalorder %s735_s14, 3 }
   0x5   : > { %s856_s15 = smov (%p24_p1, %s23_s15), 0  ;;  %p175_p3 = pnand %p603_p0, %p174_p2 }
   0x6   : > { %s604_s22 = sshll.u32 (!%p175_p3), %s727_s12, 1  ;;  %p248_p5 = scmp.lt.s32.totalorder (!%p175_p3), %s727_s12, 1 }
   0x7   : > { %178 = sbr.rel (%p175_p3) target bundleno = 219 (0xdb), region = 28  ;;  %p223_p4 = scmp.lt.s32.totalorder (!%p175_p3), %s604_s22, 3 }
   0xc   : > { %v683_v0 = vld [vmem:[%s850_s1 + $0x38] sm:$0xff]  ;;  %v283_v1 = vld [vmem:[%s850_s1 + $0x68] sm:$0xf]  ;;  %vm378_vm0 = vcmask 1043456   ;;  %v682_v3 = vld [vmem:[%s850_s1 + $0x30] sm:$0xff]  ;;  %s858_s22 = smov (!%p223_p4, %s604_s22), 3  ;;  %v434_v49 = vlaneseq }
   0xd   : > { %v346_v2 = vunpack.c.l.b16 %v283_v1  ;;  %382 = vmatpush.bf16.msra.mxu0 %v683_v0  ;;  %v688_v6 = vld [vmem:[%s850_s1 + $0x60] sm:$0xff]  ;;  %v681_v7 = vld [vmem:[%s850_s1 + $0x28] sm:$0xff]  ;;  %v687_v8 = vld [vmem:[%s850_s1 + $0x58] sm:$0xff]  ;;  %s673_s8 = sshll.u32 %s858_s22, 3  ;;  %vm374_vm1 = vcmask 719872   ;;  %s608_s27 = sshll.u32 %s858_s22, 2 }
   0xe   : > { %v680_v9 = vld [vmem:[%s850_s1 + $0x20] sm:$0xff]  ;;  %v686_v10 = vld [vmem:[%s850_s1 + $0x50] sm:$0xff]  ;;  %v679_v11 = vld [vmem:[%s850_s1 + $0x18] sm:$0xff]  ;;  %s229_s19 = scalar_lea.vmem %s849_s0, %s673_s8  ;;  %s244_s30 = scalar_lea.vmem %s851_s2, %s608_s27  ;;  %vm443_vm2 = vcmask 60416   ;;  %vm410_vm3 = vcmask 64512   ;;  %v435_v52 = vshrl.u32 %v434_v49, 7 }
   0xf   : > { %v360_v4 = vpack.c.b16 %v346_v2, %v346_v2  ;;  %v685_v12 = vld [vmem:[%s850_s1 + $0x48] sm:$0xff]  ;;  %v678_v13 = vld [vmem:[%s850_s1 + $0x10] sm:$0xff]  ;;  %v684_v14 = vld [vmem:[%s850_s1 + $0x40] sm:$0xff]  ;;  %s860_s12 = smov (!%p248_p5, %s727_s12), 1 }
  0x10   : > { %v677_v15 = vld [vmem:[%s850_s1 + $0x8] sm:$0xff]  ;;  %v674_v16 = vld [vmem:[%s229_s19 + $0x4] sm:$0xf]  ;;  %v612_v20 = vld [vmem:[%s229_s19] sm:$0xf]  ;;  %s609_s22 = sshll.u32 %s860_s12, 3 }
  0x11   : > { %v380_v5 = vsel %vm378_vm0, %v360_v4, 0  ;;  %383 = vmatpush.bf16.msra.mxu0 %v682_v3  ;;  %v614_v17 = vld [vmem:[%s229_s19 + $0x8] sm:$0xf0]  ;;  %v676_v19 = vld [vmem:[%s850_s1] sm:$0xff]  ;;  %v675_v21 = vld [vmem:[%s229_s19 + $0x4] sm:$0xf0]  ;;  %s253_s6 = scalar_lea.vmem %s852_s3, %s609_s22 }
  0x12   : > { %398 = vmatpush.bf16.msra.mxu1 %v380_v5  ;;  %v617_v18 = vor.u32 %v674_v16, %v614_v17  ;;  %v613_v22 = vor.u32 %v675_v21, %v612_v20  ;;  %vm437_vm4 = vcmp.eq.s32.totalorder %v435_v52, 1  ;;  %vm436_vm5 = vcmp.eq.s32.totalorder %v435_v52, 0 }
  0x15   : > { %384 = vmatpush.bf16.msra.mxu0 %v681_v7 }
  0x16   : > { %399 = vmatpush.bf16.msra.mxu1 %v688_v6 }
  0x19   : > { %385 = vmatpush.bf16.msra.mxu0 %v680_v9 }
  0x1a   : > { %400 = vmatpush.bf16.msra.mxu1 %v687_v8 }
  0x1d   : > { %386 = vmatpush.bf16.msra.mxu0 %v679_v11 }
  0x1e   : > { %401 = vmatpush.bf16.msra.mxu1 %v686_v10 }
  0x21   : > { %387 = vmatpush.bf16.msra.mxu0 %v678_v13 }
  0x22   : > { %402 = vmatpush.bf16.msra.mxu1 %v685_v12 }
  0x25   : > { %388 = vmatpush.bf16.msra.mxu0 %v677_v15 }
  0x26   : > { %403 = vmatpush.bf16.msra.mxu1 %v684_v14 }
  0x29   : > { %670 = vmatmul.msk.bf16.vlgmr.msra.gmra.mxu1 %vm374_vm1, %v617_v18  ;;  %389 = vmatpush.bf16.msra.mxu0 %v676_v19 }
  0x2c   : > { %390 = vmatmul.bf16.vlgmr.msra.gmra.mxu0 %v613_v22 }
  0xa6   : > { %v405_v23 = vpop.f32.mrf.mxu1 }
  0xa9   : > { %v391_v24 = vpop.f32.mrf.mxu0 }
  0xaa   : > { %v406_v25 = vadd.f32 %v405_v23, %v391_v24 }
  0xac   : > { %v441_v26 = vpack.c.bf16 %v406_v25, %v406_v25  ;;  %v411_v30 = vsel %vm410_vm3, %v406_v25, 0.0 }
  0xae   : > { %444 = vst.msk [vmem:[%s244_s30] sm:$0xf] %vm443_vm2, %v441_v26  ;;  %v407_v27 = vpop.f32.mrf.mxu1 }
  0xb1   : > { %v393_v28 = vpop.f32.mrf.mxu0 }
  0xb2   : > { %v408_v29 = vadd.f32 %v407_v27, %v393_v28 }
  0xb4   : > { %v412_v31 = vsel %vm410_vm3, %v408_v29, 0.0  ;;  %v442_v32 = vpack.c.bf16 %v408_v29, %v408_v29 }
  0xb5   : > { %v413_v33 = vadd.f32 %v412_v31, %v411_v30 }
  0xb6   : > { %445 = vst.msk [vmem:[%s244_s30 + $0x4] sm:$0xf] %vm443_vm2, %v442_v32 }
  0xb7   : > { %v414_v34 = vrot.slane %v413_v33, 4 }
  0xb9   : > { %v415_v35 = vadd.f32 %v414_v34, %v413_v33 }
  0xbb   : > { %v416_v36 = vrot.slane %v415_v35, 2 }
  0xbd   : > { %v417_v37 = vadd.f32 %v416_v36, %v415_v35 }
  0xbf   : > { %v418_v38 = vrot.slane %v417_v37, 1 }
  0xc1   : > { %v419_v39 = vadd.f32 %v418_v38, %v417_v37 }
  0xc3   : > { %v420_v40 = vmul.f32 0.0625, %v419_v39 }
  0xc5   : > { %v421_v41 = vsub.f32 %v406_v25, %v420_v40  ;;  %v422_v42 = vsub.f32 %v408_v29, %v420_v40 }
  0xc7   : > { %v423_v43 = vmul.f32 %v421_v41, %v421_v41  ;;  %v424_v44 = vmul.f32 %v422_v42, %v422_v42 }
  0xc9   : > { %v425_v45 = vsel %vm410_vm3, %v423_v43, 0.0  ;;  %v426_v46 = vsel %vm410_vm3, %v424_v44, 0.0 }
  0xca   : > { %v427_v47 = vadd.f32 %v426_v46, %v425_v45 }
  0xcc   : > { %v428_v48 = vrot.slane %v427_v47, 4 }
  0xce   : > { %v429_v50 = vadd.f32 %v428_v48, %v427_v47 }
  0xd0   : > { %v430_v51 = vrot.slane %v429_v50, 2 }
  0xd2   : > { %v431_v53 = vadd.f32 %v430_v51, %v429_v50 }
  0xd4   : > { %v432_v54 = vrot.slane %v431_v53, 1 }
  0xd6   : > { %v433_v55 = vadd.f32 %v432_v54, %v431_v53 }
  0xd8   : > { %v438_v56 = vsel %vm437_vm4, %v433_v55, 0.0 }
  0xd9   : > { %v439_v57 = vsel %vm436_vm5, %v419_v39, %v438_v56 }
  0xda   : > { %440 = vst.msk [vmem:[%s253_s6] sm:$0xff] %vm410_vm3, %v439_v57 }
  0xdb PF: > { %s14_s14 = sadd.s32 1, %s735_s14   ;;  %s853_s12 = smov %s731_s13 }
  0xdc   : > { %p11_p6 = scmp.ge.s32.totalorder %s14_s14, 4   ;;  %s854_s13 = smov %s856_s15 }
  0xde   :  { %13 = sbr.rel (!%p11_p6) target bundleno = 2 (0x2), region = 73 }

// kernel: tile.83
= control target key start
LH: loop header
LB: loop body
LE: loop exit
PB: predicated region body
PF: predicated region fallthrough
CT: control target
= control target key end

     0   :  { %s40_s0 = inlined_call_operand.vmem [shape: f32[8], index: 0, kind: input, shape index: {}]   ;;  %s41_s1 = inlined_call_operand.vmem [shape: f32[32,8], index: 1, kind: output, shape index: {}]  }
   0x1   :  { %v4_v0 = vld [vmem:[%s40_s0] ss:$0 sm:$0xff] }
   0x2   :  { %5 = vst [vmem:[%s41_s1] sm:$0xff] %v4_v0 }
   0x3   :  { %12 = vst [vmem:[%s41_s1 + $0x8] sm:$0xff] %v4_v0 }
   0x4   :  { %13 = vst [vmem:[%s41_s1 + $0x10] sm:$0xff] %v4_v0 }
   0x5   :  { %14 = vst [vmem:[%s41_s1 + $0x18] sm:$0xff] %v4_v0 }

// kernel: tile.84
= control target key start
LH: loop header
LB: loop body
LE: loop exit
PB: predicated region body
PF: predicated region fallthrough
CT: control target
= control target key end

     0   :  { %s7_s6 = smov 3  ;;  %s21_s9 = smov 3  ;;  %vm4_vm0 = vcmask 64512   ;;  %vm11_vm1 = vcmask 1048512   ;;  %vm18_vm2 = vcmask 982912   ;;  %vm25_vm3 = vcmask 917312   ;;  %s233_s0 = inlined_call_operand.vmem [shape: f32[32,8], index: 0, kind: input, shape index: {}]   ;;  %s234_s1 = inlined_call_operand.vmem [shape: f32[1,256], index: 1, kind: output, shape index: {}]  }
   0x1   :  { %v123_v0 = vld [vmem:[%s233_s0 + $0xf] ss:$16 sm:%s7_s6]   ;;  %s154_s10 = smov 120   ;;  %v125_v1 = vld [vmem:[%s233_s0 + $0xd] ss:$16 sm:%s21_s9]   ;;  %s155_s13 = smov 104  }
   0x2   :  { %9 = vrot.lane.b32.xlu0 %v123_v0, %s154_s10  ;;  %23 = vrot.lane.b32.xlu1 %v125_v1, %s155_s13  ;;  %s14_s14 = smov 3  ;;  %s28_s15 = smov 3  ;;  %vm32_vm4 = vcmask 851712   ;;  %vm39_vm5 = vcmask 786112   ;;  %vm46_vm6 = vcmask 720512   ;;  %vm53_vm7 = vcmask 654912  }
   0x3   :  { %v124_v2 = vld [vmem:[%s233_s0 + $0xe] ss:$16 sm:%s14_s14]   ;;  %v126_v3 = vld [vmem:[%s233_s0 + $0xc] ss:$16 sm:%s28_s15]   ;;  %s35_s20 = smov 3  ;;  %s156_s23 = smov 112  }
   0x4   :  { %v127_v4 = vld [vmem:[%s233_s0 + $0xb] ss:$16 sm:%s35_s20]   ;;  %s157_s24 = smov 88   ;;  %s158_s25 = smov 96   ;;  %vm60_vm8 = vcmask 589312   ;;  %vm67_vm9 = vcmask 523712  }
   0x5   :  { %37 = vrot.lane.b32.xlu2 %v127_v4, %s157_s24  ;;  %s49_s26 = smov 3  ;;  %s42_s27 = smov 3  ;;  %vm74_vm10 = vcmask 458112   ;;  %vm81_vm11 = vcmask 392512   ;;  %vm88_vm12 = vcmask 326912   ;;  %vm95_vm13 = vcmask 261312  }
   0x6   :  { %s56_s28 = smov 3  ;;  %v129_v5 = vld [vmem:[%s233_s0 + $0x9] ss:$16 sm:%s49_s26]   ;;  %v128_v6 = vld [vmem:[%s233_s0 + $0xa] ss:$16 sm:%s42_s27]   ;;  %s159_s6 = smov 72  }
   0x7   :  { %v130_v7 = vld [vmem:[%s233_s0 + $0x8] ss:$16 sm:%s56_s28]   ;;  %s160_s7 = smov 80   ;;  %s161_s8 = smov 64   ;;  %vm102_vm14 = vcmask 195712   ;;  %vm109_vm15 = vcmask 130112  }
   0x8   :  { %s70_s9 = smov 3  ;;  %s63_s10 = smov 3 }
   0x9   :  { %s77_s11 = smov 3  ;;  %v132_v8 = vld [vmem:[%s233_s0 + $0x6] ss:$16 sm:%s70_s9]   ;;  %v131_v9 = vld [vmem:[%s233_s0 + $0x7] ss:$16 sm:%s63_s10]   ;;  %s162_s18 = smov 48  }
   0xa   :  { %16 = vrot.lane.b32.xlu0 %v124_v2, %s156_s23  ;;  %30 = vrot.lane.b32.xlu1 %v126_v3, %s158_s25  ;;  %v133_v10 = vld [vmem:[%s233_s0 + $0x5] ss:$16 sm:%s77_s11]   ;;  %s163_s19 = smov 56   ;;  %s164_s20 = smov 40  }
   0xb   :  { %s91_s21 = smov 3  ;;  %s84_s22 = smov 3 }
   0xc   :  { %s98_s23 = smov 3  ;;  %v135_v11 = vld [vmem:[%s233_s0 + $0x3] ss:$16 sm:%s91_s21]   ;;  %v134_v12 = vld [vmem:[%s233_s0 + $0x4] ss:$16 sm:%s84_s22]   ;;  %s165_s30 = smov 24  }
   0xd   :  { %44 = vrot.lane.b32.xlu2 %v128_v6, %s160_s7  ;;  %v136_v13 = vld [vmem:[%s233_s0 + $0x2] ss:$16 sm:%s98_s23]   ;;  %s166_s2 = smov 32   ;;  %s167_s3 = smov 16  }
   0xe   :  { %s105_s4 = smov 3  ;;  %s168_s7 = smov 8  }
   0xf   :  { %v137_v14 = vld [vmem:[%s233_s0 + $0x1] ss:$16 sm:%s105_s4]  }
  0x12   :  { %51 = vrot.lane.b32.xlu0 %v129_v5, %s159_s6  ;;  %58 = vrot.lane.b32.xlu1 %v130_v7, %s161_s8  ;;  %s2_s8 = smov 3 }
  0x13   :  { %v3_v15 = vld [vmem:[%s233_s0] ss:$16 sm:%s2_s8]  }
  0x14   :  { %5 = vst.msk [vmem:[#allocation0] ss:$8 sm:$0x3] %vm4_vm0, %v3_v15  }
  0x15   :  { %65 = vrot.lane.b32.xlu2 %v131_v9, %s163_s19 }
  0x1a   :  { %72 = vrot.lane.b32.xlu0 %v132_v8, %s162_s18  ;;  %79 = vrot.lane.b32.xlu1 %v133_v10, %s164_s20 }
  0x1d   :  { %86 = vrot.lane.b32.xlu2 %v134_v12, %s166_s2 }
  0x22   :  { %93 = vrot.lane.b32.xlu0 %v135_v11, %s165_s30  ;;  %100 = vrot.lane.b32.xlu1 %v136_v13, %s167_s3 }
  0x25   :  { %107 = vrot.lane.b32.xlu2 %v137_v14, %s168_s7 }
  0x5f   :  { %v38_v16 = vpop.permute.xlu2 %37  }
  0x67   :  { %v45_v17 = vpop.permute.xlu2 %44  }
  0x6f   :  { %v66_v19 = vpop.permute.xlu2 %65  }
  0x74   :  { %v10_v18 = vpop.permute.xlu0 %9   ;;  %v24_v20 = vpop.permute.xlu1 %23  }
  0x75   :  { %12 = vst.msk [vmem:[#allocation0] ss:$8 sm:$0x3] %vm11_vm1, %v10_v18  }
  0x77   :  { %v87_v22 = vpop.permute.xlu2 %86  }
  0x7c   :  { %v17_v21 = vpop.permute.xlu0 %16   ;;  %v31_v23 = vpop.permute.xlu1 %30  }
  0x7d   :  { %19 = vst.msk [vmem:[#allocation0] ss:$8 sm:$0x3] %vm18_vm2, %v17_v21  }
  0x7e   :  { %26 = vst.msk [vmem:[#allocation0] ss:$8 sm:$0x3] %vm25_vm3, %v24_v20  }
  0x7f   :  { %33 = vst.msk [vmem:[#allocation0] ss:$8 sm:$0x3] %vm32_vm4, %v31_v23   ;;  %v108_v25 = vpop.permute.xlu2 %107  }
  0x80   :  { %40 = vst.msk [vmem:[#allocation0] ss:$8 sm:$0x3] %vm39_vm5, %v38_v16  }
  0x81   :  { %47 = vst.msk [vmem:[#allocation0] ss:$8 sm:$0x3] %vm46_vm6, %v45_v17  }
  0x84   :  { %v52_v24 = vpop.permute.xlu0 %51   ;;  %v59_v26 = vpop.permute.xlu1 %58  }
  0x85   :  { %54 = vst.msk [vmem:[#allocation0] ss:$8 sm:$0x3] %vm53_vm7, %v52_v24  }
  0x86   :  { %61 = vst.msk [vmem:[#allocation0] ss:$8 sm:$0x3] %vm60_vm8, %v59_v26  }
  0x87   :  { %68 = vst.msk [vmem:[#allocation0] ss:$8 sm:$0x3] %vm67_vm9, %v66_v19  }
  0x8c   :  { %v73_v27 = vpop.permute.xlu0 %72   ;;  %v80_v28 = vpop.permute.xlu1 %79  }
  0x8d   :  { %75 = vst.msk [vmem:[#allocation0] ss:$8 sm:$0x3] %vm74_vm10, %v73_v27  }
  0x8e   :  { %82 = vst.msk [vmem:[#allocation0] ss:$8 sm:$0x3] %vm81_vm11, %v80_v28  }
  0x8f   :  { %89 = vst.msk [vmem:[#allocation0] ss:$8 sm:$0x3] %vm88_vm12, %v87_v22  }
  0x94   :  { %v94_v29 = vpop.permute.xlu0 %93   ;;  %v101_v30 = vpop.permute.xlu1 %100  }
  0x95   :  { %96 = vst.msk [vmem:[#allocation0] ss:$8 sm:$0x3] %vm95_vm13, %v94_v29  }
  0x96   :  { %103 = vst.msk [vmem:[#allocation0] ss:$8 sm:$0x3] %vm102_vm14, %v101_v30  }
  0x97   :  { %110 = vst.msk [vmem:[#allocation0] ss:$8 sm:$0x3] %vm109_vm15, %v108_v25  }
  0x9e   :  { %v113_v31 = vld [vmem:[#allocation0] sm:$0x1]  ;;  %v118_v32 = vld [vmem:[#allocation0 + $0x8] sm:$0x1] }
  0x9f   :  { %116 = vst [vmem:[%s234_s1] sm:$0x1] %v113_v31 }
  0xa0   :  { %138 = vst [vmem:[%s234_s1 + $0x1] sm:$0x1] %v118_v32 }

// kernel: squeeze.106
= control target key start
LH: loop header
LB: loop body
LE: loop exit
PB: predicated region body
PF: predicated region fallthrough
CT: control target
= control target key end

     0   :  { %s81_s10 = smov 3  ;;  %s95_s11 = smov 3  ;;  %vm64_vm0 = vcmask 64512   ;;  %vm71_vm1 = vcmask 1048512   ;;  %vm78_vm2 = vcmask 982912   ;;  %vm85_vm3 = vcmask 917312   ;;  %s250_s0 = inlined_call_operand.vmem [shape: bf16[1,32,8], index: 0, kind: input, shape index: {}]   ;;  %s251_s1 = inlined_call_operand.vmem [shape: bf16[1,256], index: 1, kind: output, shape index: {}]  }
   0x1   :  { %v197_v0 = vld [vmem:[%s250_s0 + $0x8] sm:$0xff]   ;;  %v194_v1 = vld [vmem:[%s250_s0] sm:$0xff]   ;;  %s67_s0 = smov 3  ;;  %s213_s12 = smov 120   ;;  %vm92_vm4 = vcmask 851712   ;;  %vm99_vm5 = vcmask 786112  }
   0x2   :  { %v192_v2 = vunpack.c.h.bf16 %v197_v0  ;;  %v196_v3 = vunpack.c.h.bf16 %v194_v1  ;;  %v191_v4 = vunpack.c.l.bf16 %v197_v0  ;;  %v195_v5 = vunpack.c.l.bf16 %v194_v1  ;;  %s214_s13 = smov 104   ;;  %s74_s14 = smov 3 }
   0x3   :  { %s88_s15 = smov 3  ;;  %s215_s16 = smov 88   ;;  %vm106_vm6 = vcmask 720512   ;;  %vm113_vm7 = vcmask 654912   ;;  %vm120_vm8 = vcmask 589312   ;;  %vm127_vm9 = vcmask 523712  }
   0x4   :  { %18 = vst [vmem:[#allocation1 + $0x18] sm:$0xff] %v192_v2  ;;  %s102_s17 = smov 3  ;;  %s216_s18 = smov 112   ;;  %vm134_vm10 = vcmask 458112   ;;  %vm141_vm11 = vcmask 392512   ;;  %vm148_vm12 = vcmask 326912  }
   0x5   :  { %48 = vst [vmem:[#allocation1 + $0x8] sm:$0xff] %v196_v3  ;;  %s217_s19 = smov 96   ;;  %s109_s20 = smov 3  ;;  %vm155_vm13 = vcmask 261312   ;;  %vm162_vm14 = vcmask 195712   ;;  %vm169_vm15 = vcmask 130112  }
   0x6   :  { %33 = vst [vmem:[#allocation1 + $0x10] sm:$0xff] %v191_v4  ;;  %s116_s21 = smov 3  ;;  %s218_s22 = smov 80  }
   0x7   :  { %61 = vst [vmem:[#allocation1] sm:$0xff] %v195_v5  ;;  %s123_s23 = smov 3  ;;  %s219_s24 = smov 72  }
   0x8   :  { %s220_s25 = smov 64   ;;  %s130_s26 = smov 3 }
   0x9   :  { %s137_s27 = smov 3  ;;  %s221_s28 = smov 56  }
   0xa   :  { %s144_s29 = smov 3  ;;  %s222_s30 = smov 48  }
   0xb   :  { %s223_s2 = smov 40   ;;  %s151_s3 = smov 3 }
   0xc   :  { %v68_v6 = vld [vmem:[#allocation1 + $0xf] ss:$16 sm:%s67_s0]   ;;  %v82_v7 = vld [vmem:[#allocation1 + $0xd] ss:$16 sm:%s81_s10]   ;;  %v96_v8 = vld [vmem:[#allocation1 + $0xb] ss:$16 sm:%s95_s11]  }
   0xd   :  { %69 = vrot.lane.b32.xlu0 %v68_v6, %s213_s12  ;;  %83 = vrot.lane.b32.xlu1 %v82_v7, %s214_s13  ;;  %v75_v9 = vld [vmem:[#allocation1 + $0xe] ss:$16 sm:%s74_s14]   ;;  %v89_v10 = vld [vmem:[#allocation1 + $0xc] ss:$16 sm:%s88_s15]   ;;  %s158_s4 = smov 3  ;;  %s224_s5 = smov 32  }
   0xe   :  { %97 = vrot.lane.b32.xlu2 %v96_v8, %s215_s16  ;;  %v103_v11 = vld [vmem:[#allocation1 + $0xa] ss:$16 sm:%s102_s17]   ;;  %v110_v12 = vld [vmem:[#allocation1 + $0x9] ss:$16 sm:%s109_s20]   ;;  %v117_v13 = vld [vmem:[#allocation1 + $0x8] ss:$16 sm:%s116_s21]  }
   0xf   :  { %v124_v14 = vld [vmem:[#allocation1 + $0x7] ss:$16 sm:%s123_s23]   ;;  %v131_v15 = vld [vmem:[#allocation1 + $0x6] ss:$16 sm:%s130_s26]   ;;  %v138_v16 = vld [vmem:[#allocation1 + $0x5] ss:$16 sm:%s137_s27]  }
  0x10   :  { %v145_v17 = vld [vmem:[#allocation1 + $0x4] ss:$16 sm:%s144_s29]   ;;  %v152_v18 = vld [vmem:[#allocation1 + $0x3] ss:$16 sm:%s151_s3]   ;;  %v159_v19 = vld [vmem:[#allocation1 + $0x2] ss:$16 sm:%s158_s4]  }
  0x11   :  { %s165_s6 = smov 3  ;;  %s225_s7 = smov 24  }
  0x12   :  { %s226_s8 = smov 16   ;;  %v166_v20 = vld [vmem:[#allocation1 + $0x1] ss:$16 sm:%s165_s6]   ;;  %s227_s9 = smov 8  }
  0x13   :  { %s62_s0 = smov 3 }
  0x14   :  { %v63_v21 = vld [vmem:[#allocation1] ss:$16 sm:%s62_s0]  }
  0x15   :  { %76 = vrot.lane.b32.xlu0 %v75_v9, %s216_s18  ;;  %90 = vrot.lane.b32.xlu1 %v89_v10, %s217_s19  ;;  %65 = vst.msk [vmem:[#allocation0] ss:$8 sm:$0x3] %vm64_vm0, %v63_v21  }
  0x16   :  { %104 = vrot.lane.b32.xlu2 %v103_v11, %s218_s22 }
  0x1d   :  { %111 = vrot.lane.b32.xlu0 %v110_v12, %s219_s24  ;;  %118 = vrot.lane.b32.xlu1 %v117_v13, %s220_s25 }
  0x1e   :  { %125 = vrot.lane.b32.xlu2 %v124_v14, %s221_s28 }
  0x25   :  { %132 = vrot.lane.b32.xlu0 %v131_v15, %s222_s30  ;;  %139 = vrot.lane.b32.xlu1 %v138_v16, %s223_s2 }
  0x26   :  { %146 = vrot.lane.b32.xlu2 %v145_v17, %s224_s5 }
  0x2d   :  { %153 = vrot.lane.b32.xlu0 %v152_v18, %s225_s7  ;;  %160 = vrot.lane.b32.xlu1 %v159_v19, %s226_s8 }
  0x2e   :  { %167 = vrot.lane.b32.xlu2 %v166_v20, %s227_s9 }
  0x68   :  { %v98_v22 = vpop.permute.xlu2 %97  }
  0x70   :  { %v105_v23 = vpop.permute.xlu2 %104  }
  0x78   :  { %v126_v24 = vpop.permute.xlu2 %125  }
  0x7f   :  { %v70_v25 = vpop.permute.xlu0 %69   ;;  %v84_v26 = vpop.permute.xlu1 %83  }
  0x80   :  { %72 = vst.msk [vmem:[#allocation0] ss:$8 sm:$0x3] %vm71_vm1, %v70_v25   ;;  %v147_v27 = vpop.permute.xlu2 %146  }
  0x87   :  { %v77_v28 = vpop.permute.xlu0 %76   ;;  %v91_v29 = vpop.permute.xlu1 %90  }
  0x88   :  { %79 = vst.msk [vmem:[#allocation0] ss:$8 sm:$0x3] %vm78_vm2, %v77_v28   ;;  %v168_v30 = vpop.permute.xlu2 %167  }
  0x89   :  { %86 = vst.msk [vmem:[#allocation0] ss:$8 sm:$0x3] %vm85_vm3, %v84_v26  }
  0x8a   :  { %93 = vst.msk [vmem:[#allocation0] ss:$8 sm:$0x3] %vm92_vm4, %v91_v29  }
  0x8b   :  { %100 = vst.msk [vmem:[#allocation0] ss:$8 sm:$0x3] %vm99_vm5, %v98_v22  }
  0x8c   :  { %107 = vst.msk [vmem:[#allocation0] ss:$8 sm:$0x3] %vm106_vm6, %v105_v23  }
  0x8f   :  { %v112_v31 = vpop.permute.xlu0 %111   ;;  %v119_v32 = vpop.permute.xlu1 %118  }
  0x90   :  { %114 = vst.msk [vmem:[#allocation0] ss:$8 sm:$0x3] %vm113_vm7, %v112_v31  }
  0x91   :  { %121 = vst.msk [vmem:[#allocation0] ss:$8 sm:$0x3] %vm120_vm8, %v119_v32  }
  0x92   :  { %128 = vst.msk [vmem:[#allocation0] ss:$8 sm:$0x3] %vm127_vm9, %v126_v24  }
  0x97   :  { %v133_v33 = vpop.permute.xlu0 %132   ;;  %v140_v34 = vpop.permute.xlu1 %139  }
  0x98   :  { %135 = vst.msk [vmem:[#allocation0] ss:$8 sm:$0x3] %vm134_vm10, %v133_v33  }
  0x99   :  { %142 = vst.msk [vmem:[#allocation0] ss:$8 sm:$0x3] %vm141_vm11, %v140_v34  }
  0x9a   :  { %149 = vst.msk [vmem:[#allocation0] ss:$8 sm:$0x3] %vm148_vm12, %v147_v27  }
  0x9f   :  { %v154_v35 = vpop.permute.xlu0 %153   ;;  %v161_v36 = vpop.permute.xlu1 %160  }
  0xa0   :  { %156 = vst.msk [vmem:[#allocation0] ss:$8 sm:$0x3] %vm155_vm13, %v154_v35  }
  0xa1   :  { %163 = vst.msk [vmem:[#allocation0] ss:$8 sm:$0x3] %vm162_vm14, %v161_v36  }
  0xa2   :  { %170 = vst.msk [vmem:[#allocation0] ss:$8 sm:$0x3] %vm169_vm15, %v168_v30  }
  0xa9   :  { %v173_v37 = vld [vmem:[#allocation0] sm:$0x3]  ;;  %v179_v38 = vld [vmem:[#allocation0 + $0x8] sm:$0x3] }
  0xaa   :  { %v174_v39 = vpack.c.bf16 0.0, %v173_v37  ;;  %v180_v40 = vpack.c.bf16 0.0, %v179_v38 }
  0xac   :  { %177 = vst [vmem:[%s251_s1] sm:$0x1] %v174_v39 }
  0xad   :  { %188 = vst [vmem:[%s251_s1 + $0x1] sm:$0x1] %v180_v40 }

// kernel: hourglass_forward.23
= control target key start
LH: loop header
LB: loop body
LE: loop exit
PB: predicated region body
PF: predicated region fallthrough
CT: control target
= control target key end

     0   :  { %v61_v1 = vmov 857870592   ;;  %vm41_vm0 = vcmask 1040384   ;;  %vm47_vm1 = vsmask.f32 256  ;;  %vm49_vm2 = vcmask 1041409   ;;  %s97_s0 = inlined_call_operand.vmem [shape: bf16[1,256], index: 0, kind: input, shape index: {}]   ;;  %s98_s1 = inlined_call_operand.vmem [shape: f32[1,256], index: 1, kind: input, shape index: {}]   ;;  %s99_s2 = inlined_call_operand.vmem [shape: f32[1,256], index: 2, kind: input, shape index: {}]   ;;  %s100_s3 = inlined_call_operand.vmem [shape: bf16[1,256], index: 3, kind: output, shape index: {}]  }
   0x1   :  { %v14_v0 = vld [vmem:[%s97_s0] sm:$0x3]  ;;  %v19_v2 = vunpack.c.l.s4 %v61_v1  ;;  %vm50_vm3 = vsmask.f32 1280  ;;  %vm48_vm4 = vmand %vm41_vm0, %vm47_vm1 }
   0x2   :  { %v16_v3 = vld [vmem:[%s98_s1] sm:$0x3]  ;;  %v15_v5 = vunpack.c.l.bf16 %v14_v0  ;;  %vm51_vm5 = vmand %vm49_vm2, %vm50_vm3 }
   0x3   :  { %v24_v4 = vld [vmem:[%s99_s2] sm:$0x3]  ;;  %v20_v6 = vunpack.c.0.s8 %v19_v2  ;;  %vm52_vm6 = vmor %vm51_vm5, %vm48_vm4 }
   0x4   :  { %v53_v16 = vld [vmem:[%s100_s3] sm:$0x3] }
   0x5   :  { %v21_v7 = vperm.slane %v16_v3, %v20_v6  ;;  %v29_v8 = vperm.slane %v24_v4, %v20_v6 }
   0x7   :  { %v23_v9 = vmul.f32 %v21_v7, %v15_v5 }
   0x9   :  { %v31_v10 = vadd.f32 %v29_v8, %v23_v9 }
   0xb   :  { %v32_v11 = vmax.f32 %v31_v10, 0.0 }
   0xd   :  { %v34_v12 = vperm.slane %v32_v11, 0  ;;  %v35_v13 = vperm.slane %v32_v11, 2 }
   0xf   :  { %v38_v14 = vpack.c.bf16 %v35_v13, %v34_v12 }
  0x11   :  { %v40_v15 = vrot.slane %v38_v14, 3 }
  0x13   :  { %v44_v17 = vsel %vm41_vm0, %v38_v14, %v40_v15 }
  0x14   :  { %v54_v18 = vsel %vm52_vm6, %v44_v17, %v53_v16 }
  0x15   :  { %55 = vst [vmem:[%s100_s3] sm:$0x3] %v54_v18 }

// kernel: hourglass_forward.29
= control target key start
LH: loop header
LB: loop body
LE: loop exit
PB: predicated region body
PF: predicated region fallthrough
CT: control target
= control target key end

     0   :  { %s601_s12 = smov 0   ;;  %s603_s13 = smov 0   ;;  %s659_s0 = inlined_call_operand.vmem [shape: bf16[1,32,64], index: 0, kind: input, shape index: {}]   ;;  %s660_s1 = inlined_call_operand.vmem [shape: bf16[1,64,8], index: 1, kind: input, shape index: {}]   ;;  %s661_s2 = inlined_call_operand.vmem [shape: bf16[1,32,8], index: 2, kind: output, shape index: {0}]   ;;  %s662_s3 = inlined_call_operand.vmem [shape: f32[1,2,8,8], index: 3, kind: output, shape index: {1}]  }
   0x1   :  { %s605_s14 = smov 0  }
   0x2 LB: > { %s23_s15 = sadd.s32 1, %s575_s13  ;;  %p499_p0 = scmp.ge.s32.totalorder %s579_s14, 1  ;;  %s579_s14 = sphi %s605_s14, %s14_s14   ;;  %s575_s13 = sphi %s603_s13, %s664_s13   ;;  %s571_s12 = sphi %s601_s12, %s663_s12  }
   0x3   : > { %p24_p1 = scmp.ge.s32.totalorder %s23_s15, 2  ;;  %p173_p2 = scmp.lt.s32.totalorder %s579_s14, 3 }
   0x5   : > { %s666_s15 = smov (%p24_p1, %s23_s15), 0  ;;  %p174_p3 = pnand %p499_p0, %p173_p2 }
   0x6   : > { %s500_s18 = sshll.u32 (!%p174_p3), %s571_s12, 1  ;;  %p245_p5 = scmp.lt.s32.totalorder (!%p174_p3), %s571_s12, 1 }
   0x7   : > { %177 = sbr.rel (%p174_p3) target bundleno = 201 (0xc9), region = 28  ;;  %p221_p4 = scmp.lt.s32.totalorder (!%p174_p3), %s500_s18, 3 }
   0xc   : > { %v532_v0 = vld [vmem:[%s660_s1 + $0x18] sm:$0xff]  ;;  %v531_v1 = vld [vmem:[%s660_s1 + $0x10] sm:$0xff]  ;;  %s668_s18 = smov (!%p221_p4, %s500_s18), 3  ;;  %v530_v2 = vld [vmem:[%s660_s1 + $0x8] sm:$0xff]  ;;  %vm291_vm0 = vcmask 523264   ;;  %vm342_vm1 = vcmask 60416   ;;  %v333_v27 = vlaneseq }
   0xd   : > { %299 = vmatpush.bf16.msra.mxu0 %v532_v0  ;;  %s501_s23 = sshll.u32 %s668_s18, 2  ;;  %v529_v3 = vld [vmem:[%s660_s1] sm:$0xff]  ;;  %vm309_vm2 = vcmask 64512   ;;  %s670_s12 = smov (!%p245_p5, %s571_s12), 1 }
   0xe   : > { %s226_s28 = scalar_lea.vmem %s659_s0, %s501_s23  ;;  %s241_s4 = scalar_lea.vmem %s661_s2, %s501_s23  ;;  %v334_v30 = vshrl.u32 %v333_v27, 7 }
   0xf   : > { %v528_v4 = vld [vmem:[%s226_s28] sm:$0xff]  ;;  %s504_s5 = sshll.u32 %s670_s12, 3 }
  0x10   : > { %vm336_vm3 = vcmp.eq.s32.totalorder %v334_v30, 1  ;;  %vm335_vm4 = vcmp.eq.s32.totalorder %v334_v30, 0  ;;  %s250_s8 = scalar_lea.vmem %s662_s3, %s504_s5 }
  0x11   : > { %300 = vmatpush.bf16.msra.mxu0 %v531_v1 }
  0x15   : > { %301 = vmatpush.bf16.msra.mxu0 %v530_v2 }
  0x19   : > { %302 = vmatpush.bf16.msra.mxu0 %v529_v3 }
  0x1c   : > { %525 = vmatmul.msk.bf16.vlgmr.msra.gmra.mxu0 %vm291_vm0, %v528_v4 }
  0x99   : > { %v304_v5 = vpop.f32.mrf.mxu0 }
  0x9a   : > { %v340_v6 = vpack.c.bf16 %v304_v5, %v304_v5  ;;  %v310_v8 = vsel %vm309_vm2, %v304_v5, 0.0 }
  0x9c   : > { %343 = vst.msk [vmem:[%s241_s4] sm:$0xf] %vm342_vm1, %v340_v6 }
  0xa1   : > { %v306_v7 = vpop.f32.mrf.mxu0 }
  0xa2   : > { %v311_v9 = vsel %vm309_vm2, %v306_v7, 0.0  ;;  %v341_v10 = vpack.c.bf16 %v306_v7, %v306_v7 }
  0xa3   : > { %v312_v11 = vadd.f32 %v311_v9, %v310_v8 }
  0xa4   : > { %344 = vst.msk [vmem:[%s241_s4 + $0x4] sm:$0xf] %vm342_vm1, %v341_v10 }
  0xa5   : > { %v313_v12 = vrot.slane %v312_v11, 4 }
  0xa7   : > { %v314_v13 = vadd.f32 %v313_v12, %v312_v11 }
  0xa9   : > { %v315_v14 = vrot.slane %v314_v13, 2 }
  0xab   : > { %v316_v15 = vadd.f32 %v315_v14, %v314_v13 }
  0xad   : > { %v317_v16 = vrot.slane %v316_v15, 1 }
  0xaf   : > { %v318_v17 = vadd.f32 %v317_v16, %v316_v15 }
  0xb1   : > { %v319_v18 = vmul.f32 0.0625, %v318_v17 }
  0xb3   : > { %v320_v19 = vsub.f32 %v304_v5, %v319_v18  ;;  %v321_v20 = vsub.f32 %v306_v7, %v319_v18 }
  0xb5   : > { %v322_v21 = vmul.f32 %v320_v19, %v320_v19  ;;  %v323_v22 = vmul.f32 %v321_v20, %v321_v20 }
  0xb7   : > { %v324_v23 = vsel %vm309_vm2, %v322_v21, 0.0  ;;  %v325_v24 = vsel %vm309_vm2, %v323_v22, 0.0 }
  0xb8   : > { %v326_v25 = vadd.f32 %v325_v24, %v324_v23 }
  0xba   : > { %v327_v26 = vrot.slane %v326_v25, 4 }
  0xbc   : > { %v328_v28 = vadd.f32 %v327_v26, %v326_v25 }
  0xbe   : > { %v329_v29 = vrot.slane %v328_v28, 2 }
  0xc0   : > { %v330_v31 = vadd.f32 %v329_v29, %v328_v28 }
  0xc2   : > { %v331_v32 = vrot.slane %v330_v31, 1 }
  0xc4   : > { %v332_v33 = vadd.f32 %v331_v32, %v330_v31 }
  0xc6   : > { %v337_v34 = vsel %vm336_vm3, %v332_v33, 0.0 }
  0xc7   : > { %v338_v35 = vsel %vm335_vm4, %v318_v17, %v337_v34 }
  0xc8   : > { %339 = vst.msk [vmem:[%s250_s8] sm:$0xff] %vm309_vm2, %v338_v35 }
  0xc9 PF: > { %s14_s14 = sadd.s32 1, %s579_s14   ;;  %s663_s12 = smov %s575_s13 }
  0xca   : > { %p11_p6 = scmp.ge.s32.totalorder %s14_s14, 4   ;;  %s664_s13 = smov %s666_s15 }
  0xcc   :  { %13 = sbr.rel (!%p11_p6) target bundleno = 2 (0x2), region = 73 }

// kernel: hourglass_forward.28
= control target key start
LH: loop header
LB: loop body
LE: loop exit
PB: predicated region body
PF: predicated region fallthrough
CT: control target
= control target key end

     0   :  { %s612_s12 = smov 0   ;;  %s614_s13 = smov 0   ;;  %s684_s0 = inlined_call_operand.vmem [shape: bf16[3,32,32], index: 0, kind: input, shape index: {}]   ;;  %s685_s1 = inlined_call_operand.vmem [shape: bf16[3,32,8], index: 1, kind: input, shape index: {}]   ;;  %s686_s2 = inlined_call_operand.vmem [shape: bf16[3,32,8], index: 2, kind: output, shape index: {0}]   ;;  %s687_s3 = inlined_call_operand.vmem [shape: f32[3,2,8,8], index: 3, kind: output, shape index: {1}]  }
   0x1   :  { %s616_s14 = smov 0   ;;  %s618_s15 = smov 0  }
   0x2   :  { %s620_s16 = smov 0  }
   0x3 LB: > { %s23_s17 = sadd.s32 1, %s582_s14  ;;  %s26_s18 = sadd.s32 1, %s586_s15  ;;  %s590_s16 = sphi %s620_s16, %s14_s16   ;;  %s586_s15 = sphi %s618_s15, %s691_s15   ;;  %s582_s14 = sphi %s616_s14, %s690_s14   ;;  %s578_s13 = sphi %s614_s13, %s689_s13   ;;  %s574_s12 = sphi %s612_s12, %s688_s12  }
   0x4   : > { %p24_p0 = scmp.ge.s32.totalorder %s23_s17, 2  ;;  %p482_p1 = scmp.ge.s32.totalorder %s590_s16, 1 }
   0x5   : > { %p173_p2 = scmp.lt.s32.totalorder %s590_s16, 7 }
   0x6   : > { %s693_s17 = smov (%p24_p0, %s23_s17), 0  ;;  %s695_s18 = smov (!%p24_p0, %s26_s18), %s586_s15 }
   0x7   : > { %p174_p3 = pnand %p482_p1, %p173_p2  ;;  %p28_p4 = scmp.ge.s32.totalorder %s695_s18, 3 }
   0x8   : > { %p219_p5 = scmp.lt.s32.totalorder (!%p174_p3), %s578_s13, 2  ;;  %s483_s19 = sshll.u32 (!%p174_p3), %s574_s12, 1 }
   0x9   : > { %s697_s18 = smov (%p28_p4, %s695_s18), 0  ;;  %177 = sbr.rel (%p174_p3) target bundleno = 198 (0xc6), region = 28 }
   0xa   : > { %p221_p6 = scmp.lt.s32.totalorder (!%p174_p3), %s483_s19, 3  ;;  %p245_p7 = scmp.lt.s32.totalorder (!%p174_p3), %s574_s12, 1 }
   0xe   : > { %s699_s13 = smov (!%p219_p5, %s578_s13), 2  ;;  %s701_s19 = smov (!%p221_p6, %s483_s19), 3  ;;  %vm275_vm0 = vcmask 261120   ;;  %vm326_vm1 = vcmask 60416   ;;  %vm293_vm2 = vcmask 64512   ;;  %v317_v25 = vlaneseq }
   0xf   : > { %s508_s20 = sshll.u32 %s699_s13, 4  ;;  %s484_s24 = sshll.u32 %s699_s13, 2 }
  0x10   : > { %s232_s23 = scalar_lea.vmem %s685_s1, %s508_s20  ;;  %s224_s25 = sadd.s32 %s484_s24, %s701_s19  ;;  %v318_v28 = vshrl.u32 %v317_v25, 7 }
  0x11   : > { %v511_v0 = vld [vmem:[%s232_s23 + $0x8] sm:$0xff]  ;;  %s485_s26 = sshll.u32 %s224_s25, 2  ;;  %v510_v1 = vld [vmem:[%s232_s23] sm:$0xff]  ;;  %s703_s12 = smov (!%p245_p7, %s574_s12), 1 }
  0x12   : > { %285 = vmatpush.bf16.msra.mxu0 %v511_v0  ;;  %s226_s29 = scalar_lea.vmem %s684_s0, %s485_s26  ;;  %s241_s5 = scalar_lea.vmem %s686_s2, %s485_s26  ;;  %vm320_vm3 = vcmp.eq.s32.totalorder %v318_v28, 1  ;;  %vm319_vm4 = vcmp.eq.s32.totalorder %v318_v28, 0 }
  0x13   : > { %v509_v2 = vld [vmem:[%s226_s29] sm:$0xff]  ;;  %s491_s6 = sshll.u32 %s699_s13, 1 }
  0x14   : > { %s248_s7 = sadd.s32 %s491_s6, %s703_s12 }
  0x15   : > { %s492_s8 = sshll.u32 %s248_s7, 3 }
  0x16   : > { %286 = vmatpush.bf16.msra.mxu0 %v510_v1  ;;  %s250_s11 = scalar_lea.vmem %s687_s3, %s492_s8 }
  0x19   : > { %505 = vmatmul.msk.bf16.vlgmr.msra.gmra.mxu0 %vm275_vm0, %v509_v2 }
  0x96   : > { %v288_v3 = vpop.f32.mrf.mxu0 }
  0x97   : > { %v324_v4 = vpack.c.bf16 %v288_v3, %v288_v3  ;;  %v294_v6 = vsel %vm293_vm2, %v288_v3, 0.0 }
  0x99   : > { %327 = vst.msk [vmem:[%s241_s5] sm:$0xf] %vm326_vm1, %v324_v4 }
  0x9e   : > { %v290_v5 = vpop.f32.mrf.mxu0 }
  0x9f   : > { %v295_v7 = vsel %vm293_vm2, %v290_v5, 0.0  ;;  %v325_v8 = vpack.c.bf16 %v290_v5, %v290_v5 }
  0xa0   : > { %v296_v9 = vadd.f32 %v295_v7, %v294_v6 }
  0xa1   : > { %328 = vst.msk [vmem:[%s241_s5 + $0x4] sm:$0xf] %vm326_vm1, %v325_v8 }
  0xa2   : > { %v297_v10 = vrot.slane %v296_v9, 4 }
  0xa4   : > { %v298_v11 = vadd.f32 %v297_v10, %v296_v9 }
  0xa6   : > { %v299_v12 = vrot.slane %v298_v11, 2 }
  0xa8   : > { %v300_v13 = vadd.f32 %v299_v12, %v298_v11 }
  0xaa   : > { %v301_v14 = vrot.slane %v300_v13, 1 }
  0xac   : > { %v302_v15 = vadd.f32 %v301_v14, %v300_v13 }
  0xae   : > { %v303_v16 = vmul.f32 0.0625, %v302_v15 }
  0xb0   : > { %v304_v17 = vsub.f32 %v288_v3, %v303_v16  ;;  %v305_v18 = vsub.f32 %v290_v5, %v303_v16 }
  0xb2   : > { %v306_v19 = vmul.f32 %v304_v17, %v304_v17  ;;  %v307_v20 = vmul.f32 %v305_v18, %v305_v18 }
  0xb4   : > { %v308_v21 = vsel %vm293_vm2, %v306_v19, 0.0  ;;  %v309_v22 = vsel %vm293_vm2, %v307_v20, 0.0 }
  0xb5   : > { %v310_v23 = vadd.f32 %v309_v22, %v308_v21 }
  0xb7   : > { %v311_v24 = vrot.slane %v310_v23, 4 }
  0xb9   : > { %v312_v26 = vadd.f32 %v311_v24, %v310_v23 }
  0xbb   : > { %v313_v27 = vrot.slane %v312_v26, 2 }
  0xbd   : > { %v314_v29 = vadd.f32 %v313_v27, %v312_v26 }
  0xbf   : > { %v315_v30 = vrot.slane %v314_v29, 1 }
  0xc1   : > { %v316_v31 = vadd.f32 %v315_v30, %v314_v29 }
  0xc3   : > { %v321_v32 = vsel %vm320_vm3, %v316_v31, 0.0 }
  0xc4   : > { %v322_v33 = vsel %vm319_vm4, %v302_v15, %v321_v32 }
  0xc5   : > { %323 = vst.msk [vmem:[%s250_s11] sm:$0xff] %vm293_vm2, %v322_v33 }
  0xc6 PF: > { %s14_s16 = sadd.s32 1, %s590_s16   ;;  %s688_s12 = smov %s582_s14 }
  0xc7   : > { %p11_p8 = scmp.ge.s32.totalorder %s14_s16, 8   ;;  %s689_s13 = smov %s586_s15 }
  0xc8   : > { %s690_s14 = smov %s693_s17  ;;  %s691_s15 = smov %s697_s18 }
  0xc9   :  { %13 = sbr.rel (!%p11_p8) target bundleno = 3 (0x3), region = 73 }

// kernel: squeeze.141
= control target key start
LH: loop header
LB: loop body
LE: loop exit
PB: predicated region body
PF: predicated region fallthrough
CT: control target
= control target key end

     0   :  { %vm15_vm0 = vcmask 64512   ;;  %s59_s0 = inlined_call_operand.vmem [shape: f32[3,2,8], index: 0, kind: input, shape index: {}]   ;;  %s60_s1 = inlined_call_operand.vmem [shape: f32[6,8], index: 1, kind: output, shape index: {}]  }
   0x1   :  { %v27_v0 = vld [vmem:[%s59_s0 + $0x4] sm:$0x3]  ;;  %v28_v1 = vld [vmem:[%s59_s0 + $0x2] sm:$0x3]  ;;  %v12_v2 = vld [vmem:[%s59_s0] sm:$0x3] }
   0x2   :  { %7 = vst [vmem:[#allocation0] sm:$0x3] %v27_v0 }
   0x3   :  { %11 = vst [vmem:[#allocation0 + $0x10] sm:$0x3] %v28_v1 }
   0x4   :  { %13 = vst [vmem:[#allocation0 + $0x8] sm:$0x3] %v12_v2 }
   0x9   :  { %v23_v3 = vld [vmem:[#allocation0] sm:$0x3]  }
   0xa   :  { %v18_v4 = vld [vmem:[#allocation0 + $0x10] sm:$0x3]   ;;  %30 = vst.msk [vmem:[%s60_s1 + $0x4] sm:$0x3] %vm15_vm0, %v23_v3  }
   0xb   :  { %v14_v5 = vld [vmem:[#allocation0 + $0x8] sm:$0x3]   ;;  %29 = vst.msk [vmem:[%s60_s1 + $0x2] sm:$0x3] %vm15_vm0, %v18_v4  }
   0xc   :  { %16 = vst.msk [vmem:[%s60_s1] sm:$0x3] %vm15_vm0, %v14_v5  }

// kernel: hourglass_forward.27
= control target key start
LH: loop header
LB: loop body
LE: loop exit
PB: predicated region body
PF: predicated region fallthrough
CT: control target
= control target key end

     0   :  { %s599_s12 = smov 0   ;;  %s601_s13 = smov 0   ;;  %s671_s0 = inlined_call_operand.vmem [shape: bf16[3,32,16], index: 0, kind: input, shape index: {}]   ;;  %s672_s1 = inlined_call_operand.vmem [shape: bf16[3,16,8], index: 1, kind: input, shape index: {}]   ;;  %s673_s2 = inlined_call_operand.vmem [shape: bf16[3,32,8], index: 2, kind: output, shape index: {0}]   ;;  %s674_s3 = inlined_call_operand.vmem [shape: f32[3,2,8,8], index: 3, kind: output, shape index: {1}]  }
   0x1   :  { %s603_s14 = smov 0   ;;  %s605_s15 = smov 0  }
   0x2   :  { %s607_s16 = smov 0  }
   0x3 LB: > { %s23_s17 = sadd.s32 1, %s569_s14  ;;  %s26_s18 = sadd.s32 1, %s573_s15  ;;  %s577_s16 = sphi %s607_s16, %s14_s16   ;;  %s573_s15 = sphi %s605_s15, %s678_s15   ;;  %s569_s14 = sphi %s603_s14, %s677_s14   ;;  %s565_s13 = sphi %s601_s13, %s676_s13   ;;  %s561_s12 = sphi %s599_s12, %s675_s12  }
   0x4   : > { %p24_p0 = scmp.ge.s32.totalorder %s23_s17, 2  ;;  %p474_p1 = scmp.ge.s32.totalorder %s577_s16, 1 }
   0x5   : > { %p173_p2 = scmp.lt.s32.totalorder %s577_s16, 7 }
   0x6   : > { %s680_s17 = smov (%p24_p0, %s23_s17), 0  ;;  %s682_s18 = smov (!%p24_p0, %s26_s18), %s573_s15 }
   0x7   : > { %p174_p3 = pnand %p474_p1, %p173_p2  ;;  %p28_p4 = scmp.ge.s32.totalorder %s682_s18, 3 }
   0x8   : > { %p219_p5 = scmp.lt.s32.totalorder (!%p174_p3), %s565_s13, 2  ;;  %s475_s19 = sshll.u32 (!%p174_p3), %s561_s12, 1 }
   0x9   : > { %s684_s18 = smov (%p28_p4, %s682_s18), 0  ;;  %177 = sbr.rel (%p174_p3) target bundleno = 194 (0xc2), region = 28 }
   0xa   : > { %p221_p6 = scmp.lt.s32.totalorder (!%p174_p3), %s475_s19, 3  ;;  %p245_p7 = scmp.lt.s32.totalorder (!%p174_p3), %s561_s12, 1 }
   0xe   : > { %s686_s13 = smov (!%p219_p5, %s565_s13), 2  ;;  %s688_s19 = smov (!%p221_p6, %s475_s19), 3  ;;  %vm267_vm0 = vcmask 130048   ;;  %vm318_vm1 = vcmask 60416   ;;  %vm285_vm2 = vcmask 64512   ;;  %v309_v24 = vlaneseq }
   0xf   : > { %s496_s20 = sshll.u32 %s686_s13, 3  ;;  %s476_s24 = sshll.u32 %s686_s13, 2 }
  0x10   : > { %s232_s23 = scalar_lea.vmem %s672_s1, %s496_s20  ;;  %s224_s25 = sadd.s32 %s476_s24, %s688_s19  ;;  %v310_v27 = vshrl.u32 %v309_v24, 7 }
  0x11   : > { %v498_v0 = vld [vmem:[%s232_s23] sm:$0xff]  ;;  %s477_s26 = sshll.u32 %s224_s25, 2  ;;  %s690_s12 = smov (!%p245_p7, %s561_s12), 1 }
  0x12   : > { %278 = vmatpush.bf16.msra.mxu0 %v498_v0  ;;  %s226_s29 = scalar_lea.vmem %s671_s0, %s477_s26  ;;  %s241_s5 = scalar_lea.vmem %s673_s2, %s477_s26  ;;  %vm312_vm3 = vcmp.eq.s32.totalorder %v310_v27, 1  ;;  %vm311_vm4 = vcmp.eq.s32.totalorder %v310_v27, 0 }
  0x13   : > { %v497_v1 = vld [vmem:[%s226_s29] sm:$0xff]  ;;  %s483_s6 = sshll.u32 %s686_s13, 1 }
  0x14   : > { %s248_s7 = sadd.s32 %s483_s6, %s690_s12 }
  0x15   : > { %493 = vmatmul.msk.bf16.vlgmr.msra.gmra.mxu0 %vm267_vm0, %v497_v1  ;;  %s484_s8 = sshll.u32 %s248_s7, 3 }
  0x16   : > { %s250_s11 = scalar_lea.vmem %s674_s3, %s484_s8 }
  0x92   : > { %v280_v2 = vpop.f32.mrf.mxu0 }
  0x93   : > { %v316_v3 = vpack.c.bf16 %v280_v2, %v280_v2  ;;  %v286_v5 = vsel %vm285_vm2, %v280_v2, 0.0 }
  0x95   : > { %319 = vst.msk [vmem:[%s241_s5] sm:$0xf] %vm318_vm1, %v316_v3 }
  0x9a   : > { %v282_v4 = vpop.f32.mrf.mxu0 }
  0x9b   : > { %v287_v6 = vsel %vm285_vm2, %v282_v4, 0.0  ;;  %v317_v7 = vpack.c.bf16 %v282_v4, %v282_v4 }
  0x9c   : > { %v288_v8 = vadd.f32 %v287_v6, %v286_v5 }
  0x9d   : > { %320 = vst.msk [vmem:[%s241_s5 + $0x4] sm:$0xf] %vm318_vm1, %v317_v7 }
  0x9e   : > { %v289_v9 = vrot.slane %v288_v8, 4 }
  0xa0   : > { %v290_v10 = vadd.f32 %v289_v9, %v288_v8 }
  0xa2   : > { %v291_v11 = vrot.slane %v290_v10, 2 }
  0xa4   : > { %v292_v12 = vadd.f32 %v291_v11, %v290_v10 }
  0xa6   : > { %v293_v13 = vrot.slane %v292_v12, 1 }
  0xa8   : > { %v294_v14 = vadd.f32 %v293_v13, %v292_v12 }
  0xaa   : > { %v295_v15 = vmul.f32 0.0625, %v294_v14 }
  0xac   : > { %v296_v16 = vsub.f32 %v280_v2, %v295_v15  ;;  %v297_v17 = vsub.f32 %v282_v4, %v295_v15 }
  0xae   : > { %v298_v18 = vmul.f32 %v296_v16, %v296_v16  ;;  %v299_v19 = vmul.f32 %v297_v17, %v297_v17 }
  0xb0   : > { %v300_v20 = vsel %vm285_vm2, %v298_v18, 0.0  ;;  %v301_v21 = vsel %vm285_vm2, %v299_v19, 0.0 }
  0xb1   : > { %v302_v22 = vadd.f32 %v301_v21, %v300_v20 }
  0xb3   : > { %v303_v23 = vrot.slane %v302_v22, 4 }
  0xb5   : > { %v304_v25 = vadd.f32 %v303_v23, %v302_v22 }
  0xb7   : > { %v305_v26 = vrot.slane %v304_v25, 2 }
  0xb9   : > { %v306_v28 = vadd.f32 %v305_v26, %v304_v25 }
  0xbb   : > { %v307_v29 = vrot.slane %v306_v28, 1 }
  0xbd   : > { %v308_v30 = vadd.f32 %v307_v29, %v306_v28 }
  0xbf   : > { %v313_v31 = vsel %vm312_vm3, %v308_v30, 0.0 }
  0xc0   : > { %v314_v32 = vsel %vm311_vm4, %v294_v14, %v313_v31 }
  0xc1   : > { %315 = vst.msk [vmem:[%s250_s11] sm:$0xff] %vm285_vm2, %v314_v32 }
  0xc2 PF: > { %s14_s16 = sadd.s32 1, %s577_s16   ;;  %s675_s12 = smov %s569_s14 }
  0xc3   : > { %p11_p8 = scmp.ge.s32.totalorder %s14_s16, 8   ;;  %s676_s13 = smov %s573_s15 }
  0xc4   : > { %s677_s14 = smov %s680_s17  ;;  %s678_s15 = smov %s684_s18 }
  0xc5   :  { %13 = sbr.rel (!%p11_p8) target bundleno = 3 (0x3), region = 73 }

// kernel: hourglass_forward.26
= control target key start
LH: loop header
LB: loop body
LE: loop exit
PB: predicated region body
PF: predicated region fallthrough
CT: control target
= control target key end

     0   :  { %s550_s12 = smov 0   ;;  %s552_s13 = smov 0   ;;  %s600_s0 = inlined_call_operand.vmem [shape: bf16[1,32,8], index: 0, kind: input, shape index: {}]   ;;  %s601_s1 = inlined_call_operand.vmem [shape: bf16[1,8,8], index: 1, kind: input, shape index: {}]   ;;  %s602_s2 = inlined_call_operand.vmem [shape: bf16[1,32,8], index: 2, kind: output, shape index: {0}]   ;;  %s603_s3 = inlined_call_operand.vmem [shape: f32[1,2,8,8], index: 3, kind: output, shape index: {1}]  }
   0x1   :  { %s554_s14 = smov 0  }
   0x2 LB: > { %s23_s15 = sadd.s32 1, %s524_s13  ;;  %p468_p0 = scmp.ge.s32.totalorder %s528_s14, 1  ;;  %s528_s14 = sphi %s554_s14, %s14_s14   ;;  %s524_s13 = sphi %s552_s13, %s605_s13   ;;  %s520_s12 = sphi %s550_s12, %s604_s12  }
   0x3   : > { %p24_p1 = scmp.ge.s32.totalorder %s23_s15, 2  ;;  %p172_p2 = scmp.lt.s32.totalorder %s528_s14, 3 }
   0x5   : > { %s607_s15 = smov (%p24_p1, %s23_s15), 0  ;;  %p173_p3 = pnand %p468_p0, %p172_p2 }
   0x6   : > { %s469_s18 = sshll.u32 (!%p173_p3), %s520_s12, 1  ;;  %p242_p5 = scmp.lt.s32.totalorder (!%p173_p3), %s520_s12, 1 }
   0x7   : > { %176 = sbr.rel (%p173_p3) target bundleno = 190 (0xbe), region = 28  ;;  %p219_p4 = scmp.lt.s32.totalorder (!%p173_p3), %s469_s18, 3 }
   0xc   : > { %v251_v0 = vld [vmem:[%s601_s1] sm:$0xf]  ;;  %vm261_vm0 = vcmask 1043456   ;;  %s609_s18 = smov (!%p219_p4, %s469_s18), 3  ;;  %vm257_vm1 = vcmask 64512   ;;  %vm311_vm2 = vcmask 60416   ;;  %v302_v25 = vlaneseq }
   0xd   : > { %v263_v1 = vsel %vm261_vm0, %v251_v0, 0  ;;  %s470_s19 = sshll.u32 %s609_s18, 2  ;;  %s611_s12 = smov (!%p242_p5, %s520_s12), 1 }
   0xe   : > { %272 = vmatpush.bf16.msra.mxu0 %v263_v1  ;;  %s224_s22 = scalar_lea.vmem %s600_s0, %s470_s19  ;;  %s238_s25 = scalar_lea.vmem %s602_s2, %s470_s19  ;;  %v303_v28 = vshrl.u32 %v302_v25, 7 }
   0xf   : > { %v481_v2 = vld [vmem:[%s224_s22] sm:$0xff]  ;;  %s473_s26 = sshll.u32 %s611_s12, 3 }
  0x10   : > { %vm305_vm3 = vcmp.eq.s32.totalorder %v303_v28, 1  ;;  %vm304_vm4 = vcmp.eq.s32.totalorder %v303_v28, 0  ;;  %s247_s29 = scalar_lea.vmem %s603_s3, %s473_s26 }
  0x11   : > { %478 = vmatmul.msk.bf16.vlgmr.msra.gmra.mxu0 %vm257_vm1, %v481_v2 }
  0x8e   : > { %v274_v3 = vpop.f32.mrf.mxu0 }
  0x8f   : > { %v309_v4 = vpack.c.bf16 %v274_v3, %v274_v3  ;;  %v279_v6 = vsel %vm257_vm1, %v274_v3, 0.0 }
  0x91   : > { %312 = vst.msk [vmem:[%s238_s25] sm:$0xf] %vm311_vm2, %v309_v4 }
  0x96   : > { %v276_v5 = vpop.f32.mrf.mxu0 }
  0x97   : > { %v280_v7 = vsel %vm257_vm1, %v276_v5, 0.0  ;;  %v310_v8 = vpack.c.bf16 %v276_v5, %v276_v5 }
  0x98   : > { %v281_v9 = vadd.f32 %v280_v7, %v279_v6 }
  0x99   : > { %313 = vst.msk [vmem:[%s238_s25 + $0x4] sm:$0xf] %vm311_vm2, %v310_v8 }
  0x9a   : > { %v282_v10 = vrot.slane %v281_v9, 4 }
  0x9c   : > { %v283_v11 = vadd.f32 %v282_v10, %v281_v9 }
  0x9e   : > { %v284_v12 = vrot.slane %v283_v11, 2 }
  0xa0   : > { %v285_v13 = vadd.f32 %v284_v12, %v283_v11 }
  0xa2   : > { %v286_v14 = vrot.slane %v285_v13, 1 }
  0xa4   : > { %v287_v15 = vadd.f32 %v286_v14, %v285_v13 }
  0xa6   : > { %v288_v16 = vmul.f32 0.0625, %v287_v15 }
  0xa8   : > { %v289_v17 = vsub.f32 %v274_v3, %v288_v16  ;;  %v290_v18 = vsub.f32 %v276_v5, %v288_v16 }
  0xaa   : > { %v291_v19 = vmul.f32 %v289_v17, %v289_v17  ;;  %v292_v20 = vmul.f32 %v290_v18, %v290_v18 }
  0xac   : > { %v293_v21 = vsel %vm257_vm1, %v291_v19, 0.0  ;;  %v294_v22 = vsel %vm257_vm1, %v292_v20, 0.0 }
  0xad   : > { %v295_v23 = vadd.f32 %v294_v22, %v293_v21 }
  0xaf   : > { %v296_v24 = vrot.slane %v295_v23, 4 }
  0xb1   : > { %v297_v26 = vadd.f32 %v296_v24, %v295_v23 }
  0xb3   : > { %v298_v27 = vrot.slane %v297_v26, 2 }
  0xb5   : > { %v299_v29 = vadd.f32 %v298_v27, %v297_v26 }
  0xb7   : > { %v300_v30 = vrot.slane %v299_v29, 1 }
  0xb9   : > { %v301_v31 = vadd.f32 %v300_v30, %v299_v29 }
  0xbb   : > { %v306_v32 = vsel %vm305_vm3, %v301_v31, 0.0 }
  0xbc   : > { %v307_v33 = vsel %vm304_vm4, %v287_v15, %v306_v32 }
  0xbd   : > { %308 = vst.msk [vmem:[%s247_s29] sm:$0xff] %vm257_vm1, %v307_v33 }
  0xbe PF: > { %s14_s14 = sadd.s32 1, %s528_s14   ;;  %s604_s12 = smov %s524_s13 }
  0xbf   : > { %p11_p6 = scmp.ge.s32.totalorder %s14_s14, 4   ;;  %s605_s13 = smov %s607_s15 }
  0xc1   :  { %13 = sbr.rel (!%p11_p6) target bundleno = 2 (0x2), region = 73 }

// kernel: hourglass_forward.30
= control target key start
LH: loop header
LB: loop body
LE: loop exit
PB: predicated region body
PF: predicated region fallthrough
CT: control target
= control target key end

     0   :  { %vm28_vm0 = vcmask 1043456   ;;  %vm76_vm1 = vcmask 1041408   ;;  %vm80_vm2 = vcmask 1045508   ;;  %s136_s0 = inlined_call_operand.vmem [shape: bf16[4,512], index: 0, kind: input, shape index: {}]   ;;  %s137_s1 = inlined_call_operand.vmem [shape: f32[1,512], index: 1, kind: input, shape index: {}]   ;;  %s138_s2 = inlined_call_operand.vmem [shape: f32[1,512], index: 2, kind: input, shape index: {}]   ;;  %s139_s3 = inlined_call_operand.vmem [shape: bf16[4,512], index: 3, kind: input, shape index: {}]   ;;  %s140_s4 = inlined_call_operand.vmem [shape: bf16[4,512], index: 4, kind: output, shape index: {}]  }
   0x1   :  { %v17_v0 = vld [vmem:[%s136_s0] sm:$0xff] }
   0x2   :  { %v20_v1 = vld [vmem:[%s137_s1] sm:$0xf]  ;;  %v18_v5 = vunpack.c.l.bf16 %v17_v0  ;;  %v19_v15 = vunpack.c.h.bf16 %v17_v0 }
   0x3   :  { %v35_v2 = vld [vmem:[%s138_s2] sm:$0xf]  ;;  %v22_v3 = vperm.slane %v20_v1, 0  ;;  %v23_v4 = vperm.slane %v20_v1, 1  ;;  %v24_v8 = vperm.slane %v20_v1, 2  ;;  %v25_v11 = vperm.slane %v20_v1, 3 }
   0x4   :  { %v37_v6 = vperm.slane %v35_v2, 0  ;;  %v38_v7 = vperm.slane %v35_v2, 1  ;;  %v49_v10 = vld [vmem:[%s139_s3] sm:$0xff]  ;;  %v39_v12 = vperm.slane %v35_v2, 2  ;;  %v40_v13 = vperm.slane %v35_v2, 3 }
   0x5   :  { %v26_v9 = vrot.slane %v23_v4, 4  ;;  %v27_v17 = vrot.slane %v25_v11, 4  ;;  %v50_v21 = vunpack.c.l.bf16 %v49_v10  ;;  %v51_v26 = vunpack.c.h.bf16 %v49_v10 }
   0x6   :  { %v41_v14 = vrot.slane %v38_v7, 4  ;;  %v42_v18 = vrot.slane %v40_v13, 4 }
   0x7   :  { %v29_v16 = vsel %vm28_vm0, %v22_v3, %v26_v9  ;;  %v30_v22 = vsel %vm28_vm0, %v24_v8, %v27_v17 }
   0x8   :  { %v33_v19 = vmul.f32 %v29_v16, %v18_v5  ;;  %v43_v20 = vsel %vm28_vm0, %v37_v6, %v41_v14  ;;  %v44_v23 = vsel %vm28_vm0, %v39_v12, %v42_v18  ;;  %v34_v25 = vmul.f32 %v30_v22, %v19_v15 }
   0xa   :  { %v47_v24 = vadd.f32 %v43_v20, %v33_v19  ;;  %v48_v28 = vadd.f32 %v44_v23, %v34_v25 }
   0xc   :  { %v52_v27 = vadd.f32 %v50_v21, %v47_v24  ;;  %v53_v30 = vadd.f32 %v51_v26, %v48_v28 }
   0xe   :  { %v54_v29 = vmax.f32 %v52_v27, 0.0  ;;  %v55_v31 = vmax.f32 %v53_v30, 0.0 }
  0x10   :  { %58 = vst [vmem:[#allocation1] ss:$2 sm:$0xff] %v54_v29 }
  0x11   :  { %60 = vst [vmem:[#allocation1 + $0x10] ss:$2 sm:$0xff] %v55_v31 }
  0x17   :  { %v61_v32 = vld.sshfl [vmem:[#allocation1] sm:$0xff pattern:$0x75316420]  ;;  %v62_v33 = vld.sshfl [vmem:[#allocation1 + $0x8] sm:$0xff pattern:$0x75316420] }
  0x18   :  { %v69_v34 = vpack.c.bf16 %v62_v33, %v61_v32  ;;  %v63_v35 = vld.sshfl [vmem:[#allocation1 + $0x10] sm:$0xff pattern:$0x75316420]  ;;  %v64_v36 = vld.sshfl [vmem:[#allocation1 + $0x18] sm:$0xff pattern:$0x75316420] }
  0x19   :  { %v70_v37 = vpack.c.bf16 %v64_v36, %v63_v35 }
  0x1a   :  { %v73_v38 = vrot.slane %v69_v34, 2 }
  0x1b   :  { %v74_v39 = vrot.slane %v70_v37, 4  ;;  %v75_v40 = vrot.slane %v70_v37, 6 }
  0x1c   :  { %v79_v41 = vsel %vm76_vm1, %v69_v34, %v73_v38 }
  0x1d   :  { %v83_v42 = vsel %vm80_vm2, %v74_v39, %v75_v40 }
  0x1e   :  { %v84_v43 = vsel %vm28_vm0, %v79_v41, %v83_v42 }
  0x1f   :  { %86 = vst [vmem:[%s140_s4] sm:$0xff] %v84_v43 }

// kernel: hourglass_forward.34
= control target key start
LH: loop header
LB: loop body
LE: loop exit
PB: predicated region body
PF: predicated region fallthrough
CT: control target
= control target key end

     0   :  { %s872_s12 = smov 0   ;;  %s874_s13 = smov 0   ;;  %s1097_s0 = inlined_call_operand.vmem [shape: bf16[1,256,64], index: 0, kind: input, shape index: {}]   ;;  %s1098_s1 = inlined_call_operand.vmem [shape: bf16[1,64,4], index: 1, kind: input, shape index: {}]   ;;  %s1099_s2 = inlined_call_operand.vmem [shape: bf16[1,256,4], index: 2, kind: output, shape index: {0}]   ;;  %s1100_s3 = inlined_call_operand.vmem [shape: f32[1,2,8,4], index: 3, kind: output, shape index: {1}]  }
   0x1   :  { %s876_s14 = smov 0  }
   0x2 LB: > { %s23_s15 = sadd.s32 1, %s846_s13  ;;  %p716_p0 = scmp.ge.s32.totalorder %s850_s14, 1  ;;  %s850_s14 = sphi %s876_s14, %s14_s14   ;;  %s846_s13 = sphi %s874_s13, %s1102_s13   ;;  %s842_s12 = sphi %s872_s12, %s1101_s12  }
   0x3   : > { %p24_p1 = scmp.ge.s32.totalorder %s23_s15, 2  ;;  %p173_p2 = scmp.lt.s32.totalorder %s850_s14, 3 }
   0x5   : > { %s1104_s15 = smov (%p24_p1, %s23_s15), 0  ;;  %p174_p3 = pnand %p716_p0, %p173_p2 }
   0x6   : > { %s717_s18 = sshll.u32 (!%p174_p3), %s842_s12, 4  ;;  %p245_p5 = scmp.lt.s32.totalorder (!%p174_p3), %s842_s12, 1 }
   0x7   : > { %177 = sbr.rel (%p174_p3) target bundleno = 269 (0x10d), region = 28  ;;  %p221_p4 = scmp.lt.s32.totalorder (!%p174_p3), %s717_s18, 31 }
   0xc   : > { %v791_v0 = vld [vmem:[%s1098_s1 + $0x18] sm:$0xff]  ;;  %v790_v1 = vld [vmem:[%s1098_s1 + $0x10] sm:$0xff]  ;;  %s1106_s18 = smov (!%p221_p4, %s717_s18), 31  ;;  %v789_v2 = vld [vmem:[%s1098_s1 + $0x8] sm:$0xff]  ;;  %vm340_vm0 = vcmask 523264   ;;  %vm545_vm1 = vcmask 27648  }
   0xd   : > { %369 = vmatpush.bf16.msra.mxu0 %v791_v0  ;;  %792 = vmatpush.bf16.msra.mxu1 %v791_v0  ;;  %s718_s23 = sshll.u32 %s1106_s18, 2  ;;  %v788_v3 = vld [vmem:[%s1098_s1] sm:$0xff]  ;;  %vm414_vm2 = vcmask 31744   ;;  %s1108_s12 = smov (!%p245_p5, %s842_s12), 1 }
   0xe   : > { %793 = vmatpush.bf16.msra.mxu2 %v791_v0  ;;  %794 = vmatpush.bf16.msra.mxu3 %v791_v0  ;;  %s226_s28 = scalar_lea.vmem %s1097_s0, %s718_s23  ;;  %s922_s4 = scalar_lea.vmem %s1099_s2, %s718_s23 }
   0xf   : > { %v780_v4 = vld [vmem:[%s226_s28] sm:$0xff]  ;;  %v782_v5 = vld [vmem:[%s226_s28 + $0x10] sm:$0xff]  ;;  %v781_v8 = vld [vmem:[%s226_s28 + $0x8] sm:$0xff]  ;;  %s721_s5 = sshll.u32 %s1108_s12, 3 }
  0x10   : > { %v784_v6 = vld [vmem:[%s226_s28 + $0x20] sm:$0xff]  ;;  %v786_v7 = vld [vmem:[%s226_s28 + $0x30] sm:$0xff]  ;;  %v783_v9 = vld [vmem:[%s226_s28 + $0x18] sm:$0xff]  ;;  %s250_s8 = scalar_lea.vmem %s1100_s3, %s721_s5 }
  0x11   : > { %370 = vmatpush.bf16.msra.mxu0 %v790_v1  ;;  %795 = vmatpush.bf16.msra.mxu1 %v790_v1  ;;  %v785_v10 = vld [vmem:[%s226_s28 + $0x28] sm:$0xff]  ;;  %v787_v11 = vld [vmem:[%s226_s28 + $0x38] sm:$0xff] }
  0x12   : > { %796 = vmatpush.bf16.msra.mxu2 %v790_v1  ;;  %797 = vmatpush.bf16.msra.mxu3 %v790_v1 }
  0x15   : > { %371 = vmatpush.bf16.msra.mxu0 %v789_v2  ;;  %798 = vmatpush.bf16.msra.mxu1 %v789_v2 }
  0x16   : > { %799 = vmatpush.bf16.msra.mxu2 %v789_v2  ;;  %800 = vmatpush.bf16.msra.mxu3 %v789_v2 }
  0x19   : > { %372 = vmatpush.bf16.msra.mxu0 %v788_v3  ;;  %801 = vmatpush.bf16.msra.mxu1 %v788_v3 }
  0x1a   : > { %802 = vmatpush.bf16.msra.mxu2 %v788_v3  ;;  %803 = vmatpush.bf16.msra.mxu3 %v788_v3 }
  0x1c   : > { %770 = vmatmul.msk.bf16.vlgmr.msra.gmra.mxu0 %vm340_vm0, %v780_v4  ;;  %772 = vmatmul.msk.bf16.vlgmr.msra.gmra.mxu1 %vm340_vm0, %v782_v5 }
  0x1d   : > { %774 = vmatmul.msk.bf16.vlgmr.msra.gmra.mxu2 %vm340_vm0, %v784_v6  ;;  %776 = vmatmul.msk.bf16.vlgmr.msra.gmra.mxu3 %vm340_vm0, %v786_v7 }
  0x2c   : > { %771 = vmatmul.msk.bf16.gmra.mxu0 %vm340_vm0, %v781_v8  ;;  %773 = vmatmul.msk.bf16.gmra.mxu1 %vm340_vm0, %v783_v9 }
  0x2d   : > { %775 = vmatmul.msk.bf16.gmra.mxu2 %vm340_vm0, %v785_v10  ;;  %777 = vmatmul.msk.bf16.gmra.mxu3 %vm340_vm0, %v787_v11 }
  0x99   : > { %v924_v12 = vpop.f32.mrf.mxu0  ;;  %v926_v13 = vpop.f32.mrf.mxu1 }
  0x9a   : > { %v529_v14 = vpack.c.bf16 %v924_v12, %v924_v12  ;;  %v533_v15 = vpack.c.bf16 %v926_v13, %v926_v13  ;;  %v415_v33 = vsel %vm414_vm2, %v924_v12, 0.0  ;;  %v422_v47 = vsel %vm414_vm2, %v926_v13, 0.0 }
  0x9c   : > { %546 = vst.msk [vmem:[%s922_s4] sm:$0xf] %vm545_vm1, %v529_v14 }
  0x9d   : > { %550 = vst.msk [vmem:[%s922_s4 + $0x10] sm:$0xf] %vm545_vm1, %v533_v15 }
  0xa0   : > { %v936_v16 = vpop.f32.mrf.mxu2  ;;  %v938_v17 = vpop.f32.mrf.mxu3 }
  0xa1   : > { %v940_v18 = vpop.f32.mrf.mxu0  ;;  %v942_v19 = vpop.f32.mrf.mxu1  ;;  %v537_v20 = vpack.c.bf16 %v936_v16, %v936_v16  ;;  %v541_v23 = vpack.c.bf16 %v938_v17, %v938_v17  ;;  %v430_v59 = vsel %vm414_vm2, %v936_v16, 0.0  ;;  %v438_v3 = vsel %vm414_vm2, %v938_v17, 0.0 }
  0xa2   : > { %v530_v21 = vpack.c.bf16 %v940_v18, %v940_v18  ;;  %v534_v22 = vpack.c.bf16 %v942_v19, %v942_v19  ;;  %v416_v32 = vsel %vm414_vm2, %v940_v18, 0.0  ;;  %v424_v49 = vsel %vm414_vm2, %v942_v19, 0.0 }
  0xa3   : > { %554 = vst.msk [vmem:[%s922_s4 + $0x20] sm:$0xf] %vm545_vm1, %v537_v20  ;;  %v417_v35 = vadd.f32 %v416_v32, %v415_v33 }
  0xa4   : > { %547 = vst.msk [vmem:[%s922_s4 + $0x4] sm:$0xf] %vm545_vm1, %v530_v21 }
  0xa5   : > { %551 = vst.msk [vmem:[%s922_s4 + $0x14] sm:$0xf] %vm545_vm1, %v534_v22 }
  0xa6   : > { %558 = vst.msk [vmem:[%s922_s4 + $0x30] sm:$0xf] %vm545_vm1, %v541_v23 }
  0xa8   : > { %v960_v24 = vpop.f32.mrf.mxu2  ;;  %v962_v25 = vpop.f32.mrf.mxu3 }
  0xa9   : > { %v964_v26 = vpop.f32.mrf.mxu0  ;;  %v966_v27 = vpop.f32.mrf.mxu1  ;;  %v538_v28 = vpack.c.bf16 %v960_v24, %v960_v24  ;;  %v542_v31 = vpack.c.bf16 %v962_v25, %v962_v25  ;;  %v432_v61 = vsel %vm414_vm2, %v960_v24, 0.0  ;;  %v440_v5 = vsel %vm414_vm2, %v962_v25, 0.0 }
  0xaa   : > { %v531_v29 = vpack.c.bf16 %v964_v26, %v964_v26  ;;  %v535_v30 = vpack.c.bf16 %v966_v27, %v966_v27  ;;  %v418_v34 = vsel %vm414_vm2, %v964_v26, 0.0  ;;  %v426_v51 = vsel %vm414_vm2, %v966_v27, 0.0 }
  0xab   : > { %555 = vst.msk [vmem:[%s922_s4 + $0x24] sm:$0xf] %vm545_vm1, %v538_v28  ;;  %v419_v38 = vadd.f32 %v418_v34, %v417_v35 }
  0xac   : > { %548 = vst.msk [vmem:[%s922_s4 + $0x8] sm:$0xf] %vm545_vm1, %v531_v29 }
  0xad   : > { %552 = vst.msk [vmem:[%s922_s4 + $0x18] sm:$0xf] %vm545_vm1, %v535_v30 }
  0xae   : > { %559 = vst.msk [vmem:[%s922_s4 + $0x34] sm:$0xf] %vm545_vm1, %v542_v31 }
  0xb0   : > { %v990_v36 = vpop.f32.mrf.mxu2  ;;  %v992_v37 = vpop.f32.mrf.mxu3 }
  0xb1   : > { %v381_v39 = vpop.f32.mrf.mxu0  ;;  %v994_v40 = vpop.f32.mrf.mxu1  ;;  %v539_v41 = vpack.c.bf16 %v990_v36, %v990_v36  ;;  %v543_v45 = vpack.c.bf16 %v992_v37, %v992_v37  ;;  %v434_v63 = vsel %vm414_vm2, %v990_v36, 0.0  ;;  %v442_v7 = vsel %vm414_vm2, %v992_v37, 0.0 }
  0xb2   : > { %v420_v42 = vsel %vm414_vm2, %v381_v39, 0.0  ;;  %v532_v43 = vpack.c.bf16 %v381_v39, %v381_v39  ;;  %v536_v44 = vpack.c.bf16 %v994_v40, %v994_v40  ;;  %v428_v56 = vsel %vm414_vm2, %v994_v40, 0.0 }
  0xb3   : > { %v421_v46 = vadd.f32 %v420_v42, %v419_v38  ;;  %556 = vst.msk [vmem:[%s922_s4 + $0x28] sm:$0xf] %vm545_vm1, %v539_v41 }
  0xb4   : > { %549 = vst.msk [vmem:[%s922_s4 + $0xc] sm:$0xf] %vm545_vm1, %v532_v43 }
  0xb5   : > { %v423_v48 = vadd.f32 %v422_v47, %v421_v46  ;;  %553 = vst.msk [vmem:[%s922_s4 + $0x1c] sm:$0xf] %vm545_vm1, %v536_v44 }
  0xb6   : > { %560 = vst.msk [vmem:[%s922_s4 + $0x38] sm:$0xf] %vm545_vm1, %v543_v45 }
  0xb7   : > { %v425_v50 = vadd.f32 %v424_v49, %v423_v48 }
  0xb8   : > { %v1017_v52 = vpop.f32.mrf.mxu2  ;;  %v1019_v53 = vpop.f32.mrf.mxu3 }
  0xb9   : > { %v427_v54 = vadd.f32 %v426_v51, %v425_v50  ;;  %v540_v55 = vpack.c.bf16 %v1017_v52, %v1017_v52  ;;  %v544_v57 = vpack.c.bf16 %v1019_v53, %v1019_v53  ;;  %v436_v1 = vsel %vm414_vm2, %v1017_v52, 0.0 }
  0xba   : > { %v444_v9 = vsel %vm414_vm2, %v1019_v53, 0.0 }
  0xbb   : > { %v429_v58 = vadd.f32 %v428_v56, %v427_v54  ;;  %557 = vst.msk [vmem:[%s922_s4 + $0x2c] sm:$0xf] %vm545_vm1, %v540_v55 }
  0xbc   : > { %561 = vst.msk [vmem:[%s922_s4 + $0x3c] sm:$0xf] %vm545_vm1, %v544_v57 }
  0xbd   : > { %v431_v60 = vadd.f32 %v430_v59, %v429_v58 }
  0xbf   : > { %v433_v62 = vadd.f32 %v432_v61, %v431_v60 }
  0xc1   : > { %v435_v0 = vadd.f32 %v434_v63, %v433_v62 }
  0xc3   : > { %v437_v2 = vadd.f32 %v436_v1, %v435_v0 }
  0xc5   : > { %v439_v4 = vadd.f32 %v438_v3, %v437_v2 }
  0xc7   : > { %v441_v6 = vadd.f32 %v440_v5, %v439_v4 }
  0xc9   : > { %v443_v8 = vadd.f32 %v442_v7, %v441_v6 }
  0xcb   : > { %v445_v10 = vadd.f32 %v444_v9, %v443_v8 }
  0xcd   : > { %v446_v11 = vrot.slane %v445_v10, 4 }
  0xcf   : > { %v447_v14 = vadd.f32 %v446_v11, %v445_v10 }
  0xd1   : > { %v448_v15 = vrot.slane %v447_v14, 2 }
  0xd3   : > { %v449_v20 = vadd.f32 %v448_v15, %v447_v14 }
  0xd5   : > { %v450_v21 = vrot.slane %v449_v20, 1 }
  0xd7   : > { %v1047_v22 = vadd.f32 %v450_v21, %v449_v20 }
  0xd9   : > { %v452_v23 = vmul.f32 0.0078125, %v1047_v22 }
  0xdb   : > { %v453_v28 = vsub.f32 %v924_v12, %v452_v23  ;;  %v454_v29 = vsub.f32 %v940_v18, %v452_v23  ;;  %v455_v30 = vsub.f32 %v964_v26, %v452_v23  ;;  %v456_v31 = vsub.f32 %v381_v39, %v452_v23 }
  0xdc   : > { %v457_v34 = vsub.f32 %v926_v13, %v452_v23  ;;  %v458_v38 = vsub.f32 %v942_v19, %v452_v23  ;;  %v459_v12 = vsub.f32 %v966_v27, %v452_v23  ;;  %v460_v39 = vsub.f32 %v994_v40, %v452_v23 }
  0xdd   : > { %v469_v32 = vmul.f32 %v453_v28, %v453_v28  ;;  %v470_v33 = vmul.f32 %v454_v29, %v454_v29  ;;  %v471_v35 = vmul.f32 %v455_v30, %v455_v30  ;;  %v472_v41 = vmul.f32 %v456_v31, %v456_v31 }
  0xde   : > { %v473_v45 = vmul.f32 %v457_v34, %v457_v34  ;;  %v474_v46 = vmul.f32 %v458_v38, %v458_v38  ;;  %v461_v19 = vsub.f32 %v936_v16, %v452_v23  ;;  %v475_v48 = vmul.f32 %v459_v12, %v459_v12 }
  0xdf   : > { %v485_v42 = vsel %vm414_vm2, %v469_v32, 0.0  ;;  %v486_v43 = vsel %vm414_vm2, %v470_v33, 0.0  ;;  %v488_v18 = vsel %vm414_vm2, %v471_v35, 0.0  ;;  %v490_v13 = vsel %vm414_vm2, %v472_v41, 0.0 }
  0xe0   : > { %v487_v44 = vadd.f32 %v486_v43, %v485_v42  ;;  %v492_v49 = vsel %vm414_vm2, %v473_v45, 0.0  ;;  %v462_v51 = vsub.f32 %v960_v24, %v452_v23  ;;  %v476_v54 = vmul.f32 %v460_v39, %v460_v39 }
  0xe1   : > { %v494_v27 = vsel %vm414_vm2, %v474_v46, 0.0  ;;  %v463_v56 = vsub.f32 %v990_v36, %v452_v23  ;;  %v477_v57 = vmul.f32 %v461_v19, %v461_v19  ;;  %v496_v40 = vsel %vm414_vm2, %v475_v48, 0.0 }
  0xe2   : > { %v489_v26 = vadd.f32 %v488_v18, %v487_v44  ;;  %v464_v59 = vsub.f32 %v1017_v52, %v452_v23  ;;  %v478_v60 = vmul.f32 %v462_v51, %v462_v51  ;;  %v498_v16 = vsel %vm414_vm2, %v476_v54, 0.0 }
  0xe3   : > { %v465_v62 = vsub.f32 %v938_v17, %v452_v23  ;;  %v479_v63 = vmul.f32 %v463_v56, %v463_v56  ;;  %v500_v24 = vsel %vm414_vm2, %v477_v57, 0.0  ;;  %v466_v1 = vsub.f32 %v962_v25, %v452_v23 }
  0xe4   : > { %v491_v47 = vadd.f32 %v490_v13, %v489_v26  ;;  %v480_v2 = vmul.f32 %v464_v59, %v464_v59  ;;  %v502_v36 = vsel %vm414_vm2, %v478_v60, 0.0  ;;  %v467_v4 = vsub.f32 %v992_v37, %v452_v23 }
  0xe5   : > { %v481_v5 = vmul.f32 %v465_v62, %v465_v62  ;;  %v504_v52 = vsel %vm414_vm2, %v479_v63, 0.0  ;;  %v468_v7 = vsub.f32 %v1019_v53, %v452_v23  ;;  %v482_v17 = vmul.f32 %v466_v1, %v466_v1 }
  0xe6   : > { %v493_v50 = vadd.f32 %v492_v49, %v491_v47  ;;  %v506_v8 = vsel %vm414_vm2, %v480_v2, 0.0  ;;  %v483_v10 = vmul.f32 %v467_v4, %v467_v4  ;;  %v522_v23 = vlaneseq }
  0xe7   : > { %v508_v25 = vsel %vm414_vm2, %v481_v5, 0.0  ;;  %v484_v14 = vmul.f32 %v468_v7, %v468_v7  ;;  %v510_v15 = vsel %vm414_vm2, %v482_v17, 0.0 }
  0xe8   : > { %v495_v55 = vadd.f32 %v494_v27, %v493_v50  ;;  %v512_v20 = vsel %vm414_vm2, %v483_v10, 0.0  ;;  %v523_v32 = vshrl.u32 %v522_v23, 7 }
  0xe9   : > { %v514_v28 = vsel %vm414_vm2, %v484_v14, 0.0 }
  0xea   : > { %v497_v58 = vadd.f32 %v496_v40, %v495_v55  ;;  %vm525_vm3 = vcmp.eq.s32.totalorder %v523_v32, 1  ;;  %vm524_vm4 = vcmp.eq.s32.totalorder %v523_v32, 0 }
  0xec   : > { %v499_v61 = vadd.f32 %v498_v16, %v497_v58 }
  0xee   : > { %v501_v0 = vadd.f32 %v500_v24, %v499_v61 }
  0xf0   : > { %v503_v3 = vadd.f32 %v502_v36, %v501_v0 }
  0xf2   : > { %v505_v6 = vadd.f32 %v504_v52, %v503_v3 }
  0xf4   : > { %v507_v9 = vadd.f32 %v506_v8, %v505_v6 }
  0xf6   : > { %v509_v11 = vadd.f32 %v508_v25, %v507_v9 }
  0xf8   : > { %v511_v37 = vadd.f32 %v510_v15, %v509_v11 }
  0xfa   : > { %v513_v21 = vadd.f32 %v512_v20, %v511_v37 }
  0xfc   : > { %v515_v29 = vadd.f32 %v514_v28, %v513_v21 }
  0xfe   : > { %v516_v53 = vrot.slane %v515_v29, 4 }
 0x100   : > { %v517_v30 = vadd.f32 %v516_v53, %v515_v29 }
 0x102   : > { %v518_v31 = vrot.slane %v517_v30, 2 }
 0x104   : > { %v519_v33 = vadd.f32 %v518_v31, %v517_v30 }
 0x106   : > { %v520_v34 = vrot.slane %v519_v33, 1 }
 0x108   : > { %v521_v35 = vadd.f32 %v520_v34, %v519_v33 }
 0x10a   : > { %v526_v38 = vsel %vm525_vm3, %v521_v35, 0.0 }
 0x10b   : > { %v527_v41 = vsel %vm524_vm4, %v1047_v22, %v526_v38 }
 0x10c   : > { %528 = vst.msk [vmem:[%s250_s8] sm:$0xff] %vm414_vm2, %v527_v41 }
 0x10d PF: > { %s14_s14 = sadd.s32 1, %s850_s14   ;;  %s1101_s12 = smov %s846_s13 }
 0x10e   : > { %p11_p6 = scmp.ge.s32.totalorder %s14_s14, 4   ;;  %s1102_s13 = smov %s1104_s15 }
 0x110   :  { %13 = sbr.rel (!%p11_p6) target bundleno = 2 (0x2), region = 73 }

// kernel: hourglass_forward.33
= control target key start
LH: loop header
LB: loop body
LE: loop exit
PB: predicated region body
PF: predicated region fallthrough
CT: control target
= control target key end

     0   :  { %s877_s12 = smov 0   ;;  %s879_s13 = smov 0   ;;  %s1120_s0 = inlined_call_operand.vmem [shape: bf16[3,256,32], index: 0, kind: input, shape index: {}]   ;;  %s1121_s1 = inlined_call_operand.vmem [shape: bf16[3,32,4], index: 1, kind: input, shape index: {}]   ;;  %s1122_s2 = inlined_call_operand.vmem [shape: bf16[3,256,4], index: 2, kind: output, shape index: {0}]   ;;  %s1123_s3 = inlined_call_operand.vmem [shape: f32[3,2,8,4], index: 3, kind: output, shape index: {1}]  }
   0x1   :  { %s881_s14 = smov 0   ;;  %s883_s15 = smov 0  }
   0x2   :  { %s885_s16 = smov 0  }
   0x3 LB: > { %s23_s17 = sadd.s32 1, %s847_s14  ;;  %s26_s18 = sadd.s32 1, %s851_s15  ;;  %s855_s16 = sphi %s885_s16, %s14_s16   ;;  %s851_s15 = sphi %s883_s15, %s1127_s15   ;;  %s847_s14 = sphi %s881_s14, %s1126_s14   ;;  %s843_s13 = sphi %s879_s13, %s1125_s13   ;;  %s839_s12 = sphi %s877_s12, %s1124_s12  }
   0x4   : > { %p24_p0 = scmp.ge.s32.totalorder %s23_s17, 2  ;;  %p699_p1 = scmp.ge.s32.totalorder %s855_s16, 1 }
   0x5   : > { %p173_p2 = scmp.lt.s32.totalorder %s855_s16, 7 }
   0x6   : > { %s1129_s17 = smov (%p24_p0, %s23_s17), 0  ;;  %s1131_s18 = smov (!%p24_p0, %s26_s18), %s851_s15 }
   0x7   : > { %p174_p3 = pnand %p699_p1, %p173_p2  ;;  %p28_p4 = scmp.ge.s32.totalorder %s1131_s18, 3 }
   0x8   : > { %s700_s19 = sshll.u32 (!%p174_p3), %s839_s12, 4  ;;  %p219_p5 = scmp.lt.s32.totalorder (!%p174_p3), %s843_s13, 2 }
   0x9   : > { %s1133_s18 = smov (%p28_p4, %s1131_s18), 0  ;;  %177 = sbr.rel (%p174_p3) target bundleno = 266 (0x10a), region = 28 }
   0xa   : > { %p221_p6 = scmp.lt.s32.totalorder (!%p174_p3), %s700_s19, 31  ;;  %p245_p7 = scmp.lt.s32.totalorder (!%p174_p3), %s839_s12, 1 }
   0xe   : > { %s1135_s13 = smov (!%p219_p5, %s843_s13), 2  ;;  %s1137_s19 = smov (!%p221_p6, %s700_s19), 31  ;;  %vm324_vm0 = vcmask 261120   ;;  %vm529_vm1 = vcmask 27648   ;;  %vm398_vm2 = vcmask 31744  }
   0xf   : > { %s701_s20 = sshll.u32 %s1135_s13, 5  ;;  %s760_s21 = sshll.u32 %s1135_s13, 4 }
  0x10   : > { %s914_s22 = sadd.s32 %s701_s20, %s1137_s19  ;;  %s232_s25 = scalar_lea.vmem %s1121_s1, %s760_s21 }
  0x11   : > { %s702_s26 = sshll.u32 %s914_s22, 2  ;;  %v770_v0 = vld [vmem:[%s232_s25 + $0x8] sm:$0xff]  ;;  %v769_v1 = vld [vmem:[%s232_s25] sm:$0xff]  ;;  %s1139_s12 = smov (!%p245_p7, %s839_s12), 1 }
  0x12   : > { %s226_s29 = scalar_lea.vmem %s1120_s0, %s702_s26  ;;  %355 = vmatpush.bf16.msra.mxu0 %v770_v0  ;;  %771 = vmatpush.bf16.msra.mxu1 %v770_v0  ;;  %s938_s5 = scalar_lea.vmem %s1122_s2, %s702_s26 }
  0x13   : > { %772 = vmatpush.bf16.msra.mxu2 %v770_v0  ;;  %773 = vmatpush.bf16.msra.mxu3 %v770_v0  ;;  %v761_v2 = vld [vmem:[%s226_s29] sm:$0xff]  ;;  %v763_v3 = vld [vmem:[%s226_s29 + $0x10] sm:$0xff]  ;;  %v762_v6 = vld [vmem:[%s226_s29 + $0x8] sm:$0xff]  ;;  %s708_s6 = sshll.u32 %s1135_s13, 1 }
  0x14   : > { %v765_v4 = vld [vmem:[%s226_s29 + $0x20] sm:$0xff]  ;;  %v767_v5 = vld [vmem:[%s226_s29 + $0x30] sm:$0xff]  ;;  %v764_v7 = vld [vmem:[%s226_s29 + $0x18] sm:$0xff]  ;;  %s248_s7 = sadd.s32 %s708_s6, %s1139_s12 }
  0x15   : > { %v766_v8 = vld [vmem:[%s226_s29 + $0x28] sm:$0xff]  ;;  %v768_v9 = vld [vmem:[%s226_s29 + $0x38] sm:$0xff]  ;;  %s709_s8 = sshll.u32 %s248_s7, 3 }
  0x16   : > { %356 = vmatpush.bf16.msra.mxu0 %v769_v1  ;;  %774 = vmatpush.bf16.msra.mxu1 %v769_v1  ;;  %s250_s11 = scalar_lea.vmem %s1123_s3, %s709_s8 }
  0x17   : > { %775 = vmatpush.bf16.msra.mxu2 %v769_v1  ;;  %776 = vmatpush.bf16.msra.mxu3 %v769_v1 }
  0x19   : > { %750 = vmatmul.msk.bf16.vlgmr.msra.gmra.mxu0 %vm324_vm0, %v761_v2  ;;  %752 = vmatmul.msk.bf16.vlgmr.msra.gmra.mxu1 %vm324_vm0, %v763_v3 }
  0x1a   : > { %754 = vmatmul.msk.bf16.vlgmr.msra.gmra.mxu2 %vm324_vm0, %v765_v4  ;;  %756 = vmatmul.msk.bf16.vlgmr.msra.gmra.mxu3 %vm324_vm0, %v767_v5 }
  0x29   : > { %751 = vmatmul.msk.bf16.gmra.mxu0 %vm324_vm0, %v762_v6  ;;  %753 = vmatmul.msk.bf16.gmra.mxu1 %vm324_vm0, %v764_v7 }
  0x2a   : > { %755 = vmatmul.msk.bf16.gmra.mxu2 %vm324_vm0, %v766_v8  ;;  %757 = vmatmul.msk.bf16.gmra.mxu3 %vm324_vm0, %v768_v9 }
  0x96   : > { %v940_v10 = vpop.f32.mrf.mxu0  ;;  %v942_v11 = vpop.f32.mrf.mxu1 }
  0x97   : > { %v513_v12 = vpack.c.bf16 %v940_v10, %v940_v10  ;;  %v517_v13 = vpack.c.bf16 %v942_v11, %v942_v11  ;;  %v399_v31 = vsel %vm398_vm2, %v940_v10, 0.0  ;;  %v406_v45 = vsel %vm398_vm2, %v942_v11, 0.0 }
  0x99   : > { %530 = vst.msk [vmem:[%s938_s5] sm:$0xf] %vm529_vm1, %v513_v12 }
  0x9a   : > { %534 = vst.msk [vmem:[%s938_s5 + $0x10] sm:$0xf] %vm529_vm1, %v517_v13 }
  0x9d   : > { %v952_v14 = vpop.f32.mrf.mxu2  ;;  %v954_v15 = vpop.f32.mrf.mxu3 }
  0x9e   : > { %v956_v16 = vpop.f32.mrf.mxu0  ;;  %v958_v17 = vpop.f32.mrf.mxu1  ;;  %v521_v18 = vpack.c.bf16 %v952_v14, %v952_v14  ;;  %v525_v21 = vpack.c.bf16 %v954_v15, %v954_v15  ;;  %v414_v57 = vsel %vm398_vm2, %v952_v14, 0.0  ;;  %v422_v1 = vsel %vm398_vm2, %v954_v15, 0.0 }
  0x9f   : > { %v514_v19 = vpack.c.bf16 %v956_v16, %v956_v16  ;;  %v518_v20 = vpack.c.bf16 %v958_v17, %v958_v17  ;;  %v400_v30 = vsel %vm398_vm2, %v956_v16, 0.0  ;;  %v408_v47 = vsel %vm398_vm2, %v958_v17, 0.0 }
  0xa0   : > { %538 = vst.msk [vmem:[%s938_s5 + $0x20] sm:$0xf] %vm529_vm1, %v521_v18  ;;  %v401_v33 = vadd.f32 %v400_v30, %v399_v31 }
  0xa1   : > { %531 = vst.msk [vmem:[%s938_s5 + $0x4] sm:$0xf] %vm529_vm1, %v514_v19 }
  0xa2   : > { %535 = vst.msk [vmem:[%s938_s5 + $0x14] sm:$0xf] %vm529_vm1, %v518_v20 }
  0xa3   : > { %542 = vst.msk [vmem:[%s938_s5 + $0x30] sm:$0xf] %vm529_vm1, %v525_v21 }
  0xa5   : > { %v976_v22 = vpop.f32.mrf.mxu2  ;;  %v978_v23 = vpop.f32.mrf.mxu3 }
  0xa6   : > { %v980_v24 = vpop.f32.mrf.mxu0  ;;  %v982_v25 = vpop.f32.mrf.mxu1  ;;  %v522_v26 = vpack.c.bf16 %v976_v22, %v976_v22  ;;  %v526_v29 = vpack.c.bf16 %v978_v23, %v978_v23  ;;  %v416_v59 = vsel %vm398_vm2, %v976_v22, 0.0  ;;  %v424_v3 = vsel %vm398_vm2, %v978_v23, 0.0 }
  0xa7   : > { %v515_v27 = vpack.c.bf16 %v980_v24, %v980_v24  ;;  %v519_v28 = vpack.c.bf16 %v982_v25, %v982_v25  ;;  %v402_v32 = vsel %vm398_vm2, %v980_v24, 0.0  ;;  %v410_v49 = vsel %vm398_vm2, %v982_v25, 0.0 }
  0xa8   : > { %539 = vst.msk [vmem:[%s938_s5 + $0x24] sm:$0xf] %vm529_vm1, %v522_v26  ;;  %v403_v36 = vadd.f32 %v402_v32, %v401_v33 }
  0xa9   : > { %532 = vst.msk [vmem:[%s938_s5 + $0x8] sm:$0xf] %vm529_vm1, %v515_v27 }
  0xaa   : > { %536 = vst.msk [vmem:[%s938_s5 + $0x18] sm:$0xf] %vm529_vm1, %v519_v28 }
  0xab   : > { %543 = vst.msk [vmem:[%s938_s5 + $0x34] sm:$0xf] %vm529_vm1, %v526_v29 }
  0xad   : > { %v1006_v34 = vpop.f32.mrf.mxu2  ;;  %v1008_v35 = vpop.f32.mrf.mxu3 }
  0xae   : > { %v365_v37 = vpop.f32.mrf.mxu0  ;;  %v1010_v38 = vpop.f32.mrf.mxu1  ;;  %v523_v39 = vpack.c.bf16 %v1006_v34, %v1006_v34  ;;  %v527_v43 = vpack.c.bf16 %v1008_v35, %v1008_v35  ;;  %v418_v61 = vsel %vm398_vm2, %v1006_v34, 0.0  ;;  %v426_v5 = vsel %vm398_vm2, %v1008_v35, 0.0 }
  0xaf   : > { %v404_v40 = vsel %vm398_vm2, %v365_v37, 0.0  ;;  %v516_v41 = vpack.c.bf16 %v365_v37, %v365_v37  ;;  %v520_v42 = vpack.c.bf16 %v1010_v38, %v1010_v38  ;;  %v412_v54 = vsel %vm398_vm2, %v1010_v38, 0.0 }
  0xb0   : > { %v405_v44 = vadd.f32 %v404_v40, %v403_v36  ;;  %540 = vst.msk [vmem:[%s938_s5 + $0x28] sm:$0xf] %vm529_vm1, %v523_v39 }
  0xb1   : > { %533 = vst.msk [vmem:[%s938_s5 + $0xc] sm:$0xf] %vm529_vm1, %v516_v41 }
  0xb2   : > { %v407_v46 = vadd.f32 %v406_v45, %v405_v44  ;;  %537 = vst.msk [vmem:[%s938_s5 + $0x1c] sm:$0xf] %vm529_vm1, %v520_v42 }
  0xb3   : > { %544 = vst.msk [vmem:[%s938_s5 + $0x38] sm:$0xf] %vm529_vm1, %v527_v43 }
  0xb4   : > { %v409_v48 = vadd.f32 %v408_v47, %v407_v46 }
  0xb5   : > { %v1033_v50 = vpop.f32.mrf.mxu2  ;;  %v1035_v51 = vpop.f32.mrf.mxu3 }
  0xb6   : > { %v411_v52 = vadd.f32 %v410_v49, %v409_v48  ;;  %v524_v53 = vpack.c.bf16 %v1033_v50, %v1033_v50  ;;  %v528_v55 = vpack.c.bf16 %v1035_v51, %v1035_v51  ;;  %v420_v63 = vsel %vm398_vm2, %v1033_v50, 0.0 }
  0xb7   : > { %v428_v7 = vsel %vm398_vm2, %v1035_v51, 0.0 }
  0xb8   : > { %v413_v56 = vadd.f32 %v412_v54, %v411_v52  ;;  %541 = vst.msk [vmem:[%s938_s5 + $0x2c] sm:$0xf] %vm529_vm1, %v524_v53 }
  0xb9   : > { %545 = vst.msk [vmem:[%s938_s5 + $0x3c] sm:$0xf] %vm529_vm1, %v528_v55 }
  0xba   : > { %v415_v58 = vadd.f32 %v414_v57, %v413_v56 }
  0xbc   : > { %v417_v60 = vadd.f32 %v416_v59, %v415_v58 }
  0xbe   : > { %v419_v62 = vadd.f32 %v418_v61, %v417_v60 }
  0xc0   : > { %v421_v0 = vadd.f32 %v420_v63, %v419_v62 }
  0xc2   : > { %v423_v2 = vadd.f32 %v422_v1, %v421_v0 }
  0xc4   : > { %v425_v4 = vadd.f32 %v424_v3, %v423_v2 }
  0xc6   : > { %v427_v6 = vadd.f32 %v426_v5, %v425_v4 }
  0xc8   : > { %v429_v8 = vadd.f32 %v428_v7, %v427_v6 }
  0xca   : > { %v430_v9 = vrot.slane %v429_v8, 4 }
  0xcc   : > { %v431_v12 = vadd.f32 %v430_v9, %v429_v8 }
  0xce   : > { %v432_v13 = vrot.slane %v431_v12, 2 }
  0xd0   : > { %v433_v18 = vadd.f32 %v432_v13, %v431_v12 }
  0xd2   : > { %v434_v19 = vrot.slane %v433_v18, 1 }
  0xd4   : > { %v1063_v20 = vadd.f32 %v434_v19, %v433_v18 }
  0xd6   : > { %v436_v21 = vmul.f32 0.0078125, %v1063_v20 }
  0xd8   : > { %v437_v26 = vsub.f32 %v940_v10, %v436_v21  ;;  %v438_v27 = vsub.f32 %v956_v16, %v436_v21  ;;  %v439_v28 = vsub.f32 %v980_v24, %v436_v21  ;;  %v440_v29 = vsub.f32 %v365_v37, %v436_v21 }
  0xd9   : > { %v441_v32 = vsub.f32 %v942_v11, %v436_v21  ;;  %v442_v36 = vsub.f32 %v958_v17, %v436_v21  ;;  %v443_v10 = vsub.f32 %v982_v25, %v436_v21  ;;  %v444_v37 = vsub.f32 %v1010_v38, %v436_v21 }
  0xda   : > { %v453_v30 = vmul.f32 %v437_v26, %v437_v26  ;;  %v454_v31 = vmul.f32 %v438_v27, %v438_v27  ;;  %v455_v33 = vmul.f32 %v439_v28, %v439_v28  ;;  %v456_v39 = vmul.f32 %v440_v29, %v440_v29 }
  0xdb   : > { %v457_v43 = vmul.f32 %v441_v32, %v441_v32  ;;  %v458_v44 = vmul.f32 %v442_v36, %v442_v36  ;;  %v445_v17 = vsub.f32 %v952_v14, %v436_v21  ;;  %v459_v46 = vmul.f32 %v443_v10, %v443_v10 }
  0xdc   : > { %v469_v40 = vsel %vm398_vm2, %v453_v30, 0.0  ;;  %v470_v41 = vsel %vm398_vm2, %v454_v31, 0.0  ;;  %v472_v16 = vsel %vm398_vm2, %v455_v33, 0.0  ;;  %v474_v11 = vsel %vm398_vm2, %v456_v39, 0.0 }
  0xdd   : > { %v471_v42 = vadd.f32 %v470_v41, %v469_v40  ;;  %v476_v47 = vsel %vm398_vm2, %v457_v43, 0.0  ;;  %v446_v49 = vsub.f32 %v976_v22, %v436_v21  ;;  %v460_v52 = vmul.f32 %v444_v37, %v444_v37 }
  0xde   : > { %v478_v25 = vsel %vm398_vm2, %v458_v44, 0.0  ;;  %v447_v54 = vsub.f32 %v1006_v34, %v436_v21  ;;  %v461_v55 = vmul.f32 %v445_v17, %v445_v17  ;;  %v480_v38 = vsel %vm398_vm2, %v459_v46, 0.0 }
  0xdf   : > { %v473_v24 = vadd.f32 %v472_v16, %v471_v42  ;;  %v448_v57 = vsub.f32 %v1033_v50, %v436_v21  ;;  %v462_v58 = vmul.f32 %v446_v49, %v446_v49  ;;  %v482_v14 = vsel %vm398_vm2, %v460_v52, 0.0 }
  0xe0   : > { %v449_v60 = vsub.f32 %v954_v15, %v436_v21  ;;  %v463_v61 = vmul.f32 %v447_v54, %v447_v54  ;;  %v484_v22 = vsel %vm398_vm2, %v461_v55, 0.0  ;;  %v450_v63 = vsub.f32 %v978_v23, %v436_v21 }
  0xe1   : > { %v475_v45 = vadd.f32 %v474_v11, %v473_v24  ;;  %v464_v0 = vmul.f32 %v448_v57, %v448_v57  ;;  %v486_v34 = vsel %vm398_vm2, %v462_v58, 0.0  ;;  %v451_v2 = vsub.f32 %v1008_v35, %v436_v21 }
  0xe2   : > { %v465_v50 = vmul.f32 %v449_v60, %v449_v60  ;;  %v488_v3 = vsel %vm398_vm2, %v463_v61, 0.0  ;;  %v452_v5 = vsub.f32 %v1035_v51, %v436_v21  ;;  %v466_v15 = vmul.f32 %v450_v63, %v450_v63 }
  0xe3   : > { %v477_v48 = vadd.f32 %v476_v47, %v475_v45  ;;  %v490_v6 = vsel %vm398_vm2, %v464_v0, 0.0  ;;  %v467_v23 = vmul.f32 %v451_v2, %v451_v2  ;;  %v506_v27 = vlaneseq }
  0xe4   : > { %v492_v8 = vsel %vm398_vm2, %v465_v50, 0.0  ;;  %v468_v12 = vmul.f32 %v452_v5, %v452_v5  ;;  %v494_v35 = vsel %vm398_vm2, %v466_v15, 0.0 }
  0xe5   : > { %v479_v53 = vadd.f32 %v478_v25, %v477_v48  ;;  %v496_v18 = vsel %vm398_vm2, %v467_v23, 0.0  ;;  %v507_v30 = vshrl.u32 %v506_v27, 7 }
  0xe6   : > { %v498_v51 = vsel %vm398_vm2, %v468_v12, 0.0 }
  0xe7   : > { %v481_v56 = vadd.f32 %v480_v38, %v479_v53  ;;  %vm509_vm3 = vcmp.eq.s32.totalorder %v507_v30, 1  ;;  %vm508_vm4 = vcmp.eq.s32.totalorder %v507_v30, 0 }
  0xe9   : > { %v483_v59 = vadd.f32 %v482_v14, %v481_v56 }
  0xeb   : > { %v485_v62 = vadd.f32 %v484_v22, %v483_v59 }
  0xed   : > { %v487_v1 = vadd.f32 %v486_v34, %v485_v62 }
  0xef   : > { %v489_v4 = vadd.f32 %v488_v3, %v487_v1 }
  0xf1   : > { %v491_v7 = vadd.f32 %v490_v6, %v489_v4 }
  0xf3   : > { %v493_v9 = vadd.f32 %v492_v8, %v491_v7 }
  0xf5   : > { %v495_v13 = vadd.f32 %v494_v35, %v493_v9 }
  0xf7   : > { %v497_v19 = vadd.f32 %v496_v18, %v495_v13 }
  0xf9   : > { %v499_v21 = vadd.f32 %v498_v51, %v497_v19 }
  0xfb   : > { %v500_v26 = vrot.slane %v499_v21, 4 }
  0xfd   : > { %v501_v28 = vadd.f32 %v500_v26, %v499_v21 }
  0xff   : > { %v502_v29 = vrot.slane %v501_v28, 2 }
 0x101   : > { %v503_v31 = vadd.f32 %v502_v29, %v501_v28 }
 0x103   : > { %v504_v32 = vrot.slane %v503_v31, 1 }
 0x105   : > { %v505_v33 = vadd.f32 %v504_v32, %v503_v31 }
 0x107   : > { %v510_v36 = vsel %vm509_vm3, %v505_v33, 0.0 }
 0x108   : > { %v511_v39 = vsel %vm508_vm4, %v1063_v20, %v510_v36 }
 0x109   : > { %512 = vst.msk [vmem:[%s250_s11] sm:$0xff] %vm398_vm2, %v511_v39 }
 0x10a PF: > { %s14_s16 = sadd.s32 1, %s855_s16   ;;  %s1124_s12 = smov %s847_s14 }
 0x10b   : > { %p11_p8 = scmp.ge.s32.totalorder %s14_s16, 8   ;;  %s1125_s13 = smov %s851_s15 }
 0x10c   : > { %s1126_s14 = smov %s1129_s17  ;;  %s1127_s15 = smov %s1133_s18 }
 0x10d   :  { %13 = sbr.rel (!%p11_p8) target bundleno = 3 (0x3), region = 73 }

// kernel: squeeze.184
= control target key start
LH: loop header
LB: loop body
LE: loop exit
PB: predicated region body
PF: predicated region fallthrough
CT: control target
= control target key end

     0   :  { %vm15_vm0 = vcmask 31744   ;;  %s59_s0 = inlined_call_operand.vmem [shape: f32[3,2,4], index: 0, kind: input, shape index: {}]   ;;  %s60_s1 = inlined_call_operand.vmem [shape: f32[6,4], index: 1, kind: output, shape index: {}]  }
   0x1   :  { %v27_v0 = vld [vmem:[%s59_s0 + $0x4] sm:$0x3]  ;;  %v28_v1 = vld [vmem:[%s59_s0 + $0x2] sm:$0x3]  ;;  %v12_v2 = vld [vmem:[%s59_s0] sm:$0x3] }
   0x2   :  { %7 = vst [vmem:[#allocation0] sm:$0x3] %v27_v0 }
   0x3   :  { %11 = vst [vmem:[#allocation0 + $0x10] sm:$0x3] %v28_v1 }
   0x4   :  { %13 = vst [vmem:[#allocation0 + $0x8] sm:$0x3] %v12_v2 }
   0x9   :  { %v23_v3 = vld [vmem:[#allocation0] sm:$0x3]  }
   0xa   :  { %v18_v4 = vld [vmem:[#allocation0 + $0x10] sm:$0x3]   ;;  %30 = vst.msk [vmem:[%s60_s1 + $0x4] sm:$0x3] %vm15_vm0, %v23_v3  }
   0xb   :  { %v14_v5 = vld [vmem:[#allocation0 + $0x8] sm:$0x3]   ;;  %29 = vst.msk [vmem:[%s60_s1 + $0x2] sm:$0x3] %vm15_vm0, %v18_v4  }
   0xc   :  { %16 = vst.msk [vmem:[%s60_s1] sm:$0x3] %vm15_vm0, %v14_v5  }

// kernel: hourglass_forward.32
= control target key start
LH: loop header
LB: loop body
LE: loop exit
PB: predicated region body
PF: predicated region fallthrough
CT: control target
= control target key end

     0   :  { %s861_s12 = smov 0   ;;  %s863_s13 = smov 0   ;;  %s1097_s0 = inlined_call_operand.vmem [shape: bf16[3,256,16], index: 0, kind: input, shape index: {}]   ;;  %s1098_s1 = inlined_call_operand.vmem [shape: bf16[3,16,4], index: 1, kind: input, shape index: {}]   ;;  %s1099_s2 = inlined_call_operand.vmem [shape: bf16[3,256,4], index: 2, kind: output, shape index: {0}]   ;;  %s1100_s3 = inlined_call_operand.vmem [shape: f32[3,2,8,4], index: 3, kind: output, shape index: {1}]  }
   0x1   :  { %s865_s14 = smov 0   ;;  %s867_s15 = smov 0  }
   0x2   :  { %s869_s16 = smov 0  }
   0x3 LB: > { %s23_s17 = sadd.s32 1, %s831_s14  ;;  %s26_s18 = sadd.s32 1, %s835_s15  ;;  %s839_s16 = sphi %s869_s16, %s14_s16   ;;  %s835_s15 = sphi %s867_s15, %s1104_s15   ;;  %s831_s14 = sphi %s865_s14, %s1103_s14   ;;  %s827_s13 = sphi %s863_s13, %s1102_s13   ;;  %s823_s12 = sphi %s861_s12, %s1101_s12  }
   0x4   : > { %p24_p0 = scmp.ge.s32.totalorder %s23_s17, 2  ;;  %p691_p1 = scmp.ge.s32.totalorder %s839_s16, 1 }
   0x5   : > { %p173_p2 = scmp.lt.s32.totalorder %s839_s16, 7 }
   0x6   : > { %s1106_s17 = smov (%p24_p0, %s23_s17), 0  ;;  %s1108_s18 = smov (!%p24_p0, %s26_s18), %s835_s15 }
   0x7   : > { %p174_p3 = pnand %p691_p1, %p173_p2  ;;  %p28_p4 = scmp.ge.s32.totalorder %s1108_s18, 3 }
   0x8   : > { %s692_s19 = sshll.u32 (!%p174_p3), %s823_s12, 4  ;;  %p219_p5 = scmp.lt.s32.totalorder (!%p174_p3), %s827_s13, 2 }
   0x9   : > { %s1110_s18 = smov (%p28_p4, %s1108_s18), 0  ;;  %177 = sbr.rel (%p174_p3) target bundleno = 262 (0x106), region = 28 }
   0xa   : > { %p221_p6 = scmp.lt.s32.totalorder (!%p174_p3), %s692_s19, 31  ;;  %p245_p7 = scmp.lt.s32.totalorder (!%p174_p3), %s823_s12, 1 }
   0xe   : > { %s1112_s13 = smov (!%p219_p5, %s827_s13), 2  ;;  %s1114_s19 = smov (!%p221_p6, %s692_s19), 31  ;;  %vm316_vm0 = vcmask 130048   ;;  %vm521_vm1 = vcmask 27648   ;;  %vm390_vm2 = vcmask 31744  }
   0xf   : > { %s693_s20 = sshll.u32 %s1112_s13, 5  ;;  %s748_s21 = sshll.u32 %s1112_s13, 3 }
  0x10   : > { %s224_s22 = sadd.s32 %s693_s20, %s1114_s19  ;;  %s232_s25 = scalar_lea.vmem %s1098_s1, %s748_s21 }
  0x11   : > { %s694_s26 = sshll.u32 %s224_s22, 2  ;;  %v757_v0 = vld [vmem:[%s232_s25] sm:$0xff]  ;;  %s1116_s12 = smov (!%p245_p7, %s823_s12), 1 }
  0x12   : > { %s226_s29 = scalar_lea.vmem %s1097_s0, %s694_s26  ;;  %348 = vmatpush.bf16.msra.mxu0 %v757_v0  ;;  %758 = vmatpush.bf16.msra.mxu1 %v757_v0  ;;  %s915_s5 = scalar_lea.vmem %s1099_s2, %s694_s26 }
  0x13   : > { %v749_v1 = vld [vmem:[%s226_s29] sm:$0xff]  ;;  %v751_v2 = vld [vmem:[%s226_s29 + $0x10] sm:$0xff]  ;;  %759 = vmatpush.bf16.msra.mxu2 %v757_v0  ;;  %760 = vmatpush.bf16.msra.mxu3 %v757_v0  ;;  %v750_v5 = vld [vmem:[%s226_s29 + $0x8] sm:$0xff]  ;;  %s700_s6 = sshll.u32 %s1112_s13, 1 }
  0x14   : > { %v753_v3 = vld [vmem:[%s226_s29 + $0x20] sm:$0xff]  ;;  %v755_v4 = vld [vmem:[%s226_s29 + $0x30] sm:$0xff]  ;;  %v752_v6 = vld [vmem:[%s226_s29 + $0x18] sm:$0xff]  ;;  %s248_s7 = sadd.s32 %s700_s6, %s1116_s12 }
  0x15   : > { %738 = vmatmul.msk.bf16.vlgmr.msra.gmra.mxu0 %vm316_vm0, %v749_v1  ;;  %740 = vmatmul.msk.bf16.vlgmr.msra.gmra.mxu1 %vm316_vm0, %v751_v2  ;;  %v754_v7 = vld [vmem:[%s226_s29 + $0x28] sm:$0xff]  ;;  %v756_v8 = vld [vmem:[%s226_s29 + $0x38] sm:$0xff]  ;;  %s701_s8 = sshll.u32 %s248_s7, 3 }
  0x16   : > { %742 = vmatmul.msk.bf16.vlgmr.msra.gmra.mxu2 %vm316_vm0, %v753_v3  ;;  %744 = vmatmul.msk.bf16.vlgmr.msra.gmra.mxu3 %vm316_vm0, %v755_v4  ;;  %s250_s11 = scalar_lea.vmem %s1100_s3, %s701_s8 }
  0x25   : > { %739 = vmatmul.msk.bf16.gmra.mxu0 %vm316_vm0, %v750_v5  ;;  %741 = vmatmul.msk.bf16.gmra.mxu1 %vm316_vm0, %v752_v6 }
  0x26   : > { %743 = vmatmul.msk.bf16.gmra.mxu2 %vm316_vm0, %v754_v7  ;;  %745 = vmatmul.msk.bf16.gmra.mxu3 %vm316_vm0, %v756_v8 }
  0x92   : > { %v917_v9 = vpop.f32.mrf.mxu0  ;;  %v919_v10 = vpop.f32.mrf.mxu1 }
  0x93   : > { %v505_v11 = vpack.c.bf16 %v917_v9, %v917_v9  ;;  %v509_v12 = vpack.c.bf16 %v919_v10, %v919_v10  ;;  %v391_v30 = vsel %vm390_vm2, %v917_v9, 0.0  ;;  %v398_v44 = vsel %vm390_vm2, %v919_v10, 0.0 }
  0x95   : > { %522 = vst.msk [vmem:[%s915_s5] sm:$0xf] %vm521_vm1, %v505_v11 }
  0x96   : > { %526 = vst.msk [vmem:[%s915_s5 + $0x10] sm:$0xf] %vm521_vm1, %v509_v12 }
  0x99   : > { %v929_v13 = vpop.f32.mrf.mxu2  ;;  %v931_v14 = vpop.f32.mrf.mxu3 }
  0x9a   : > { %v933_v15 = vpop.f32.mrf.mxu0  ;;  %v935_v16 = vpop.f32.mrf.mxu1  ;;  %v513_v17 = vpack.c.bf16 %v929_v13, %v929_v13  ;;  %v517_v20 = vpack.c.bf16 %v931_v14, %v931_v14  ;;  %v406_v56 = vsel %vm390_vm2, %v929_v13, 0.0  ;;  %v414_v0 = vsel %vm390_vm2, %v931_v14, 0.0 }
  0x9b   : > { %v506_v18 = vpack.c.bf16 %v933_v15, %v933_v15  ;;  %v510_v19 = vpack.c.bf16 %v935_v16, %v935_v16  ;;  %v392_v29 = vsel %vm390_vm2, %v933_v15, 0.0  ;;  %v400_v46 = vsel %vm390_vm2, %v935_v16, 0.0 }
  0x9c   : > { %530 = vst.msk [vmem:[%s915_s5 + $0x20] sm:$0xf] %vm521_vm1, %v513_v17  ;;  %v393_v32 = vadd.f32 %v392_v29, %v391_v30 }
  0x9d   : > { %523 = vst.msk [vmem:[%s915_s5 + $0x4] sm:$0xf] %vm521_vm1, %v506_v18 }
  0x9e   : > { %527 = vst.msk [vmem:[%s915_s5 + $0x14] sm:$0xf] %vm521_vm1, %v510_v19 }
  0x9f   : > { %534 = vst.msk [vmem:[%s915_s5 + $0x30] sm:$0xf] %vm521_vm1, %v517_v20 }
  0xa1   : > { %v953_v21 = vpop.f32.mrf.mxu2  ;;  %v955_v22 = vpop.f32.mrf.mxu3 }
  0xa2   : > { %v957_v23 = vpop.f32.mrf.mxu0  ;;  %v959_v24 = vpop.f32.mrf.mxu1  ;;  %v514_v25 = vpack.c.bf16 %v953_v21, %v953_v21  ;;  %v518_v28 = vpack.c.bf16 %v955_v22, %v955_v22  ;;  %v408_v58 = vsel %vm390_vm2, %v953_v21, 0.0  ;;  %v416_v2 = vsel %vm390_vm2, %v955_v22, 0.0 }
  0xa3   : > { %v507_v26 = vpack.c.bf16 %v957_v23, %v957_v23  ;;  %v511_v27 = vpack.c.bf16 %v959_v24, %v959_v24  ;;  %v394_v31 = vsel %vm390_vm2, %v957_v23, 0.0  ;;  %v402_v48 = vsel %vm390_vm2, %v959_v24, 0.0 }
  0xa4   : > { %531 = vst.msk [vmem:[%s915_s5 + $0x24] sm:$0xf] %vm521_vm1, %v514_v25  ;;  %v395_v35 = vadd.f32 %v394_v31, %v393_v32 }
  0xa5   : > { %524 = vst.msk [vmem:[%s915_s5 + $0x8] sm:$0xf] %vm521_vm1, %v507_v26 }
  0xa6   : > { %528 = vst.msk [vmem:[%s915_s5 + $0x18] sm:$0xf] %vm521_vm1, %v511_v27 }
  0xa7   : > { %535 = vst.msk [vmem:[%s915_s5 + $0x34] sm:$0xf] %vm521_vm1, %v518_v28 }
  0xa9   : > { %v983_v33 = vpop.f32.mrf.mxu2  ;;  %v985_v34 = vpop.f32.mrf.mxu3 }
  0xaa   : > { %v357_v36 = vpop.f32.mrf.mxu0  ;;  %v987_v37 = vpop.f32.mrf.mxu1  ;;  %v515_v38 = vpack.c.bf16 %v983_v33, %v983_v33  ;;  %v519_v42 = vpack.c.bf16 %v985_v34, %v985_v34  ;;  %v410_v60 = vsel %vm390_vm2, %v983_v33, 0.0  ;;  %v418_v4 = vsel %vm390_vm2, %v985_v34, 0.0 }
  0xab   : > { %v396_v39 = vsel %vm390_vm2, %v357_v36, 0.0  ;;  %v508_v40 = vpack.c.bf16 %v357_v36, %v357_v36  ;;  %v512_v41 = vpack.c.bf16 %v987_v37, %v987_v37  ;;  %v404_v53 = vsel %vm390_vm2, %v987_v37, 0.0 }
  0xac   : > { %v397_v43 = vadd.f32 %v396_v39, %v395_v35  ;;  %532 = vst.msk [vmem:[%s915_s5 + $0x28] sm:$0xf] %vm521_vm1, %v515_v38 }
  0xad   : > { %525 = vst.msk [vmem:[%s915_s5 + $0xc] sm:$0xf] %vm521_vm1, %v508_v40 }
  0xae   : > { %v399_v45 = vadd.f32 %v398_v44, %v397_v43  ;;  %529 = vst.msk [vmem:[%s915_s5 + $0x1c] sm:$0xf] %vm521_vm1, %v512_v41 }
  0xaf   : > { %536 = vst.msk [vmem:[%s915_s5 + $0x38] sm:$0xf] %vm521_vm1, %v519_v42 }
  0xb0   : > { %v401_v47 = vadd.f32 %v400_v46, %v399_v45 }
  0xb1   : > { %v1010_v49 = vpop.f32.mrf.mxu2  ;;  %v1012_v50 = vpop.f32.mrf.mxu3 }
  0xb2   : > { %v403_v51 = vadd.f32 %v402_v48, %v401_v47  ;;  %v516_v52 = vpack.c.bf16 %v1010_v49, %v1010_v49  ;;  %v520_v54 = vpack.c.bf16 %v1012_v50, %v1012_v50  ;;  %v412_v62 = vsel %vm390_vm2, %v1010_v49, 0.0 }
  0xb3   : > { %v420_v6 = vsel %vm390_vm2, %v1012_v50, 0.0 }
  0xb4   : > { %v405_v55 = vadd.f32 %v404_v53, %v403_v51  ;;  %533 = vst.msk [vmem:[%s915_s5 + $0x2c] sm:$0xf] %vm521_vm1, %v516_v52 }
  0xb5   : > { %537 = vst.msk [vmem:[%s915_s5 + $0x3c] sm:$0xf] %vm521_vm1, %v520_v54 }
  0xb6   : > { %v407_v57 = vadd.f32 %v406_v56, %v405_v55 }
  0xb8   : > { %v409_v59 = vadd.f32 %v408_v58, %v407_v57 }
  0xba   : > { %v411_v61 = vadd.f32 %v410_v60, %v409_v59 }
  0xbc   : > { %v413_v63 = vadd.f32 %v412_v62, %v411_v61 }
  0xbe   : > { %v415_v1 = vadd.f32 %v414_v0, %v413_v63 }
  0xc0   : > { %v417_v3 = vadd.f32 %v416_v2, %v415_v1 }
  0xc2   : > { %v419_v5 = vadd.f32 %v418_v4, %v417_v3 }
  0xc4   : > { %v421_v7 = vadd.f32 %v420_v6, %v419_v5 }
  0xc6   : > { %v422_v8 = vrot.slane %v421_v7, 4 }
  0xc8   : > { %v423_v11 = vadd.f32 %v422_v8, %v421_v7 }
  0xca   : > { %v424_v12 = vrot.slane %v423_v11, 2 }
  0xcc   : > { %v425_v17 = vadd.f32 %v424_v12, %v423_v11 }
  0xce   : > { %v426_v18 = vrot.slane %v425_v17, 1 }
  0xd0   : > { %v1040_v19 = vadd.f32 %v426_v18, %v425_v17 }
  0xd2   : > { %v428_v20 = vmul.f32 0.0078125, %v1040_v19 }
  0xd4   : > { %v429_v25 = vsub.f32 %v917_v9, %v428_v20  ;;  %v430_v26 = vsub.f32 %v933_v15, %v428_v20  ;;  %v431_v27 = vsub.f32 %v957_v23, %v428_v20  ;;  %v432_v28 = vsub.f32 %v357_v36, %v428_v20 }
  0xd5   : > { %v433_v31 = vsub.f32 %v919_v10, %v428_v20  ;;  %v434_v35 = vsub.f32 %v935_v16, %v428_v20  ;;  %v435_v9 = vsub.f32 %v959_v24, %v428_v20  ;;  %v436_v36 = vsub.f32 %v987_v37, %v428_v20 }
  0xd6   : > { %v445_v29 = vmul.f32 %v429_v25, %v429_v25  ;;  %v446_v30 = vmul.f32 %v430_v26, %v430_v26  ;;  %v447_v32 = vmul.f32 %v431_v27, %v431_v27  ;;  %v448_v38 = vmul.f32 %v432_v28, %v432_v28 }
  0xd7   : > { %v449_v42 = vmul.f32 %v433_v31, %v433_v31  ;;  %v450_v43 = vmul.f32 %v434_v35, %v434_v35  ;;  %v437_v16 = vsub.f32 %v929_v13, %v428_v20  ;;  %v451_v45 = vmul.f32 %v435_v9, %v435_v9 }
  0xd8   : > { %v461_v39 = vsel %vm390_vm2, %v445_v29, 0.0  ;;  %v462_v40 = vsel %vm390_vm2, %v446_v30, 0.0  ;;  %v464_v15 = vsel %vm390_vm2, %v447_v32, 0.0  ;;  %v466_v10 = vsel %vm390_vm2, %v448_v38, 0.0 }
  0xd9   : > { %v463_v41 = vadd.f32 %v462_v40, %v461_v39  ;;  %v468_v46 = vsel %vm390_vm2, %v449_v42, 0.0  ;;  %v438_v48 = vsub.f32 %v953_v21, %v428_v20  ;;  %v452_v51 = vmul.f32 %v436_v36, %v436_v36 }
  0xda   : > { %v470_v24 = vsel %vm390_vm2, %v450_v43, 0.0  ;;  %v439_v53 = vsub.f32 %v983_v33, %v428_v20  ;;  %v453_v54 = vmul.f32 %v437_v16, %v437_v16  ;;  %v472_v37 = vsel %vm390_vm2, %v451_v45, 0.0 }
  0xdb   : > { %v465_v23 = vadd.f32 %v464_v15, %v463_v41  ;;  %v440_v56 = vsub.f32 %v1010_v49, %v428_v20  ;;  %v454_v57 = vmul.f32 %v438_v48, %v438_v48  ;;  %v474_v13 = vsel %vm390_vm2, %v452_v51, 0.0 }
  0xdc   : > { %v441_v59 = vsub.f32 %v931_v14, %v428_v20  ;;  %v455_v60 = vmul.f32 %v439_v53, %v439_v53  ;;  %v476_v21 = vsel %vm390_vm2, %v453_v54, 0.0  ;;  %v442_v62 = vsub.f32 %v955_v22, %v428_v20 }
  0xdd   : > { %v467_v44 = vadd.f32 %v466_v10, %v465_v23  ;;  %v456_v63 = vmul.f32 %v440_v56, %v440_v56  ;;  %v478_v33 = vsel %vm390_vm2, %v454_v57, 0.0  ;;  %v443_v1 = vsub.f32 %v985_v34, %v428_v20 }
  0xde   : > { %v457_v49 = vmul.f32 %v441_v59, %v441_v59  ;;  %v480_v2 = vsel %vm390_vm2, %v455_v60, 0.0  ;;  %v444_v4 = vsub.f32 %v1012_v50, %v428_v20  ;;  %v458_v14 = vmul.f32 %v442_v62, %v442_v62 }
  0xdf   : > { %v469_v47 = vadd.f32 %v468_v46, %v467_v44  ;;  %v482_v5 = vsel %vm390_vm2, %v456_v63, 0.0  ;;  %v459_v22 = vmul.f32 %v443_v1, %v443_v1  ;;  %v498_v26 = vlaneseq }
  0xe0   : > { %v484_v7 = vsel %vm390_vm2, %v457_v49, 0.0  ;;  %v460_v11 = vmul.f32 %v444_v4, %v444_v4  ;;  %v486_v34 = vsel %vm390_vm2, %v458_v14, 0.0 }
  0xe1   : > { %v471_v52 = vadd.f32 %v470_v24, %v469_v47  ;;  %v488_v17 = vsel %vm390_vm2, %v459_v22, 0.0  ;;  %v499_v29 = vshrl.u32 %v498_v26, 7 }
  0xe2   : > { %v490_v50 = vsel %vm390_vm2, %v460_v11, 0.0 }
  0xe3   : > { %v473_v55 = vadd.f32 %v472_v37, %v471_v52  ;;  %vm501_vm3 = vcmp.eq.s32.totalorder %v499_v29, 1  ;;  %vm500_vm4 = vcmp.eq.s32.totalorder %v499_v29, 0 }
  0xe5   : > { %v475_v58 = vadd.f32 %v474_v13, %v473_v55 }
  0xe7   : > { %v477_v61 = vadd.f32 %v476_v21, %v475_v58 }
  0xe9   : > { %v479_v0 = vadd.f32 %v478_v33, %v477_v61 }
  0xeb   : > { %v481_v3 = vadd.f32 %v480_v2, %v479_v0 }
  0xed   : > { %v483_v6 = vadd.f32 %v482_v5, %v481_v3 }
  0xef   : > { %v485_v8 = vadd.f32 %v484_v7, %v483_v6 }
  0xf1   : > { %v487_v12 = vadd.f32 %v486_v34, %v485_v8 }
  0xf3   : > { %v489_v18 = vadd.f32 %v488_v17, %v487_v12 }
  0xf5   : > { %v491_v20 = vadd.f32 %v490_v50, %v489_v18 }
  0xf7   : > { %v492_v25 = vrot.slane %v491_v20, 4 }
  0xf9   : > { %v493_v27 = vadd.f32 %v492_v25, %v491_v20 }
  0xfb   : > { %v494_v28 = vrot.slane %v493_v27, 2 }
  0xfd   : > { %v495_v30 = vadd.f32 %v494_v28, %v493_v27 }
  0xff   : > { %v496_v31 = vrot.slane %v495_v30, 1 }
 0x101   : > { %v497_v32 = vadd.f32 %v496_v31, %v495_v30 }
 0x103   : > { %v502_v35 = vsel %vm501_vm3, %v497_v32, 0.0 }
 0x104   : > { %v503_v38 = vsel %vm500_vm4, %v1040_v19, %v502_v35 }
 0x105   : > { %504 = vst.msk [vmem:[%s250_s11] sm:$0xff] %vm390_vm2, %v503_v38 }
 0x106 PF: > { %s14_s16 = sadd.s32 1, %s839_s16   ;;  %s1101_s12 = smov %s831_s14 }
 0x107   : > { %p11_p8 = scmp.ge.s32.totalorder %s14_s16, 8   ;;  %s1102_s13 = smov %s835_s15 }
 0x108   : > { %s1103_s14 = smov %s1106_s17  ;;  %s1104_s15 = smov %s1110_s18 }
 0x109   :  { %13 = sbr.rel (!%p11_p8) target bundleno = 3 (0x3), region = 73 }

// kernel: tile.113
= control target key start
LH: loop header
LB: loop body
LE: loop exit
PB: predicated region body
PF: predicated region fallthrough
CT: control target
= control target key end

     0   :  { %s112_s0 = inlined_call_operand.vmem [shape: f32[4], index: 0, kind: input, shape index: {}]   ;;  %s113_s1 = inlined_call_operand.vmem [shape: f32[128,4], index: 1, kind: output, shape index: {}]  }
   0x1   :  { %v4_v0 = vld [vmem:[%s112_s0] ss:$0 sm:$0xff] }
   0x2   :  { %5 = vst [vmem:[%s113_s1] sm:$0xff] %v4_v0 }
   0x3   :  { %36 = vst [vmem:[%s113_s1 + $0x8] sm:$0xff] %v4_v0 }
   0x4   :  { %37 = vst [vmem:[%s113_s1 + $0x10] sm:$0xff] %v4_v0 }
   0x5   :  { %38 = vst [vmem:[%s113_s1 + $0x18] sm:$0xff] %v4_v0 }
   0x6   :  { %39 = vst [vmem:[%s113_s1 + $0x20] sm:$0xff] %v4_v0 }
   0x7   :  { %40 = vst [vmem:[%s113_s1 + $0x28] sm:$0xff] %v4_v0 }
   0x8   :  { %41 = vst [vmem:[%s113_s1 + $0x30] sm:$0xff] %v4_v0 }
   0x9   :  { %42 = vst [vmem:[%s113_s1 + $0x38] sm:$0xff] %v4_v0 }
   0xa   :  { %43 = vst [vmem:[%s113_s1 + $0x40] sm:$0xff] %v4_v0 }
   0xb   :  { %44 = vst [vmem:[%s113_s1 + $0x48] sm:$0xff] %v4_v0 }
   0xc   :  { %45 = vst [vmem:[%s113_s1 + $0x50] sm:$0xff] %v4_v0 }
   0xd   :  { %46 = vst [vmem:[%s113_s1 + $0x58] sm:$0xff] %v4_v0 }
   0xe   :  { %47 = vst [vmem:[%s113_s1 + $0x60] sm:$0xff] %v4_v0 }
   0xf   :  { %48 = vst [vmem:[%s113_s1 + $0x68] sm:$0xff] %v4_v0 }
  0x10   :  { %49 = vst [vmem:[%s113_s1 + $0x70] sm:$0xff] %v4_v0 }
  0x11   :  { %50 = vst [vmem:[%s113_s1 + $0x78] sm:$0xff] %v4_v0 }

// kernel: tile.114
= control target key start
LH: loop header
LB: loop body
LE: loop exit
PB: predicated region body
PF: predicated region fallthrough
CT: control target
= control target key end

     0   :  { %vm5_vm0 = vcmask 1041409   ;;  %vm9_vm1 = vcmask 1042434   ;;  %vm13_vm2 = vcmask 1043459   ;;  %s760_s28 = smov 124   ;;  %s761_s6 = smov 116   ;;  %vm15_vm3 = vcmask 31744   ;;  %s1293_s0 = inlined_call_operand.vmem [shape: f32[128,4], index: 0, kind: input, shape index: {}]   ;;  %s1294_s1 = inlined_call_operand.vmem [shape: f32[1,512], index: 1, kind: output, shape index: {}]  }
   0x1   :  { %v602_v0 = vld [vmem:[%s1293_s0 + $0x1f] sm:$0x1]   ;;  %v610_v5 = vld [vmem:[%s1293_s0 + $0x1d] sm:$0x1]   ;;  %v606_v11 = vld [vmem:[%s1293_s0 + $0x1e] sm:$0x1]  }
   0x2   :  { %v603_v1 = vld [vmem:[%s1293_s0 + $0x3e] sm:$0x2]   ;;  %v611_v6 = vld [vmem:[%s1293_s0 + $0x3c] sm:$0x2]   ;;  %v607_v14 = vld [vmem:[%s1293_s0 + $0x3d] sm:$0x2]  }
   0x3   :  { %v604_v2 = vld [vmem:[%s1293_s0 + $0x5d] sm:$0x4]   ;;  %v22_v4 = vsel %vm5_vm0, %v603_v1, %v602_v0  ;;  %v612_v7 = vld [vmem:[%s1293_s0 + $0x5b] sm:$0x4]   ;;  %v58_v9 = vsel %vm5_vm0, %v611_v6, %v610_v5  ;;  %v608_v15 = vld [vmem:[%s1293_s0 + $0x5c] sm:$0x4]   ;;  %v40_v17 = vsel %vm5_vm0, %v607_v14, %v606_v11 }
   0x4   :  { %v605_v3 = vld [vmem:[%s1293_s0 + $0x7c] sm:$0x8]   ;;  %v26_v8 = vsel %vm9_vm1, %v604_v2, %v22_v4  ;;  %v613_v10 = vld [vmem:[%s1293_s0 + $0x7a] sm:$0x8]   ;;  %v62_v13 = vsel %vm9_vm1, %v612_v7, %v58_v9  ;;  %v614_v18 = vld [vmem:[%s1293_s0 + $0x1c] sm:$0x1]   ;;  %v44_v22 = vsel %vm9_vm1, %v608_v15, %v40_v17 }
   0x5   :  { %v30_v12 = vsel %vm13_vm2, %v605_v3, %v26_v8  ;;  %v66_v16 = vsel %vm13_vm2, %v613_v10, %v62_v13  ;;  %v615_v19 = vld [vmem:[%s1293_s0 + $0x3b] sm:$0x2]   ;;  %v609_v23 = vld [vmem:[%s1293_s0 + $0x7b] sm:$0x8]   ;;  %v626_v26 = vld [vmem:[%s1293_s0 + $0x19] sm:$0x1]  }
   0x6   :  { %31 = vrot.lane.b32.xlu0 %v30_v12, %s760_s28  ;;  %v616_v20 = vld [vmem:[%s1293_s0 + $0x5a] sm:$0x4]   ;;  %67 = vrot.lane.b32.xlu1 %v66_v16, %s761_s6  ;;  %v76_v21 = vsel %vm5_vm0, %v615_v19, %v614_v18  ;;  %v627_v27 = vld [vmem:[%s1293_s0 + $0x38] sm:$0x2]   ;;  %v48_v28 = vsel %vm13_vm2, %v609_v23, %v44_v22  ;;  %s762_s25 = smov 120   ;;  %s763_s3 = smov 112  }
   0x7   :  { %v80_v24 = vsel %vm9_vm1, %v616_v20, %v76_v21  ;;  %v617_v25 = vld [vmem:[%s1293_s0 + $0x79] sm:$0x8]   ;;  %v630_v29 = vld [vmem:[%s1293_s0 + $0x18] sm:$0x1]   ;;  %v130_v32 = vsel %vm5_vm0, %v627_v27, %v626_v26  ;;  %v628_v33 = vld [vmem:[%s1293_s0 + $0x57] sm:$0x4]  }
   0x8   :  { %v631_v30 = vld [vmem:[%s1293_s0 + $0x37] sm:$0x2]   ;;  %v84_v31 = vsel %vm13_vm2, %v617_v25, %v80_v24  ;;  %v618_v35 = vld [vmem:[%s1293_s0 + $0x1b] sm:$0x1]   ;;  %v134_v41 = vsel %vm9_vm1, %v628_v33, %v130_v32  ;;  %v629_v42 = vld [vmem:[%s1293_s0 + $0x76] sm:$0x8]  }
   0x9   :  { %v632_v34 = vld [vmem:[%s1293_s0 + $0x56] sm:$0x4]   ;;  %v148_v36 = vsel %vm5_vm0, %v631_v30, %v630_v29  ;;  %v619_v37 = vld [vmem:[%s1293_s0 + $0x3a] sm:$0x2]   ;;  %v638_v46 = vld [vmem:[%s1293_s0 + $0x16] sm:$0x1]   ;;  %v138_v52 = vsel %vm13_vm2, %v629_v42, %v134_v41 }
   0xa   :  { %v620_v38 = vld [vmem:[%s1293_s0 + $0x59] sm:$0x4]   ;;  %v94_v40 = vsel %vm5_vm0, %v619_v37, %v618_v35  ;;  %v152_v44 = vsel %vm9_vm1, %v632_v34, %v148_v36  ;;  %v633_v45 = vld [vmem:[%s1293_s0 + $0x75] sm:$0x8]   ;;  %v639_v47 = vld [vmem:[%s1293_s0 + $0x35] sm:$0x2]  }
   0xb   :  { %v621_v39 = vld [vmem:[%s1293_s0 + $0x78] sm:$0x8]   ;;  %v98_v43 = vsel %vm9_vm1, %v620_v38, %v94_v40  ;;  %s764_s12 = smov 108   ;;  %v622_v49 = vld [vmem:[%s1293_s0 + $0x1a] sm:$0x1]   ;;  %v156_v56 = vsel %vm13_vm2, %v633_v45, %v152_v44  ;;  %v184_v59 = vsel %vm5_vm0, %v639_v47, %v638_v46  ;;  %s765_s27 = smov 100  }
   0xc   :  { %v102_v48 = vsel %vm13_vm2, %v621_v39, %v98_v43  ;;  %v623_v50 = vld [vmem:[%s1293_s0 + $0x39] sm:$0x2]   ;;  %v642_v53 = vld [vmem:[%s1293_s0 + $0x15] sm:$0x1]   ;;  %v640_v60 = vld [vmem:[%s1293_s0 + $0x54] sm:$0x4]  }
   0xd   :  { %103 = vrot.lane.b32.xlu2 %v102_v48, %s764_s12  ;;  %v624_v51 = vld [vmem:[%s1293_s0 + $0x58] sm:$0x4]   ;;  %v643_v54 = vld [vmem:[%s1293_s0 + $0x34] sm:$0x2]   ;;  %v112_v55 = vsel %vm5_vm0, %v623_v50, %v622_v49  ;;  %v634_v63 = vld [vmem:[%s1293_s0 + $0x17] sm:$0x1]   ;;  %v188_v2 = vsel %vm9_vm1, %v640_v60, %v184_v59 }
   0xe   :  { %49 = vrot.lane.b32.xlu0 %v48_v28, %s762_s25  ;;  %85 = vrot.lane.b32.xlu1 %v84_v31, %s763_s3  ;;  %v116_v57 = vsel %vm9_vm1, %v624_v51, %v112_v55  ;;  %v625_v58 = vld [vmem:[%s1293_s0 + $0x77] sm:$0x8]   ;;  %v202_v61 = vsel %vm5_vm0, %v643_v54, %v642_v53  ;;  %v644_v62 = vld [vmem:[%s1293_s0 + $0x53] sm:$0x4]   ;;  %s766_s3 = smov 96   ;;  %s767_s16 = smov 104  }
   0xf   :  { %v120_v0 = vsel %vm13_vm2, %v625_v58, %v116_v57  ;;  %v635_v1 = vld [vmem:[%s1293_s0 + $0x36] sm:$0x2]   ;;  %v641_v3 = vld [vmem:[%s1293_s0 + $0x73] sm:$0x8]   ;;  %v206_v4 = vsel %vm9_vm1, %v644_v62, %v202_v61  ;;  %v645_v5 = vld [vmem:[%s1293_s0 + $0x72] sm:$0x8]  }
  0x10   :  { %v166_v6 = vsel %vm5_vm0, %v635_v1, %v634_v63  ;;  %v636_v7 = vld [vmem:[%s1293_s0 + $0x55] sm:$0x4]   ;;  %v650_v8 = vld [vmem:[%s1293_s0 + $0x13] sm:$0x1]   ;;  %v192_v10 = vsel %vm13_vm2, %v641_v3, %v188_v2  ;;  %v654_v11 = vld [vmem:[%s1293_s0 + $0x12] sm:$0x1]   ;;  %v210_v13 = vsel %vm13_vm2, %v645_v5, %v206_v4 }
  0x11   :  { %v651_v9 = vld [vmem:[%s1293_s0 + $0x32] sm:$0x2]   ;;  %v655_v12 = vld [vmem:[%s1293_s0 + $0x31] sm:$0x2]   ;;  %v170_v14 = vsel %vm9_vm1, %v636_v7, %v166_v6  ;;  %v637_v15 = vld [vmem:[%s1293_s0 + $0x74] sm:$0x8]  }
  0x12   :  { %v238_v16 = vsel %vm5_vm0, %v651_v9, %v650_v8  ;;  %v652_v17 = vld [vmem:[%s1293_s0 + $0x51] sm:$0x4]   ;;  %s768_s25 = smov 88   ;;  %v256_v18 = vsel %vm5_vm0, %v655_v12, %v654_v11  ;;  %v656_v19 = vld [vmem:[%s1293_s0 + $0x50] sm:$0x4]   ;;  %v174_v22 = vsel %vm13_vm2, %v637_v15, %v170_v14  ;;  %s770_s14 = smov 92  }
  0x13   :  { %v646_v20 = vld [vmem:[%s1293_s0 + $0x14] sm:$0x1]   ;;  %v242_v23 = vsel %vm9_vm1, %v652_v17, %v238_v16  ;;  %v653_v24 = vld [vmem:[%s1293_s0 + $0x70] sm:$0x8]   ;;  %v260_v25 = vsel %vm9_vm1, %v656_v19, %v256_v18  ;;  %v657_v26 = vld [vmem:[%s1293_s0 + $0x6f] sm:$0x8]  }
  0x14   :  { %v647_v21 = vld [vmem:[%s1293_s0 + $0x33] sm:$0x2]   ;;  %v662_v29 = vld [vmem:[%s1293_s0 + $0x10] sm:$0x1]   ;;  %v246_v31 = vsel %vm13_vm2, %v653_v24, %v242_v23  ;;  %v666_v32 = vld [vmem:[%s1293_s0 + $0xf] sm:$0x1]   ;;  %v264_v34 = vsel %vm13_vm2, %v657_v26, %v260_v25 }
  0x15   :  { %121 = vrot.lane.b32.xlu2 %v120_v0, %s767_s16  ;;  %v220_v27 = vsel %vm5_vm0, %v647_v21, %v646_v20  ;;  %v648_v28 = vld [vmem:[%s1293_s0 + $0x52] sm:$0x4]   ;;  %v663_v30 = vld [vmem:[%s1293_s0 + $0x2f] sm:$0x2]   ;;  %v667_v33 = vld [vmem:[%s1293_s0 + $0x2e] sm:$0x2]  }
  0x16   :  { %139 = vrot.lane.b32.xlu0 %v138_v52, %s765_s27  ;;  %157 = vrot.lane.b32.xlu1 %v156_v56, %s766_s3  ;;  %s769_s3 = smov 84   ;;  %v224_v35 = vsel %vm9_vm1, %v648_v28, %v220_v27  ;;  %v649_v36 = vld [vmem:[%s1293_s0 + $0x71] sm:$0x8]   ;;  %v292_v37 = vsel %vm5_vm0, %v663_v30, %v662_v29  ;;  %v664_v38 = vld [vmem:[%s1293_s0 + $0x4e] sm:$0x4]   ;;  %s771_s23 = smov 76   ;;  %v310_v39 = vsel %vm5_vm0, %v667_v33, %v666_v32 }
  0x17   :  { %v668_v40 = vld [vmem:[%s1293_s0 + $0x4d] sm:$0x4]   ;;  %v658_v41 = vld [vmem:[%s1293_s0 + $0x11] sm:$0x1]   ;;  %s772_s30 = smov 72   ;;  %v228_v43 = vsel %vm13_vm2, %v649_v36, %v224_v35  ;;  %v296_v44 = vsel %vm9_vm1, %v664_v38, %v292_v37  ;;  %s773_s12 = smov 80  }
  0x18   :  { %v659_v42 = vld [vmem:[%s1293_s0 + $0x30] sm:$0x2]   ;;  %v665_v45 = vld [vmem:[%s1293_s0 + $0x6d] sm:$0x8]   ;;  %v314_v46 = vsel %vm9_vm1, %v668_v40, %v310_v39  ;;  %v669_v47 = vld [vmem:[%s1293_s0 + $0x6c] sm:$0x8]  }
  0x19   :  { %v274_v48 = vsel %vm5_vm0, %v659_v42, %v658_v41  ;;  %v660_v49 = vld [vmem:[%s1293_s0 + $0x4f] sm:$0x4]   ;;  %v674_v50 = vld [vmem:[%s1293_s0 + $0xd] sm:$0x1]   ;;  %v300_v52 = vsel %vm13_vm2, %v665_v45, %v296_v44  ;;  %v678_v53 = vld [vmem:[%s1293_s0 + $0xc] sm:$0x1]   ;;  %v318_v55 = vsel %vm13_vm2, %v669_v47, %v314_v46 }
  0x1a   :  { %v675_v51 = vld [vmem:[%s1293_s0 + $0x2c] sm:$0x2]   ;;  %v679_v54 = vld [vmem:[%s1293_s0 + $0x2b] sm:$0x2]   ;;  %v278_v56 = vsel %vm9_vm1, %v660_v49, %v274_v48  ;;  %v661_v57 = vld [vmem:[%s1293_s0 + $0x6e] sm:$0x8]  }
  0x1b   :  { %v346_v58 = vsel %vm5_vm0, %v675_v51, %v674_v50  ;;  %v676_v59 = vld [vmem:[%s1293_s0 + $0x4b] sm:$0x4]   ;;  %s774_s21 = smov 64   ;;  %v364_v60 = vsel %vm5_vm0, %v679_v54, %v678_v53  ;;  %v680_v61 = vld [vmem:[%s1293_s0 + $0x4a] sm:$0x4]   ;;  %s775_s28 = smov 60   ;;  %v282_v0 = vsel %vm13_vm2, %v661_v57, %v278_v56 }
  0x1c   :  { %v670_v62 = vld [vmem:[%s1293_s0 + $0xe] sm:$0x1]   ;;  %v350_v1 = vsel %vm9_vm1, %v676_v59, %v346_v58  ;;  %v677_v2 = vld [vmem:[%s1293_s0 + $0x6a] sm:$0x8]   ;;  %v368_v3 = vsel %vm9_vm1, %v680_v61, %v364_v60  ;;  %v681_v4 = vld [vmem:[%s1293_s0 + $0x69] sm:$0x8]  }
  0x1d   :  { %175 = vrot.lane.b32.xlu2 %v174_v22, %s770_s14  ;;  %v671_v63 = vld [vmem:[%s1293_s0 + $0x2d] sm:$0x2]   ;;  %v686_v7 = vld [vmem:[%s1293_s0 + $0xa] sm:$0x1]   ;;  %s776_s10 = smov 68   ;;  %v354_v9 = vsel %vm13_vm2, %v677_v2, %v350_v1  ;;  %v372_v12 = vsel %vm13_vm2, %v681_v4, %v368_v3  ;;  %s777_s19 = smov 52  }
  0x1e   :  { %193 = vrot.lane.b32.xlu0 %v192_v10, %s768_s25  ;;  %211 = vrot.lane.b32.xlu1 %v210_v13, %s769_s3  ;;  %v328_v5 = vsel %vm5_vm0, %v671_v63, %v670_v62  ;;  %v672_v6 = vld [vmem:[%s1293_s0 + $0x4c] sm:$0x4]   ;;  %v687_v8 = vld [vmem:[%s1293_s0 + $0x29] sm:$0x2]   ;;  %s778_s26 = smov 48   ;;  %s779_s8 = smov 56  }
  0x1f   :  { %v690_v10 = vld [vmem:[%s1293_s0 + $0x9] sm:$0x1]   ;;  %v332_v13 = vsel %vm9_vm1, %v672_v6, %v328_v5  ;;  %v673_v14 = vld [vmem:[%s1293_s0 + $0x6b] sm:$0x8]   ;;  %v400_v15 = vsel %vm5_vm0, %v687_v8, %v686_v7  ;;  %v688_v16 = vld [vmem:[%s1293_s0 + $0x48] sm:$0x4]  }
  0x20   :  { %v691_v11 = vld [vmem:[%s1293_s0 + $0x28] sm:$0x2]   ;;  %v682_v19 = vld [vmem:[%s1293_s0 + $0xb] sm:$0x1]   ;;  %v336_v21 = vsel %vm13_vm2, %v673_v14, %v332_v13  ;;  %v404_v22 = vsel %vm9_vm1, %v688_v16, %v400_v15  ;;  %v689_v23 = vld [vmem:[%s1293_s0 + $0x67] sm:$0x8]  }
  0x21   :  { %v418_v17 = vsel %vm5_vm0, %v691_v11, %v690_v10  ;;  %v692_v18 = vld [vmem:[%s1293_s0 + $0x47] sm:$0x4]   ;;  %v683_v20 = vld [vmem:[%s1293_s0 + $0x2a] sm:$0x2]   ;;  %v698_v28 = vld [vmem:[%s1293_s0 + $0x7] sm:$0x1]   ;;  %v408_v30 = vsel %vm13_vm2, %v689_v23, %v404_v22 }
  0x22   :  { %v422_v24 = vsel %vm9_vm1, %v692_v18, %v418_v17  ;;  %v693_v25 = vld [vmem:[%s1293_s0 + $0x66] sm:$0x8]   ;;  %v382_v26 = vsel %vm5_vm0, %v683_v20, %v682_v19  ;;  %v684_v27 = vld [vmem:[%s1293_s0 + $0x49] sm:$0x4]   ;;  %v699_v29 = vld [vmem:[%s1293_s0 + $0x26] sm:$0x2]  }
  0x23   :  { %v703_v32 = vld [vmem:[%s1293_s0 + $0x25] sm:$0x2]   ;;  %v426_v33 = vsel %vm13_vm2, %v693_v25, %v422_v24  ;;  %v685_v35 = vld [vmem:[%s1293_s0 + $0x68] sm:$0x8]   ;;  %v454_v36 = vsel %vm5_vm0, %v699_v29, %v698_v28  ;;  %v700_v37 = vld [vmem:[%s1293_s0 + $0x45] sm:$0x4]  }
  0x24   :  { %s780_s17 = smov 40   ;;  %v704_v39 = vld [vmem:[%s1293_s0 + $0x44] sm:$0x4]   ;;  %v694_v40 = vld [vmem:[%s1293_s0 + $0x8] sm:$0x1]   ;;  %s781_s24 = smov 36  }
  0x25   :  { %229 = vrot.lane.b32.xlu2 %v228_v43, %s773_s12  ;;  %v695_v41 = vld [vmem:[%s1293_s0 + $0x27] sm:$0x2]   ;;  %v458_v43 = vsel %vm9_vm1, %v700_v37, %v454_v36  ;;  %v701_v44 = vld [vmem:[%s1293_s0 + $0x64] sm:$0x8]   ;;  %v705_v46 = vld [vmem:[%s1293_s0 + $0x63] sm:$0x8]  }
  0x26   :  { %247 = vrot.lane.b32.xlu0 %v246_v31, %s771_s23  ;;  %265 = vrot.lane.b32.xlu1 %v264_v34, %s772_s30  ;;  %v702_v31 = vld [vmem:[%s1293_s0 + $0x6] sm:$0x1]   ;;  %v386_v34 = vsel %vm9_vm1, %v684_v27, %v382_v26  ;;  %v436_v47 = vsel %vm5_vm0, %v695_v41, %v694_v40  ;;  %v696_v48 = vld [vmem:[%s1293_s0 + $0x46] sm:$0x4]   ;;  %s782_s6 = smov 44   ;;  %v462_v51 = vsel %vm13_vm2, %v701_v44, %v458_v43  ;;  %s783_s15 = smov 28  }
  0x27   :  { %v472_v38 = vsel %vm5_vm0, %v703_v32, %v702_v31  ;;  %v390_v42 = vsel %vm13_vm2, %v685_v35, %v386_v34  ;;  %v710_v49 = vld [vmem:[%s1293_s0 + $0x4] sm:$0x1]   ;;  %v715_v53 = vld [vmem:[%s1293_s0 + $0x22] sm:$0x2]   ;;  %v697_v56 = vld [vmem:[%s1293_s0 + $0x65] sm:$0x8]  }
  0x28   :  { %v476_v45 = vsel %vm9_vm1, %v704_v39, %v472_v38  ;;  %v711_v50 = vld [vmem:[%s1293_s0 + $0x23] sm:$0x2]   ;;  %v716_v60 = vld [vmem:[%s1293_s0 + $0x41] sm:$0x4]   ;;  %v706_v61 = vld [vmem:[%s1293_s0 + $0x5] sm:$0x1]  }
  0x29   :  { %v480_v54 = vsel %vm13_vm2, %v705_v46, %v476_v45  ;;  %v508_v57 = vsel %vm5_vm0, %v711_v50, %v710_v49  ;;  %v712_v58 = vld [vmem:[%s1293_s0 + $0x42] sm:$0x4]   ;;  %v707_v62 = vld [vmem:[%s1293_s0 + $0x24] sm:$0x2]   ;;  %s784_s22 = smov 24   ;;  %s785_s4 = smov 32  }
  0x2a   :  { %v713_v1 = vld [vmem:[%s1293_s0 + $0x61] sm:$0x8]   ;;  %v717_v3 = vld [vmem:[%s1293_s0 + $0x60] sm:$0x8]   ;;  %v490_v4 = vsel %vm5_vm0, %v707_v62, %v706_v61  ;;  %v708_v5 = vld [vmem:[%s1293_s0 + $0x43] sm:$0x4]  }
  0x2b   :  { %v722_v6 = vld [vmem:[%s1293_s0 + $0x1] sm:$0x1]   ;;  %v494_v10 = vsel %vm9_vm1, %v708_v5, %v490_v4  ;;  %v709_v11 = vld [vmem:[%s1293_s0 + $0x62] sm:$0x8]   ;;  %s786_s9 = smov 16   ;;  %s787_s14 = smov 12  }
  0x2c   :  { %v723_v7 = vld [vmem:[%s1293_s0 + $0x20] sm:$0x2]   ;;  %v718_v14 = vld [vmem:[%s1293_s0 + $0x2] sm:$0x1]   ;;  %v498_v16 = vsel %vm13_vm2, %v709_v11, %v494_v10  ;;  %v600_v23 = vld [vmem:[%s1293_s0 + $0x3e] sm:$0x4]  }
  0x2d   :  { %283 = vrot.lane.b32.xlu2 %v282_v0, %s776_s10  ;;  %v512_v0 = vsel %vm9_vm1, %v712_v58, %v508_v57  ;;  %v724_v13 = vld [vmem:[%s1293_s0 + $0x3f] sm:$0x4]   ;;  %v719_v15 = vld [vmem:[%s1293_s0 + $0x21] sm:$0x2]   ;;  %v601_v25 = vld [vmem:[%s1293_s0 + $0x5d] sm:$0x8]  }
  0x2e   :  { %301 = vrot.lane.b32.xlu0 %v300_v52, %s774_s21  ;;  %319 = vrot.lane.b32.xlu1 %v318_v55, %s775_s28  ;;  %v714_v52 = vld [vmem:[%s1293_s0 + $0x3] sm:$0x1]   ;;  %v440_v55 = vsel %vm9_vm1, %v696_v48, %v436_v47  ;;  %v516_v8 = vsel %vm13_vm2, %v713_v1, %v512_v0  ;;  %v725_v18 = vld [vmem:[%s1293_s0 + $0x5e] sm:$0x8]   ;;  %v544_v19 = vsel %vm5_vm0, %v719_v15, %v718_v14  ;;  %s790_s30 = smov 8   ;;  %vm33_vm4 = vcmask 1048544  }
  0x2f   :  { %v526_v59 = vsel %vm5_vm0, %v715_v53, %v714_v52  ;;  %v444_v63 = vsel %vm13_vm2, %v697_v56, %v440_v55  ;;  %v720_v20 = vld [vmem:[%s1293_s0 + $0x40] sm:$0x4]   ;;  %v2_v26 = vld [vmem:[%s1293_s0] sm:$0x1]   ;;  %vm51_vm5 = vcmask 1015744   ;;  %vm69_vm6 = vcmask 982944  }
  0x30   :  { %v530_v2 = vsel %vm9_vm1, %v716_v60, %v526_v59  ;;  %v721_v22 = vld [vmem:[%s1293_s0 + $0x5f] sm:$0x8]   ;;  %v548_v24 = vsel %vm9_vm1, %v720_v20, %v544_v19  ;;  %v599_v27 = vld [vmem:[%s1293_s0 + $0x1f] sm:$0x2]   ;;  %s789_s0 = smov 4   ;;  %vm87_vm7 = vcmask 950144  }
  0x31   :  { %v6_v28 = vsel %vm5_vm0, %v599_v27, %v2_v26  ;;  %vm105_vm8 = vcmask 917344   ;;  %vm123_vm9 = vcmask 884544   ;;  %vm141_vm10 = vcmask 851744  }
  0x32   :  { %v10_v29 = vsel %vm9_vm1, %v600_v23, %v6_v28  ;;  %vm159_vm11 = vcmask 818944   ;;  %vm177_vm12 = vcmask 786144   ;;  %vm195_vm13 = vcmask 753344  }
  0x33   :  { %v14_v31 = vsel %vm13_vm2, %v601_v25, %v10_v29  ;;  %vm213_vm14 = vcmask 720544   ;;  %vm231_vm15 = vcmask 687744  }
  0x34   :  { %16 = vst.msk [vmem:[#allocation0] ss:$8 sm:$0xf] %vm15_vm3, %v14_v31   ;;  %vm303_vm3 = vcmask 556544  }
  0x35   :  { %337 = vrot.lane.b32.xlu2 %v336_v21, %s779_s8 }
  0x36   :  { %355 = vrot.lane.b32.xlu0 %v354_v9, %s777_s19  ;;  %373 = vrot.lane.b32.xlu1 %v372_v12, %s778_s26  ;;  %v534_v9 = vsel %vm13_vm2, %v717_v3, %v530_v2  ;;  %v562_v12 = vsel %vm5_vm0, %v723_v7, %v722_v6  ;;  %s788_s19 = smov 20   ;;  %vm249_vm0 = vcmask 654944  }
  0x37   :  { %v566_v17 = vsel %vm9_vm1, %v724_v13, %v562_v12  ;;  %vm267_vm1 = vcmask 622144  }
  0x38   :  { %v570_v21 = vsel %vm13_vm2, %v725_v18, %v566_v17 }
  0x3d   :  { %391 = vrot.lane.b32.xlu2 %v390_v42, %s782_s6 }
  0x3e   :  { %409 = vrot.lane.b32.xlu0 %v408_v30, %s780_s17  ;;  %427 = vrot.lane.b32.xlu1 %v426_v33, %s781_s24  ;;  %v552_v30 = vsel %vm13_vm2, %v721_v22, %v548_v24  ;;  %vm285_vm2 = vcmask 589344  }
  0x45   :  { %445 = vrot.lane.b32.xlu2 %v444_v63, %s785_s4 }
  0x46   :  { %463 = vrot.lane.b32.xlu0 %v462_v51, %s783_s15  ;;  %481 = vrot.lane.b32.xlu1 %v480_v54, %s784_s22 }
  0x4d   :  { %499 = vrot.lane.b32.xlu2 %v498_v16, %s788_s19 }
  0x4e   :  { %517 = vrot.lane.b32.xlu0 %v516_v8, %s786_s9  ;;  %535 = vrot.lane.b32.xlu1 %v534_v9, %s787_s14 }
  0x55   :  { %553 = vrot.lane.b32.xlu2 %v552_v30, %s790_s30 }
  0x56   :  { %571 = vrot.lane.b32.xlu0 %v570_v21, %s789_s0 }
  0x67   :  { %v104_v32 = vpop.permute.xlu2 %103  }
  0x6f   :  { %v122_v33 = vpop.permute.xlu2 %121  }
  0x77   :  { %v176_v36 = vpop.permute.xlu2 %175  }
  0x78   :  { %v32_v34 = vpop.permute.xlu0 %31   ;;  %v68_v35 = vpop.permute.xlu1 %67  }
  0x79   :  { %34 = vst.msk [vmem:[#allocation0] ss:$8 sm:$0xf] %vm33_vm4, %v32_v34   ;;  %vm321_vm4 = vcmask 523744  }
  0x7f   :  { %v230_v39 = vpop.permute.xlu2 %229  }
  0x80   :  { %v50_v37 = vpop.permute.xlu0 %49   ;;  %v86_v38 = vpop.permute.xlu1 %85  }
  0x81   :  { %52 = vst.msk [vmem:[#allocation0] ss:$8 sm:$0xf] %vm51_vm5, %v50_v37   ;;  %vm339_vm5 = vcmask 490944  }
  0x82   :  { %70 = vst.msk [vmem:[#allocation0] ss:$8 sm:$0xf] %vm69_vm6, %v68_v35   ;;  %vm357_vm6 = vcmask 458144  }
  0x83   :  { %88 = vst.msk [vmem:[#allocation0] ss:$8 sm:$0xf] %vm87_vm7, %v86_v38   ;;  %vm375_vm7 = vcmask 425344  }
  0x84   :  { %106 = vst.msk [vmem:[#allocation0] ss:$8 sm:$0xf] %vm105_vm8, %v104_v32   ;;  %vm393_vm8 = vcmask 392544  }
  0x85   :  { %124 = vst.msk [vmem:[#allocation0] ss:$8 sm:$0xf] %vm123_vm9, %v122_v33   ;;  %vm411_vm9 = vcmask 359744  }
  0x87   :  { %v284_v42 = vpop.permute.xlu2 %283  }
  0x88   :  { %v140_v40 = vpop.permute.xlu0 %139   ;;  %v158_v41 = vpop.permute.xlu1 %157  }
  0x89   :  { %142 = vst.msk [vmem:[#allocation0] ss:$8 sm:$0xf] %vm141_vm10, %v140_v40   ;;  %vm429_vm10 = vcmask 326944  }
  0x8a   :  { %160 = vst.msk [vmem:[#allocation0] ss:$8 sm:$0xf] %vm159_vm11, %v158_v41   ;;  %vm447_vm11 = vcmask 294144  }
  0x8b   :  { %178 = vst.msk [vmem:[#allocation0] ss:$8 sm:$0xf] %vm177_vm12, %v176_v36   ;;  %vm465_vm12 = vcmask 261344  }
  0x8f   :  { %v338_v45 = vpop.permute.xlu2 %337  }
  0x90   :  { %v194_v43 = vpop.permute.xlu0 %193   ;;  %v212_v44 = vpop.permute.xlu1 %211  }
  0x91   :  { %196 = vst.msk [vmem:[#allocation0] ss:$8 sm:$0xf] %vm195_vm13, %v194_v43   ;;  %vm483_vm13 = vcmask 228544  }
  0x92   :  { %214 = vst.msk [vmem:[#allocation0] ss:$8 sm:$0xf] %vm213_vm14, %v212_v44   ;;  %vm501_vm14 = vcmask 195744  }
  0x93   :  { %232 = vst.msk [vmem:[#allocation0] ss:$8 sm:$0xf] %vm231_vm15, %v230_v39   ;;  %vm519_vm15 = vcmask 162944  }
  0x97   :  { %v392_v48 = vpop.permute.xlu2 %391  }
  0x98   :  { %v248_v46 = vpop.permute.xlu0 %247   ;;  %v266_v47 = vpop.permute.xlu1 %265  }
  0x99   :  { %250 = vst.msk [vmem:[#allocation0] ss:$8 sm:$0xf] %vm249_vm0, %v248_v46   ;;  %vm537_vm0 = vcmask 130144  }
  0x9a   :  { %268 = vst.msk [vmem:[#allocation0] ss:$8 sm:$0xf] %vm267_vm1, %v266_v47   ;;  %vm555_vm1 = vcmask 97344  }
  0x9b   :  { %286 = vst.msk [vmem:[#allocation0] ss:$8 sm:$0xf] %vm285_vm2, %v284_v42   ;;  %vm573_vm2 = vcmask 64544  }
  0x9f   :  { %v446_v51 = vpop.permute.xlu2 %445  }
  0xa0   :  { %v302_v49 = vpop.permute.xlu0 %301   ;;  %v320_v50 = vpop.permute.xlu1 %319  }
  0xa1   :  { %304 = vst.msk [vmem:[#allocation0] ss:$8 sm:$0xf] %vm303_vm3, %v302_v49  }
  0xa2   :  { %322 = vst.msk [vmem:[#allocation0] ss:$8 sm:$0xf] %vm321_vm4, %v320_v50  }
  0xa3   :  { %340 = vst.msk [vmem:[#allocation0] ss:$8 sm:$0xf] %vm339_vm5, %v338_v45  }
  0xa7   :  { %v500_v54 = vpop.permute.xlu2 %499  }
  0xa8   :  { %v356_v52 = vpop.permute.xlu0 %355   ;;  %v374_v53 = vpop.permute.xlu1 %373  }
  0xa9   :  { %358 = vst.msk [vmem:[#allocation0] ss:$8 sm:$0xf] %vm357_vm6, %v356_v52  }
  0xaa   :  { %376 = vst.msk [vmem:[#allocation0] ss:$8 sm:$0xf] %vm375_vm7, %v374_v53  }
  0xab   :  { %394 = vst.msk [vmem:[#allocation0] ss:$8 sm:$0xf] %vm393_vm8, %v392_v48  }
  0xaf   :  { %v554_v57 = vpop.permute.xlu2 %553  }
  0xb0   :  { %v410_v55 = vpop.permute.xlu0 %409   ;;  %v428_v56 = vpop.permute.xlu1 %427  }
  0xb1   :  { %412 = vst.msk [vmem:[#allocation0] ss:$8 sm:$0xf] %vm411_vm9, %v410_v55  }
  0xb2   :  { %430 = vst.msk [vmem:[#allocation0] ss:$8 sm:$0xf] %vm429_vm10, %v428_v56  }
  0xb3   :  { %448 = vst.msk [vmem:[#allocation0] ss:$8 sm:$0xf] %vm447_vm11, %v446_v51  }
  0xb8   :  { %v464_v58 = vpop.permute.xlu0 %463   ;;  %v482_v59 = vpop.permute.xlu1 %481  }
  0xb9   :  { %466 = vst.msk [vmem:[#allocation0] ss:$8 sm:$0xf] %vm465_vm12, %v464_v58  }
  0xba   :  { %484 = vst.msk [vmem:[#allocation0] ss:$8 sm:$0xf] %vm483_vm13, %v482_v59  }
  0xbb   :  { %502 = vst.msk [vmem:[#allocation0] ss:$8 sm:$0xf] %vm501_vm14, %v500_v54  }
  0xc0   :  { %v518_v60 = vpop.permute.xlu0 %517   ;;  %v536_v61 = vpop.permute.xlu1 %535  }
  0xc1   :  { %520 = vst.msk [vmem:[#allocation0] ss:$8 sm:$0xf] %vm519_vm15, %v518_v60  }
  0xc2   :  { %538 = vst.msk [vmem:[#allocation0] ss:$8 sm:$0xf] %vm537_vm0, %v536_v61  }
  0xc3   :  { %556 = vst.msk [vmem:[#allocation0] ss:$8 sm:$0xf] %vm555_vm1, %v554_v57  }
  0xc8   :  { %v572_v62 = vpop.permute.xlu0 %571  }
  0xc9   :  { %574 = vst.msk [vmem:[#allocation0] ss:$8 sm:$0xf] %vm573_vm2, %v572_v62  }
  0xd0   :  { %v577_v63 = vld [vmem:[#allocation0] sm:$0x1]  ;;  %v582_v0 = vld [vmem:[#allocation0 + $0x8] sm:$0x1]  ;;  %v588_v1 = vld [vmem:[#allocation0 + $0x10] sm:$0x1] }
  0xd1   :  { %580 = vst [vmem:[%s1294_s1] sm:$0x1] %v577_v63  ;;  %v594_v2 = vld [vmem:[#allocation0 + $0x18] sm:$0x1] }
  0xd2   :  { %726 = vst [vmem:[%s1294_s1 + $0x1] sm:$0x1] %v582_v0 }
  0xd3   :  { %727 = vst [vmem:[%s1294_s1 + $0x2] sm:$0x1] %v588_v1 }
  0xd4   :  { %728 = vst [vmem:[%s1294_s1 + $0x3] sm:$0x1] %v594_v2 }

// kernel: hourglass_forward.31
= control target key start
LH: loop header
LB: loop body
LE: loop exit
PB: predicated region body
PF: predicated region fallthrough
CT: control target
= control target key end

     0   :  { %s813_s12 = smov 0   ;;  %s815_s13 = smov 0   ;;  %s1026_s0 = inlined_call_operand.vmem [shape: bf16[1,256,8], index: 0, kind: input, shape index: {}]   ;;  %s1027_s1 = inlined_call_operand.vmem [shape: bf16[1,8,4], index: 1, kind: input, shape index: {}]   ;;  %s1028_s2 = inlined_call_operand.vmem [shape: bf16[1,256,4], index: 2, kind: output, shape index: {0}]   ;;  %s1029_s3 = inlined_call_operand.vmem [shape: f32[1,2,8,4], index: 3, kind: output, shape index: {1}]  }
   0x1   :  { %s817_s14 = smov 0  }
   0x2 LB: > { %s23_s15 = sadd.s32 1, %s787_s13  ;;  %p686_p0 = scmp.ge.s32.totalorder %s791_s14, 1  ;;  %s791_s14 = sphi %s817_s14, %s14_s14   ;;  %s787_s13 = sphi %s815_s13, %s1031_s13   ;;  %s783_s12 = sphi %s813_s12, %s1030_s12  }
   0x3   : > { %p24_p1 = scmp.ge.s32.totalorder %s23_s15, 2  ;;  %p172_p2 = scmp.lt.s32.totalorder %s791_s14, 3 }
   0x5   : > { %s1033_s15 = smov (%p24_p1, %s23_s15), 0  ;;  %p173_p3 = pnand %p686_p0, %p172_p2 }
   0x6   : > { %s687_s18 = sshll.u32 (!%p173_p3), %s783_s12, 4  ;;  %p242_p5 = scmp.lt.s32.totalorder (!%p173_p3), %s783_s12, 1 }
   0x7   : > { %176 = sbr.rel (%p173_p3) target bundleno = 258 (0x102), region = 28  ;;  %p219_p4 = scmp.lt.s32.totalorder (!%p173_p3), %s687_s18, 31 }
   0xc   : > { %v265_v0 = vld [vmem:[%s1027_s1] sm:$0xf]  ;;  %vm331_vm0 = vcmask 1043456   ;;  %s1035_s18 = smov (!%p219_p4, %s687_s18), 31  ;;  %vm306_vm1 = vcmask 64512   ;;  %vm515_vm2 = vcmask 27648  }
   0xd   : > { %v333_v1 = vsel %vm331_vm0, %v265_v0, 0  ;;  %s688_s19 = sshll.u32 %s1035_s18, 2  ;;  %vm384_vm3 = vcmask 31744   ;;  %s1037_s12 = smov (!%p242_p5, %s783_s12), 1 }
   0xe   : > { %342 = vmatpush.bf16.msra.mxu0 %v333_v1  ;;  %742 = vmatpush.bf16.msra.mxu1 %v333_v1  ;;  %s224_s22 = scalar_lea.vmem %s1026_s0, %s688_s19  ;;  %s851_s25 = scalar_lea.vmem %s1028_s2, %s688_s19 }
   0xf   : > { %743 = vmatpush.bf16.msra.mxu2 %v333_v1  ;;  %744 = vmatpush.bf16.msra.mxu3 %v333_v1  ;;  %v734_v2 = vld [vmem:[%s224_s22] sm:$0xff]  ;;  %v736_v3 = vld [vmem:[%s224_s22 + $0x10] sm:$0xff]  ;;  %v735_v6 = vld [vmem:[%s224_s22 + $0x8] sm:$0xff]  ;;  %s691_s26 = sshll.u32 %s1037_s12, 3 }
  0x10   : > { %v738_v4 = vld [vmem:[%s224_s22 + $0x20] sm:$0xff]  ;;  %v740_v5 = vld [vmem:[%s224_s22 + $0x30] sm:$0xff]  ;;  %v737_v7 = vld [vmem:[%s224_s22 + $0x18] sm:$0xff]  ;;  %s247_s29 = scalar_lea.vmem %s1029_s3, %s691_s26 }
  0x11   : > { %724 = vmatmul.msk.bf16.vlgmr.msra.gmra.mxu0 %vm306_vm1, %v734_v2  ;;  %726 = vmatmul.msk.bf16.vlgmr.msra.gmra.mxu1 %vm306_vm1, %v736_v3  ;;  %v739_v8 = vld [vmem:[%s224_s22 + $0x28] sm:$0xff]  ;;  %v741_v9 = vld [vmem:[%s224_s22 + $0x38] sm:$0xff] }
  0x12   : > { %728 = vmatmul.msk.bf16.vlgmr.msra.gmra.mxu2 %vm306_vm1, %v738_v4  ;;  %730 = vmatmul.msk.bf16.vlgmr.msra.gmra.mxu3 %vm306_vm1, %v740_v5 }
  0x21   : > { %725 = vmatmul.msk.bf16.gmra.mxu0 %vm306_vm1, %v735_v6  ;;  %727 = vmatmul.msk.bf16.gmra.mxu1 %vm306_vm1, %v737_v7 }
  0x22   : > { %729 = vmatmul.msk.bf16.gmra.mxu2 %vm306_vm1, %v739_v8  ;;  %731 = vmatmul.msk.bf16.gmra.mxu3 %vm306_vm1, %v741_v9 }
  0x8e   : > { %v853_v10 = vpop.f32.mrf.mxu0  ;;  %v855_v11 = vpop.f32.mrf.mxu1 }
  0x8f   : > { %v499_v12 = vpack.c.bf16 %v853_v10, %v853_v10  ;;  %v503_v13 = vpack.c.bf16 %v855_v11, %v855_v11  ;;  %v385_v31 = vsel %vm384_vm3, %v853_v10, 0.0  ;;  %v392_v45 = vsel %vm384_vm3, %v855_v11, 0.0 }
  0x91   : > { %516 = vst.msk [vmem:[%s851_s25] sm:$0xf] %vm515_vm2, %v499_v12 }
  0x92   : > { %520 = vst.msk [vmem:[%s851_s25 + $0x10] sm:$0xf] %vm515_vm2, %v503_v13 }
  0x95   : > { %v865_v14 = vpop.f32.mrf.mxu2  ;;  %v867_v15 = vpop.f32.mrf.mxu3 }
  0x96   : > { %v869_v16 = vpop.f32.mrf.mxu0  ;;  %v871_v17 = vpop.f32.mrf.mxu1  ;;  %v507_v18 = vpack.c.bf16 %v865_v14, %v865_v14  ;;  %v511_v21 = vpack.c.bf16 %v867_v15, %v867_v15  ;;  %v400_v57 = vsel %vm384_vm3, %v865_v14, 0.0  ;;  %v408_v1 = vsel %vm384_vm3, %v867_v15, 0.0 }
  0x97   : > { %v500_v19 = vpack.c.bf16 %v869_v16, %v869_v16  ;;  %v504_v20 = vpack.c.bf16 %v871_v17, %v871_v17  ;;  %v386_v30 = vsel %vm384_vm3, %v869_v16, 0.0  ;;  %v394_v47 = vsel %vm384_vm3, %v871_v17, 0.0 }
  0x98   : > { %524 = vst.msk [vmem:[%s851_s25 + $0x20] sm:$0xf] %vm515_vm2, %v507_v18  ;;  %v387_v33 = vadd.f32 %v386_v30, %v385_v31 }
  0x99   : > { %517 = vst.msk [vmem:[%s851_s25 + $0x4] sm:$0xf] %vm515_vm2, %v500_v19 }
  0x9a   : > { %521 = vst.msk [vmem:[%s851_s25 + $0x14] sm:$0xf] %vm515_vm2, %v504_v20 }
  0x9b   : > { %528 = vst.msk [vmem:[%s851_s25 + $0x30] sm:$0xf] %vm515_vm2, %v511_v21 }
  0x9d   : > { %v889_v22 = vpop.f32.mrf.mxu2  ;;  %v891_v23 = vpop.f32.mrf.mxu3 }
  0x9e   : > { %v893_v24 = vpop.f32.mrf.mxu0  ;;  %v895_v25 = vpop.f32.mrf.mxu1  ;;  %v508_v26 = vpack.c.bf16 %v889_v22, %v889_v22  ;;  %v512_v29 = vpack.c.bf16 %v891_v23, %v891_v23  ;;  %v402_v59 = vsel %vm384_vm3, %v889_v22, 0.0  ;;  %v410_v3 = vsel %vm384_vm3, %v891_v23, 0.0 }
  0x9f   : > { %v501_v27 = vpack.c.bf16 %v893_v24, %v893_v24  ;;  %v505_v28 = vpack.c.bf16 %v895_v25, %v895_v25  ;;  %v388_v32 = vsel %vm384_vm3, %v893_v24, 0.0  ;;  %v396_v49 = vsel %vm384_vm3, %v895_v25, 0.0 }
  0xa0   : > { %525 = vst.msk [vmem:[%s851_s25 + $0x24] sm:$0xf] %vm515_vm2, %v508_v26  ;;  %v389_v36 = vadd.f32 %v388_v32, %v387_v33 }
  0xa1   : > { %518 = vst.msk [vmem:[%s851_s25 + $0x8] sm:$0xf] %vm515_vm2, %v501_v27 }
  0xa2   : > { %522 = vst.msk [vmem:[%s851_s25 + $0x18] sm:$0xf] %vm515_vm2, %v505_v28 }
  0xa3   : > { %529 = vst.msk [vmem:[%s851_s25 + $0x34] sm:$0xf] %vm515_vm2, %v512_v29 }
  0xa5   : > { %v919_v34 = vpop.f32.mrf.mxu2  ;;  %v921_v35 = vpop.f32.mrf.mxu3 }
  0xa6   : > { %v351_v37 = vpop.f32.mrf.mxu0  ;;  %v923_v38 = vpop.f32.mrf.mxu1  ;;  %v509_v39 = vpack.c.bf16 %v919_v34, %v919_v34  ;;  %v513_v43 = vpack.c.bf16 %v921_v35, %v921_v35  ;;  %v404_v61 = vsel %vm384_vm3, %v919_v34, 0.0  ;;  %v412_v5 = vsel %vm384_vm3, %v921_v35, 0.0 }
  0xa7   : > { %v390_v40 = vsel %vm384_vm3, %v351_v37, 0.0  ;;  %v502_v41 = vpack.c.bf16 %v351_v37, %v351_v37  ;;  %v506_v42 = vpack.c.bf16 %v923_v38, %v923_v38  ;;  %v398_v54 = vsel %vm384_vm3, %v923_v38, 0.0 }
  0xa8   : > { %v391_v44 = vadd.f32 %v390_v40, %v389_v36  ;;  %526 = vst.msk [vmem:[%s851_s25 + $0x28] sm:$0xf] %vm515_vm2, %v509_v39 }
  0xa9   : > { %519 = vst.msk [vmem:[%s851_s25 + $0xc] sm:$0xf] %vm515_vm2, %v502_v41 }
  0xaa   : > { %v393_v46 = vadd.f32 %v392_v45, %v391_v44  ;;  %523 = vst.msk [vmem:[%s851_s25 + $0x1c] sm:$0xf] %vm515_vm2, %v506_v42 }
  0xab   : > { %530 = vst.msk [vmem:[%s851_s25 + $0x38] sm:$0xf] %vm515_vm2, %v513_v43 }
  0xac   : > { %v395_v48 = vadd.f32 %v394_v47, %v393_v46 }
  0xad   : > { %v946_v50 = vpop.f32.mrf.mxu2  ;;  %v948_v51 = vpop.f32.mrf.mxu3 }
  0xae   : > { %v397_v52 = vadd.f32 %v396_v49, %v395_v48  ;;  %v510_v53 = vpack.c.bf16 %v946_v50, %v946_v50  ;;  %v514_v55 = vpack.c.bf16 %v948_v51, %v948_v51  ;;  %v406_v63 = vsel %vm384_vm3, %v946_v50, 0.0 }
  0xaf   : > { %v414_v7 = vsel %vm384_vm3, %v948_v51, 0.0 }
  0xb0   : > { %v399_v56 = vadd.f32 %v398_v54, %v397_v52  ;;  %527 = vst.msk [vmem:[%s851_s25 + $0x2c] sm:$0xf] %vm515_vm2, %v510_v53 }
  0xb1   : > { %531 = vst.msk [vmem:[%s851_s25 + $0x3c] sm:$0xf] %vm515_vm2, %v514_v55 }
  0xb2   : > { %v401_v58 = vadd.f32 %v400_v57, %v399_v56 }
  0xb4   : > { %v403_v60 = vadd.f32 %v402_v59, %v401_v58 }
  0xb6   : > { %v405_v62 = vadd.f32 %v404_v61, %v403_v60 }
  0xb8   : > { %v407_v0 = vadd.f32 %v406_v63, %v405_v62 }
  0xba   : > { %v409_v2 = vadd.f32 %v408_v1, %v407_v0 }
  0xbc   : > { %v411_v4 = vadd.f32 %v410_v3, %v409_v2 }
  0xbe   : > { %v413_v6 = vadd.f32 %v412_v5, %v411_v4 }
  0xc0   : > { %v415_v8 = vadd.f32 %v414_v7, %v413_v6 }
  0xc2   : > { %v416_v9 = vrot.slane %v415_v8, 4 }
  0xc4   : > { %v417_v12 = vadd.f32 %v416_v9, %v415_v8 }
  0xc6   : > { %v418_v13 = vrot.slane %v417_v12, 2 }
  0xc8   : > { %v419_v18 = vadd.f32 %v418_v13, %v417_v12 }
  0xca   : > { %v420_v19 = vrot.slane %v419_v18, 1 }
  0xcc   : > { %v976_v20 = vadd.f32 %v420_v19, %v419_v18 }
  0xce   : > { %v422_v21 = vmul.f32 0.0078125, %v976_v20 }
  0xd0   : > { %v423_v26 = vsub.f32 %v853_v10, %v422_v21  ;;  %v424_v27 = vsub.f32 %v869_v16, %v422_v21  ;;  %v425_v28 = vsub.f32 %v893_v24, %v422_v21  ;;  %v426_v29 = vsub.f32 %v351_v37, %v422_v21 }
  0xd1   : > { %v427_v32 = vsub.f32 %v855_v11, %v422_v21  ;;  %v428_v36 = vsub.f32 %v871_v17, %v422_v21  ;;  %v429_v10 = vsub.f32 %v895_v25, %v422_v21  ;;  %v430_v37 = vsub.f32 %v923_v38, %v422_v21 }
  0xd2   : > { %v439_v30 = vmul.f32 %v423_v26, %v423_v26  ;;  %v440_v31 = vmul.f32 %v424_v27, %v424_v27  ;;  %v441_v33 = vmul.f32 %v425_v28, %v425_v28  ;;  %v442_v39 = vmul.f32 %v426_v29, %v426_v29 }
  0xd3   : > { %v443_v43 = vmul.f32 %v427_v32, %v427_v32  ;;  %v444_v44 = vmul.f32 %v428_v36, %v428_v36  ;;  %v431_v17 = vsub.f32 %v865_v14, %v422_v21  ;;  %v445_v46 = vmul.f32 %v429_v10, %v429_v10 }
  0xd4   : > { %v455_v40 = vsel %vm384_vm3, %v439_v30, 0.0  ;;  %v456_v41 = vsel %vm384_vm3, %v440_v31, 0.0  ;;  %v458_v16 = vsel %vm384_vm3, %v441_v33, 0.0  ;;  %v460_v11 = vsel %vm384_vm3, %v442_v39, 0.0 }
  0xd5   : > { %v457_v42 = vadd.f32 %v456_v41, %v455_v40  ;;  %v462_v47 = vsel %vm384_vm3, %v443_v43, 0.0  ;;  %v432_v49 = vsub.f32 %v889_v22, %v422_v21  ;;  %v446_v52 = vmul.f32 %v430_v37, %v430_v37 }
  0xd6   : > { %v464_v25 = vsel %vm384_vm3, %v444_v44, 0.0  ;;  %v433_v54 = vsub.f32 %v919_v34, %v422_v21  ;;  %v447_v55 = vmul.f32 %v431_v17, %v431_v17  ;;  %v466_v38 = vsel %vm384_vm3, %v445_v46, 0.0 }
  0xd7   : > { %v459_v24 = vadd.f32 %v458_v16, %v457_v42  ;;  %v434_v57 = vsub.f32 %v946_v50, %v422_v21  ;;  %v448_v58 = vmul.f32 %v432_v49, %v432_v49  ;;  %v468_v14 = vsel %vm384_vm3, %v446_v52, 0.0 }
  0xd8   : > { %v435_v60 = vsub.f32 %v867_v15, %v422_v21  ;;  %v449_v61 = vmul.f32 %v433_v54, %v433_v54  ;;  %v470_v22 = vsel %vm384_vm3, %v447_v55, 0.0  ;;  %v436_v63 = vsub.f32 %v891_v23, %v422_v21 }
  0xd9   : > { %v461_v45 = vadd.f32 %v460_v11, %v459_v24  ;;  %v450_v0 = vmul.f32 %v434_v57, %v434_v57  ;;  %v472_v34 = vsel %vm384_vm3, %v448_v58, 0.0  ;;  %v437_v2 = vsub.f32 %v921_v35, %v422_v21 }
  0xda   : > { %v451_v3 = vmul.f32 %v435_v60, %v435_v60  ;;  %v474_v50 = vsel %vm384_vm3, %v449_v61, 0.0  ;;  %v438_v5 = vsub.f32 %v948_v51, %v422_v21  ;;  %v452_v15 = vmul.f32 %v436_v63, %v436_v63 }
  0xdb   : > { %v463_v48 = vadd.f32 %v462_v47, %v461_v45  ;;  %v476_v6 = vsel %vm384_vm3, %v450_v0, 0.0  ;;  %v453_v8 = vmul.f32 %v437_v2, %v437_v2  ;;  %v492_v21 = vlaneseq }
  0xdc   : > { %v478_v23 = vsel %vm384_vm3, %v451_v3, 0.0  ;;  %v454_v12 = vmul.f32 %v438_v5, %v438_v5  ;;  %v480_v13 = vsel %vm384_vm3, %v452_v15, 0.0 }
  0xdd   : > { %v465_v53 = vadd.f32 %v464_v25, %v463_v48  ;;  %v482_v18 = vsel %vm384_vm3, %v453_v8, 0.0  ;;  %v493_v30 = vshrl.u32 %v492_v21, 7 }
  0xde   : > { %v484_v26 = vsel %vm384_vm3, %v454_v12, 0.0 }
  0xdf   : > { %v467_v56 = vadd.f32 %v466_v38, %v465_v53  ;;  %vm495_vm4 = vcmp.eq.s32.totalorder %v493_v30, 1  ;;  %vm494_vm5 = vcmp.eq.s32.totalorder %v493_v30, 0 }
  0xe1   : > { %v469_v59 = vadd.f32 %v468_v14, %v467_v56 }
  0xe3   : > { %v471_v62 = vadd.f32 %v470_v22, %v469_v59 }
  0xe5   : > { %v473_v1 = vadd.f32 %v472_v34, %v471_v62 }
  0xe7   : > { %v475_v4 = vadd.f32 %v474_v50, %v473_v1 }
  0xe9   : > { %v477_v7 = vadd.f32 %v476_v6, %v475_v4 }
  0xeb   : > { %v479_v9 = vadd.f32 %v478_v23, %v477_v7 }
  0xed   : > { %v481_v35 = vadd.f32 %v480_v13, %v479_v9 }
  0xef   : > { %v483_v19 = vadd.f32 %v482_v18, %v481_v35 }
  0xf1   : > { %v485_v27 = vadd.f32 %v484_v26, %v483_v19 }
  0xf3   : > { %v486_v51 = vrot.slane %v485_v27, 4 }
  0xf5   : > { %v487_v28 = vadd.f32 %v486_v51, %v485_v27 }
  0xf7   : > { %v488_v29 = vrot.slane %v487_v28, 2 }
  0xf9   : > { %v489_v31 = vadd.f32 %v488_v29, %v487_v28 }
  0xfb   : > { %v490_v32 = vrot.slane %v489_v31, 1 }
  0xfd   : > { %v491_v33 = vadd.f32 %v490_v32, %v489_v31 }
  0xff   : > { %v496_v36 = vsel %vm495_vm4, %v491_v33, 0.0 }
 0x100   : > { %v497_v39 = vsel %vm494_vm5, %v976_v20, %v496_v36 }
 0x101   : > { %498 = vst.msk [vmem:[%s247_s29] sm:$0xff] %vm384_vm3, %v497_v39 }
 0x102 PF: > { %s14_s14 = sadd.s32 1, %s791_s14   ;;  %s1030_s12 = smov %s787_s13 }
 0x103   : > { %p11_p6 = scmp.ge.s32.totalorder %s14_s14, 4   ;;  %s1031_s13 = smov %s1033_s15 }
 0x105   :  { %13 = sbr.rel (!%p11_p6) target bundleno = 2 (0x2), region = 73 }

// kernel: hourglass_forward.35
= control target key start
LH: loop header
LB: loop body
LE: loop exit
PB: predicated region body
PF: predicated region fallthrough
CT: control target
= control target key end

     0   :  { %s124_s0 = inlined_call_operand.vmem [shape: bf16[16,512], index: 0, kind: input, shape index: {}]   ;;  %s125_s1 = inlined_call_operand.vmem [shape: f32[1,512], index: 1, kind: input, shape index: {}]   ;;  %s126_s2 = inlined_call_operand.vmem [shape: f32[1,512], index: 2, kind: input, shape index: {}]   ;;  %s127_s3 = inlined_call_operand.vmem [shape: bf16[16,512], index: 3, kind: output, shape index: {}]  }
   0x1   :  { %v14_v0 = vld [vmem:[%s124_s0] sm:$0xff]  ;;  %v15_v7 = vld [vmem:[%s124_s0 + $0x8] sm:$0xff]  ;;  %v16_v8 = vld [vmem:[%s124_s0 + $0x10] sm:$0xff] }
   0x2   :  { %v26_v1 = vld [vmem:[%s125_s1] sm:$0xf]  ;;  %v18_v3 = vunpack.c.l.bf16 %v14_v0  ;;  %v19_v4 = vunpack.c.h.bf16 %v14_v0  ;;  %v20_v11 = vunpack.c.l.bf16 %v15_v7  ;;  %v21_v12 = vunpack.c.h.bf16 %v15_v7  ;;  %v17_v17 = vld [vmem:[%s124_s0 + $0x18] sm:$0xff] }
   0x3   :  { %v44_v2 = vld [vmem:[%s126_s2] sm:$0xf]  ;;  %v28_v5 = vperm.slane %v26_v1, 0  ;;  %v29_v6 = vperm.slane %v26_v1, 1  ;;  %v30_v15 = vperm.slane %v26_v1, 2  ;;  %v31_v16 = vperm.slane %v26_v1, 3 }
   0x4   :  { %v46_v9 = vperm.slane %v44_v2, 0  ;;  %v47_v10 = vperm.slane %v44_v2, 1  ;;  %v48_v18 = vperm.slane %v44_v2, 2  ;;  %v49_v19 = vperm.slane %v44_v2, 3 }
   0x5   :  { %v36_v13 = vmul.f32 %v28_v5, %v18_v3  ;;  %v37_v14 = vmul.f32 %v29_v6, %v19_v4  ;;  %v22_v20 = vunpack.c.l.bf16 %v16_v8  ;;  %v23_v21 = vunpack.c.h.bf16 %v16_v8 }
   0x6   :  { %v38_v24 = vmul.f32 %v30_v15, %v20_v11  ;;  %v39_v25 = vmul.f32 %v31_v16, %v21_v12  ;;  %v24_v28 = vunpack.c.l.bf16 %v17_v17  ;;  %v25_v29 = vunpack.c.h.bf16 %v17_v17 }
   0x7   :  { %v54_v22 = vadd.f32 %v46_v9, %v36_v13  ;;  %v55_v23 = vadd.f32 %v47_v10, %v37_v14  ;;  %v40_v26 = vmul.f32 %v28_v5, %v22_v20  ;;  %v41_v27 = vmul.f32 %v29_v6, %v23_v21 }
   0x8   :  { %v56_v31 = vadd.f32 %v48_v18, %v38_v24  ;;  %v57_v32 = vadd.f32 %v49_v19, %v39_v25  ;;  %v42_v35 = vmul.f32 %v30_v15, %v24_v28  ;;  %v43_v36 = vmul.f32 %v31_v16, %v25_v29 }
   0x9   :  { %v62_v30 = vpack.c.bf16 %v55_v23, %v54_v22  ;;  %v58_v33 = vadd.f32 %v46_v9, %v40_v26  ;;  %v59_v34 = vadd.f32 %v47_v10, %v41_v27 }
   0xa   :  { %v63_v37 = vpack.c.bf16 %v57_v32, %v56_v31  ;;  %v60_v39 = vadd.f32 %v48_v18, %v42_v35  ;;  %v61_v40 = vadd.f32 %v49_v19, %v43_v36 }
   0xb   :  { %66 = vst [vmem:[%s127_s3] sm:$0xff] %v62_v30  ;;  %v64_v38 = vpack.c.bf16 %v59_v34, %v58_v33 }
   0xc   :  { %67 = vst [vmem:[%s127_s3 + $0x8] sm:$0xff] %v63_v37  ;;  %v65_v41 = vpack.c.bf16 %v61_v40, %v60_v39 }
   0xd   :  { %68 = vst [vmem:[%s127_s3 + $0x10] sm:$0xff] %v64_v38 }
   0xe   :  { %69 = vst [vmem:[%s127_s3 + $0x18] sm:$0xff] %v65_v41 }

</bundles_post_ra>
